<compile_context>
chip_gen: v7x
topology: tpu7x:2x2x1
jax: 0.10.0
libtpu: 0.0.40
codegen_flags: <defaults>
</compile_context>

<pallas_src>
import functools
import numpy as np
import jax
import jax.numpy as jnp
from jax.experimental import pallas as pl
from jax.experimental.pallas import tpu as pltpu

# ----------------------------- config ---------------------------------------
DIM = 32
NUM_HEADS = 4
WINDOW = 4
H = W = 8
B = 2
COMPRESS_RATIO = 4
SQUEEZE_FACTOR = 8
CONV_SCALE = 0.01
MLP_RATIO = 4.0
SHIFT_SIZE = 0
EPS = 1e-5
NEG_INF = -1e9


# --------------------------- in-kernel helpers -------------------------------
def _erf(x):
    # Abramowitz & Stegun 7.1.26 (~1.5e-7 abs error).
    a1, a2, a3, a4, a5 = 0.254829592, -0.284496736, 1.421413741, -1.453152027, 1.061405429
    p = 0.3275911
    sgn = jnp.where(x >= 0.0, 1.0, -1.0)
    ax = jnp.abs(x)
    t = 1.0 / (1.0 + p * ax)
    poly = ((((a5 * t + a4) * t + a3) * t + a2) * t + a1) * t
    return sgn * (1.0 - poly * jnp.exp(-ax * ax))


def _gelu(x):
    # erf-based GELU (PyTorch nn.GELU default).
    return 0.5 * x * (1.0 + _erf(x * 0.7071067811865475))


def _layernorm(x, g, b):
    mean = jnp.mean(x, axis=-1, keepdims=True)
    var = jnp.mean((x - mean) ** 2, axis=-1, keepdims=True)
    return (x - mean) * jax.lax.rsqrt(var + EPS) * g + b


# ------------------------------ fused kernel ----------------------------------
def hab_kernel(x_ref,
               g1_ref, b1_ref,
               wall_ref, bqk_ref, bias_ref, bproj_ref,
               mask_ref, wc1_ref, cb1_ref, wc2_ref, cb2_ref,
               caw1_ref, cab1_ref, caw2_ref, cab2_ref,
               pool_ref, bcast_ref,
               g2_ref, b2_ref,
               mw1_ref, mb1_ref, mw2_ref, mb2_ref,
               o_ref,
               *, num_heads, conv_scale, img_w):
    f32 = jnp.float32
    bf16 = jnp.bfloat16

    x = x_ref[0].astype(f32)                                        # (T, C)
    T, C = x.shape
    nh = num_heads
    hd = C // nh

    # ---------------- norm1 ----------------
    xn = _layernorm(x, g1_ref[...], b1_ref[...])
    xb = xn.astype(bf16)

    # ---------------- window attention as masked dense attention ----------------
    # one matmul: [ V_proj_folded | Q*scale | K ]; V already carries the output proj.
    qkv = jnp.dot(xb, wall_ref[...], preferred_element_type=f32)     # (T, nh*C + 2C)
    vcat = qkv[:, :nh * C].astype(bf16)                              # (T, nh*C)
    qk = (qkv[:, nh * C:] + bqk_ref[...]).astype(bf16)               # (T, 2C)

    attn = jnp.zeros((T, C), f32)
    for h in range(nh):
        qh = qk[:, h * hd:(h + 1) * hd]                              # (T, hd)
        kh = qk[:, C + h * hd:C + (h + 1) * hd]                      # (T, hd)
        s = jax.lax.dot_general(qh, kh, (((1,), (1,)), ((), ())),
                                preferred_element_type=f32)          # (T, T)
        s = s + bias_ref[h]                 # rel-pos bias in-window, -1e9 elsewhere
        s = s - jnp.max(s, axis=-1, keepdims=True)
        e = jnp.exp(s)
        p = e * pl.reciprocal(jnp.sum(e, axis=-1, keepdims=True), approx=True)
        attn = attn + jnp.dot(p.astype(bf16), vcat[:, h * C:(h + 1) * C],
                              preferred_element_type=f32)            # (T, C)
    attn_x = attn + bproj_ref[...]          # proj bias + folded V-bias contribution

    # ---------------- CAB conv branch ----------------
    # 3x3 conv: roll tokens (sublane axis) per tap, zero out-of-image taps with the
    # host masks, concat the 9 taps along lanes, then ONE (T, 9*Cin)@(9*Cin, Cout) matmul.
    def conv3x3(inp, w_ref, b_ref):
        taps = []
        for ky in range(3):
            for kx in range(3):
                off = (ky - 1) * img_w + (kx - 1)
                r = inp if off == 0 else pltpu.roll(inp, (-off) % T, 0)
                taps.append(r * mask_ref[ky * 3 + kx])
        xcat = jnp.concatenate(taps, axis=-1).astype(bf16)           # (T, 9*Cin)
        return (jnp.dot(xcat, w_ref[...], preferred_element_type=f32)
                + b_ref[...])

    y1 = _gelu(conv3x3(xn, wc1_ref, cb1_ref))                        # (T, Cmid)
    y2 = conv3x3(y1, wc2_ref, cb2_ref)                               # (T, C)

    # channel attention (per batch element): pool -> FC -> ReLU -> FC -> sigmoid gate
    pooled = jnp.dot(pool_ref[...], y2, preferred_element_type=f32)  # (bp, C)
    ca = jnp.maximum(jnp.dot(pooled, caw1_ref[...], preferred_element_type=f32)
                     + cab1_ref[...], 0.0)
    ca = jnp.dot(ca, caw2_ref[...], preferred_element_type=f32) + cab2_ref[...]
    gate = jax.nn.sigmoid(ca)                                        # (bp, C)
    conv_x = y2 * jnp.dot(bcast_ref[...], gate, preferred_element_type=f32)

    # ---------------- residual combine (drop_path == identity at eval) ----------------
    x1 = x + attn_x + conv_x * conv_scale

    # ---------------- norm2 + MLP + residual ----------------
    xn2 = _layernorm(x1, g2_ref[...], b2_ref[...])
    h1 = _gelu(jnp.dot(xn2.astype(bf16), mw1_ref[...], preferred_element_type=f32)
               + mb1_ref[...])
    mlp = (jnp.dot(h1.astype(bf16), mw2_ref[...], preferred_element_type=f32)
           + mb2_ref[...])

    o_ref[0] = (x1 + mlp).astype(o_ref.dtype)


# ------------------------------ host-side glue --------------------------------
def calc_rpi(ws):
    coords = np.stack(np.meshgrid(np.arange(ws), np.arange(ws), indexing="ij"))
    coords_flat = coords.reshape(2, -1)
    rel = coords_flat[:, :, None] - coords_flat[:, None, :]
    rel = rel.transpose(1, 2, 0).astype(np.int64)
    rel[:, :, 0] += ws - 1
    rel[:, :, 1] += ws - 1
    rel[:, :, 0] *= 2 * ws - 1
    return rel.sum(-1)                                   # (ws*ws, ws*ws) numpy


def _attn_bias(rpb_table, rpi, h, w, ws, nh, bp):
    """Dense (nh, bp*L, bp*L) tensor: rel-pos bias for same-window pairs, -1e9 elsewhere."""
    L = h * w
    n = ws * ws
    ii, jj = np.meshgrid(np.arange(h), np.arange(w), indexing="ij")
    win_id = ((ii // ws) * (w // ws) + (jj // ws)).reshape(-1)
    pos = ((ii % ws) * ws + (jj % ws)).reshape(-1)
    rel = np.asarray(rpb_table, np.float32)[np.asarray(rpi).reshape(-1)]
    rel = rel.reshape(n, n, nh).transpose(2, 0, 1)                     # (nh, n, n)
    same = win_id[:, None] == win_id[None, :]
    blk = np.where(same[None], rel[:, pos[:, None], pos[None, :]], NEG_INF)
    out = np.full((nh, bp * L, bp * L), NEG_INF, np.float32)
    for b_ in range(bp):
        out[:, b_ * L:(b_ + 1) * L, b_ * L:(b_ + 1) * L] = blk
    return jnp.asarray(out)


def _tap_masks(h, w, bp):
    """(9, bp*L, 1) 0/1 masks: tap (ky,kx) valid iff the neighbor is inside the image."""
    L = h * w
    i = np.arange(L) // w
    j = np.arange(L) % w
    m = np.zeros((9, bp * L, 1), np.float32)
    for ky in range(3):
        for kx in range(3):
            ok = ((i + ky - 1 >= 0) & (i + ky - 1 < h) &
                  (j + kx - 1 >= 0) & (j + kx - 1 < w)).astype(np.float32)
            m[ky * 3 + kx, :, 0] = np.tile(ok, bp)
    return jnp.asarray(m)


def _pool_mats(L, bp):
    """Per-batch-element mean-pool matrix (bp, bp*L) and broadcast-back matrix (bp*L, bp)."""
    pool = np.zeros((bp, bp * L), np.float32)
    bc = np.zeros((bp * L, bp), np.float32)
    for b_ in range(bp):
        pool[b_, b_ * L:(b_ + 1) * L] = 1.0 / L
        bc[b_ * L:(b_ + 1) * L, b_] = 1.0
    return jnp.asarray(pool), jnp.asarray(bc)


def _batch_per_block(b):
    """Batch elements per grid step: collapse on single-TC chips, split on multi-TC chips."""
    try:
        kind = jax.devices()[0].device_kind.lower()
    except Exception:
        return b
    if any(tag in kind for tag in ("v7", "v4", "v5p")):
        return 1 if b > 1 else b
    return b


def hab_forward(x, x_size, params):
    h, w = x_size
    b, L, c = x.shape
    ws = WINDOW
    nh = NUM_HEADS
    assert L == h * w and h % ws == 0 and w % ws == 0 and c % nh == 0
    hd = c // nh
    cmid = params["cw1"].shape[-1]
    sq = params["caw1"].shape[-1]
    hid = params["mw1"].shape[-1]

    bp = _batch_per_block(b)
    if b % bp:
        bp = 1
    nblk = b // bp
    T = bp * L
    bf16 = jnp.bfloat16

    # ---- fold attn scale into Q and the output projection into V (host side, once) ----
    wqkv, bqkv = params["wqkv"], params["bqkv"]
    wproj, bproj = params["wproj"], params["bproj"]
    scale = hd ** (-0.5)
    wq, wk, wv = wqkv[:, :c] * scale, wqkv[:, c:2 * c], wqkv[:, 2 * c:]
    bq, bk, bv = bqkv[:c] * scale, bqkv[c:2 * c], bqkv[2 * c:]
    wv_fold = jnp.concatenate(
        [wv[:, i * hd:(i + 1) * hd] @ wproj[i * hd:(i + 1) * hd, :] for i in range(nh)],
        axis=1)                                                       # (c, nh*c)
    w_all = jnp.concatenate([wv_fold, wq, wk], axis=1).astype(bf16)   # (c, nh*c + 2c)
    bqk = jnp.concatenate([bq, bk]).reshape(1, 2 * c).astype(jnp.float32)
    # V-bias is softmax-row-sum invariant -> fold (bv @ Wproj) into the proj bias
    bproj_f = (bproj + bv @ wproj).reshape(1, c).astype(jnp.float32)

    # ---- host-precomputed attention bias/mask, conv edge masks, pooling matrices ----
    bias_full = _attn_bias(params["rpb_table"], params["rpi"], h, w, ws, nh, bp)
    masks = _tap_masks(h, w, bp)
    pool_m, bcast_m = _pool_mats(L, bp)

    kern = functools.partial(hab_kernel, num_heads=nh, conv_scale=CONV_SCALE, img_w=w)

    operands = [
        x.reshape(nblk, T, c),
        params["g1"].reshape(1, c), params["b1"].reshape(1, c),
        w_all, bqk, bias_full, bproj_f,
        masks,
        params["cw1"].reshape(9 * c, cmid).astype(bf16), params["cb1"].reshape(1, cmid),
        params["cw2"].reshape(9 * cmid, c).astype(bf16), params["cb2"].reshape(1, c),
        params["caw1"], params["cab1"].reshape(1, sq),
        params["caw2"], params["cab2"].reshape(1, c),
        pool_m, bcast_m,
        params["g2"].reshape(1, c), params["b2"].reshape(1, c),
        params["mw1"].astype(bf16), params["mb1"].reshape(1, hid),
        params["mw2"].astype(bf16), params["mb2"].reshape(1, c),
    ]

    in_specs = [pl.BlockSpec((1, T, c), lambda i: (i, 0, 0))]
    for op in operands[1:]:
        nd = op.ndim
        in_specs.append(pl.BlockSpec(op.shape, lambda i, _nd=nd: (0,) * _nd))

    out = pl.pallas_call(
        kern,
        out_shape=jax.ShapeDtypeStruct((nblk, T, c), x.dtype),
        grid=(nblk,),
        in_specs=in_specs,
        out_specs=pl.BlockSpec((1, T, c), lambda i: (i, 0, 0)),
        compiler_params=pltpu.CompilerParams(dimension_semantics=("parallel",)),
    )(*operands)
    return out.reshape(b, L, c)


# --------------------------------- main ---------------------------------------
if __name__ == "__main__":
    key = jax.random.PRNGKey(0)
    ks = jax.random.split(key, 20)

    def nrm(k, shape, scl=0.02):
        return (scl * jax.random.normal(k, shape)).astype(jnp.float32)

    c = DIM
    hid = int(c * MLP_RATIO)
    cmid = c // COMPRESS_RATIO
    sq = c // SQUEEZE_FACTOR
    ws = WINDOW

    params = dict(
        g1=jnp.ones((c,), jnp.float32), b1=jnp.zeros((c,), jnp.float32),
        g2=jnp.ones((c,), jnp.float32), b2=jnp.zeros((c,), jnp.float32),
        wqkv=nrm(ks[0], (c, 3 * c)), bqkv=nrm(ks[1], (3 * c,), 0.01),
        wproj=nrm(ks[2], (c, c)), bproj=nrm(ks[3], (c,), 0.01),
        rpb_table=nrm(ks[4], ((2 * ws - 1) ** 2, NUM_HEADS)),
        cw1=nrm(ks[5], (3, 3, c, cmid)), cb1=nrm(ks[6], (cmid,), 0.01),
        cw2=nrm(ks[7], (3, 3, cmid, c)), cb2=nrm(ks[8], (c,), 0.01),
        caw1=nrm(ks[9], (c, sq)), cab1=nrm(ks[10], (sq,), 0.01),
        caw2=nrm(ks[11], (sq, c)), cab2=nrm(ks[12], (c,), 0.01),
        mw1=nrm(ks[13], (c, hid)), mb1=nrm(ks[14], (hid,), 0.01),
        mw2=nrm(ks[15], (hid, c)), mb2=nrm(ks[16], (c,), 0.01),
        rpi=calc_rpi(ws),
    )

    x = jax.random.normal(ks[17], (B, H * W, c), jnp.float32)

    out = hab_forward(x, (H, W), params)
    jax.block_until_ready(out)
    assert out.shape == (B, H * W, c) and out.dtype == jnp.float32
    assert bool(jnp.all(jnp.isfinite(out)))
    print("KERNEL_OK")
</pallas_src>

<mosaic_0001>
module attributes {stable_mosaic.version = 11 : i64} {
  func.func @hab_kernel(%arg0: i32, %arg1: memref<1x128x32xf32, #tpu.memory_space<vmem>>, %arg2: memref<1x32xf32, #tpu.memory_space<vmem>>, %arg3: memref<1x32xf32, #tpu.memory_space<vmem>>, %arg4: memref<32x192xbf16, #tpu.memory_space<vmem>>, %arg5: memref<1x64xf32, #tpu.memory_space<vmem>>, %arg6: memref<4x128x128xf32, #tpu.memory_space<vmem>>, %arg7: memref<1x32xf32, #tpu.memory_space<vmem>>, %arg8: memref<9x128x1xf32, #tpu.memory_space<vmem>>, %arg9: memref<288x8xbf16, #tpu.memory_space<vmem>>, %arg10: memref<1x8xf32, #tpu.memory_space<vmem>>, %arg11: memref<72x32xbf16, #tpu.memory_space<vmem>>, %arg12: memref<1x32xf32, #tpu.memory_space<vmem>>, %arg13: memref<32x4xf32, #tpu.memory_space<vmem>>, %arg14: memref<1x4xf32, #tpu.memory_space<vmem>>, %arg15: memref<4x32xf32, #tpu.memory_space<vmem>>, %arg16: memref<1x32xf32, #tpu.memory_space<vmem>>, %arg17: memref<2x128xf32, #tpu.memory_space<vmem>>, %arg18: memref<128x2xf32, #tpu.memory_space<vmem>>, %arg19: memref<1x32xf32, #tpu.memory_space<vmem>>, %arg20: memref<1x32xf32, #tpu.memory_space<vmem>>, %arg21: memref<32x128xbf16, #tpu.memory_space<vmem>>, %arg22: memref<1x128xf32, #tpu.memory_space<vmem>>, %arg23: memref<128x32xbf16, #tpu.memory_space<vmem>>, %arg24: memref<1x32xf32, #tpu.memory_space<vmem>>, %arg25: memref<1x128x32xf32, #tpu.memory_space<vmem>>) attributes {dimension_semantics = [#tpu.dimension_semantics<parallel>], iteration_bounds = array<i64: 1>, scalar_prefetch = 0 : i64, scratch_operands = 0 : i64, tpu.core_type = #tpu.core_type<tc>, window_params = [{transform_indices = @transform_0, window_bounds = array<i64: 1, 128, 32>}, {pipeline_mode = #tpu.pipeline_mode<synchronous>, transform_indices = @transform_1, window_bounds = array<i64: 1, 32>}, {pipeline_mode = #tpu.pipeline_mode<synchronous>, transform_indices = @transform_2, window_bounds = array<i64: 1, 32>}, {pipeline_mode = #tpu.pipeline_mode<synchronous>, transform_indices = @transform_3, window_bounds = array<i64: 32, 192>}, {pipeline_mode = #tpu.pipeline_mode<synchronous>, transform_indices = @transform_4, window_bounds = array<i64: 1, 64>}, {pipeline_mode = #tpu.pipeline_mode<synchronous>, transform_indices = @transform_5, window_bounds = array<i64: 4, 128, 128>}, {pipeline_mode = #tpu.pipeline_mode<synchronous>, transform_indices = @transform_6, window_bounds = array<i64: 1, 32>}, {pipeline_mode = #tpu.pipeline_mode<synchronous>, transform_indices = @transform_7, window_bounds = array<i64: 9, 128, 1>}, {pipeline_mode = #tpu.pipeline_mode<synchronous>, transform_indices = @transform_8, window_bounds = array<i64: 288, 8>}, {pipeline_mode = #tpu.pipeline_mode<synchronous>, transform_indices = @transform_9, window_bounds = array<i64: 1, 8>}, {pipeline_mode = #tpu.pipeline_mode<synchronous>, transform_indices = @transform_10, window_bounds = array<i64: 72, 32>}, {pipeline_mode = #tpu.pipeline_mode<synchronous>, transform_indices = @transform_11, window_bounds = array<i64: 1, 32>}, {pipeline_mode = #tpu.pipeline_mode<synchronous>, transform_indices = @transform_12, window_bounds = array<i64: 32, 4>}, {pipeline_mode = #tpu.pipeline_mode<synchronous>, transform_indices = @transform_13, window_bounds = array<i64: 1, 4>}, {pipeline_mode = #tpu.pipeline_mode<synchronous>, transform_indices = @transform_14, window_bounds = array<i64: 4, 32>}, {pipeline_mode = #tpu.pipeline_mode<synchronous>, transform_indices = @transform_15, window_bounds = array<i64: 1, 32>}, {pipeline_mode = #tpu.pipeline_mode<synchronous>, transform_indices = @transform_16, window_bounds = array<i64: 2, 128>}, {pipeline_mode = #tpu.pipeline_mode<synchronous>, transform_indices = @transform_17, window_bounds = array<i64: 128, 2>}, {pipeline_mode = #tpu.pipeline_mode<synchronous>, transform_indices = @transform_18, window_bounds = array<i64: 1, 32>}, {pipeline_mode = #tpu.pipeline_mode<synchronous>, transform_indices = @transform_19, window_bounds = array<i64: 1, 32>}, {pipeline_mode = #tpu.pipeline_mode<synchronous>, transform_indices = @transform_20, window_bounds = array<i64: 32, 128>}, {pipeline_mode = #tpu.pipeline_mode<synchronous>, transform_indices = @transform_21, window_bounds = array<i64: 1, 128>}, {pipeline_mode = #tpu.pipeline_mode<synchronous>, transform_indices = @transform_22, window_bounds = array<i64: 128, 32>}, {pipeline_mode = #tpu.pipeline_mode<synchronous>, transform_indices = @transform_23, window_bounds = array<i64: 1, 32>}, {transform_indices = @transform_24, window_bounds = array<i64: 1, 128, 32>}]} {
    %c0 = arith.constant 0 : index
    %c0_0 = arith.constant 0 : index
    %c0_1 = arith.constant 0 : index
    %0 = vector.load %arg1[%c0, %c0_0, %c0_1] : memref<1x128x32xf32, #tpu.memory_space<vmem>>, vector<1x128x32xf32>
    %1 = vector.shape_cast %0 : vector<1x128x32xf32> to vector<128x32xf32>
    %c0_2 = arith.constant 0 : index
    %c0_3 = arith.constant 0 : index
    %2 = vector.load %arg2[%c0_2, %c0_3] : memref<1x32xf32, #tpu.memory_space<vmem>>, vector<1x32xf32>
    %c0_4 = arith.constant 0 : index
    %c0_5 = arith.constant 0 : index
    %3 = vector.load %arg3[%c0_4, %c0_5] : memref<1x32xf32, #tpu.memory_space<vmem>>, vector<1x32xf32>
    %cst = arith.constant dense<0.000000e+00> : vector<128xf32>
    %4 = vector.multi_reduction <add>, %1, %cst [1] : vector<128x32xf32> to vector<128xf32>
    %5 = vector.shape_cast %4 : vector<128xf32> to vector<128x1xf32>
    %cst_6 = arith.constant 3.200000e+01 : f32
    %6 = vector.broadcast %cst_6 : f32 to vector<128x1xf32>
    %7 = arith.divf %5, %6 : vector<128x1xf32>
    %8 = vector.broadcast %7 : vector<128x1xf32> to vector<128x32xf32>
    %9 = arith.subf %1, %8 : vector<128x32xf32>
    %10 = arith.mulf %9, %9 : vector<128x32xf32>
    %cst_7 = arith.constant dense<0.000000e+00> : vector<128xf32>
    %11 = vector.multi_reduction <add>, %10, %cst_7 [1] : vector<128x32xf32> to vector<128xf32>
    %12 = vector.shape_cast %11 : vector<128xf32> to vector<128x1xf32>
    %cst_8 = arith.constant 3.200000e+01 : f32
    %13 = vector.broadcast %cst_8 : f32 to vector<128x1xf32>
    %14 = arith.divf %12, %13 : vector<128x1xf32>
    %15 = vector.broadcast %7 : vector<128x1xf32> to vector<128x32xf32>
    %16 = arith.subf %1, %15 : vector<128x32xf32>
    %cst_9 = arith.constant 9.99999974E-6 : f32
    %17 = vector.broadcast %cst_9 : f32 to vector<128x1xf32>
    %18 = arith.addf %14, %17 : vector<128x1xf32>
    %19 = math.rsqrt %18 : vector<128x1xf32>
    %20 = vector.broadcast %19 : vector<128x1xf32> to vector<128x32xf32>
    %21 = arith.mulf %16, %20 : vector<128x32xf32>
    %22 = vector.broadcast %2 : vector<1x32xf32> to vector<128x32xf32>
    %23 = arith.mulf %21, %22 : vector<128x32xf32>
    %24 = vector.broadcast %3 : vector<1x32xf32> to vector<128x32xf32>
    %25 = arith.addf %23, %24 : vector<128x32xf32>
    %26 = arith.truncf %25 : vector<128x32xf32> to vector<128x32xbf16>
    %c0_10 = arith.constant 0 : index
    %c0_11 = arith.constant 0 : index
    %27 = vector.load %arg4[%c0_10, %c0_11] : memref<32x192xbf16, #tpu.memory_space<vmem>>, vector<32x192xbf16>
    %cst_12 = arith.constant dense<0.000000e+00> : vector<128x192xf32>
    %28 = tpu.matmul %26, %27, %cst_12 {dimension_numbers = #tpu.dot_dimension_numbers<[1], [0], [0], [1], [0, 0, 1, 1], [], []>} : vector<128x32xbf16>, vector<32x192xbf16>, vector<128x192xf32> -> vector<128x192xf32>
    %29 = vector.extract_strided_slice %28 {offsets = [0, 0], sizes = [128, 128], strides = [1, 1]} : vector<128x192xf32> to vector<128x128xf32>
    %30 = arith.truncf %29 : vector<128x128xf32> to vector<128x128xbf16>
    %31 = vector.extract_strided_slice %28 {offsets = [0, 128], sizes = [128, 64], strides = [1, 1]} : vector<128x192xf32> to vector<128x64xf32>
    %c0_13 = arith.constant 0 : index
    %c0_14 = arith.constant 0 : index
    %32 = vector.load %arg5[%c0_13, %c0_14] : memref<1x64xf32, #tpu.memory_space<vmem>>, vector<1x64xf32>
    %33 = vector.broadcast %32 : vector<1x64xf32> to vector<128x64xf32>
    %34 = arith.addf %31, %33 : vector<128x64xf32>
    %35 = arith.truncf %34 : vector<128x64xf32> to vector<128x64xbf16>
    %cst_15 = arith.constant 0.000000e+00 : f32
    %36 = vector.broadcast %cst_15 : f32 to vector<128x32xf32>
    %37 = vector.extract_strided_slice %35 {offsets = [0, 0], sizes = [128, 8], strides = [1, 1]} : vector<128x64xbf16> to vector<128x8xbf16>
    %38 = vector.extract_strided_slice %35 {offsets = [0, 32], sizes = [128, 8], strides = [1, 1]} : vector<128x64xbf16> to vector<128x8xbf16>
    %cst_16 = arith.constant dense<0.000000e+00> : vector<128x128xf32>
    %39 = tpu.matmul %37, %38, %cst_16 {dimension_numbers = #tpu.dot_dimension_numbers<[1], [1], [0], [0], [0, 0, 1, 0], [], []>} : vector<128x8xbf16>, vector<128x8xbf16>, vector<128x128xf32> -> vector<128x128xf32>
    %c0_17 = arith.constant 0 : index
    %c0_18 = arith.constant 0 : index
    %c0_19 = arith.constant 0 : index
    %40 = vector.load %arg6[%c0_17, %c0_18, %c0_19] : memref<4x128x128xf32, #tpu.memory_space<vmem>>, vector<1x128x128xf32>
    %41 = vector.shape_cast %40 : vector<1x128x128xf32> to vector<128x128xf32>
    %42 = arith.addf %39, %41 : vector<128x128xf32>
    %cst_20 = arith.constant dense<0xFF800000> : vector<128xf32>
    %43 = vector.multi_reduction <maximumf>, %42, %cst_20 [1] : vector<128x128xf32> to vector<128xf32>
    %44 = vector.shape_cast %43 : vector<128xf32> to vector<128x1xf32>
    %45 = vector.broadcast %44 : vector<128x1xf32> to vector<128x128xf32>
    %46 = arith.subf %42, %45 : vector<128x128xf32>
    %47 = math.exp %46 : vector<128x128xf32>
    %cst_21 = arith.constant dense<0.000000e+00> : vector<128xf32>
    %48 = vector.multi_reduction <add>, %47, %cst_21 [1] : vector<128x128xf32> to vector<128xf32>
    %49 = vector.shape_cast %48 : vector<128xf32> to vector<128x1xf32>
    %50 = tpu.reciprocal %49 {approx = true} : vector<128x1xf32> -> vector<128x1xf32>
    %51 = vector.broadcast %50 : vector<128x1xf32> to vector<128x128xf32>
    %52 = arith.mulf %47, %51 : vector<128x128xf32>
    %53 = arith.truncf %52 : vector<128x128xf32> to vector<128x128xbf16>
    %54 = vector.extract_strided_slice %30 {offsets = [0, 0], sizes = [128, 32], strides = [1, 1]} : vector<128x128xbf16> to vector<128x32xbf16>
    %cst_22 = arith.constant dense<0.000000e+00> : vector<128x32xf32>
    %55 = tpu.matmul %53, %54, %cst_22 {dimension_numbers = #tpu.dot_dimension_numbers<[1], [0], [0], [1], [0, 0, 1, 1], [], []>} : vector<128x128xbf16>, vector<128x32xbf16>, vector<128x32xf32> -> vector<128x32xf32>
    %56 = arith.addf %36, %55 : vector<128x32xf32>
    %57 = vector.extract_strided_slice %35 {offsets = [0, 8], sizes = [128, 8], strides = [1, 1]} : vector<128x64xbf16> to vector<128x8xbf16>
    %58 = vector.extract_strided_slice %35 {offsets = [0, 40], sizes = [128, 8], strides = [1, 1]} : vector<128x64xbf16> to vector<128x8xbf16>
    %cst_23 = arith.constant dense<0.000000e+00> : vector<128x128xf32>
    %59 = tpu.matmul %57, %58, %cst_23 {dimension_numbers = #tpu.dot_dimension_numbers<[1], [1], [0], [0], [0, 0, 1, 0], [], []>} : vector<128x8xbf16>, vector<128x8xbf16>, vector<128x128xf32> -> vector<128x128xf32>
    %c1 = arith.constant 1 : index
    %c0_24 = arith.constant 0 : index
    %c0_25 = arith.constant 0 : index
    %60 = vector.load %arg6[%c1, %c0_24, %c0_25] : memref<4x128x128xf32, #tpu.memory_space<vmem>>, vector<1x128x128xf32>
    %61 = vector.shape_cast %60 : vector<1x128x128xf32> to vector<128x128xf32>
    %62 = arith.addf %59, %61 : vector<128x128xf32>
    %cst_26 = arith.constant dense<0xFF800000> : vector<128xf32>
    %63 = vector.multi_reduction <maximumf>, %62, %cst_26 [1] : vector<128x128xf32> to vector<128xf32>
    %64 = vector.shape_cast %63 : vector<128xf32> to vector<128x1xf32>
    %65 = vector.broadcast %64 : vector<128x1xf32> to vector<128x128xf32>
    %66 = arith.subf %62, %65 : vector<128x128xf32>
    %67 = math.exp %66 : vector<128x128xf32>
    %cst_27 = arith.constant dense<0.000000e+00> : vector<128xf32>
    %68 = vector.multi_reduction <add>, %67, %cst_27 [1] : vector<128x128xf32> to vector<128xf32>
    %69 = vector.shape_cast %68 : vector<128xf32> to vector<128x1xf32>
    %70 = tpu.reciprocal %69 {approx = true} : vector<128x1xf32> -> vector<128x1xf32>
    %71 = vector.broadcast %70 : vector<128x1xf32> to vector<128x128xf32>
    %72 = arith.mulf %67, %71 : vector<128x128xf32>
    %73 = arith.truncf %72 : vector<128x128xf32> to vector<128x128xbf16>
    %74 = vector.extract_strided_slice %30 {offsets = [0, 32], sizes = [128, 32], strides = [1, 1]} : vector<128x128xbf16> to vector<128x32xbf16>
    %cst_28 = arith.constant dense<0.000000e+00> : vector<128x32xf32>
    %75 = tpu.matmul %73, %74, %cst_28 {dimension_numbers = #tpu.dot_dimension_numbers<[1], [0], [0], [1], [0, 0, 1, 1], [], []>} : vector<128x128xbf16>, vector<128x32xbf16>, vector<128x32xf32> -> vector<128x32xf32>
    %76 = arith.addf %56, %75 : vector<128x32xf32>
    %77 = vector.extract_strided_slice %35 {offsets = [0, 16], sizes = [128, 8], strides = [1, 1]} : vector<128x64xbf16> to vector<128x8xbf16>
    %78 = vector.extract_strided_slice %35 {offsets = [0, 48], sizes = [128, 8], strides = [1, 1]} : vector<128x64xbf16> to vector<128x8xbf16>
    %cst_29 = arith.constant dense<0.000000e+00> : vector<128x128xf32>
    %79 = tpu.matmul %77, %78, %cst_29 {dimension_numbers = #tpu.dot_dimension_numbers<[1], [1], [0], [0], [0, 0, 1, 0], [], []>} : vector<128x8xbf16>, vector<128x8xbf16>, vector<128x128xf32> -> vector<128x128xf32>
    %c2 = arith.constant 2 : index
    %c0_30 = arith.constant 0 : index
    %c0_31 = arith.constant 0 : index
    %80 = vector.load %arg6[%c2, %c0_30, %c0_31] : memref<4x128x128xf32, #tpu.memory_space<vmem>>, vector<1x128x128xf32>
    %81 = vector.shape_cast %80 : vector<1x128x128xf32> to vector<128x128xf32>
    %82 = arith.addf %79, %81 : vector<128x128xf32>
    %cst_32 = arith.constant dense<0xFF800000> : vector<128xf32>
    %83 = vector.multi_reduction <maximumf>, %82, %cst_32 [1] : vector<128x128xf32> to vector<128xf32>
    %84 = vector.shape_cast %83 : vector<128xf32> to vector<128x1xf32>
    %85 = vector.broadcast %84 : vector<128x1xf32> to vector<128x128xf32>
    %86 = arith.subf %82, %85 : vector<128x128xf32>
    %87 = math.exp %86 : vector<128x128xf32>
    %cst_33 = arith.constant dense<0.000000e+00> : vector<128xf32>
    %88 = vector.multi_reduction <add>, %87, %cst_33 [1] : vector<128x128xf32> to vector<128xf32>
    %89 = vector.shape_cast %88 : vector<128xf32> to vector<128x1xf32>
    %90 = tpu.reciprocal %89 {approx = true} : vector<128x1xf32> -> vector<128x1xf32>
    %91 = vector.broadcast %90 : vector<128x1xf32> to vector<128x128xf32>
    %92 = arith.mulf %87, %91 : vector<128x128xf32>
    %93 = arith.truncf %92 : vector<128x128xf32> to vector<128x128xbf16>
    %94 = vector.extract_strided_slice %30 {offsets = [0, 64], sizes = [128, 32], strides = [1, 1]} : vector<128x128xbf16> to vector<128x32xbf16>
    %cst_34 = arith.constant dense<0.000000e+00> : vector<128x32xf32>
    %95 = tpu.matmul %93, %94, %cst_34 {dimension_numbers = #tpu.dot_dimension_numbers<[1], [0], [0], [1], [0, 0, 1, 1], [], []>} : vector<128x128xbf16>, vector<128x32xbf16>, vector<128x32xf32> -> vector<128x32xf32>
    %96 = arith.addf %76, %95 : vector<128x32xf32>
    %97 = vector.extract_strided_slice %35 {offsets = [0, 24], sizes = [128, 8], strides = [1, 1]} : vector<128x64xbf16> to vector<128x8xbf16>
    %98 = vector.extract_strided_slice %35 {offsets = [0, 56], sizes = [128, 8], strides = [1, 1]} : vector<128x64xbf16> to vector<128x8xbf16>
    %cst_35 = arith.constant dense<0.000000e+00> : vector<128x128xf32>
    %99 = tpu.matmul %97, %98, %cst_35 {dimension_numbers = #tpu.dot_dimension_numbers<[1], [1], [0], [0], [0, 0, 1, 0], [], []>} : vector<128x8xbf16>, vector<128x8xbf16>, vector<128x128xf32> -> vector<128x128xf32>
    %c3 = arith.constant 3 : index
    %c0_36 = arith.constant 0 : index
    %c0_37 = arith.constant 0 : index
    %100 = vector.load %arg6[%c3, %c0_36, %c0_37] : memref<4x128x128xf32, #tpu.memory_space<vmem>>, vector<1x128x128xf32>
    %101 = vector.shape_cast %100 : vector<1x128x128xf32> to vector<128x128xf32>
    %102 = arith.addf %99, %101 : vector<128x128xf32>
    %cst_38 = arith.constant dense<0xFF800000> : vector<128xf32>
    %103 = vector.multi_reduction <maximumf>, %102, %cst_38 [1] : vector<128x128xf32> to vector<128xf32>
    %104 = vector.shape_cast %103 : vector<128xf32> to vector<128x1xf32>
    %105 = vector.broadcast %104 : vector<128x1xf32> to vector<128x128xf32>
    %106 = arith.subf %102, %105 : vector<128x128xf32>
    %107 = math.exp %106 : vector<128x128xf32>
    %cst_39 = arith.constant dense<0.000000e+00> : vector<128xf32>
    %108 = vector.multi_reduction <add>, %107, %cst_39 [1] : vector<128x128xf32> to vector<128xf32>
    %109 = vector.shape_cast %108 : vector<128xf32> to vector<128x1xf32>
    %110 = tpu.reciprocal %109 {approx = true} : vector<128x1xf32> -> vector<128x1xf32>
    %111 = vector.broadcast %110 : vector<128x1xf32> to vector<128x128xf32>
    %112 = arith.mulf %107, %111 : vector<128x128xf32>
    %113 = arith.truncf %112 : vector<128x128xf32> to vector<128x128xbf16>
    %114 = vector.extract_strided_slice %30 {offsets = [0, 96], sizes = [128, 32], strides = [1, 1]} : vector<128x128xbf16> to vector<128x32xbf16>
    %cst_40 = arith.constant dense<0.000000e+00> : vector<128x32xf32>
    %115 = tpu.matmul %113, %114, %cst_40 {dimension_numbers = #tpu.dot_dimension_numbers<[1], [0], [0], [1], [0, 0, 1, 1], [], []>} : vector<128x128xbf16>, vector<128x32xbf16>, vector<128x32xf32> -> vector<128x32xf32>
    %116 = arith.addf %96, %115 : vector<128x32xf32>
    %c0_41 = arith.constant 0 : index
    %c0_42 = arith.constant 0 : index
    %117 = vector.load %arg7[%c0_41, %c0_42] : memref<1x32xf32, #tpu.memory_space<vmem>>, vector<1x32xf32>
    %118 = vector.broadcast %117 : vector<1x32xf32> to vector<128x32xf32>
    %119 = arith.addf %116, %118 : vector<128x32xf32>
    %c9_i32 = arith.constant 9 : i32
    %120 = tpu.dynamic_rotate %25 by %c9_i32 dim 0 : vector<128x32xf32>, i32 -> vector<128x32xf32>
    %c0_43 = arith.constant 0 : index
    %c0_44 = arith.constant 0 : index
    %c0_45 = arith.constant 0 : index
    %121 = vector.load %arg8[%c0_43, %c0_44, %c0_45] : memref<9x128x1xf32, #tpu.memory_space<vmem>>, vector<1x128x1xf32>
    %122 = vector.shape_cast %121 : vector<1x128x1xf32> to vector<128x1xf32>
    %123 = vector.broadcast %122 : vector<128x1xf32> to vector<128x32xf32>
    %124 = arith.mulf %120, %123 : vector<128x32xf32>
    %c8_i32 = arith.constant 8 : i32
    %125 = tpu.dynamic_rotate %25 by %c8_i32 dim 0 : vector<128x32xf32>, i32 -> vector<128x32xf32>
    %c1_46 = arith.constant 1 : index
    %c0_47 = arith.constant 0 : index
    %c0_48 = arith.constant 0 : index
    %126 = vector.load %arg8[%c1_46, %c0_47, %c0_48] : memref<9x128x1xf32, #tpu.memory_space<vmem>>, vector<1x128x1xf32>
    %127 = vector.shape_cast %126 : vector<1x128x1xf32> to vector<128x1xf32>
    %128 = vector.broadcast %127 : vector<128x1xf32> to vector<128x32xf32>
    %129 = arith.mulf %125, %128 : vector<128x32xf32>
    %c7_i32 = arith.constant 7 : i32
    %130 = tpu.dynamic_rotate %25 by %c7_i32 dim 0 : vector<128x32xf32>, i32 -> vector<128x32xf32>
    %c2_49 = arith.constant 2 : index
    %c0_50 = arith.constant 0 : index
    %c0_51 = arith.constant 0 : index
    %131 = vector.load %arg8[%c2_49, %c0_50, %c0_51] : memref<9x128x1xf32, #tpu.memory_space<vmem>>, vector<1x128x1xf32>
    %132 = vector.shape_cast %131 : vector<1x128x1xf32> to vector<128x1xf32>
    %133 = vector.broadcast %132 : vector<128x1xf32> to vector<128x32xf32>
    %134 = arith.mulf %130, %133 : vector<128x32xf32>
    %c1_i32 = arith.constant 1 : i32
    %135 = tpu.dynamic_rotate %25 by %c1_i32 dim 0 : vector<128x32xf32>, i32 -> vector<128x32xf32>
    %c3_52 = arith.constant 3 : index
    %c0_53 = arith.constant 0 : index
    %c0_54 = arith.constant 0 : index
    %136 = vector.load %arg8[%c3_52, %c0_53, %c0_54] : memref<9x128x1xf32, #tpu.memory_space<vmem>>, vector<1x128x1xf32>
    %137 = vector.shape_cast %136 : vector<1x128x1xf32> to vector<128x1xf32>
    %138 = vector.broadcast %137 : vector<128x1xf32> to vector<128x32xf32>
    %139 = arith.mulf %135, %138 : vector<128x32xf32>
    %c4 = arith.constant 4 : index
    %c0_55 = arith.constant 0 : index
    %c0_56 = arith.constant 0 : index
    %140 = vector.load %arg8[%c4, %c0_55, %c0_56] : memref<9x128x1xf32, #tpu.memory_space<vmem>>, vector<1x128x1xf32>
    %141 = vector.shape_cast %140 : vector<1x128x1xf32> to vector<128x1xf32>
    %142 = vector.broadcast %141 : vector<128x1xf32> to vector<128x32xf32>
    %143 = arith.mulf %25, %142 : vector<128x32xf32>
    %c127_i32 = arith.constant 127 : i32
    %144 = tpu.dynamic_rotate %25 by %c127_i32 dim 0 : vector<128x32xf32>, i32 -> vector<128x32xf32>
    %c5 = arith.constant 5 : index
    %c0_57 = arith.constant 0 : index
    %c0_58 = arith.constant 0 : index
    %145 = vector.load %arg8[%c5, %c0_57, %c0_58] : memref<9x128x1xf32, #tpu.memory_space<vmem>>, vector<1x128x1xf32>
    %146 = vector.shape_cast %145 : vector<1x128x1xf32> to vector<128x1xf32>
    %147 = vector.broadcast %146 : vector<128x1xf32> to vector<128x32xf32>
    %148 = arith.mulf %144, %147 : vector<128x32xf32>
    %c121_i32 = arith.constant 121 : i32
    %149 = tpu.dynamic_rotate %25 by %c121_i32 dim 0 : vector<128x32xf32>, i32 -> vector<128x32xf32>
    %c6 = arith.constant 6 : index
    %c0_59 = arith.constant 0 : index
    %c0_60 = arith.constant 0 : index
    %150 = vector.load %arg8[%c6, %c0_59, %c0_60] : memref<9x128x1xf32, #tpu.memory_space<vmem>>, vector<1x128x1xf32>
    %151 = vector.shape_cast %150 : vector<1x128x1xf32> to vector<128x1xf32>
    %152 = vector.broadcast %151 : vector<128x1xf32> to vector<128x32xf32>
    %153 = arith.mulf %149, %152 : vector<128x32xf32>
    %c120_i32 = arith.constant 120 : i32
    %154 = tpu.dynamic_rotate %25 by %c120_i32 dim 0 : vector<128x32xf32>, i32 -> vector<128x32xf32>
    %c7 = arith.constant 7 : index
    %c0_61 = arith.constant 0 : index
    %c0_62 = arith.constant 0 : index
    %155 = vector.load %arg8[%c7, %c0_61, %c0_62] : memref<9x128x1xf32, #tpu.memory_space<vmem>>, vector<1x128x1xf32>
    %156 = vector.shape_cast %155 : vector<1x128x1xf32> to vector<128x1xf32>
    %157 = vector.broadcast %156 : vector<128x1xf32> to vector<128x32xf32>
    %158 = arith.mulf %154, %157 : vector<128x32xf32>
    %c119_i32 = arith.constant 119 : i32
    %159 = tpu.dynamic_rotate %25 by %c119_i32 dim 0 : vector<128x32xf32>, i32 -> vector<128x32xf32>
    %c8 = arith.constant 8 : index
    %c0_63 = arith.constant 0 : index
    %c0_64 = arith.constant 0 : index
    %160 = vector.load %arg8[%c8, %c0_63, %c0_64] : memref<9x128x1xf32, #tpu.memory_space<vmem>>, vector<1x128x1xf32>
    %161 = vector.shape_cast %160 : vector<1x128x1xf32> to vector<128x1xf32>
    %162 = vector.broadcast %161 : vector<128x1xf32> to vector<128x32xf32>
    %163 = arith.mulf %159, %162 : vector<128x32xf32>
    %164 = tpu.concatenate %124, %129, %134, %139, %143, %148, %153, %158, %163 in 1 : vector<128x32xf32>, vector<128x32xf32>, vector<128x32xf32>, vector<128x32xf32>, vector<128x32xf32>, vector<128x32xf32>, vector<128x32xf32>, vector<128x32xf32>, vector<128x32xf32> -> vector<128x288xf32>
    %165 = arith.truncf %164 : vector<128x288xf32> to vector<128x288xbf16>
    %c0_65 = arith.constant 0 : index
    %c0_66 = arith.constant 0 : index
    %166 = vector.load %arg9[%c0_65, %c0_66] : memref<288x8xbf16, #tpu.memory_space<vmem>>, vector<288x8xbf16>
    %cst_67 = arith.constant dense<0.000000e+00> : vector<128x8xf32>
    %167 = tpu.matmul %165, %166, %cst_67 {dimension_numbers = #tpu.dot_dimension_numbers<[1], [0], [0], [1], [0, 0, 1, 1], [], []>} : vector<128x288xbf16>, vector<288x8xbf16>, vector<128x8xf32> -> vector<128x8xf32>
    %c0_68 = arith.constant 0 : index
    %c0_69 = arith.constant 0 : index
    %168 = vector.load %arg10[%c0_68, %c0_69] : memref<1x8xf32, #tpu.memory_space<vmem>>, vector<1x8xf32>
    %169 = vector.broadcast %168 : vector<1x8xf32> to vector<128x8xf32>
    %170 = arith.addf %167, %169 : vector<128x8xf32>
    %cst_70 = arith.constant 5.000000e-01 : f32
    %171 = vector.broadcast %cst_70 : f32 to vector<128x8xf32>
    %172 = arith.mulf %171, %170 : vector<128x8xf32>
    %cst_71 = arith.constant 0.707106769 : f32
    %173 = vector.broadcast %cst_71 : f32 to vector<128x8xf32>
    %174 = arith.mulf %170, %173 : vector<128x8xf32>
    %cst_72 = arith.constant 0.000000e+00 : f32
    %175 = vector.broadcast %cst_72 : f32 to vector<128x8xf32>
    %176 = arith.cmpf oge, %174, %175 : vector<128x8xf32>
    %cst_73 = arith.constant 1.000000e+00 : f32
    %cst_74 = arith.constant -1.000000e+00 : f32
    %177 = vector.broadcast %cst_73 : f32 to vector<128x8xf32>
    %178 = vector.broadcast %cst_74 : f32 to vector<128x8xf32>
    %179 = arith.select %176, %177, %178 : vector<128x8xi1>, vector<128x8xf32>
    %180 = math.absf %174 : vector<128x8xf32>
    %cst_75 = arith.constant 0.327591091 : f32
    %181 = vector.broadcast %cst_75 : f32 to vector<128x8xf32>
    %182 = arith.mulf %181, %180 : vector<128x8xf32>
    %cst_76 = arith.constant 1.000000e+00 : f32
    %183 = vector.broadcast %cst_76 : f32 to vector<128x8xf32>
    %184 = arith.addf %183, %182 : vector<128x8xf32>
    %cst_77 = arith.constant 1.000000e+00 : f32
    %185 = vector.broadcast %cst_77 : f32 to vector<128x8xf32>
    %186 = arith.divf %185, %184 : vector<128x8xf32>
    %cst_78 = arith.constant 1.06140542 : f32
    %187 = vector.broadcast %cst_78 : f32 to vector<128x8xf32>
    %188 = arith.mulf %187, %186 : vector<128x8xf32>
    %cst_79 = arith.constant -1.45315206 : f32
    %189 = vector.broadcast %cst_79 : f32 to vector<128x8xf32>
    %190 = arith.addf %188, %189 : vector<128x8xf32>
    %191 = arith.mulf %190, %186 : vector<128x8xf32>
    %cst_80 = arith.constant 1.42141378 : f32
    %192 = vector.broadcast %cst_80 : f32 to vector<128x8xf32>
    %193 = arith.addf %191, %192 : vector<128x8xf32>
    %194 = arith.mulf %193, %186 : vector<128x8xf32>
    %cst_81 = arith.constant -0.284496725 : f32
    %195 = vector.broadcast %cst_81 : f32 to vector<128x8xf32>
    %196 = arith.addf %194, %195 : vector<128x8xf32>
    %197 = arith.mulf %196, %186 : vector<128x8xf32>
    %cst_82 = arith.constant 0.254829586 : f32
    %198 = vector.broadcast %cst_82 : f32 to vector<128x8xf32>
    %199 = arith.addf %197, %198 : vector<128x8xf32>
    %200 = arith.mulf %199, %186 : vector<128x8xf32>
    %cst_83 = arith.constant 0.000000e+00 : f32
    %201 = vector.broadcast %cst_83 : f32 to vector<128x8xf32>
    %202 = arith.subf %201, %180 : vector<128x8xf32>
    %203 = arith.mulf %202, %180 : vector<128x8xf32>
    %204 = math.exp %203 : vector<128x8xf32>
    %205 = arith.mulf %200, %204 : vector<128x8xf32>
    %cst_84 = arith.constant 1.000000e+00 : f32
    %206 = vector.broadcast %cst_84 : f32 to vector<128x8xf32>
    %207 = arith.subf %206, %205 : vector<128x8xf32>
    %208 = arith.mulf %179, %207 : vector<128x8xf32>
    %cst_85 = arith.constant 1.000000e+00 : f32
    %209 = vector.broadcast %cst_85 : f32 to vector<128x8xf32>
    %210 = arith.addf %209, %208 : vector<128x8xf32>
    %211 = arith.mulf %172, %210 : vector<128x8xf32>
    %c9_i32_86 = arith.constant 9 : i32
    %212 = tpu.dynamic_rotate %211 by %c9_i32_86 dim 0 : vector<128x8xf32>, i32 -> vector<128x8xf32>
    %c0_87 = arith.constant 0 : index
    %c0_88 = arith.constant 0 : index
    %c0_89 = arith.constant 0 : index
    %213 = vector.load %arg8[%c0_87, %c0_88, %c0_89] : memref<9x128x1xf32, #tpu.memory_space<vmem>>, vector<1x128x1xf32>
    %214 = vector.shape_cast %213 : vector<1x128x1xf32> to vector<128x1xf32>
    %215 = vector.broadcast %214 : vector<128x1xf32> to vector<128x8xf32>
    %216 = arith.mulf %212, %215 : vector<128x8xf32>
    %c8_i32_90 = arith.constant 8 : i32
    %217 = tpu.dynamic_rotate %211 by %c8_i32_90 dim 0 : vector<128x8xf32>, i32 -> vector<128x8xf32>
    %c1_91 = arith.constant 1 : index
    %c0_92 = arith.constant 0 : index
    %c0_93 = arith.constant 0 : index
    %218 = vector.load %arg8[%c1_91, %c0_92, %c0_93] : memref<9x128x1xf32, #tpu.memory_space<vmem>>, vector<1x128x1xf32>
    %219 = vector.shape_cast %218 : vector<1x128x1xf32> to vector<128x1xf32>
    %220 = vector.broadcast %219 : vector<128x1xf32> to vector<128x8xf32>
    %221 = arith.mulf %217, %220 : vector<128x8xf32>
    %c7_i32_94 = arith.constant 7 : i32
    %222 = tpu.dynamic_rotate %211 by %c7_i32_94 dim 0 : vector<128x8xf32>, i32 -> vector<128x8xf32>
    %c2_95 = arith.constant 2 : index
    %c0_96 = arith.constant 0 : index
    %c0_97 = arith.constant 0 : index
    %223 = vector.load %arg8[%c2_95, %c0_96, %c0_97] : memref<9x128x1xf32, #tpu.memory_space<vmem>>, vector<1x128x1xf32>
    %224 = vector.shape_cast %223 : vector<1x128x1xf32> to vector<128x1xf32>
    %225 = vector.broadcast %224 : vector<128x1xf32> to vector<128x8xf32>
    %226 = arith.mulf %222, %225 : vector<128x8xf32>
    %c1_i32_98 = arith.constant 1 : i32
    %227 = tpu.dynamic_rotate %211 by %c1_i32_98 dim 0 : vector<128x8xf32>, i32 -> vector<128x8xf32>
    %c3_99 = arith.constant 3 : index
    %c0_100 = arith.constant 0 : index
    %c0_101 = arith.constant 0 : index
    %228 = vector.load %arg8[%c3_99, %c0_100, %c0_101] : memref<9x128x1xf32, #tpu.memory_space<vmem>>, vector<1x128x1xf32>
    %229 = vector.shape_cast %228 : vector<1x128x1xf32> to vector<128x1xf32>
    %230 = vector.broadcast %229 : vector<128x1xf32> to vector<128x8xf32>
    %231 = arith.mulf %227, %230 : vector<128x8xf32>
    %c4_102 = arith.constant 4 : index
    %c0_103 = arith.constant 0 : index
    %c0_104 = arith.constant 0 : index
    %232 = vector.load %arg8[%c4_102, %c0_103, %c0_104] : memref<9x128x1xf32, #tpu.memory_space<vmem>>, vector<1x128x1xf32>
    %233 = vector.shape_cast %232 : vector<1x128x1xf32> to vector<128x1xf32>
    %234 = vector.broadcast %233 : vector<128x1xf32> to vector<128x8xf32>
    %235 = arith.mulf %211, %234 : vector<128x8xf32>
    %c127_i32_105 = arith.constant 127 : i32
    %236 = tpu.dynamic_rotate %211 by %c127_i32_105 dim 0 : vector<128x8xf32>, i32 -> vector<128x8xf32>
    %c5_106 = arith.constant 5 : index
    %c0_107 = arith.constant 0 : index
    %c0_108 = arith.constant 0 : index
    %237 = vector.load %arg8[%c5_106, %c0_107, %c0_108] : memref<9x128x1xf32, #tpu.memory_space<vmem>>, vector<1x128x1xf32>
    %238 = vector.shape_cast %237 : vector<1x128x1xf32> to vector<128x1xf32>
    %239 = vector.broadcast %238 : vector<128x1xf32> to vector<128x8xf32>
    %240 = arith.mulf %236, %239 : vector<128x8xf32>
    %c121_i32_109 = arith.constant 121 : i32
    %241 = tpu.dynamic_rotate %211 by %c121_i32_109 dim 0 : vector<128x8xf32>, i32 -> vector<128x8xf32>
    %c6_110 = arith.constant 6 : index
    %c0_111 = arith.constant 0 : index
    %c0_112 = arith.constant 0 : index
    %242 = vector.load %arg8[%c6_110, %c0_111, %c0_112] : memref<9x128x1xf32, #tpu.memory_space<vmem>>, vector<1x128x1xf32>
    %243 = vector.shape_cast %242 : vector<1x128x1xf32> to vector<128x1xf32>
    %244 = vector.broadcast %243 : vector<128x1xf32> to vector<128x8xf32>
    %245 = arith.mulf %241, %244 : vector<128x8xf32>
    %c120_i32_113 = arith.constant 120 : i32
    %246 = tpu.dynamic_rotate %211 by %c120_i32_113 dim 0 : vector<128x8xf32>, i32 -> vector<128x8xf32>
    %c7_114 = arith.constant 7 : index
    %c0_115 = arith.constant 0 : index
    %c0_116 = arith.constant 0 : index
    %247 = vector.load %arg8[%c7_114, %c0_115, %c0_116] : memref<9x128x1xf32, #tpu.memory_space<vmem>>, vector<1x128x1xf32>
    %248 = vector.shape_cast %247 : vector<1x128x1xf32> to vector<128x1xf32>
    %249 = vector.broadcast %248 : vector<128x1xf32> to vector<128x8xf32>
    %250 = arith.mulf %246, %249 : vector<128x8xf32>
    %c119_i32_117 = arith.constant 119 : i32
    %251 = tpu.dynamic_rotate %211 by %c119_i32_117 dim 0 : vector<128x8xf32>, i32 -> vector<128x8xf32>
    %c8_118 = arith.constant 8 : index
    %c0_119 = arith.constant 0 : index
    %c0_120 = arith.constant 0 : index
    %252 = vector.load %arg8[%c8_118, %c0_119, %c0_120] : memref<9x128x1xf32, #tpu.memory_space<vmem>>, vector<1x128x1xf32>
    %253 = vector.shape_cast %252 : vector<1x128x1xf32> to vector<128x1xf32>
    %254 = vector.broadcast %253 : vector<128x1xf32> to vector<128x8xf32>
    %255 = arith.mulf %251, %254 : vector<128x8xf32>
    %256 = tpu.concatenate %216, %221, %226, %231, %235, %240, %245, %250, %255 in 1 : vector<128x8xf32>, vector<128x8xf32>, vector<128x8xf32>, vector<128x8xf32>, vector<128x8xf32>, vector<128x8xf32>, vector<128x8xf32>, vector<128x8xf32>, vector<128x8xf32> -> vector<128x72xf32>
    %257 = arith.truncf %256 : vector<128x72xf32> to vector<128x72xbf16>
    %c0_121 = arith.constant 0 : index
    %c0_122 = arith.constant 0 : index
    %258 = vector.load %arg11[%c0_121, %c0_122] : memref<72x32xbf16, #tpu.memory_space<vmem>>, vector<72x32xbf16>
    %cst_123 = arith.constant dense<0.000000e+00> : vector<128x32xf32>
    %259 = tpu.matmul %257, %258, %cst_123 {dimension_numbers = #tpu.dot_dimension_numbers<[1], [0], [0], [1], [0, 0, 1, 1], [], []>} : vector<128x72xbf16>, vector<72x32xbf16>, vector<128x32xf32> -> vector<128x32xf32>
    %c0_124 = arith.constant 0 : index
    %c0_125 = arith.constant 0 : index
    %260 = vector.load %arg12[%c0_124, %c0_125] : memref<1x32xf32, #tpu.memory_space<vmem>>, vector<1x32xf32>
    %261 = vector.broadcast %260 : vector<1x32xf32> to vector<128x32xf32>
    %262 = arith.addf %259, %261 : vector<128x32xf32>
    %c0_126 = arith.constant 0 : index
    %c0_127 = arith.constant 0 : index
    %263 = vector.load %arg17[%c0_126, %c0_127] : memref<2x128xf32, #tpu.memory_space<vmem>>, vector<2x128xf32>
    %cst_128 = arith.constant dense<0.000000e+00> : vector<2x32xf32>
    %264 = tpu.matmul %263, %262, %cst_128 {dimension_numbers = #tpu.dot_dimension_numbers<[1], [0], [0], [1], [0, 0, 1, 1], [], []>} : vector<2x128xf32>, vector<128x32xf32>, vector<2x32xf32> -> vector<2x32xf32>
    %c0_129 = arith.constant 0 : index
    %c0_130 = arith.constant 0 : index
    %265 = vector.load %arg13[%c0_129, %c0_130] : memref<32x4xf32, #tpu.memory_space<vmem>>, vector<32x4xf32>
    %cst_131 = arith.constant dense<0.000000e+00> : vector<2x4xf32>
    %266 = tpu.matmul %264, %265, %cst_131 {dimension_numbers = #tpu.dot_dimension_numbers<[1], [0], [0], [1], [0, 0, 1, 1], [], []>} : vector<2x32xf32>, vector<32x4xf32>, vector<2x4xf32> -> vector<2x4xf32>
    %c0_132 = arith.constant 0 : index
    %c0_133 = arith.constant 0 : index
    %267 = vector.load %arg14[%c0_132, %c0_133] : memref<1x4xf32, #tpu.memory_space<vmem>>, vector<1x4xf32>
    %268 = vector.broadcast %267 : vector<1x4xf32> to vector<2x4xf32>
    %269 = arith.addf %266, %268 : vector<2x4xf32>
    %cst_134 = arith.constant 0.000000e+00 : f32
    %270 = vector.broadcast %cst_134 : f32 to vector<2x4xf32>
    %271 = arith.maximumf %269, %270 : vector<2x4xf32>
    %c0_135 = arith.constant 0 : index
    %c0_136 = arith.constant 0 : index
    %272 = vector.load %arg15[%c0_135, %c0_136] : memref<4x32xf32, #tpu.memory_space<vmem>>, vector<4x32xf32>
    %cst_137 = arith.constant dense<0.000000e+00> : vector<2x32xf32>
    %273 = tpu.matmul %271, %272, %cst_137 {dimension_numbers = #tpu.dot_dimension_numbers<[1], [0], [0], [1], [0, 0, 1, 1], [], []>} : vector<2x4xf32>, vector<4x32xf32>, vector<2x32xf32> -> vector<2x32xf32>
    %c0_138 = arith.constant 0 : index
    %c0_139 = arith.constant 0 : index
    %274 = vector.load %arg16[%c0_138, %c0_139] : memref<1x32xf32, #tpu.memory_space<vmem>>, vector<1x32xf32>
    %275 = vector.broadcast %274 : vector<1x32xf32> to vector<2x32xf32>
    %276 = arith.addf %273, %275 : vector<2x32xf32>
    %277 = arith.negf %276 : vector<2x32xf32>
    %278 = math.exp %277 : vector<2x32xf32>
    %cst_140 = arith.constant 1.000000e+00 : f32
    %279 = vector.broadcast %cst_140 : f32 to vector<2x32xf32>
    %280 = arith.addf %279, %278 : vector<2x32xf32>
    %281 = arith.divf %279, %280 : vector<2x32xf32>
    %c0_141 = arith.constant 0 : index
    %c0_142 = arith.constant 0 : index
    %282 = vector.load %arg18[%c0_141, %c0_142] : memref<128x2xf32, #tpu.memory_space<vmem>>, vector<128x2xf32>
    %cst_143 = arith.constant dense<0.000000e+00> : vector<128x32xf32>
    %283 = tpu.matmul %282, %281, %cst_143 {dimension_numbers = #tpu.dot_dimension_numbers<[1], [0], [0], [1], [0, 0, 1, 1], [], []>} : vector<128x2xf32>, vector<2x32xf32>, vector<128x32xf32> -> vector<128x32xf32>
    %284 = arith.mulf %262, %283 : vector<128x32xf32>
    %285 = arith.addf %1, %119 : vector<128x32xf32>
    %cst_144 = arith.constant 0.00999999977 : f32
    %286 = vector.broadcast %cst_144 : f32 to vector<128x32xf32>
    %287 = arith.mulf %284, %286 : vector<128x32xf32>
    %288 = arith.addf %285, %287 : vector<128x32xf32>
    %c0_145 = arith.constant 0 : index
    %c0_146 = arith.constant 0 : index
    %289 = vector.load %arg19[%c0_145, %c0_146] : memref<1x32xf32, #tpu.memory_space<vmem>>, vector<1x32xf32>
    %c0_147 = arith.constant 0 : index
    %c0_148 = arith.constant 0 : index
    %290 = vector.load %arg20[%c0_147, %c0_148] : memref<1x32xf32, #tpu.memory_space<vmem>>, vector<1x32xf32>
    %cst_149 = arith.constant dense<0.000000e+00> : vector<128xf32>
    %291 = vector.multi_reduction <add>, %288, %cst_149 [1] : vector<128x32xf32> to vector<128xf32>
    %292 = vector.shape_cast %291 : vector<128xf32> to vector<128x1xf32>
    %cst_150 = arith.constant 3.200000e+01 : f32
    %293 = vector.broadcast %cst_150 : f32 to vector<128x1xf32>
    %294 = arith.divf %292, %293 : vector<128x1xf32>
    %295 = vector.broadcast %294 : vector<128x1xf32> to vector<128x32xf32>
    %296 = arith.subf %288, %295 : vector<128x32xf32>
    %297 = arith.mulf %296, %296 : vector<128x32xf32>
    %cst_151 = arith.constant dense<0.000000e+00> : vector<128xf32>
    %298 = vector.multi_reduction <add>, %297, %cst_151 [1] : vector<128x32xf32> to vector<128xf32>
    %299 = vector.shape_cast %298 : vector<128xf32> to vector<128x1xf32>
    %cst_152 = arith.constant 3.200000e+01 : f32
    %300 = vector.broadcast %cst_152 : f32 to vector<128x1xf32>
    %301 = arith.divf %299, %300 : vector<128x1xf32>
    %302 = vector.broadcast %294 : vector<128x1xf32> to vector<128x32xf32>
    %303 = arith.subf %288, %302 : vector<128x32xf32>
    %cst_153 = arith.constant 9.99999974E-6 : f32
    %304 = vector.broadcast %cst_153 : f32 to vector<128x1xf32>
    %305 = arith.addf %301, %304 : vector<128x1xf32>
    %306 = math.rsqrt %305 : vector<128x1xf32>
    %307 = vector.broadcast %306 : vector<128x1xf32> to vector<128x32xf32>
    %308 = arith.mulf %303, %307 : vector<128x32xf32>
    %309 = vector.broadcast %289 : vector<1x32xf32> to vector<128x32xf32>
    %310 = arith.mulf %308, %309 : vector<128x32xf32>
    %311 = vector.broadcast %290 : vector<1x32xf32> to vector<128x32xf32>
    %312 = arith.addf %310, %311 : vector<128x32xf32>
    %313 = arith.truncf %312 : vector<128x32xf32> to vector<128x32xbf16>
    %c0_154 = arith.constant 0 : index
    %c0_155 = arith.constant 0 : index
    %314 = vector.load %arg21[%c0_154, %c0_155] : memref<32x128xbf16, #tpu.memory_space<vmem>>, vector<32x128xbf16>
    %cst_156 = arith.constant dense<0.000000e+00> : vector<128x128xf32>
    %315 = tpu.matmul %313, %314, %cst_156 {dimension_numbers = #tpu.dot_dimension_numbers<[1], [0], [0], [1], [0, 0, 1, 1], [], []>} : vector<128x32xbf16>, vector<32x128xbf16>, vector<128x128xf32> -> vector<128x128xf32>
    %c0_157 = arith.constant 0 : index
    %c0_158 = arith.constant 0 : index
    %316 = vector.load %arg22[%c0_157, %c0_158] : memref<1x128xf32, #tpu.memory_space<vmem>>, vector<1x128xf32>
    %317 = vector.broadcast %316 : vector<1x128xf32> to vector<128x128xf32>
    %318 = arith.addf %315, %317 : vector<128x128xf32>
    %cst_159 = arith.constant 5.000000e-01 : f32
    %319 = vector.broadcast %cst_159 : f32 to vector<128x128xf32>
    %320 = arith.mulf %319, %318 : vector<128x128xf32>
    %cst_160 = arith.constant 0.707106769 : f32
    %321 = vector.broadcast %cst_160 : f32 to vector<128x128xf32>
    %322 = arith.mulf %318, %321 : vector<128x128xf32>
    %cst_161 = arith.constant 0.000000e+00 : f32
    %323 = vector.broadcast %cst_161 : f32 to vector<128x128xf32>
    %324 = arith.cmpf oge, %322, %323 : vector<128x128xf32>
    %cst_162 = arith.constant 1.000000e+00 : f32
    %cst_163 = arith.constant -1.000000e+00 : f32
    %325 = vector.broadcast %cst_162 : f32 to vector<128x128xf32>
    %326 = vector.broadcast %cst_163 : f32 to vector<128x128xf32>
    %327 = arith.select %324, %325, %326 : vector<128x128xi1>, vector<128x128xf32>
    %328 = math.absf %322 : vector<128x128xf32>
    %cst_164 = arith.constant 0.327591091 : f32
    %329 = vector.broadcast %cst_164 : f32 to vector<128x128xf32>
    %330 = arith.mulf %329, %328 : vector<128x128xf32>
    %cst_165 = arith.constant 1.000000e+00 : f32
    %331 = vector.broadcast %cst_165 : f32 to vector<128x128xf32>
    %332 = arith.addf %331, %330 : vector<128x128xf32>
    %cst_166 = arith.constant 1.000000e+00 : f32
    %333 = vector.broadcast %cst_166 : f32 to vector<128x128xf32>
    %334 = arith.divf %333, %332 : vector<128x128xf32>
    %cst_167 = arith.constant 1.06140542 : f32
    %335 = vector.broadcast %cst_167 : f32 to vector<128x128xf32>
    %336 = arith.mulf %335, %334 : vector<128x128xf32>
    %cst_168 = arith.constant -1.45315206 : f32
    %337 = vector.broadcast %cst_168 : f32 to vector<128x128xf32>
    %338 = arith.addf %336, %337 : vector<128x128xf32>
    %339 = arith.mulf %338, %334 : vector<128x128xf32>
    %cst_169 = arith.constant 1.42141378 : f32
    %340 = vector.broadcast %cst_169 : f32 to vector<128x128xf32>
    %341 = arith.addf %339, %340 : vector<128x128xf32>
    %342 = arith.mulf %341, %334 : vector<128x128xf32>
    %cst_170 = arith.constant -0.284496725 : f32
    %343 = vector.broadcast %cst_170 : f32 to vector<128x128xf32>
    %344 = arith.addf %342, %343 : vector<128x128xf32>
    %345 = arith.mulf %344, %334 : vector<128x128xf32>
    %cst_171 = arith.constant 0.254829586 : f32
    %346 = vector.broadcast %cst_171 : f32 to vector<128x128xf32>
    %347 = arith.addf %345, %346 : vector<128x128xf32>
    %348 = arith.mulf %347, %334 : vector<128x128xf32>
    %cst_172 = arith.constant 0.000000e+00 : f32
    %349 = vector.broadcast %cst_172 : f32 to vector<128x128xf32>
    %350 = arith.subf %349, %328 : vector<128x128xf32>
    %351 = arith.mulf %350, %328 : vector<128x128xf32>
    %352 = math.exp %351 : vector<128x128xf32>
    %353 = arith.mulf %348, %352 : vector<128x128xf32>
    %cst_173 = arith.constant 1.000000e+00 : f32
    %354 = vector.broadcast %cst_173 : f32 to vector<128x128xf32>
    %355 = arith.subf %354, %353 : vector<128x128xf32>
    %356 = arith.mulf %327, %355 : vector<128x128xf32>
    %cst_174 = arith.constant 1.000000e+00 : f32
    %357 = vector.broadcast %cst_174 : f32 to vector<128x128xf32>
    %358 = arith.addf %357, %356 : vector<128x128xf32>
    %359 = arith.mulf %320, %358 : vector<128x128xf32>
    %360 = arith.truncf %359 : vector<128x128xf32> to vector<128x128xbf16>
    %c0_175 = arith.constant 0 : index
    %c0_176 = arith.constant 0 : index
    %361 = vector.load %arg23[%c0_175, %c0_176] : memref<128x32xbf16, #tpu.memory_space<vmem>>, vector<128x32xbf16>
    %cst_177 = arith.constant dense<0.000000e+00> : vector<128x32xf32>
    %362 = tpu.matmul %360, %361, %cst_177 {dimension_numbers = #tpu.dot_dimension_numbers<[1], [0], [0], [1], [0, 0, 1, 1], [], []>} : vector<128x128xbf16>, vector<128x32xbf16>, vector<128x32xf32> -> vector<128x32xf32>
    %c0_178 = arith.constant 0 : index
    %c0_179 = arith.constant 0 : index
    %363 = vector.load %arg24[%c0_178, %c0_179] : memref<1x32xf32, #tpu.memory_space<vmem>>, vector<1x32xf32>
    %364 = vector.broadcast %363 : vector<1x32xf32> to vector<128x32xf32>
    %365 = arith.addf %362, %364 : vector<128x32xf32>
    %366 = arith.addf %288, %365 : vector<128x32xf32>
    %c0_180 = arith.constant 0 : index
    %c0_181 = arith.constant 0 : index
    %c0_182 = arith.constant 0 : index
    %367 = vector.load %arg25[%c0_180, %c0_181, %c0_182] : memref<1x128x32xf32, #tpu.memory_space<vmem>>, vector<1x128x32xf32>
    %368 = vector.shape_cast %367 : vector<1x128x32xf32> to vector<128x32xf32>
    %369 = vector.shape_cast %366 : vector<128x32xf32> to vector<1x128x32xf32>
    tpu.vector_store %arg25[%c0_180, %c0_181, %c0_182], %369 {strides = array<i32>} : memref<1x128x32xf32, #tpu.memory_space<vmem>>, vector<1x128x32xf32>,
    return
  }
  func.func @transform_0(%arg0: i32) -> (i32, i32, i32) {
    %c0_i32 = arith.constant 0 : i32
    %c0_i32_0 = arith.constant 0 : i32
    %c0_i32_1 = arith.constant 0 : i32
    return %arg0, %c0_i32, %c0_i32_0 : i32, i32, i32
  }
  func.func @transform_1(%arg0: i32) -> (i32, i32) {
    %c0_i32 = arith.constant 0 : i32
    %c0_i32_0 = arith.constant 0 : i32
    %c0_i32_1 = arith.constant 0 : i32
    return %c0_i32, %c0_i32_0 : i32, i32
  }
  func.func @transform_2(%arg0: i32) -> (i32, i32) {
    %c0_i32 = arith.constant 0 : i32
    %c0_i32_0 = arith.constant 0 : i32
    %c0_i32_1 = arith.constant 0 : i32
    return %c0_i32, %c0_i32_0 : i32, i32
  }
  func.func @transform_3(%arg0: i32) -> (i32, i32) {
    %c0_i32 = arith.constant 0 : i32
    %c0_i32_0 = arith.constant 0 : i32
    %c0_i32_1 = arith.constant 0 : i32
    return %c0_i32, %c0_i32_0 : i32, i32
  }
  func.func @transform_4(%arg0: i32) -> (i32, i32) {
    %c0_i32 = arith.constant 0 : i32
    %c0_i32_0 = arith.constant 0 : i32
    %c0_i32_1 = arith.constant 0 : i32
    return %c0_i32, %c0_i32_0 : i32, i32
  }
  func.func @transform_5(%arg0: i32) -> (i32, i32, i32) {
    %c0_i32 = arith.constant 0 : i32
    %c0_i32_0 = arith.constant 0 : i32
    %c0_i32_1 = arith.constant 0 : i32
    %c0_i32_2 = arith.constant 0 : i32
    return %c0_i32, %c0_i32_0, %c0_i32_1 : i32, i32, i32
  }
  func.func @transform_6(%arg0: i32) -> (i32, i32) {
    %c0_i32 = arith.constant 0 : i32
    %c0_i32_0 = arith.constant 0 : i32
    %c0_i32_1 = arith.constant 0 : i32
    return %c0_i32, %c0_i32_0 : i32, i32
  }
  func.func @transform_7(%arg0: i32) -> (i32, i32, i32) {
    %c0_i32 = arith.constant 0 : i32
    %c0_i32_0 = arith.constant 0 : i32
    %c0_i32_1 = arith.constant 0 : i32
    %c0_i32_2 = arith.constant 0 : i32
    return %c0_i32, %c0_i32_0, %c0_i32_1 : i32, i32, i32
  }
  func.func @transform_8(%arg0: i32) -> (i32, i32) {
    %c0_i32 = arith.constant 0 : i32
    %c0_i32_0 = arith.constant 0 : i32
    %c0_i32_1 = arith.constant 0 : i32
    return %c0_i32, %c0_i32_0 : i32, i32
  }
  func.func @transform_9(%arg0: i32) -> (i32, i32) {
    %c0_i32 = arith.constant 0 : i32
    %c0_i32_0 = arith.constant 0 : i32
    %c0_i32_1 = arith.constant 0 : i32
    return %c0_i32, %c0_i32_0 : i32, i32
  }
  func.func @transform_10(%arg0: i32) -> (i32, i32) {
    %c0_i32 = arith.constant 0 : i32
    %c0_i32_0 = arith.constant 0 : i32
    %c0_i32_1 = arith.constant 0 : i32
    return %c0_i32, %c0_i32_0 : i32, i32
  }
  func.func @transform_11(%arg0: i32) -> (i32, i32) {
    %c0_i32 = arith.constant 0 : i32
    %c0_i32_0 = arith.constant 0 : i32
    %c0_i32_1 = arith.constant 0 : i32
    return %c0_i32, %c0_i32_0 : i32, i32
  }
  func.func @transform_12(%arg0: i32) -> (i32, i32) {
    %c0_i32 = arith.constant 0 : i32
    %c0_i32_0 = arith.constant 0 : i32
    %c0_i32_1 = arith.constant 0 : i32
    return %c0_i32, %c0_i32_0 : i32, i32
  }
  func.func @transform_13(%arg0: i32) -> (i32, i32) {
    %c0_i32 = arith.constant 0 : i32
    %c0_i32_0 = arith.constant 0 : i32
    %c0_i32_1 = arith.constant 0 : i32
    return %c0_i32, %c0_i32_0 : i32, i32
  }
  func.func @transform_14(%arg0: i32) -> (i32, i32) {
    %c0_i32 = arith.constant 0 : i32
    %c0_i32_0 = arith.constant 0 : i32
    %c0_i32_1 = arith.constant 0 : i32
    return %c0_i32, %c0_i32_0 : i32, i32
  }
  func.func @transform_15(%arg0: i32) -> (i32, i32) {
    %c0_i32 = arith.constant 0 : i32
    %c0_i32_0 = arith.constant 0 : i32
    %c0_i32_1 = arith.constant 0 : i32
    return %c0_i32, %c0_i32_0 : i32, i32
  }
  func.func @transform_16(%arg0: i32) -> (i32, i32) {
    %c0_i32 = arith.constant 0 : i32
    %c0_i32_0 = arith.constant 0 : i32
    %c0_i32_1 = arith.constant 0 : i32
    return %c0_i32, %c0_i32_0 : i32, i32
  }
  func.func @transform_17(%arg0: i32) -> (i32, i32) {
    %c0_i32 = arith.constant 0 : i32
    %c0_i32_0 = arith.constant 0 : i32
    %c0_i32_1 = arith.constant 0 : i32
    return %c0_i32, %c0_i32_0 : i32, i32
  }
  func.func @transform_18(%arg0: i32) -> (i32, i32) {
    %c0_i32 = arith.constant 0 : i32
    %c0_i32_0 = arith.constant 0 : i32
    %c0_i32_1 = arith.constant 0 : i32
    return %c0_i32, %c0_i32_0 : i32, i32
  }
  func.func @transform_19(%arg0: i32) -> (i32, i32) {
    %c0_i32 = arith.constant 0 : i32
    %c0_i32_0 = arith.constant 0 : i32
    %c0_i32_1 = arith.constant 0 : i32
    return %c0_i32, %c0_i32_0 : i32, i32
  }
  func.func @transform_20(%arg0: i32) -> (i32, i32) {
    %c0_i32 = arith.constant 0 : i32
    %c0_i32_0 = arith.constant 0 : i32
    %c0_i32_1 = arith.constant 0 : i32
    return %c0_i32, %c0_i32_0 : i32, i32
  }
  func.func @transform_21(%arg0: i32) -> (i32, i32) {
    %c0_i32 = arith.constant 0 : i32
    %c0_i32_0 = arith.constant 0 : i32
    %c0_i32_1 = arith.constant 0 : i32
    return %c0_i32, %c0_i32_0 : i32, i32
  }
  func.func @transform_22(%arg0: i32) -> (i32, i32) {
    %c0_i32 = arith.constant 0 : i32
    %c0_i32_0 = arith.constant 0 : i32
    %c0_i32_1 = arith.constant 0 : i32
    return %c0_i32, %c0_i32_0 : i32, i32
  }
  func.func @transform_23(%arg0: i32) -> (i32, i32) {
    %c0_i32 = arith.constant 0 : i32
    %c0_i32_0 = arith.constant 0 : i32
    %c0_i32_1 = arith.constant 0 : i32
    return %c0_i32, %c0_i32_0 : i32, i32
  }
  func.func @transform_24(%arg0: i32) -> (i32, i32, i32) {
    %c0_i32 = arith.constant 0 : i32
    %c0_i32_0 = arith.constant 0 : i32
    %c0_i32_1 = arith.constant 0 : i32
    return %arg0, %c0_i32, %c0_i32_0 : i32, i32, i32
  }
}

</mosaic_0001>

<bundles_post_ra>
// kernel: tpu_custom_call.1
= control target key start
LH: loop header
LB: loop body
LE: loop exit
PB: predicated region body
PF: predicated region fallthrough
CT: control target
= control target key end

     0   :  { %vm96_vm0 = vcmask 261120   ;;  %v9692_v32 = vmov 0   ;;  %s9694_s28 = smov 96   ;;  %vm598_vm1 = vcmask 64512   ;;  %s9697_s29 = smov 120   ;;  %vm3941_vm4 = vcmask 523264   ;;  %s15332_s0 = inlined_call_operand.vmem [shape: f32[1,128,32], index: 0, kind: input, shape index: {}]   ;;  %s15333_s3 = inlined_call_operand.vmem [shape: bf16[32,192], index: 3, kind: input, shape index: {}]   ;;  %s15334_s7 = inlined_call_operand.vmem [shape: f32[9,128,1], index: 7, kind: input, shape index: {}]   ;;  %s15335_s1 = inlined_call_operand.vmem [shape: f32[1,32], index: 1, kind: input, shape index: {}]   ;;  %s15336_s2 = inlined_call_operand.vmem [shape: f32[1,32], index: 2, kind: input, shape index: {}]   ;;  %s15337_s4 = inlined_call_operand.vmem [shape: f32[1,64], index: 4, kind: input, shape index: {}]   ;;  %s15338_s5 = inlined_call_operand.vmem [shape: f32[4,128,128], index: 5, kind: input, shape index: {}]   ;;  %s15339_s8 = inlined_call_operand.vmem [shape: bf16[288,8], index: 8, kind: input, shape index: {}]   ;;  %s15340_s9 = inlined_call_operand.vmem [shape: f32[1,8], index: 9, kind: input, shape index: {}]   ;;  %s15341_s10 = inlined_call_operand.vmem [shape: bf16[72,32], index: 10, kind: input, shape index: {}]   ;;  %s15342_s12 = inlined_call_operand.vmem [shape: f32[32,4], index: 12, kind: input, shape index: {}]   ;;  %s15343_s11 = inlined_call_operand.vmem [shape: f32[1,32], index: 11, kind: input, shape index: {}]   ;;  %s15344_s16 = inlined_call_operand.vmem [shape: f32[2,128], index: 16, kind: input, shape index: {}]   ;;  %s15345_s14 = inlined_call_operand.vmem [shape: f32[4,32], index: 14, kind: input, shape index: {}]   ;;  %s15346_s13 = inlined_call_operand.vmem [shape: f32[1,4], index: 13, kind: input, shape index: {}]   ;;  %s15347_s17 = inlined_call_operand.vmem [shape: f32[128,2], index: 17, kind: input, shape index: {}]   ;;  %s15348_s15 = inlined_call_operand.vmem [shape: f32[1,32], index: 15, kind: input, shape index: {}]   ;;  %s15349_s6 = inlined_call_operand.vmem [shape: f32[1,32], index: 6, kind: input, shape index: {}]   ;;  %s15350_s20 = inlined_call_operand.vmem [shape: bf16[32,128], index: 20, kind: input, shape index: {}]   ;;  %s15351_s18 = inlined_call_operand.vmem [shape: f32[1,32], index: 18, kind: input, shape index: {}]   ;;  %s15352_s19 = inlined_call_operand.vmem [shape: f32[1,32], index: 19, kind: input, shape index: {}]   ;;  %s15353_s22 = inlined_call_operand.vmem [shape: bf16[128,32], index: 22, kind: input, shape index: {}]   ;;  %s15354_s21 = inlined_call_operand.vmem [shape: f32[1,128], index: 21, kind: input, shape index: {}]   ;;  %s15355_s23 = inlined_call_operand.vmem [shape: f32[1,32], index: 23, kind: input, shape index: {}]   ;;  %s15356_s24 = inlined_call_operand.vmem [shape: f32[1,128,32], index: 24, kind: output, shape index: {}]  }
   0x1   :  { %15669 = sst [smem:[#allocation153_spill]] %s15332_s0  ;;  %8624 = vset.pattern.permute.xlu0 %v9692_v32  ;;  %8623 = vset.pattern.permute.xlu1 %v9692_v32  ;;  %vm3958_vm5 = vcmask 785408  }
   0x2   :  { %15670 = sst [smem:[#allocation154_spill]] %s15333_s3  ;;  %s15678_s27 = sld [smem:[#allocation153_spill]]  ;;  %438 = vmatprep.mubr.bf16.mxu0 %v9692_v32 }
   0x3   :  { %15671 = sst [smem:[#allocation155_spill]] %s15334_s7  ;;  %s15679_s0 = sld [smem:[#allocation154_spill]] }
   0x4   :  { %15672 = sst [smem:[#allocation156_spill]] %s15335_s1  ;;  %s15680_s26 = sld [smem:[#allocation155_spill]] }
   0x5   :  { %15673 = sst [smem:[#allocation157_spill]] %s15336_s2  ;;  %s15681_s30 = sld [smem:[#allocation156_spill]] }
   0x6   :  { %15674 = sst [smem:[#allocation158_spill]] %s15337_s4  ;;  %s15682_s25 = sld [smem:[#allocation157_spill]] }
   0x7   :  { %15675 = sst [smem:[#allocation159_spill]] %s15338_s5  ;;  %s15700_s3 = sld [smem:[#allocation158_spill]] }
   0x8   :  { %15676 = sst [smem:[#allocation160_spill]] %s15339_s8  ;;  %v78_v0 = vld [vmem:[%s15678_s27] sm:$0xff]  ;;  %v80_v1 = vld [vmem:[%s15678_s27 + $0x10] sm:$0xff]  ;;  %v79_v2 = vld [vmem:[%s15678_s27 + $0x8] sm:$0xff]  ;;  %s9693_s4 = smov 64  }
   0x9   :  { %15677 = sst [smem:[#allocation161_spill]] %s15340_s9  ;;  %v97_v3 = vsel %vm96_vm0, %v78_v0, 0.0  ;;  %v103_v4 = vsel %vm96_vm0, %v80_v1, 0.0  ;;  %v81_v5 = vld [vmem:[%s15678_s27 + $0x18] sm:$0xff]  ;;  %v100_v6 = vsel %vm96_vm0, %v79_v2, 0.0  ;;  %v9856_v8 = vld [vmem:[%s15678_s27 + $0x20] sm:$0xff] }
   0xa   :  { %98 = vadd.xlane.f32.xlu0 %v97_v3  ;;  %104 = vadd.xlane.f32.xlu1 %v103_v4  ;;  %v106_v7 = vsel %vm96_vm0, %v81_v5, 0.0  ;;  %v9861_v9 = vld [vmem:[%s15678_s27 + $0x28] sm:$0xff]  ;;  %v109_v10 = vsel %vm96_vm0, %v9856_v8, 0.0  ;;  %v9870_v12 = vld [vmem:[%s15678_s27 + $0x30] sm:$0xff]  ;;  %v9875_v13 = vld [vmem:[%s15678_s27 + $0x38] sm:$0xff]  ;;  %s9695_s5 = smov 32  }
   0xb   :  { %v112_v11 = vsel %vm96_vm0, %v9861_v9, 0.0  ;;  %v115_v14 = vsel %vm96_vm0, %v9870_v12, 0.0  ;;  %v118_v15 = vsel %vm96_vm0, %v9875_v13, 0.0  ;;  %v9884_v16 = vld [vmem:[%s15678_s27 + $0x40] sm:$0xff]  ;;  %v9889_v17 = vld [vmem:[%s15678_s27 + $0x48] sm:$0xff]  ;;  %v9898_v20 = vld [vmem:[%s15678_s27 + $0x50] sm:$0xff] }
   0xc   :  { %v121_v18 = vsel %vm96_vm0, %v9884_v16, 0.0  ;;  %v124_v19 = vsel %vm96_vm0, %v9889_v17, 0.0  ;;  %v9903_v21 = vld [vmem:[%s15678_s27 + $0x58] sm:$0xff]  ;;  %v127_v22 = vsel %vm96_vm0, %v9898_v20, 0.0  ;;  %v9912_v24 = vld [vmem:[%s15678_s27 + $0x60] sm:$0xff]  ;;  %v9917_v25 = vld [vmem:[%s15678_s27 + $0x68] sm:$0xff] }
   0xd   :  { %v130_v23 = vsel %vm96_vm0, %v9903_v21, 0.0  ;;  %v133_v26 = vsel %vm96_vm0, %v9912_v24, 0.0  ;;  %v136_v27 = vsel %vm96_vm0, %v9917_v25, 0.0  ;;  %v9926_v28 = vld [vmem:[%s15678_s27 + $0x70] sm:$0xff]  ;;  %v9931_v29 = vld [vmem:[%s15678_s27 + $0x78] sm:$0xff]  ;;  %s9696_s7 = smov 88  }
   0xe   :  { %101 = vadd.xlane.f32.xlu0 %v100_v6  ;;  %107 = vadd.xlane.f32.xlu1 %v106_v7  ;;  %v139_v30 = vsel %vm96_vm0, %v9926_v28, 0.0  ;;  %v142_v31 = vsel %vm96_vm0, %v9931_v29, 0.0  ;;  %s9698_s8 = smov 72   ;;  %s9701_s1 = smov 104  }
   0xf   :  { %s15758_s2 = sld [smem:[#allocation159_spill]]  ;;  %s9704_s9 = smov 56  }
  0x12   :  { %110 = vadd.xlane.f32.xlu0 %v109_v10  ;;  %113 = vadd.xlane.f32.xlu1 %v112_v11 }
  0x16   :  { %116 = vadd.xlane.f32.xlu0 %v115_v14  ;;  %119 = vadd.xlane.f32.xlu1 %v118_v15 }
  0x1a   :  { %122 = vadd.xlane.f32.xlu0 %v121_v18  ;;  %125 = vadd.xlane.f32.xlu1 %v124_v19 }
  0x1e   :  { %128 = vadd.xlane.f32.xlu0 %v127_v22  ;;  %131 = vadd.xlane.f32.xlu1 %v130_v23 }
  0x22   :  { %134 = vadd.xlane.f32.xlu0 %v133_v26  ;;  %137 = vadd.xlane.f32.xlu1 %v136_v27 }
  0x26   :  { %140 = vadd.xlane.f32.xlu0 %v139_v30  ;;  %143 = vadd.xlane.f32.xlu1 %v142_v31 }
  0x97   :  { %v99_v33 = vpop.xlane.xlu0 %98  ;;  %v105_v34 = vpop.xlane.xlu1 %104 }
  0x98   :  { %v146_v35 = vmul.f32 0.03125, %v99_v33  ;;  %v148_v36 = vmul.f32 0.03125, %v105_v34 }
  0x9a   :  { %v9940_v37 = vsub.f32 %v78_v0, %v146_v35  ;;  %v9942_v38 = vsub.f32 %v80_v1, %v148_v36 }
  0x9b   :  { %v102_v39 = vpop.xlane.xlu0 %101  ;;  %v108_v40 = vpop.xlane.xlu1 %107 }
  0x9c   :  { %v147_v41 = vmul.f32 0.03125, %v102_v39  ;;  %v149_v42 = vmul.f32 0.03125, %v108_v40  ;;  %v178_v43 = vmul.f32 %v9940_v37, %v9940_v37  ;;  %v180_v44 = vmul.f32 %v9942_v38, %v9942_v38 }
  0x9e   :  { %v9948_v45 = vsub.f32 %v79_v2, %v147_v41  ;;  %v9950_v46 = vsub.f32 %v81_v5, %v149_v42  ;;  %v194_v47 = vsel %vm96_vm0, %v178_v43, 0.0  ;;  %v200_v50 = vsel %vm96_vm0, %v180_v44, 0.0 }
  0x9f   :  { %195 = vadd.xlane.f32.xlu0 %v194_v47  ;;  %v111_v48 = vpop.xlane.xlu0 %110  ;;  %v114_v49 = vpop.xlane.xlu1 %113 }
  0xa0   :  { %v150_v51 = vmul.f32 0.03125, %v111_v48  ;;  %v151_v52 = vmul.f32 0.03125, %v114_v49  ;;  %v179_v53 = vmul.f32 %v9948_v45, %v9948_v45  ;;  %v181_v54 = vmul.f32 %v9950_v46, %v9950_v46 }
  0xa2   :  { %v9959_v55 = vsub.f32 %v9856_v8, %v150_v51  ;;  %v9962_v56 = vsub.f32 %v9861_v9, %v151_v52  ;;  %v197_v57 = vsel %vm96_vm0, %v179_v53, 0.0  ;;  %v203_v60 = vsel %vm96_vm0, %v181_v54, 0.0 }
  0xa3   :  { %201 = vadd.xlane.f32.xlu0 %v200_v50  ;;  %198 = vadd.xlane.f32.xlu1 %v197_v57  ;;  %v117_v58 = vpop.xlane.xlu0 %116  ;;  %v120_v59 = vpop.xlane.xlu1 %119  ;;  %v9187_v57 = vld [vmem:[%s15679_s0] ss:$8 sps:$4 sm:$0xff]  }
  0xa4   :  { %v152_v61 = vmul.f32 0.03125, %v117_v58  ;;  %v153_v62 = vmul.f32 0.03125, %v120_v59  ;;  %v182_v63 = vmul.f32 %v9959_v55, %v9959_v55  ;;  %v183_v0 = vmul.f32 %v9962_v56, %v9962_v56  ;;  %v9188_v58 = vld [vmem:[%s15679_s0 + $0x14] ss:$8 sps:$4 sm:$0xff]   ;;  %v9190_v59 = vld [vmem:[%s15679_s0 + $0x10] ss:$8 sps:$4 sm:$0xff]  }
  0xa6   :  { %v9971_v1 = vsub.f32 %v9870_v12, %v152_v61  ;;  %v9974_v2 = vsub.f32 %v9875_v13, %v153_v62  ;;  %v206_v3 = vsel %vm96_vm0, %v182_v63, 0.0  ;;  %v209_v6 = vsel %vm96_vm0, %v183_v0, 0.0  ;;  %v7552_v61 = vld [vmem:[%s15680_s26 + $0x98] sm:$0xff]  ;;  %v7567_v63 = vld [vmem:[%s15680_s26 + $0x110] sm:$0xff] }
  0xa7   :  { %204 = vadd.xlane.f32.xlu1 %v203_v60  ;;  %207 = vadd.xlane.f32.xlu0 %v206_v3  ;;  %v123_v4 = vpop.xlane.xlu0 %122  ;;  %v126_v5 = vpop.xlane.xlu1 %125  ;;  %v7615_v60 = vld [vmem:[%s15680_s26 + $0x290] sm:$0xff]  ;;  %v7616_v62 = vld [vmem:[%s15680_s26 + $0x298] sm:$0xff] }
  0xa8   :  { %v154_v7 = vmul.f32 0.03125, %v123_v4  ;;  %v155_v8 = vmul.f32 0.03125, %v126_v5  ;;  %v184_v9 = vmul.f32 %v9971_v1, %v9971_v1  ;;  %v185_v10 = vmul.f32 %v9974_v2, %v9974_v2  ;;  %v7551_v0 = vld [vmem:[%s15680_s26 + $0x90] sm:$0xff] }
  0xa9   :  { %v7647_v3 = vld [vmem:[%s15680_s26 + $0x390] sm:$0xff] }
  0xaa   :  { %v9983_v11 = vsub.f32 %v9884_v16, %v154_v7  ;;  %v9986_v12 = vsub.f32 %v9889_v17, %v155_v8  ;;  %v212_v13 = vsel %vm96_vm0, %v184_v9, 0.0  ;;  %v215_v18 = vsel %vm96_vm0, %v185_v10, 0.0  ;;  %v7631_v4 = vld [vmem:[%s15680_s26 + $0x310] sm:$0xff]  ;;  %v7618_v7 = vld [vmem:[%s15680_s26 + $0x2a8] sm:$0xff]  ;;  %v7568_v8 = vld [vmem:[%s15680_s26 + $0x118] sm:$0xff] }
  0xab   :  { %210 = vadd.xlane.f32.xlu1 %v209_v6  ;;  %213 = vadd.xlane.f32.xlu0 %v212_v13  ;;  %v129_v14 = vpop.xlane.xlu0 %128  ;;  %v132_v15 = vpop.xlane.xlu1 %131  ;;  %v7583_v5 = vld [vmem:[%s15680_s26 + $0x190] sm:$0xff]  ;;  %v7632_v6 = vld [vmem:[%s15680_s26 + $0x318] sm:$0xff]  ;;  %v7553_v9 = vld [vmem:[%s15680_s26 + $0xa0] sm:$0xff] }
  0xac   :  { %v156_v19 = vmul.f32 0.03125, %v129_v14  ;;  %v157_v22 = vmul.f32 0.03125, %v132_v15  ;;  %v186_v23 = vmul.f32 %v9983_v11, %v9983_v11  ;;  %v187_v16 = vmul.f32 %v9986_v12, %v9986_v12  ;;  %v7648_v10 = vld [vmem:[%s15680_s26 + $0x398] sm:$0xff]  ;;  %v7633_v13 = vld [vmem:[%s15680_s26 + $0x320] sm:$0xff] }
  0xad   :  { %v7584_v14 = vld [vmem:[%s15680_s26 + $0x198] sm:$0xff]  ;;  %v7569_v15 = vld [vmem:[%s15680_s26 + $0x120] sm:$0xff] }
  0xae   :  { %v9995_v26 = vsub.f32 %v9898_v20, %v156_v19  ;;  %v9998_v17 = vsub.f32 %v9903_v21, %v157_v22  ;;  %v218_v27 = vsel %vm96_vm0, %v186_v23, 0.0  ;;  %v221_v33 = vsel %vm96_vm0, %v187_v16, 0.0  ;;  %v7649_v19 = vld [vmem:[%s15680_s26 + $0x3a0] sm:$0xff]  ;;  %v7554_v22 = vld [vmem:[%s15680_s26 + $0xa8] sm:$0xff] }
  0xaf   :  { %216 = vadd.xlane.f32.xlu1 %v215_v18  ;;  %219 = vadd.xlane.f32.xlu0 %v218_v27  ;;  %v135_v30 = vpop.xlane.xlu0 %134  ;;  %v138_v31 = vpop.xlane.xlu1 %137  ;;  %v7617_v18 = vld [vmem:[%s15680_s26 + $0x2a0] sm:$0xff]  ;;  %v7634_v16 = vld [vmem:[%s15680_s26 + $0x328] sm:$0xff]  ;;  %v7620_v27 = vld [vmem:[%s15680_s26 + $0x2b8] sm:$0xff] }
  0xb0   :  { %v158_v34 = vmul.f32 0.03125, %v135_v30  ;;  %v159_v35 = vmul.f32 0.03125, %v138_v31  ;;  %v188_v36 = vmul.f32 %v9995_v26, %v9995_v26  ;;  %v189_v20 = vmul.f32 %v9998_v17, %v9998_v17  ;;  %v7585_v23 = vld [vmem:[%s15680_s26 + $0x1a0] sm:$0xff]  ;;  %v7570_v30 = vld [vmem:[%s15680_s26 + $0x128] sm:$0xff]  ;;  %v7555_v31 = vld [vmem:[%s15680_s26 + $0xb0] sm:$0xff] }
  0xb2   :  { %v10007_v39 = vsub.f32 %v9912_v24, %v158_v34  ;;  %v10010_v21 = vsub.f32 %v9917_v25, %v159_v35  ;;  %v224_v40 = vsel %vm96_vm0, %v188_v36, 0.0  ;;  %v227_v43 = vsel %vm96_vm0, %v189_v20, 0.0  ;;  %v7635_v34 = vld [vmem:[%s15680_s26 + $0x330] sm:$0xff]  ;;  %v7586_v35 = vld [vmem:[%s15680_s26 + $0x1a8] sm:$0xff] }
  0xb3   :  { %222 = vadd.xlane.f32.xlu1 %v221_v33  ;;  %225 = vadd.xlane.f32.xlu0 %v224_v40  ;;  %v141_v41 = vpop.xlane.xlu0 %140  ;;  %v144_v42 = vpop.xlane.xlu1 %143  ;;  %v7650_v33 = vld [vmem:[%s15680_s26 + $0x3a8] sm:$0xff]  ;;  %v7571_v36 = vld [vmem:[%s15680_s26 + $0x130] sm:$0xff] }
  0xb4   :  { %v160_v44 = vmul.f32 0.03125, %v141_v41  ;;  %v161_v47 = vmul.f32 0.03125, %v144_v42  ;;  %v190_v48 = vmul.f32 %v10007_v39, %v10007_v39  ;;  %v191_v24 = vmul.f32 %v10010_v21, %v10010_v21  ;;  %v7619_v20 = vld [vmem:[%s15680_s26 + $0x2b0] sm:$0xff]  ;;  %v7556_v41 = vld [vmem:[%s15680_s26 + $0xb8] sm:$0xff] }
  0xb5   :  { %v7651_v40 = vld [vmem:[%s15680_s26 + $0x3b0] sm:$0xff]  ;;  %v7636_v42 = vld [vmem:[%s15680_s26 + $0x338] sm:$0xff] }
  0xb6   :  { %v10019_v49 = vsub.f32 %v9926_v28, %v160_v44  ;;  %v10022_v25 = vsub.f32 %v9931_v29, %v161_v47  ;;  %v230_v50 = vsel %vm96_vm0, %v190_v48, 0.0  ;;  %v233_v51 = vsel %vm96_vm0, %v191_v24, 0.0  ;;  %v9185_v29 = vld [vmem:[%s15679_s0 + $0x4] ss:$8 sps:$4 sm:$0xff]   ;;  %v7652_v44 = vld [vmem:[%s15680_s26 + $0x3b8] sm:$0xff]  ;;  %s9700_s0 = smov 112  }
  0xb7   :  { %228 = vadd.xlane.f32.xlu1 %v227_v43  ;;  %231 = vadd.xlane.f32.xlu0 %v230_v50  ;;  %v7572_v43 = vld [vmem:[%s15680_s26 + $0x138] sm:$0xff] }
  0xb8   :  { %v192_v52 = vmul.f32 %v10019_v49, %v10019_v49  ;;  %v193_v53 = vmul.f32 %v10022_v25, %v10022_v25  ;;  %406 = vmatprep.subr.bf16.mxu0 %v9185_v29  ;;  %v7588_v47 = vld [vmem:[%s15680_s26 + $0x1b8] sm:$0xff] }
  0xb9   :  { %407 = vmatpush1.bf16.msra.mxu0 %v9187_v57 }
  0xba   :  { %v236_v54 = vsel %vm96_vm0, %v192_v52, 0.0  ;;  %v239_v28 = vsel %vm96_vm0, %v193_v53, 0.0  ;;  %408 = vmatprep.subr.bf16.mxu0 %v9188_v58 }
  0xbb   :  { %234 = vadd.xlane.f32.xlu1 %v233_v51  ;;  %237 = vadd.xlane.f32.xlu0 %v236_v54 }
  0xbd   :  { %409 = vmatpush1.bf16.msra.mxu0 %v9190_v59 }
  0xbf   :  { %240 = vadd.xlane.f32.xlu1 %v239_v28 }
  0xd0   :  { %3118 = vperm.xlu1 %8623, %v7615_v60  }
  0xd1   :  { %2638 = vperm.xlu0 %8624, %v7552_v61  }
  0xd4   :  { %3123 = vperm.xlu1 %8623, %v7616_v62  }
  0xd5   :  { %2779 = vperm.xlu0 %8624, %v7567_v63  }
  0xd8   :  { %2633 = vperm.xlu1 %8623, %v7551_v0  }
  0xd9   :  { %3344 = vperm.xlu0 %8624, %v7647_v3  }
  0xdc   :  { %3231 = vperm.xlu1 %8623, %v7631_v4  }
  0xdd   :  { %2892 = vperm.xlu0 %8624, %v7583_v5  }
  0xe0   :  { %3236 = vperm.xlu1 %8623, %v7632_v6  }
  0xe1   :  { %3133 = vperm.xlu0 %8624, %v7618_v7  }
  0xe4   :  { %2784 = vperm.xlu1 %8623, %v7568_v8   ;;  %v10153_v8 = vld [vmem:[%s15681_s30] ss:$0 sm:$0xff]  ;;  %s9699_s30 = smov 80  }
  0xe5   :  { %2643 = vperm.xlu0 %8624, %v7553_v9  }
  0xe8   :  { %3349 = vperm.xlu1 %8623, %v7648_v10  }
  0xe9   :  { %3241 = vperm.xlu0 %8624, %v7633_v13  }
  0xec   :  { %2897 = vperm.xlu1 %8623, %v7584_v14  }
  0xed   :  { %2789 = vperm.xlu0 %8624, %v7569_v15  }
  0xf0   :  { %3128 = vperm.xlu1 %8623, %v7617_v18  }
  0xf1   :  { %3354 = vperm.xlu0 %8624, %v7649_v19  }
  0xf4   :  { %2648 = vperm.xlu1 %8623, %v7554_v22  }
  0xf5   :  { %2902 = vperm.xlu0 %8624, %v7585_v23  }
  0xf8   :  { %3246 = vperm.xlu1 %8623, %v7634_v16  }
  0xf9   :  { %3143 = vperm.xlu0 %8624, %v7620_v27  }
  0xfc   :  { %2794 = vperm.xlu1 %8623, %v7570_v30  }
  0xfd   :  { %2653 = vperm.xlu0 %8624, %v7555_v31  }
 0x100   :  { %3359 = vperm.xlu1 %8623, %v7650_v33  }
 0x101   :  { %3251 = vperm.xlu0 %8624, %v7635_v34  }
 0x104   :  { %2907 = vperm.xlu1 %8623, %v7586_v35  }
 0x105   :  { %2799 = vperm.xlu0 %8624, %v7571_v36  }
 0x108   :  { %3138 = vperm.xlu1 %8623, %v7619_v20  }
 0x109   :  { %3364 = vperm.xlu0 %8624, %v7651_v40  }
 0x10c   :  { %2658 = vperm.xlu1 %8623, %v7556_v41  }
 0x110   :  { %3256 = vperm.xlu1 %8623, %v7636_v42  }
 0x114   :  { %2804 = vperm.xlu1 %8623, %v7572_v43  }
 0x118   :  { %3369 = vperm.xlu1 %8623, %v7652_v44  }
 0x11c   :  { %2917 = vperm.xlu1 %8623, %v7588_v47  }
 0x12c   :  { %v196_v48 = vpop.xlane.xlu0 %195 }
 0x12d   :  { %v242_v24 = vmul.f32 0.03125, %v196_v48 }
 0x12f   :  { %v258_v50 = vadd.f32 1e-05, %v242_v24 }
 0x130   :  { %v199_v51 = vpop.xlane.xlu1 %198  ;;  %v202_v52 = vpop.xlane.xlu0 %201 }
 0x131   :  { %9224 = vrsqrt.f32 %v258_v50  ;;  %v243_v53 = vmul.f32 0.03125, %v199_v51  ;;  %v244_v54 = vmul.f32 0.03125, %v202_v52 }
 0x133   :  { %v259_v28 = vadd.f32 1e-05, %v243_v53  ;;  %v260_v29 = vadd.f32 1e-05, %v244_v54 }
 0x134   :  { %v205_v57 = vpop.xlane.xlu1 %204  ;;  %v208_v58 = vpop.xlane.xlu0 %207 }
 0x135   :  { %9226 = vrsqrt.f32 %v259_v28  ;;  %v245_v59 = vmul.f32 0.03125, %v205_v57  ;;  %v246_v61 = vmul.f32 0.03125, %v208_v58 }
 0x136   :  { %9228 = vrsqrt.f32 %v260_v29 }
 0x137   :  { %v261_v60 = vadd.f32 1e-05, %v245_v59  ;;  %v262_v3 = vadd.f32 1e-05, %v246_v61 }
 0x138   :  { %v211_v62 = vpop.xlane.xlu1 %210  ;;  %v214_v6 = vpop.xlane.xlu0 %213 }
 0x139   :  { %9230 = vrsqrt.f32 %v261_v60  ;;  %v247_v63 = vmul.f32 0.03125, %v211_v62  ;;  %v248_v13 = vmul.f32 0.03125, %v214_v6 }
 0x13b   :  { %v9225_v0 = vpop.eup %9224  ;;  %v263_v4 = vadd.f32 1e-05, %v247_v63  ;;  %v264_v27 = vadd.f32 1e-05, %v248_v13 }
 0x13c   :  { %v290_v5 = vmul.f32 %v9225_v0, %v9940_v37  ;;  %v217_v7 = vpop.xlane.xlu1 %216  ;;  %v10160_v37 = vld [vmem:[%s15682_s25] ss:$0 sm:$0xff]  ;;  %v220_v34 = vpop.xlane.xlu0 %219  ;;  %s9703_s25 = smov 8  }
 0x13d   :  { %9232 = vrsqrt.f32 %v263_v4  ;;  %v249_v9 = vmul.f32 0.03125, %v217_v7  ;;  %v250_v41 = vmul.f32 0.03125, %v220_v34 }
 0x13e   :  { %9234 = vrsqrt.f32 %v262_v3  ;;  %v312_v14 = vmul.f32 %v10153_v8, %v290_v5 }
 0x13f   :  { %v9227_v10 = vpop.eup %9226  ;;  %v265_v19 = vadd.f32 1e-05, %v249_v9  ;;  %v266_v48 = vadd.f32 1e-05, %v250_v41 }
 0x140   :  { %v291_v15 = vmul.f32 %v9227_v10, %v9948_v45  ;;  %v9229_v18 = vpop.eup %9228  ;;  %v223_v23 = vpop.xlane.xlu1 %222  ;;  %v10164_v30 = vadd.f32 %v10160_v37, %v312_v14 }
 0x141   :  { %v292_v45 = vmul.f32 %v9229_v18, %v9942_v38  ;;  %9236 = vrsqrt.f32 %v265_v19  ;;  %v251_v35 = vmul.f32 0.03125, %v223_v23  ;;  %v226_v51 = vpop.xlane.xlu0 %225 }
 0x142   :  { %v313_v22 = vmul.f32 %v10153_v8, %v291_v15  ;;  %15683 = vst [vmem:[#allocation2_spill] sm:$0xff] %v10164_v30  ;;  %9238 = vrsqrt.f32 %v264_v27  ;;  %v252_v29 = vmul.f32 0.03125, %v226_v51 }
 0x143   :  { %v9231_v16 = vpop.eup %9230  ;;  %v314_v42 = vmul.f32 %v10153_v8, %v292_v45  ;;  %v267_v44 = vadd.f32 1e-05, %v251_v35 }
 0x144   :  { %v10167_v31 = vadd.f32 %v10160_v37, %v313_v22  ;;  %v293_v33 = vmul.f32 %v9231_v16, %v9950_v46  ;;  %v229_v47 = vpop.xlane.xlu1 %228  ;;  %v268_v61 = vadd.f32 1e-05, %v252_v29 }
 0x145   :  { %v10182_v24 = vadd.f32 %v10160_v37, %v314_v42  ;;  %9240 = vrsqrt.f32 %v267_v44  ;;  %v253_v52 = vmul.f32 0.03125, %v229_v47  ;;  %v232_v0 = vpop.xlane.xlu0 %231 }
 0x146   :  { %15684 = vst [vmem:[#allocation3_spill] sm:$0xff] %v10167_v31  ;;  %v315_v36 = vmul.f32 %v10153_v8, %v293_v33  ;;  %v350_v20 = vpack.c.bf16 %v10167_v31, %v10164_v30  ;;  %9242 = vrsqrt.f32 %v266_v48  ;;  %v254_v7 = vmul.f32 0.03125, %v232_v0 }
 0x147   :  { %v9233_v40 = vpop.eup %9232  ;;  %15686 = vst [vmem:[#allocation5_spill] sm:$0xff] %v10182_v24  ;;  %v269_v58 = vadd.f32 1e-05, %v253_v52 }
 0x148   :  { %7459 = vmatmul.mubr.msk.bf16.vlgmr.msra.gmra.mrb[0].mxu0 %vm96_vm0, %v350_v20  ;;  %v9235_v43 = vpop.eup %9234  ;;  %v10178_v38 = vadd.f32 %v10160_v37, %v315_v36  ;;  %v295_v46 = vmul.f32 %v9233_v40, %v9962_v56  ;;  %v235_v60 = vpop.xlane.xlu1 %234  ;;  %v270_v15 = vadd.f32 1e-05, %v254_v7 }
 0x149   :  { %448 = vmatprep.mubr.bf16.mxu0 %v9692_v32  ;;  %v294_v50 = vmul.f32 %v9235_v43, %v9959_v55  ;;  %9244 = vrsqrt.f32 %v269_v58  ;;  %v255_v3 = vmul.f32 0.03125, %v235_v60  ;;  %v238_v22 = vpop.xlane.xlu0 %237 }
 0x14a   :  { %15685 = vst [vmem:[#allocation4_spill] sm:$0xff] %v10178_v38  ;;  %v317_v53 = vmul.f32 %v10153_v8, %v295_v46  ;;  %v351_v54 = vpack.c.bf16 %v10178_v38, %v10182_v24  ;;  %9246 = vrsqrt.f32 %v268_v61  ;;  %v256_v33 = vmul.f32 0.03125, %v238_v22 }
 0x14b   :  { %v9237_v28 = vpop.eup %9236  ;;  %v316_v56 = vmul.f32 %v10153_v8, %v294_v50  ;;  %v271_v10 = vadd.f32 1e-05, %v255_v3 }
 0x14c   :  { %v9239_v57 = vpop.eup %9238  ;;  %v10192_v55 = vadd.f32 %v10160_v37, %v317_v53  ;;  %v297_v59 = vmul.f32 %v9237_v28, %v9974_v2  ;;  %v241_v14 = vpop.xlane.xlu1 %240  ;;  %v272_v20 = vadd.f32 1e-05, %v256_v33 }
 0x14d   :  { %v10196_v62 = vadd.f32 %v10160_v37, %v316_v56  ;;  %v296_v63 = vmul.f32 %v9239_v57, %v9971_v1  ;;  %9248 = vrsqrt.f32 %v271_v10  ;;  %v257_v23 = vmul.f32 0.03125, %v241_v14 }
 0x14e   :  { %15687 = vst [vmem:[#allocation6_spill] sm:$0xff] %v10192_v55  ;;  %v319_v4 = vmul.f32 %v10153_v8, %v297_v59  ;;  %9250 = vrsqrt.f32 %v270_v15 }
 0x14f   :  { %15688 = vst [vmem:[#allocation7_spill] sm:$0xff] %v10196_v62  ;;  %v352_v5 = vpack.c.bf16 %v10192_v55, %v10196_v62  ;;  %v9241_v6 = vpop.eup %9240  ;;  %v318_v2 = vmul.f32 %v10153_v8, %v296_v63  ;;  %v273_v35 = vadd.f32 1e-05, %v257_v23 }
 0x150   :  { %7460 = vmatmul.mubr.msk.bf16.gmra.mrb[4].mxu0 %vm96_vm0, %v351_v54  ;;  %v9243_v9 = vpop.eup %9242  ;;  %v10206_v1 = vadd.f32 %v10160_v37, %v319_v4  ;;  %v299_v13 = vmul.f32 %v9241_v6, %v9986_v12  ;;  %v10270_v63 = vpop.permute.xlu1 %3118 }
 0x151   :  { %458 = vmatprep.mubr.bf16.mxu0 %v9692_v32  ;;  %v10210_v18 = vadd.f32 %v10160_v37, %v318_v2  ;;  %v298_v19 = vmul.f32 %v9243_v9, %v9983_v11  ;;  %9252 = vrsqrt.f32 %v273_v35  ;;  %15699 = vst [vmem:[#allocation18_spill] sm:$0xff] %v10270_v63 }
 0x152   :  { %15689 = vst [vmem:[#allocation8_spill] sm:$0xff] %v10206_v1  ;;  %v321_v16 = vmul.f32 %v10153_v8, %v299_v13  ;;  %9254 = vrsqrt.f32 %v272_v20 }
 0x153   :  { %15690 = vst [vmem:[#allocation9_spill] sm:$0xff] %v10210_v18  ;;  %v353_v27 = vpack.c.bf16 %v10206_v1, %v10210_v18  ;;  %v9245_v45 = vpop.eup %9244  ;;  %v320_v12 = vmul.f32 %v10153_v8, %v298_v19 }
 0x154   :  { %v9247_v34 = vpop.eup %9246  ;;  %v10220_v11 = vadd.f32 %v10160_v37, %v321_v16  ;;  %v301_v36 = vmul.f32 %v9245_v45, %v9998_v17  ;;  %v10285_v7 = vpop.permute.xlu1 %3123 }
 0x155   :  { %v10224_v40 = vadd.f32 %v10160_v37, %v320_v12  ;;  %v300_v41 = vmul.f32 %v9247_v34, %v9995_v26  ;;  %15702 = vst [vmem:[#allocation20_spill] sm:$0xff] %v10285_v7 }
 0x156   :  { %15691 = vst [vmem:[#allocation10_spill] sm:$0xff] %v10220_v11  ;;  %v323_v42 = vmul.f32 %v10153_v8, %v301_v36 }
 0x157   :  { %15692 = vst [vmem:[#allocation11_spill] sm:$0xff] %v10224_v40  ;;  %v354_v43 = vpack.c.bf16 %v10220_v11, %v10224_v40  ;;  %v9249_v44 = vpop.eup %9248  ;;  %v322_v46 = vmul.f32 %v10153_v8, %v300_v41 }
 0x158   :  { %7461 = vmatmul.mubr.msk.bf16.gmra.mrb[8].mxu0 %vm96_vm0, %v352_v5  ;;  %v9251_v47 = vpop.eup %9250  ;;  %v10234_v17 = vadd.f32 %v10160_v37, %v323_v42  ;;  %v303_v26 = vmul.f32 %v9249_v44, %v10010_v21  ;;  %v10295_v22 = vpop.permute.xlu1 %2633 }
 0x159   :  { %468 = vmatprep.mubr.bf16.mxu0 %v9692_v32  ;;  %v10238_v48 = vadd.f32 %v10160_v37, %v322_v46  ;;  %v302_v50 = vmul.f32 %v9251_v47, %v10007_v39  ;;  %15704 = vst [vmem:[#allocation22_spill] sm:$0xff] %v10295_v22 }
 0x15a   :  { %15693 = vst [vmem:[#allocation12_spill] sm:$0xff] %v10234_v17  ;;  %v325_v51 = vmul.f32 %v10153_v8, %v303_v26 }
 0x15b   :  { %15694 = vst [vmem:[#allocation13_spill] sm:$0xff] %v10238_v48  ;;  %v355_v52 = vpack.c.bf16 %v10234_v17, %v10238_v48  ;;  %v9253_v53 = vpop.eup %9252  ;;  %v324_v54 = vmul.f32 %v10153_v8, %v302_v50 }
 0x15c   :  { %v9255_v28 = vpop.eup %9254  ;;  %v10248_v21 = vadd.f32 %v10160_v37, %v325_v51  ;;  %v305_v29 = vmul.f32 %v9253_v53, %v10022_v25  ;;  %v10303_v33 = vpop.permute.xlu1 %3231 }
 0x15d   :  { %v10252_v39 = vadd.f32 %v10160_v37, %v324_v54  ;;  %v304_v56 = vmul.f32 %v9255_v28, %v10019_v49  ;;  %15705 = vst [vmem:[#allocation23_spill] sm:$0xff] %v10303_v33  ;;  %v10327_v51 = vpop.permute.xlu0 %2638 }
 0x15e   :  { %15695 = vst [vmem:[#allocation14_spill] sm:$0xff] %v10248_v21  ;;  %v327_v57 = vmul.f32 %v10153_v8, %v305_v29  ;;  %15709 = vst [vmem:[#allocation27_spill] sm:$0xff] %v10327_v51 }
 0x15f   :  { %15696 = vst [vmem:[#allocation15_spill] sm:$0xff] %v10252_v39  ;;  %v356_v58 = vpack.c.bf16 %v10248_v21, %v10252_v39  ;;  %v326_v59 = vmul.f32 %v10153_v8, %v304_v56  ;;  %v10275_v8 = vld [vmem:[%s15700_s3] ss:$0 sm:$0xff]  ;;  %s9706_s3 = smov 16  }
 0x160   :  { %7462 = vmatmul.mubr.msk.bf16.gmra.mrb[12].mxu0 %vm96_vm0, %v353_v27  ;;  %v10262_v60 = vadd.f32 %v10160_v37, %v327_v57  ;;  %v10314_v42 = vpop.permute.xlu1 %3236 }
 0x161   :  { %478 = vmatprep.mubr.bf16.mxu0 %v9692_v32  ;;  %v10265_v25 = vadd.f32 %v10160_v37, %v326_v59  ;;  %15707 = vst [vmem:[#allocation25_spill] sm:$0xff] %v10314_v42  ;;  %v10340_v59 = vpop.permute.xlu0 %2779 }
 0x162   :  { %15697 = vst [vmem:[#allocation16_spill] sm:$0xff] %v10262_v60  ;;  %15712 = vst [vmem:[#allocation30_spill] sm:$0xff] %v10340_v59 }
 0x163   :  { %15698 = vst [vmem:[#allocation17_spill] sm:$0xff] %v10265_v25  ;;  %v357_v49 = vpack.c.bf16 %v10262_v60, %v10265_v25 }
 0x164   :  { %v10331_v53 = vpop.permute.xlu1 %2784 }
 0x165   :  { %15710 = vst [vmem:[#allocation28_spill] sm:$0xff] %v10331_v53 }
 0x168   :  { %7463 = vmatmul.mubr.msk.bf16.gmra.mrb[16].mxu0 %vm96_vm0, %v354_v43 }
 0x169   :  { %488 = vmatprep.mubr.bf16.mxu0 %v9692_v32 }
 0x170   :  { %7464 = vmatmul.mubr.msk.bf16.gmra.mrb[20].mxu0 %vm96_vm0, %v355_v52 }
 0x171   :  { %498 = vmatprep.mubr.bf16.mxu0 %v9692_v32 }
 0x178   :  { %7465 = vmatmul.mubr.msk.bf16.gmra.mrb[24].mxu0 %vm96_vm0, %v356_v58 }
 0x179   :  { %508 = vmatprep.mubr.bf16.mxu0 %v9692_v32 }
 0x180   :  { %7466 = vmatmul.mubr.msk.bf16.gmra.mrb[28].mxu0 %vm96_vm0, %v357_v49 }
 0x21b   :  { %v440_v61 = vpop.f32.mrb[0].mxu0 }
 0x21c   :  { %v442_v0 = vpop.f32.mrb[1].mxu0 }
 0x21d   :  { %v444_v32 = vpop.f32.mrb[2].mxu0  ;;  %v534_v37 = vadd.f32 %v10275_v8, %v442_v0 }
 0x21e   :  { %v10277_v3 = vpack.c.bf16 %v444_v32, %v440_v61  ;;  %v446_v4 = vpop.f32.mrb[3].mxu0  ;;  %v10343_v61 = vpop.permute.xlu1 %3349 }
 0x21f   :  { %v535_v5 = vadd.f32 %v10275_v8, %v446_v4  ;;  %15713 = vst [vmem:[#allocation31_spill] sm:$0xff] %v10343_v61 }
 0x220   :  { %15701 = vst [vmem:[#allocation19_spill] sm:$0xff] %v10277_v3  ;;  %1814 = vrot.lane.b32.xlu1 %v10277_v3, %s9693_s4  ;;  %1250 = vrot.lane.b32.xlu0 %v10277_v3, %s9694_s28 }
 0x221   :  { %v550_v6 = vpack.c.bf16 %v535_v5, %v534_v37  ;;  %v10355_v37 = vpop.permute.xlu0 %3344 }
 0x222   :  { %15714 = vst [vmem:[#allocation32_spill] sm:$0xff] %v10355_v37 }
 0x223   :  { %v450_v2 = vpop.f32.mrb[4].mxu0  ;;  %8061 = vmatprep.mubr.msk.bf16.mxu1 %vm598_vm1, %v550_v6 }
 0x224   :  { %2297 = vrot.lane.b32.xlu1 %v10277_v3, %s9695_s5  ;;  %929 = vrot.lane.b32.xlu0 %v550_v6, %s9696_s7  ;;  %v452_v9 = vpop.f32.mrb[5].mxu0 }
 0x225   :  { %v454_v10 = vpop.f32.mrb[6].mxu0  ;;  %v536_v15 = vadd.f32 %v10275_v8, %v452_v9 }
 0x226   :  { %v10291_v13 = vpack.c.bf16 %v454_v10, %v450_v2  ;;  %v456_v14 = vpop.f32.mrb[7].mxu0  ;;  %v10358_v2 = vpop.permute.xlu1 %2897 }
 0x227   :  { %v537_v19 = vadd.f32 %v10275_v8, %v456_v14  ;;  %15715 = vst [vmem:[#allocation33_spill] sm:$0xff] %v10358_v2 }
 0x228   :  { %15703 = vst [vmem:[#allocation21_spill] sm:$0xff] %v10291_v13  ;;  %913 = vrot.lane.b32.xlu1 %v550_v6, %s9697_s29  ;;  %582 = vrot.lane.b32.xlu0 %v550_v6, %s9694_s28 }
 0x229   :  { %v10299_v23 = vpack.c.bf16 %v537_v19, %v536_v15  ;;  %v10369_v19 = vpop.permute.xlu0 %2892 }
 0x22a   :  { %15717 = vst [vmem:[#allocation35_spill] sm:$0xff] %v10369_v19 }
 0x22b   :  { %v460_v16 = vpop.f32.mrb[8].mxu0 }
 0x22c   :  { %1984 = vrot.lane.b32.xlu1 %v550_v6, %s9698_s8  ;;  %1501 = vrot.lane.b32.xlu0 %v550_v6, %s9699_s30  ;;  %v462_v27 = vpop.f32.mrb[9].mxu0 }
 0x22d   :  { %v464_v45 = vpop.f32.mrb[10].mxu0  ;;  %v538_v35 = vadd.f32 %v10275_v8, %v462_v27  ;;  %v10371_v27 = vpop.permute.xlu1 %3128 }
 0x22e   :  { %v10305_v12 = vpack.c.bf16 %v464_v45, %v460_v16  ;;  %v466_v34 = vpop.f32.mrb[11].mxu0  ;;  %15718 = vst [vmem:[#allocation36_spill] sm:$0xff] %v10371_v27 }
 0x22f   :  { %v539_v36 = vadd.f32 %v10275_v8, %v466_v34 }
 0x230   :  { %15706 = vst [vmem:[#allocation24_spill] sm:$0xff] %v10305_v12  ;;  %1485 = vrot.lane.b32.xlu0 %v550_v6, %s9700_s0  ;;  %1816 = vrot.lane.b32.xlu1 %v10291_v13, %s9693_s4 }
 0x231   :  { %v10312_v20 = vpack.c.bf16 %v539_v36, %v538_v35 }
 0x233   :  { %v470_v41 = vpop.f32.mrb[12].mxu0 }
 0x234   :  { %1968 = vrot.lane.b32.xlu0 %v550_v6, %s9701_s1  ;;  %931 = vrot.lane.b32.xlu1 %v10299_v23, %s9696_s7  ;;  %v472_v43 = vpop.f32.mrb[13].mxu0 }
 0x235   :  { %v474_v44 = vpop.f32.mrb[14].mxu0  ;;  %v540_v26 = vadd.f32 %v10275_v8, %v472_v43 }
 0x236   :  { %v10319_v46 = vpack.c.bf16 %v474_v44, %v470_v41  ;;  %v476_v47 = vpop.f32.mrb[15].mxu0 }
 0x237   :  { %v541_v50 = vadd.f32 %v10275_v8, %v476_v47  ;;  %v10387_v47 = vpop.permute.xlu0 %3133 }
 0x238   :  { %15708 = vst [vmem:[#allocation26_spill] sm:$0xff] %v10319_v46  ;;  %1252 = vrot.lane.b32.xlu0 %v10291_v13, %s9694_s28  ;;  %915 = vrot.lane.b32.xlu1 %v10299_v23, %s9697_s29  ;;  %15720 = vst [vmem:[#allocation38_spill] sm:$0xff] %v10387_v47 }
 0x239   :  { %v10329_v52 = vpack.c.bf16 %v541_v50, %v540_v26  ;;  %v10389_v26 = vpop.permute.xlu1 %2648 }
 0x23a   :  { %15721 = vst [vmem:[#allocation39_spill] sm:$0xff] %v10389_v26 }
 0x23b   :  { %v480_v54 = vpop.f32.mrb[16].mxu0 }
 0x23c   :  { %2299 = vrot.lane.b32.xlu0 %v10291_v13, %s9695_s5  ;;  %1503 = vrot.lane.b32.xlu1 %v10299_v23, %s9699_s30  ;;  %v482_v28 = vpop.f32.mrb[17].mxu0 }
 0x23d   :  { %v542_v29 = vadd.f32 %v10275_v8, %v482_v28  ;;  %v484_v56 = vpop.f32.mrb[18].mxu0 }
 0x23e   :  { %v10338_v57 = vpack.c.bf16 %v484_v56, %v480_v54  ;;  %v486_v58 = vpop.f32.mrb[19].mxu0 }
 0x23f   :  { %v543_v49 = vadd.f32 %v10275_v8, %v486_v58 }
 0x240   :  { %15711 = vst [vmem:[#allocation29_spill] sm:$0xff] %v10338_v57  ;;  %584 = vrot.lane.b32.xlu0 %v10299_v23, %s9694_s28  ;;  %1986 = vrot.lane.b32.xlu1 %v10299_v23, %s9698_s8 }
 0x241   :  { %v10349_v0 = vpack.c.bf16 %v543_v49, %v542_v29 }
 0x243   :  { %v490_v32 = vpop.f32.mrb[20].mxu0 }
 0x244   :  { %1487 = vrot.lane.b32.xlu0 %v10299_v23, %s9700_s0  ;;  %1970 = vrot.lane.b32.xlu1 %v10299_v23, %s9701_s1  ;;  %v492_v4 = vpop.f32.mrb[21].mxu0 }
 0x245   :  { %v544_v5 = vadd.f32 %v10275_v8, %v492_v4  ;;  %v494_v6 = vpop.f32.mrb[22].mxu0  ;;  %v10401_v4 = vpop.permute.xlu1 %3246 }
 0x246   :  { %v10360_v9 = vpack.c.bf16 %v494_v6, %v490_v32  ;;  %v496_v10 = vpop.f32.mrb[23].mxu0  ;;  %v10399_v32 = vpop.permute.xlu0 %2643  ;;  %15724 = vst [vmem:[#allocation42_spill] sm:$0xff] %v10401_v4 }
 0x247   :  { %v545_v14 = vadd.f32 %v10275_v8, %v496_v10  ;;  %15723 = vst [vmem:[#allocation41_spill] sm:$0xff] %v10399_v32 }
 0x248   :  { %15716 = vst [vmem:[#allocation34_spill] sm:$0xff] %v10360_v9  ;;  %1818 = vrot.lane.b32.xlu0 %v10305_v12, %s9693_s4  ;;  %1254 = vrot.lane.b32.xlu1 %v10305_v12, %s9694_s28 }
 0x249   :  { %v10367_v15 = vpack.c.bf16 %v545_v14, %v544_v5 }
 0x24a   :  { %v10413_v6 = vpop.permute.xlu0 %3241 }
 0x24b   :  { %v500_v16 = vpop.f32.mrb[24].mxu0  ;;  %15725 = vst [vmem:[#allocation43_spill] sm:$0xff] %v10413_v6 }
 0x24c   :  { %2301 = vrot.lane.b32.xlu1 %v10305_v12, %s9695_s5  ;;  %586 = vrot.lane.b32.xlu0 %v10312_v20, %s9694_s28  ;;  %v502_v45 = vpop.f32.mrb[25].mxu0 }
 0x24d   :  { %v546_v34 = vadd.f32 %v10275_v8, %v502_v45  ;;  %v504_v35 = vpop.f32.mrb[26].mxu0 }
 0x24e   :  { %v10378_v36 = vpack.c.bf16 %v504_v35, %v500_v16  ;;  %v506_v41 = vpop.f32.mrb[27].mxu0  ;;  %v10421_v10 = vpop.permute.xlu0 %2789 }
 0x24f   :  { %v547_v43 = vadd.f32 %v10275_v8, %v506_v41  ;;  %15727 = vst [vmem:[#allocation45_spill] sm:$0xff] %v10421_v10 }
 0x250   :  { %15719 = vst [vmem:[#allocation37_spill] sm:$0xff] %v10378_v36  ;;  %917 = vrot.lane.b32.xlu0 %v10312_v20, %s9697_s29  ;;  %933 = vrot.lane.b32.xlu1 %v10312_v20, %s9696_s7 }
 0x251   :  { %v10385_v44 = vpack.c.bf16 %v547_v43, %v546_v34 }
 0x252   :  { %v10433_v16 = vpop.permute.xlu0 %3354 }
 0x253   :  { %v510_v50 = vpop.f32.mrb[28].mxu0  ;;  %15729 = vst [vmem:[#allocation47_spill] sm:$0xff] %v10433_v16 }
 0x254   :  { %1988 = vrot.lane.b32.xlu0 %v10312_v20, %s9698_s8  ;;  %1505 = vrot.lane.b32.xlu1 %v10312_v20, %s9699_s30  ;;  %v512_v54 = vpop.f32.mrb[29].mxu0 }
 0x255   :  { %v548_v28 = vadd.f32 %v10275_v8, %v512_v54  ;;  %v514_v29 = vpop.f32.mrb[30].mxu0 }
 0x256   :  { %v10396_v56 = vpack.c.bf16 %v514_v29, %v510_v50  ;;  %v516_v58 = vpop.f32.mrb[31].mxu0  ;;  %v10441_v34 = vpop.permute.xlu0 %2902 }
 0x257   :  { %v549_v49 = vadd.f32 %v10275_v8, %v516_v58  ;;  %v10415_v8 = vpop.permute.xlu1 %2794  ;;  %15731 = vst [vmem:[#allocation49_spill] sm:$0xff] %v10441_v34 }
 0x258   :  { %15722 = vst [vmem:[#allocation40_spill] sm:$0xff] %v10396_v56  ;;  %1972 = vrot.lane.b32.xlu0 %v10312_v20, %s9701_s1  ;;  %1489 = vrot.lane.b32.xlu1 %v10312_v20, %s9700_s0  ;;  %15726 = vst [vmem:[#allocation44_spill] sm:$0xff] %v10415_v8 }
 0x259   :  { %v10407_v5 = vpack.c.bf16 %v549_v49, %v548_v28 }
 0x25a   :  { %v10453_v41 = vpop.permute.xlu0 %3143 }
 0x25b   :  { %v10423_v14 = vpop.permute.xlu1 %3359  ;;  %15733 = vst [vmem:[#allocation51_spill] sm:$0xff] %v10453_v41 }
 0x25c   :  { %1820 = vrot.lane.b32.xlu1 %v10319_v46, %s9693_s4  ;;  %1256 = vrot.lane.b32.xlu0 %v10319_v46, %s9694_s28  ;;  %15728 = vst [vmem:[#allocation46_spill] sm:$0xff] %v10423_v14 }
 0x25e   :  { %v10461_v50 = vpop.permute.xlu0 %2653 }
 0x25f   :  { %v10435_v45 = vpop.permute.xlu1 %2907  ;;  %15735 = vst [vmem:[#allocation53_spill] sm:$0xff] %v10461_v50 }
 0x260   :  { %2303 = vrot.lane.b32.xlu0 %v10319_v46, %s9695_s5  ;;  %935 = vrot.lane.b32.xlu1 %v10329_v52, %s9696_s7  ;;  %15730 = vst [vmem:[#allocation48_spill] sm:$0xff] %v10435_v45 }
 0x262   :  { %v10473_v28 = vpop.permute.xlu0 %3251 }
 0x263   :  { %v10443_v35 = vpop.permute.xlu1 %3138  ;;  %15737 = vst [vmem:[#allocation55_spill] sm:$0xff] %v10473_v28 }
 0x264   :  { %588 = vrot.lane.b32.xlu0 %v10329_v52, %s9694_s28  ;;  %1507 = vrot.lane.b32.xlu1 %v10329_v52, %s9699_s30  ;;  %15732 = vst [vmem:[#allocation50_spill] sm:$0xff] %v10443_v35 }
 0x266   :  { %v10481_v58 = vpop.permute.xlu0 %2799 }
 0x267   :  { %v10455_v43 = vpop.permute.xlu1 %2658  ;;  %15739 = vst [vmem:[#allocation57_spill] sm:$0xff] %v10481_v58 }
 0x268   :  { %919 = vrot.lane.b32.xlu0 %v10329_v52, %s9697_s29  ;;  %1990 = vrot.lane.b32.xlu1 %v10329_v52, %s9698_s8  ;;  %15734 = vst [vmem:[#allocation52_spill] sm:$0xff] %v10455_v43 }
 0x26a   :  { %v10493_v25 = vpop.permute.xlu0 %3364 }
 0x26b   :  { %v10463_v54 = vpop.permute.xlu1 %3256  ;;  %15741 = vst [vmem:[#allocation59_spill] sm:$0xff] %v10493_v25 }
 0x26c   :  { %1491 = vrot.lane.b32.xlu0 %v10329_v52, %s9700_s0  ;;  %1974 = vrot.lane.b32.xlu1 %v10329_v52, %s9701_s1  ;;  %15736 = vst [vmem:[#allocation54_spill] sm:$0xff] %v10463_v54 }
 0x26f   :  { %v10475_v29 = vpop.permute.xlu1 %2804 }
 0x270   :  { %1822 = vrot.lane.b32.xlu0 %v10338_v57, %s9693_s4  ;;  %1258 = vrot.lane.b32.xlu1 %v10338_v57, %s9694_s28  ;;  %15738 = vst [vmem:[#allocation56_spill] sm:$0xff] %v10475_v29 }
 0x273   :  { %v10483_v49 = vpop.permute.xlu1 %3369 }
 0x274   :  { %2305 = vrot.lane.b32.xlu1 %v10338_v57, %s9695_s5  ;;  %937 = vrot.lane.b32.xlu0 %v10349_v0, %s9696_s7  ;;  %15740 = vst [vmem:[#allocation58_spill] sm:$0xff] %v10483_v49 }
 0x277   :  { %v10495_v21 = vpop.permute.xlu1 %2917 }
 0x278   :  { %1509 = vrot.lane.b32.xlu1 %v10349_v0, %s9699_s30  ;;  %590 = vrot.lane.b32.xlu0 %v10349_v0, %s9694_s28  ;;  %15742 = vst [vmem:[#allocation60_spill] sm:$0xff] %v10495_v21 }
 0x27c   :  { %921 = vrot.lane.b32.xlu0 %v10349_v0, %s9697_s29  ;;  %1260 = vrot.lane.b32.xlu1 %v10360_v9, %s9694_s28 }
 0x280   :  { %1992 = vrot.lane.b32.xlu0 %v10349_v0, %s9698_s8  ;;  %939 = vrot.lane.b32.xlu1 %v10367_v15, %s9696_s7 }
 0x284   :  { %1493 = vrot.lane.b32.xlu0 %v10349_v0, %s9700_s0  ;;  %592 = vrot.lane.b32.xlu1 %v10367_v15, %s9694_s28 }
 0x288   :  { %1976 = vrot.lane.b32.xlu0 %v10349_v0, %s9701_s1  ;;  %1511 = vrot.lane.b32.xlu1 %v10367_v15, %s9699_s30 }
 0x28c   :  { %1824 = vrot.lane.b32.xlu0 %v10360_v9, %s9693_s4  ;;  %1994 = vrot.lane.b32.xlu1 %v10367_v15, %s9698_s8 }
 0x290   :  { %2307 = vrot.lane.b32.xlu0 %v10360_v9, %s9695_s5  ;;  %1495 = vrot.lane.b32.xlu1 %v10367_v15, %s9700_s0 }
 0x292   :  { %v10501_v39 = vpop.permute.xlu1 %1814  ;;  %v10503_v17 = vpop.permute.xlu0 %1250 }
 0x293   :  { %15743 = vst [vmem:[#allocation61_spill] sm:$0xff] %v10501_v39 }
 0x294   :  { %923 = vrot.lane.b32.xlu0 %v10367_v15, %s9697_s29  ;;  %1978 = vrot.lane.b32.xlu1 %v10367_v15, %s9701_s1 }
 0x296   :  { %v10509_v48 = vpop.permute.xlu1 %2297  ;;  %v930_v11 = vpop.permute.xlu0 %929 }
 0x297   :  { %15744 = vst [vmem:[#allocation62_spill] sm:$0xff] %v10509_v48  ;;  %8578 = vmatprep.subr.msk.bf16.mxu0 %vm598_vm1, %v930_v11  ;;  %v970_v60 = vsel %vm598_vm1, %v930_v11, 0 }
 0x298   :  { %1262 = vrot.lane.b32.xlu0 %v10378_v36, %s9694_s28  ;;  %594 = vrot.lane.b32.xlu1 %v10385_v44, %s9694_s28 }
 0x299   :  { %8078 = vmatpush3.bf16.xpose.msra.mxu0 %v970_v60 }
 0x29a   :  { %v914_v21 = vpop.permute.xlu1 %913  ;;  %v583_v58 = vpop.permute.xlu0 %582 }
 0x29b   :  { %8570 = vmatprep.subr.msk.bf16.mxu1 %vm598_vm1, %v583_v58  ;;  %8093 = vmatprep.mubr.msk.bf16.mxu0 %vm598_vm1, %v914_v21  ;;  %v624_v25 = vsel %vm598_vm1, %v583_v58, 0 }
 0x29c   :  { %1826 = vrot.lane.b32.xlu0 %v10378_v36, %s9693_s4  ;;  %1513 = vrot.lane.b32.xlu1 %v10385_v44, %s9699_s30 }
 0x29d   :  { %8046 = vmatpush3.bf16.xpose.msra.mxu1 %v624_v25 }
 0x29e   :  { %v10524_v11 = vpop.permute.xlu1 %1984  ;;  %v10526_v30 = vpop.permute.xlu0 %1501 }
 0x2a0   :  { %1497 = vrot.lane.b32.xlu1 %v10385_v44, %s9700_s0  ;;  %941 = vrot.lane.b32.xlu0 %v10385_v44, %s9696_s7 }
 0x2a2   :  { %v10532_v21 = vpop.permute.xlu1 %1816  ;;  %v10534_v60 = vpop.permute.xlu0 %1485 }
 0x2a3   :  { %15745 = vst [vmem:[#allocation63_spill] sm:$0xff] %v10532_v21 }
 0x2a4   :  { %1264 = vrot.lane.b32.xlu1 %v10396_v56, %s9694_s28  ;;  %925 = vrot.lane.b32.xlu0 %v10385_v44, %s9697_s29 }
 0x2a6   :  { %v932_v25 = vpop.permute.xlu1 %931  ;;  %v10540_v58 = vpop.permute.xlu0 %1968 }
 0x2a7   :  { %8579 = vmatprep.subr.msk.bf16.mxu0 %vm598_vm1, %v932_v25  ;;  %v973_v29 = vsel %vm598_vm1, %v932_v25, 0 }
 0x2a8   :  { %943 = vrot.lane.b32.xlu1 %v10407_v5, %s9696_s7  ;;  %1996 = vrot.lane.b32.xlu0 %v10385_v44, %s9698_s8  ;;  %s15842_s7 = sld [smem:[#allocation160_spill]] }
 0x2a9   :  { %8080 = vmatpush3.bf16.xpose.msra.mxu0 %v973_v29 }
 0x2aa   :  { %v10548_v49 = vpop.permute.xlu1 %915  ;;  %v10550_v50 = vpop.permute.xlu0 %1252 }
 0x2ac   :  { %2309 = vrot.lane.b32.xlu1 %v10378_v36, %s9695_s5  ;;  %1980 = vrot.lane.b32.xlu0 %v10385_v44, %s9701_s1  ;;  %v7525_v36 = vld [vmem:[%s15758_s2 + $0x188] sm:$0xff] }
 0x2ae   :  { %v10556_v28 = vpop.permute.xlu1 %1503  ;;  %v10558_v25 = vpop.permute.xlu0 %2299 }
 0x2af   :  { %15746 = vst [vmem:[#allocation64_spill] sm:$0xff] %v10558_v25 }
 0x2b0   :  { %596 = vrot.lane.b32.xlu1 %v10407_v5, %s9694_s28  ;;  %1828 = vrot.lane.b32.xlu0 %v10396_v56, %s9693_s4 }
 0x2b2   :  { %v10564_v29 = vpop.permute.xlu1 %1986  ;;  %v585_v43 = vpop.permute.xlu0 %584 }
 0x2b3   :  { %8571 = vmatprep.subr.msk.bf16.mxu1 %vm598_vm1, %v585_v43  ;;  %v627_v54 = vsel %vm598_vm1, %v585_v43, 0 }
 0x2b4   :  { %1515 = vrot.lane.b32.xlu1 %v10407_v5, %s9699_s30  ;;  %927 = vrot.lane.b32.xlu0 %v10407_v5, %s9697_s29  ;;  %s9707_s29 = smov 48  }
 0x2b5   :  { %8048 = vmatpush3.bf16.xpose.msra.mxu1 %v627_v54 }
 0x2b6   :  { %v10572_v41 = vpop.permute.xlu1 %1970  ;;  %v10574_v35 = vpop.permute.xlu0 %1487 }
 0x2b8   :  { %1998 = vrot.lane.b32.xlu1 %v10407_v5, %s9698_s8  ;;  %1499 = vrot.lane.b32.xlu0 %v10407_v5, %s9700_s0  ;;  %s9708_s8 = smov 24  }
 0x2ba   :  { %v10580_v40 = vpop.permute.xlu1 %1254  ;;  %v10582_v43 = vpop.permute.xlu0 %1818 }
 0x2bb   :  { %15747 = vst [vmem:[#allocation65_spill] sm:$0xff] %v10582_v43 }
 0x2bc   :  { %1982 = vrot.lane.b32.xlu1 %v10407_v5, %s9701_s1  ;;  %s16138_s1 = sld [smem:[#allocation161_spill]] }
 0x2be   :  { %v10586_v1 = vpop.permute.xlu1 %2301  ;;  %v587_v54 = vpop.permute.xlu0 %586 }
 0x2bf   :  { %15748 = vst [vmem:[#allocation66_spill] sm:$0xff] %v10586_v1  ;;  %8572 = vmatprep.subr.msk.bf16.mxu1 %vm598_vm1, %v587_v54  ;;  %v630_v34 = vsel %vm598_vm1, %v587_v54, 0 }
 0x2c0   :  { %8050 = vmatpush3.bf16.xpose.msra.mxu1 %v630_v34 }
 0x2c2   :  { %v934_v45 = vpop.permute.xlu1 %933  ;;  %v10590_v10 = vpop.permute.xlu0 %917 }
 0x2c3   :  { %8580 = vmatprep.subr.msk.bf16.mxu0 %vm598_vm1, %v934_v45  ;;  %v976_v16 = vsel %vm598_vm1, %v934_v45, 0 }
 0x2c4   :  { %8082 = vmatpush3.bf16.xpose.msra.mxu0 %v976_v16 }
 0x2c6   :  { %v10594_v8 = vpop.permute.xlu1 %1505  ;;  %v10596_v14 = vpop.permute.xlu0 %1988 }
 0x2ca   :  { %v10598_v32 = vpop.permute.xlu1 %1489  ;;  %v10600_v6 = vpop.permute.xlu0 %1972 }
 0x2ce   :  { %v10602_v26 = vpop.permute.xlu1 %1820  ;;  %v10604_v54 = vpop.permute.xlu0 %1256 }
 0x2cf   :  { %15749 = vst [vmem:[#allocation67_spill] sm:$0xff] %v10602_v26 }
 0x2d2   :  { %v936_v34 = vpop.permute.xlu1 %935  ;;  %v10606_v4 = vpop.permute.xlu0 %2303 }
 0x2d3   :  { %15750 = vst [vmem:[#allocation68_spill] sm:$0xff] %v10606_v4  ;;  %8581 = vmatprep.subr.msk.bf16.mxu0 %vm598_vm1, %v936_v34  ;;  %v979_v45 = vsel %vm598_vm1, %v936_v34, 0 }
 0x2d4   :  { %8084 = vmatpush3.bf16.xpose.msra.mxu0 %v979_v45 }
 0x2d6   :  { %v10610_v16 = vpop.permute.xlu1 %1507  ;;  %v589_v47 = vpop.permute.xlu0 %588 }
 0x2d7   :  { %8573 = vmatprep.subr.msk.bf16.mxu1 %vm598_vm1, %v589_v47  ;;  %v633_v27 = vsel %vm598_vm1, %v589_v47, 0 }
 0x2d8   :  { %8052 = vmatpush3.bf16.xpose.msra.mxu1 %v633_v27 }
 0x2da   :  { %v10614_v18 = vpop.permute.xlu1 %1990  ;;  %v10616_v55 = vpop.permute.xlu0 %919 }
 0x2de   :  { %v10618_v19 = vpop.permute.xlu1 %1974  ;;  %v10620_v2 = vpop.permute.xlu0 %1491 }
 0x2e2   :  { %v10622_v59 = vpop.permute.xlu1 %1258  ;;  %v10624_v34 = vpop.permute.xlu0 %1822 }
 0x2e3   :  { %15751 = vst [vmem:[#allocation69_spill] sm:$0xff] %v10624_v34 }
 0x2e6   :  { %v10626_v45 = vpop.permute.xlu1 %2305  ;;  %v938_v37 = vpop.permute.xlu0 %937 }
 0x2e7   :  { %15752 = vst [vmem:[#allocation70_spill] sm:$0xff] %v10626_v45  ;;  %8582 = vmatprep.subr.msk.bf16.mxu0 %vm598_vm1, %v938_v37  ;;  %v982_v47 = vsel %vm598_vm1, %v938_v37, 0 }
 0x2e8   :  { %8086 = vmatpush3.bf16.xpose.msra.mxu0 %v982_v47 }
 0x2ea   :  { %v10630_v27 = vpop.permute.xlu1 %1509  ;;  %v591_v53 = vpop.permute.xlu0 %590 }
 0x2eb   :  { %8574 = vmatprep.subr.msk.bf16.mxu1 %vm598_vm1, %v591_v53  ;;  %v636_v61 = vsel %vm598_vm1, %v591_v53, 0 }
 0x2ec   :  { %8054 = vmatpush3.bf16.xpose.msra.mxu1 %v636_v61 }
 0x2ee   :  { %v10634_v51 = vpop.permute.xlu1 %1260  ;;  %v922_v33 = vpop.permute.xlu0 %921 }
 0x2f2   :  { %v940_v22 = vpop.permute.xlu1 %939  ;;  %v10636_v42 = vpop.permute.xlu0 %1992 }
 0x2f3   :  { %8583 = vmatprep.subr.msk.bf16.mxu0 %vm598_vm1, %v940_v22  ;;  %v985_v31 = vsel %vm598_vm1, %v940_v22, 0 }
 0x2f4   :  { %8088 = vmatpush3.bf16.xpose.msra.mxu0 %v985_v31 }
 0x2f6   :  { %v593_v37 = vpop.permute.xlu1 %592  ;;  %v10640_v47 = vpop.permute.xlu0 %1493 }
 0x2f7   :  { %8575 = vmatprep.subr.msk.bf16.mxu1 %vm598_vm1, %v593_v37  ;;  %v639_v63 = vsel %vm598_vm1, %v593_v37, 0 }
 0x2f8   :  { %8056 = vmatpush3.bf16.xpose.msra.mxu1 %v639_v63 }
 0x2fa   :  { %v10644_v53 = vpop.permute.xlu1 %1511  ;;  %v10646_v61 = vpop.permute.xlu0 %1976 }
 0x2fe   :  { %v10648_v7 = vpop.permute.xlu1 %1994  ;;  %v10650_v24 = vpop.permute.xlu0 %1824 }
 0x2ff   :  { %15753 = vst [vmem:[#allocation71_spill] sm:$0xff] %v10650_v24 }
 0x302   :  { %v10652_v62 = vpop.permute.xlu1 %1495  ;;  %v10654_v22 = vpop.permute.xlu0 %2307 }
 0x303   :  { %15754 = vst [vmem:[#allocation72_spill] sm:$0xff] %v10654_v22 }
 0x306   :  { %v10656_v31 = vpop.permute.xlu1 %1978  ;;  %v924_v38 = vpop.permute.xlu0 %923 }
 0x30a   :  { %v595_v45 = vpop.permute.xlu1 %594  ;;  %v10658_v4 = vpop.permute.xlu0 %1262 }
 0x30b   :  { %8576 = vmatprep.subr.msk.bf16.mxu1 %vm598_vm1, %v595_v45  ;;  %v642_v63 = vsel %vm598_vm1, %v595_v45, 0 }
 0x30c   :  { %8058 = vmatpush3.bf16.xpose.msra.mxu1 %v642_v63 }
 0x30e   :  { %v10662_v37 = vpop.permute.xlu1 %1513  ;;  %v10664_v1 = vpop.permute.xlu0 %1826 }
 0x30f   :  { %15755 = vst [vmem:[#allocation73_spill] sm:$0xff] %v10664_v1 }
 0x312   :  { %v10666_v25 = vpop.permute.xlu1 %1497  ;;  %v942_v48 = vpop.permute.xlu0 %941 }
 0x313   :  { %8584 = vmatprep.subr.msk.bf16.mxu0 %vm598_vm1, %v942_v48  ;;  %v988_v22 = vsel %vm598_vm1, %v942_v48, 0 }
 0x314   :  { %8090 = vmatpush3.bf16.xpose.msra.mxu0 %v988_v22  ;;  %v559_v22 = vld [vmem:[%s15758_s2 + $0x8] sm:$0xff] }
 0x316   :  { %v1265_v24 = vpop.permute.xlu1 %1264  ;;  %v926_v63 = vpop.permute.xlu0 %925 }
 0x31a   :  { %v944_v34 = vpop.permute.xlu1 %943 }
 0x31b   :  { %8585 = vmatprep.subr.msk.bf16.mxu0 %vm598_vm1, %v944_v34  ;;  %v991_v26 = vsel %vm598_vm1, %v944_v34, 0  ;;  %v10687_v34 = vpop.permute.xlu0 %1996 }
 0x31c   :  { %8092 = vmatpush3.bf16.xpose.msra.mxu0 %v991_v26  ;;  %v1542_v26 = vsel %vm598_vm1, %v10526_v30, 0 }
 0x31d   :  { %8586 = vmatprep.subr.msk.bf16.mxu0 %vm598_vm1, %v10526_v30  ;;  %v1545_v30 = vsel %vm598_vm1, %v10556_v28, 0 }
 0x31e   :  { %v10674_v45 = vpop.permute.xlu1 %2309 }
 0x31f   :  { %15756 = vst [vmem:[#allocation74_spill] sm:$0xff] %v10674_v45 }
 0x322   :  { %v597_v1 = vpop.permute.xlu1 %596 }
 0x323   :  { %8577 = vmatprep.subr.msk.bf16.mxu1 %vm598_vm1, %v597_v1  ;;  %8094 = vmatmul.mubr.msk.bf16.vlgmr.msra.gmra.mrb[32].mxu0 %vm598_vm1, %v10548_v49  ;;  %v645_v48 = vsel %vm598_vm1, %v597_v1, 0  ;;  %v10699_v1 = vpop.permute.xlu0 %1980 }
 0x324   :  { %8060 = vmatpush3.bf16.xpose.msra.mxu1 %v645_v48  ;;  %8097 = vmatprep.mubr.msk.bf16.mxu0 %vm598_vm1, %v10590_v10 }
 0x325   :  { %8174 = vmatpush3.bf16.xpose.msra.mxu0 %v1542_v26  ;;  %8109 = vmatprep.subr.bf16.mxu1 %v10503_v17 }
 0x326   :  { %8587 = vmatprep.subr.msk.bf16.mxu0 %vm598_vm1, %v10556_v28 }
 0x32b   :  { %8062 = vmatmul.mubr.msk.bf16.vlgmr.msra.gmra.mrb[0].mxu1 %vm598_vm1, %v10299_v23  ;;  %8098 = vmatmul.mubr.msk.bf16.gmra.mrb[36].mxu0 %vm598_vm1, %v10616_v55  ;;  %v10709_v55 = vpop.permute.xlu0 %1828  ;;  %v1554_v23 = vsel %vm598_vm1, %v10630_v27, 0 }
 0x32c   :  { %8065 = vmatprep.mubr.msk.bf16.mxu1 %vm598_vm1, %v10312_v20  ;;  %8101 = vmatprep.mubr.msk.bf16.mxu0 %vm598_vm1, %v922_v33  ;;  %15757 = vst [vmem:[#allocation75_spill] sm:$0xff] %v10709_v55  ;;  %v1557_v33 = vsel %vm598_vm1, %v10644_v53, 0  ;;  %v1560_v20 = vsel %vm598_vm1, %v10662_v37, 0 }
 0x32d   :  { %8110 = vmatpush3.bf16.msra.mxu1 %v10503_v17  ;;  %8176 = vmatpush3.bf16.xpose.msra.mxu0 %v1545_v30  ;;  %v1548_v17 = vsel %vm598_vm1, %v10594_v8, 0 }
 0x32e   :  { %8111 = vmatprep.subr.bf16.mxu1 %v10550_v50  ;;  %8588 = vmatprep.subr.msk.bf16.mxu0 %vm598_vm1, %v10594_v8 }
 0x331   :  { %8112 = vmatpush3.bf16.msra.mxu1 %v10550_v50  ;;  %v561_v50 = vld [vmem:[%s15758_s2 + $0x18] sm:$0xff] }
 0x332   :  { %8113 = vmatprep.subr.bf16.mxu1 %v10580_v40 }
 0x333   :  { %8066 = vmatmul.mubr.msk.bf16.gmra.mrb[4].mxu1 %vm598_vm1, %v10329_v52  ;;  %8102 = vmatmul.mubr.msk.bf16.gmra.mrb[40].mxu0 %vm598_vm1, %v924_v38  ;;  %v928_v38 = vpop.permute.xlu0 %927 }
 0x334   :  { %8069 = vmatprep.mubr.msk.bf16.mxu1 %vm598_vm1, %v10349_v0  ;;  %8105 = vmatprep.mubr.msk.bf16.mxu0 %vm598_vm1, %v926_v63  ;;  %v2031_v0 = vsel %vm598_vm1, %v10596_v14, 0 }
 0x335   :  { %8114 = vmatpush3.bf16.msra.mxu1 %v10580_v40  ;;  %8178 = vmatpush3.bf16.xpose.msra.mxu0 %v1548_v17  ;;  %v1551_v40 = vsel %vm598_vm1, %v10610_v16, 0 }
 0x336   :  { %8115 = vmatprep.subr.bf16.mxu1 %v10604_v54  ;;  %8589 = vmatprep.subr.msk.bf16.mxu0 %vm598_vm1, %v10610_v16 }
 0x339   :  { %8116 = vmatpush3.bf16.msra.mxu1 %v10604_v54 }
 0x33a   :  { %8117 = vmatprep.subr.bf16.mxu1 %v10622_v59 }
 0x33b   :  { %8070 = vmatmul.mubr.msk.bf16.gmra.mrb[8].mxu1 %vm598_vm1, %v10367_v15  ;;  %8106 = vmatmul.mubr.msk.bf16.gmra.mrb[44].mxu0 %vm598_vm1, %v928_v38  ;;  %v2034_v15 = vsel %vm598_vm1, %v10614_v18, 0 }
 0x33c   :  { %8073 = vmatprep.mubr.msk.bf16.mxu1 %vm598_vm1, %v10385_v44  ;;  %8189 = vmatprep.mubr.msk.bf16.mxu0 %vm598_vm1, %v10534_v60  ;;  %v2040_v44 = vsel %vm598_vm1, %v10648_v7, 0  ;;  %v7476_v60 = vld [vmem:[%s15758_s2 + $0x80] sm:$0xff] }
 0x33d   :  { %8118 = vmatpush3.bf16.msra.mxu1 %v10622_v59  ;;  %8180 = vmatpush3.bf16.xpose.msra.mxu0 %v1551_v40  ;;  %v2028_v59 = vsel %vm598_vm1, %v10564_v29, 0 }
 0x33e   :  { %8119 = vmatprep.subr.bf16.mxu1 %v10634_v51  ;;  %8590 = vmatprep.subr.msk.bf16.mxu0 %vm598_vm1, %v10630_v27  ;;  %v7477_v27 = vld [vmem:[%s15758_s2 + $0x88] sm:$0xff] }
 0x341   :  { %8120 = vmatpush3.bf16.msra.mxu1 %v10634_v51  ;;  %v1516_v51 = vpop.permute.xlu1 %1515 }
 0x342   :  { %8121 = vmatprep.subr.bf16.mxu1 %v10658_v4  ;;  %v1563_v52 = vsel %vm598_vm1, %v1516_v51, 0 }
 0x343   :  { %8074 = vmatmul.mubr.msk.bf16.gmra.mrb[12].mxu1 %vm598_vm1, %v10407_v5 }
 0x345   :  { %8122 = vmatpush3.bf16.msra.mxu1 %v10658_v4  ;;  %8182 = vmatpush3.bf16.xpose.msra.mxu0 %v1554_v23  ;;  %v7478_v4 = vld [vmem:[%s15758_s2 + $0x90] sm:$0xff]  ;;  %v7483_v23 = vld [vmem:[%s15758_s2 + $0xb8] sm:$0xff] }
 0x346   :  { %8123 = vmatprep.subr.bf16.mxu1 %v1265_v24  ;;  %8591 = vmatprep.subr.msk.bf16.mxu0 %vm598_vm1, %v10644_v53  ;;  %v558_v53 = vld [vmem:[%s15758_s2] sm:$0xff] }
 0x349   :  { %8124 = vmatpush3.bf16.msra.mxu1 %v1265_v24  ;;  %v2025_v24 = vsel %vm598_vm1, %v10524_v11, 0 }
 0x34a   :  { %8141 = vmatprep.subr.bf16.mxu1 %v10277_v3 }
 0x34d   :  { %8184 = vmatpush3.bf16.xpose.msra.mxu0 %v1557_v33 }
 0x34e   :  { %8592 = vmatprep.subr.msk.bf16.mxu0 %vm598_vm1, %v10662_v37 }
 0x355   :  { %8186 = vmatpush3.bf16.xpose.msra.mxu0 %v1560_v20  ;;  %v7482_v20 = vld [vmem:[%s15758_s2 + $0xb0] sm:$0xff] }
 0x356   :  { %8593 = vmatprep.subr.msk.bf16.mxu0 %vm598_vm1, %v1516_v51 }
 0x35d   :  { %8188 = vmatpush3.bf16.xpose.msra.mxu0 %v1563_v52  ;;  %v565_v52 = vld [vmem:[%s15758_s2 + $0x38] sm:$0xff] }
 0x35e   :  { %8594 = vmatprep.subr.msk.bf16.mxu0 %vm598_vm1, %v10524_v11 }
 0x364   :  { %8190 = vmatmul.mubr.msk.bf16.vlgmr.msra.gmra.mrb[48].mxu0 %vm598_vm1, %v10574_v35 }
 0x365   :  { %8193 = vmatprep.mubr.msk.bf16.mxu0 %vm598_vm1, %v10598_v32  ;;  %8238 = vmatpush3.bf16.xpose.msra.mxu0 %v2025_v24  ;;  %v1999_v32 = vpop.permute.xlu1 %1998 }
 0x366   :  { %8595 = vmatprep.subr.msk.bf16.mxu0 %vm598_vm1, %v10564_v29 }
 0x36c   :  { %8194 = vmatmul.mubr.msk.bf16.gmra.mrb[52].mxu0 %vm598_vm1, %v10620_v2  ;;  %v1500_v2 = vpop.permute.xlu0 %1499 }
 0x36d   :  { %8197 = vmatprep.mubr.msk.bf16.mxu0 %vm598_vm1, %v10640_v47  ;;  %8240 = vmatpush3.bf16.xpose.msra.mxu0 %v2028_v59 }
 0x36e   :  { %8596 = vmatprep.subr.msk.bf16.mxu0 %vm598_vm1, %v10596_v14  ;;  %v560_v14 = vld [vmem:[%s15758_s2 + $0x10] sm:$0xff] }
 0x374   :  { %8198 = vmatmul.mubr.msk.bf16.gmra.mrb[56].mxu0 %vm598_vm1, %v10652_v62  ;;  %v2037_v62 = vsel %vm598_vm1, %v10636_v42, 0 }
 0x375   :  { %8201 = vmatprep.mubr.msk.bf16.mxu0 %vm598_vm1, %v10666_v25  ;;  %8242 = vmatpush3.bf16.xpose.msra.mxu0 %v2031_v0 }
 0x376   :  { %8597 = vmatprep.subr.msk.bf16.mxu0 %vm598_vm1, %v10614_v18  ;;  %v2043_v18 = vsel %vm598_vm1, %v10687_v34, 0 }
 0x37c   :  { %8202 = vmatmul.mubr.msk.bf16.gmra.mrb[60].mxu0 %vm598_vm1, %v1500_v2 }
 0x37d   :  { %8244 = vmatpush3.bf16.xpose.msra.mxu0 %v2034_v15  ;;  %8253 = vmatprep.mubr.msk.bf16.mxu0 %vm598_vm1, %v10540_v58 }
 0x37e   :  { %8598 = vmatprep.subr.msk.bf16.mxu0 %vm598_vm1, %v10636_v42  ;;  %v2046_v42 = vsel %vm598_vm1, %v1999_v32, 0 }
 0x385   :  { %8246 = vmatpush3.bf16.xpose.msra.mxu0 %v2037_v62  ;;  %v564_v62 = vld [vmem:[%s15758_s2 + $0x30] sm:$0xff] }
 0x386   :  { %8599 = vmatprep.subr.msk.bf16.mxu0 %vm598_vm1, %v10648_v7  ;;  %v1983_v7 = vpop.permute.xlu1 %1982 }
 0x38d   :  { %8248 = vmatpush3.bf16.xpose.msra.mxu0 %v2040_v44 }
 0x38e   :  { %8600 = vmatprep.subr.msk.bf16.mxu0 %vm598_vm1, %v10687_v34  ;;  %v7479_v34 = vld [vmem:[%s15758_s2 + $0x98] sm:$0xff] }
 0x395   :  { %8250 = vmatpush3.bf16.xpose.msra.mxu0 %v2043_v18 }
 0x396   :  { %8601 = vmatprep.subr.msk.bf16.mxu0 %vm598_vm1, %v1999_v32 }
 0x39d   :  { %8252 = vmatpush3.bf16.xpose.msra.mxu0 %v2046_v42 }
 0x3a4   :  { %8254 = vmatmul.mubr.msk.bf16.vlgmr.msra.gmra.mrb[64].mxu0 %vm598_vm1, %v10572_v41 }
 0x3a5   :  { %8257 = vmatprep.mubr.msk.bf16.mxu0 %vm598_vm1, %v10600_v6 }
 0x3ac   :  { %8258 = vmatmul.mubr.msk.bf16.gmra.mrb[68].mxu0 %vm598_vm1, %v10618_v19 }
 0x3ad   :  { %8261 = vmatprep.mubr.msk.bf16.mxu0 %vm598_vm1, %v10646_v61 }
 0x3b4   :  { %8262 = vmatmul.mubr.msk.bf16.gmra.mrb[72].mxu0 %vm598_vm1, %v10656_v31 }
 0x3b5   :  { %8265 = vmatprep.mubr.msk.bf16.mxu0 %vm598_vm1, %v10699_v1 }
 0x3bc   :  { %8266 = vmatmul.mubr.msk.bf16.gmra.mrb[76].mxu0 %vm598_vm1, %v1983_v7 }
 0x3f6   :  { %v8095_v5 = vpop.f32.mrb[32].mxu0 }
 0x3f7   :  { %v10814_v6 = vadd.f32 %v8095_v5, %v7478_v4  ;;  %v1027_v19 = vpop.f32.mrb[33].mxu0  ;;  %v7481_v4 = vld [vmem:[%s15758_s2 + $0xa8] sm:$0xff] }
 0x3f8   :  { %v8096_v8 = vpop.f32.mrb[34].mxu0  ;;  %v10834_v47 = vadd.f32 %v7476_v60, %v1027_v19  ;;  %v7480_v19 = vld [vmem:[%s15758_s2 + $0xa0] sm:$0xff] }
 0x3f9   :  { %1094 = vmax.xlane.f32.xlu0 %v10814_v6  ;;  %v1030_v10 = vpop.f32.mrb[35].mxu0  ;;  %v10860_v33 = vadd.f32 %v8096_v8, %v7479_v34 }
 0x3fa   :  { %v10840_v61 = vadd.f32 %v7477_v27, %v1030_v10  ;;  %v563_v10 = vld [vmem:[%s15758_s2 + $0x28] sm:$0xff]  ;;  %v569_v27 = vld [vmem:[%s15758_s2 + $0x58] sm:$0xff] }
 0x3fe   :  { %v8063_v35 = vpop.f32.mrb[0].mxu1  ;;  %v8099_v41 = vpop.f32.mrb[36].mxu0 }
 0x3ff   :  { %v10823_v28 = vadd.f32 %v8063_v35, %v560_v14  ;;  %v681_v49 = vpop.f32.mrb[1].mxu1  ;;  %v1043_v11 = vpop.f32.mrb[37].mxu0  ;;  %v10872_v0 = vadd.f32 %v8099_v41, %v7482_v20 }
 0x400   :  { %v8064_v58 = vpop.f32.mrb[2].mxu1  ;;  %v8100_v25 = vpop.f32.mrb[38].mxu0  ;;  %v10846_v63 = vadd.f32 %v681_v49, %v558_v53  ;;  %v10898_v35 = vadd.f32 %v7480_v19, %v1043_v11  ;;  %v7486_v11 = vld [vmem:[%s15758_s2 + $0xd0] sm:$0xff] }
 0x401   :  { %v10828_v29 = vadd.f32 %v8064_v58, %v561_v50  ;;  %v684_v54 = vpop.f32.mrb[3].mxu1  ;;  %748 = vmax.xlane.f32.xlu0 %v10823_v28  ;;  %v1046_v16 = vpop.f32.mrb[39].mxu0  ;;  %v10866_v51 = vadd.f32 %v8100_v25, %v7483_v23  ;;  %v562_v50 = vld [vmem:[%s15758_s2 + $0x20] sm:$0xff]  ;;  %v7487_v25 = vld [vmem:[%s15758_s2 + $0xd8] sm:$0xff] }
 0x402   :  { %v10854_v17 = vadd.f32 %v684_v54, %v559_v22  ;;  %v10892_v8 = vadd.f32 %v7481_v4, %v1046_v16  ;;  %v568_v22 = vld [vmem:[%s15758_s2 + $0x50] sm:$0xff]  ;;  %v566_v23 = vld [vmem:[%s15758_s2 + $0x40] sm:$0xff] }
 0x403   :  { %750 = vmax.xlane.f32.xlu1 %v10828_v29 }
 0x405   :  { %1090 = vmax.xlane.f32.xlu0 %v10834_v47 }
 0x406   :  { %v8067_v31 = vpop.f32.mrb[4].mxu1  ;;  %v8103_v37 = vpop.f32.mrb[40].mxu0 }
 0x407   :  { %v697_v48 = vpop.f32.mrb[5].mxu1  ;;  %v10848_v26 = vpop.f32.mrb[41].mxu0  ;;  %1092 = vmax.xlane.f32.xlu1 %v10840_v61  ;;  %v10886_v5 = vadd.f32 %v8067_v31, %v564_v62  ;;  %v10922_v53 = vadd.f32 %v8103_v37, %v7486_v11  ;;  %v7484_v37 = vld [vmem:[%s15758_s2 + $0xc0] sm:$0xff]  ;;  %v573_v62 = vld [vmem:[%s15758_s2 + $0x78] sm:$0xff] }
 0x408   :  { %v8068_v30 = vpop.f32.mrb[6].mxu1  ;;  %v8104_v1 = vpop.f32.mrb[42].mxu0  ;;  %v10910_v54 = vadd.f32 %v697_v48, %v562_v50  ;;  %v7485_v48 = vld [vmem:[%s15758_s2 + $0xc8] sm:$0xff] }
 0x409   :  { %v700_v38 = vpop.f32.mrb[7].mxu1  ;;  %v1062_v40 = vpop.f32.mrb[43].mxu0  ;;  %744 = vmax.xlane.f32.xlu0 %v10846_v63  ;;  %v10880_v32 = vadd.f32 %v8068_v30, %v565_v52  ;;  %v10916_v16 = vadd.f32 %v8104_v1, %v7487_v25  ;;  %v567_v1 = vld [vmem:[%s15758_s2 + $0x48] sm:$0xff] }
 0x40a   :  { %v10904_v60 = vadd.f32 %v700_v38, %v563_v10  ;;  %v10940_v30 = vadd.f32 %v7485_v48, %v1062_v40  ;;  %v10947_v38 = vadd.f32 %v7484_v37, %v10848_v26  ;;  %v7491_v40 = vld [vmem:[%s15758_s2 + $0xf8] sm:$0xff]  ;;  %v7490_v26 = vld [vmem:[%s15758_s2 + $0xf0] sm:$0xff]  ;;  %v571_v10 = vld [vmem:[%s15758_s2 + $0x68] sm:$0xff] }
 0x40b   :  { %746 = vmax.xlane.f32.xlu1 %v10854_v17  ;;  %v7502_v48 = vld [vmem:[%s15758_s2 + $0x110] sm:$0xff] }
 0x40d   :  { %1096 = vmax.xlane.f32.xlu0 %v10860_v33 }
 0x40e   :  { %v8071_v24 = vpop.f32.mrb[8].mxu1  ;;  %v8107_v59 = vpop.f32.mrb[44].mxu0 }
 0x40f   :  { %v713_v2 = vpop.f32.mrb[9].mxu1  ;;  %1104 = vmax.xlane.f32.xlu1 %v10866_v51  ;;  %v10875_v15 = vpop.f32.mrb[45].mxu0  ;;  %v10934_v34 = vadd.f32 %v8071_v24, %v568_v22 }
 0x410   :  { %v8072_v44 = vpop.f32.mrb[10].mxu1  ;;  %v8108_v18 = vpop.f32.mrb[46].mxu0  ;;  %v10959_v52 = vadd.f32 %v713_v2, %v566_v23  ;;  %v572_v2 = vld [vmem:[%s15758_s2 + $0x70] sm:$0xff] }
 0x411   :  { %v716_v42 = vpop.f32.mrb[11].mxu1  ;;  %1102 = vmax.xlane.f32.xlu0 %v10872_v0  ;;  %v1078_v7 = vpop.f32.mrb[47].mxu0  ;;  %v10928_v31 = vadd.f32 %v8072_v44, %v569_v27  ;;  %v10965_v24 = vadd.f32 %v8108_v18, %v7491_v40  ;;  %v10971_v44 = vadd.f32 %v8107_v59, %v7490_v26  ;;  %v7489_v18 = vld [vmem:[%s15758_s2 + $0xe8] sm:$0xff]  ;;  %v7488_v59 = vld [vmem:[%s15758_s2 + $0xe0] sm:$0xff]  ;;  %v7503_v27 = vld [vmem:[%s15758_s2 + $0x118] sm:$0xff] }
 0x412   :  { %v10953_v20 = vadd.f32 %v716_v42, %v567_v1  ;;  %v10989_v19 = vadd.f32 %v7489_v18, %v1078_v7  ;;  %v10996_v50 = vadd.f32 %v7488_v59, %v10875_v15 }
 0x413   :  { %758 = vmax.xlane.f32.xlu1 %v10880_v32 }
 0x415   :  { %756 = vmax.xlane.f32.xlu0 %v10886_v5 }
 0x416   :  { %v8075_v14 = vpop.f32.mrb[12].mxu1 }
 0x417   :  { %v729_v41 = vpop.f32.mrb[13].mxu1  ;;  %1100 = vmax.xlane.f32.xlu1 %v10892_v8  ;;  %v10983_v4 = vadd.f32 %v8075_v14, %v572_v2  ;;  %v570_v14 = vld [vmem:[%s15758_s2 + $0x60] sm:$0xff]  ;;  %v7507_v2 = vld [vmem:[%s15758_s2 + $0x138] sm:$0xff] }
 0x418   :  { %v8076_v49 = vpop.f32.mrb[14].mxu1  ;;  %v11008_v15 = vadd.f32 %v729_v41, %v570_v14  ;;  %v7500_v41 = vld [vmem:[%s15758_s2 + $0x100] sm:$0xff]  ;;  %v7505_v14 = vld [vmem:[%s15758_s2 + $0x128] sm:$0xff] }
 0x419   :  { %v732_v58 = vpop.f32.mrb[15].mxu1  ;;  %1098 = vmax.xlane.f32.xlu0 %v10898_v35  ;;  %v10977_v42 = vadd.f32 %v8076_v49, %v573_v62 }
 0x41a   :  { %v11002_v11 = vadd.f32 %v732_v58, %v571_v10  ;;  %v7501_v58 = vld [vmem:[%s15758_s2 + $0x108] sm:$0xff]  ;;  %v7506_v10 = vld [vmem:[%s15758_s2 + $0x130] sm:$0xff] }
 0x41b   :  { %754 = vmax.xlane.f32.xlu1 %v10904_v60 }
 0x41d   :  { %752 = vmax.xlane.f32.xlu0 %v10910_v54 }
 0x41f   :  { %1112 = vmax.xlane.f32.xlu1 %v10916_v16 }
 0x421   :  { %1110 = vmax.xlane.f32.xlu0 %v10922_v53 }
 0x423   :  { %766 = vmax.xlane.f32.xlu1 %v10928_v31 }
 0x425   :  { %764 = vmax.xlane.f32.xlu0 %v10934_v34 }
 0x427   :  { %1108 = vmax.xlane.f32.xlu1 %v10940_v30 }
 0x429   :  { %1106 = vmax.xlane.f32.xlu0 %v10947_v38 }
 0x42b   :  { %762 = vmax.xlane.f32.xlu1 %v10953_v20 }
 0x42d   :  { %760 = vmax.xlane.f32.xlu0 %v10959_v52 }
 0x42f   :  { %1120 = vmax.xlane.f32.xlu1 %v10965_v24 }
 0x431   :  { %1118 = vmax.xlane.f32.xlu0 %v10971_v44 }
 0x433   :  { %774 = vmax.xlane.f32.xlu1 %v10977_v42 }
 0x435   :  { %772 = vmax.xlane.f32.xlu0 %v10983_v4 }
 0x437   :  { %v8191_v49 = vpop.f32.mrb[48].mxu0  ;;  %1116 = vmax.xlane.f32.xlu1 %v10989_v19 }
 0x438   :  { %v1599_v25 = vpop.f32.mrb[49].mxu0  ;;  %v11020_v1 = vadd.f32 %v8191_v49, %v7502_v48 }
 0x439   :  { %v8192_v7 = vpop.f32.mrb[50].mxu0  ;;  %1114 = vmax.xlane.f32.xlu0 %v10996_v50  ;;  %v11032_v59 = vadd.f32 %v7500_v41, %v1599_v25  ;;  %v7504_v25 = vld [vmem:[%s15758_s2 + $0x120] sm:$0xff]  ;;  %v7511_v41 = vld [vmem:[%s15758_s2 + $0x158] sm:$0xff] }
 0x43a   :  { %v1602_v22 = vpop.f32.mrb[51].mxu0  ;;  %v11014_v37 = vadd.f32 %v8192_v7, %v7503_v27 }
 0x43b   :  { %770 = vmax.xlane.f32.xlu1 %v11002_v11  ;;  %v11026_v26 = vadd.f32 %v7501_v58, %v1602_v22 }
 0x43d   :  { %768 = vmax.xlane.f32.xlu0 %v11008_v15 }
 0x43f   :  { %v8195_v23 = vpop.f32.mrb[52].mxu0  ;;  %1668 = vmax.xlane.f32.xlu1 %v11014_v37 }
 0x440   :  { %v1615_v40 = vpop.f32.mrb[53].mxu0  ;;  %v11044_v7 = vadd.f32 %v8195_v23, %v7506_v10 }
 0x441   :  { %v8196_v62 = vpop.f32.mrb[54].mxu0  ;;  %1666 = vmax.xlane.f32.xlu0 %v11020_v1  ;;  %v11056_v23 = vadd.f32 %v7504_v25, %v1615_v40  ;;  %v7508_v40 = vld [vmem:[%s15758_s2 + $0x140] sm:$0xff] }
 0x442   :  { %v1618_v18 = vpop.f32.mrb[55].mxu0  ;;  %v11038_v49 = vadd.f32 %v8196_v62, %v7507_v2  ;;  %v7510_v2 = vld [vmem:[%s15758_s2 + $0x150] sm:$0xff] }
 0x443   :  { %1664 = vmax.xlane.f32.xlu1 %v11026_v26  ;;  %v11050_v48 = vadd.f32 %v7505_v14, %v1618_v18  ;;  %v7509_v18 = vld [vmem:[%s15758_s2 + $0x148] sm:$0xff] }
 0x445   :  { %1662 = vmax.xlane.f32.xlu0 %v11032_v59 }
 0x447   :  { %v8199_v27 = vpop.f32.mrb[56].mxu0  ;;  %1676 = vmax.xlane.f32.xlu1 %v11038_v49 }
 0x448   :  { %v1631_v22 = vpop.f32.mrb[57].mxu0  ;;  %v11068_v14 = vadd.f32 %v8199_v27, %v7510_v2  ;;  %v7515_v2 = vld [vmem:[%s15758_s2 + $0x178] sm:$0xff] }
 0x449   :  { %v8200_v58 = vpop.f32.mrb[58].mxu0  ;;  %1674 = vmax.xlane.f32.xlu0 %v11044_v7  ;;  %v11080_v27 = vadd.f32 %v7508_v40, %v1631_v22  ;;  %v7513_v40 = vld [vmem:[%s15758_s2 + $0x168] sm:$0xff] }
 0x44a   :  { %v1634_v62 = vpop.f32.mrb[59].mxu0  ;;  %v11062_v10 = vadd.f32 %v8200_v58, %v7511_v41  ;;  %v7514_v41 = vld [vmem:[%s15758_s2 + $0x170] sm:$0xff] }
 0x44b   :  { %1672 = vmax.xlane.f32.xlu1 %v11050_v48  ;;  %v11074_v55 = vadd.f32 %v7509_v18, %v1634_v62  ;;  %v7512_v62 = vld [vmem:[%s15758_s2 + $0x160] sm:$0xff] }
 0x44d   :  { %1670 = vmax.xlane.f32.xlu0 %v11056_v23 }
 0x44f   :  { %v8203_v45 = vpop.f32.mrb[60].mxu0  ;;  %1684 = vmax.xlane.f32.xlu1 %v11062_v10 }
 0x450   :  { %v1647_v25 = vpop.f32.mrb[61].mxu0  ;;  %v11086_v21 = vadd.f32 %v8203_v45, %v7514_v41 }
 0x451   :  { %v8204_v58 = vpop.f32.mrb[62].mxu0  ;;  %1682 = vmax.xlane.f32.xlu0 %v11068_v14  ;;  %v11095_v22 = vadd.f32 %v7512_v62, %v1647_v25  ;;  %v7524_v25 = vld [vmem:[%s15758_s2 + $0x180] sm:$0xff] }
 0x452   :  { %v1650_v43 = vpop.f32.mrb[63].mxu0  ;;  %v11092_v18 = vadd.f32 %v8204_v58, %v7515_v2  ;;  %v7526_v58 = vld [vmem:[%s15758_s2 + $0x190] sm:$0xff] }
 0x453   :  { %1680 = vmax.xlane.f32.xlu1 %v11074_v55  ;;  %15759 = vst [vmem:[#allocation76_spill] sm:$0xff] %v11095_v22  ;;  %v11102_v45 = vadd.f32 %v7513_v40, %v1650_v43  ;;  %v7527_v43 = vld [vmem:[%s15758_s2 + $0x198] sm:$0xff] }
 0x455   :  { %1678 = vmax.xlane.f32.xlu0 %v11080_v27 }
 0x457   :  { %1690 = vmax.xlane.f32.xlu1 %v11086_v21 }
 0x459   :  { %1692 = vmax.xlane.f32.xlu0 %v11092_v18 }
 0x45b   :  { %1686 = vmax.xlane.f32.xlu1 %v11095_v22 }
 0x45f   :  { %1688 = vmax.xlane.f32.xlu1 %v11102_v45 }
 0x477   :  { %v8255_v41 = vpop.f32.mrb[64].mxu0 }
 0x478   :  { %v11111_v2 = vadd.f32 %v8255_v41, %v7526_v58  ;;  %v2082_v62 = vpop.f32.mrb[65].mxu0 }
 0x479   :  { %v11113_v39 = vadd.f32 %v7524_v25, %v2082_v62  ;;  %v8256_v40 = vpop.f32.mrb[66].mxu0  ;;  %v7530_v25 = vld [vmem:[%s15758_s2 + $0x1b0] sm:$0xff] }
 0x47a   :  { %15760 = vst [vmem:[#allocation77_spill] sm:$0xff] %v11111_v2  ;;  %v2085_v56 = vpop.f32.mrb[67].mxu0  ;;  %2149 = vmax.xlane.f32.xlu1 %v11111_v2  ;;  %v11123_v9 = vadd.f32 %v8256_v40, %v7527_v43  ;;  %v7528_v43 = vld [vmem:[%s15758_s2 + $0x1a0] sm:$0xff] }
 0x47b   :  { %15761 = vst [vmem:[#allocation78_spill] sm:$0xff] %v11113_v39  ;;  %2145 = vmax.xlane.f32.xlu0 %v11113_v39  ;;  %v11125_v58 = vadd.f32 %v7525_v36, %v2085_v56  ;;  %v7531_v56 = vld [vmem:[%s15758_s2 + $0x1b8] sm:$0xff] }
 0x47c   :  { %15762 = vst [vmem:[#allocation79_spill] sm:$0xff] %v11123_v9 }
 0x47d   :  { %15763 = vst [vmem:[#allocation80_spill] sm:$0xff] %v11125_v58 }
 0x47e   :  { %2151 = vmax.xlane.f32.xlu1 %v11123_v9  ;;  %v7529_v9 = vld [vmem:[%s15758_s2 + $0x1a8] sm:$0xff] }
 0x47f   :  { %v8259_v41 = vpop.f32.mrb[68].mxu0  ;;  %2147 = vmax.xlane.f32.xlu0 %v11125_v58 }
 0x480   :  { %v11132_v62 = vadd.f32 %v8259_v41, %v7530_v25  ;;  %v2098_v57 = vpop.f32.mrb[69].mxu0  ;;  %v7532_v25 = vld [vmem:[%s15758_s2 + $0x1c0] sm:$0xff] }
 0x481   :  { %v8260_v46 = vpop.f32.mrb[70].mxu0  ;;  %v11138_v36 = vadd.f32 %v7528_v43, %v2098_v57 }
 0x482   :  { %15764 = vst [vmem:[#allocation81_spill] sm:$0xff] %v11132_v62  ;;  %v2101_v40 = vpop.f32.mrb[71].mxu0  ;;  %v11148_v58 = vadd.f32 %v8260_v46, %v7531_v56 }
 0x483   :  { %2157 = vmax.xlane.f32.xlu0 %v11132_v62  ;;  %15765 = vst [vmem:[#allocation82_spill] sm:$0xff] %v11138_v36 }
 0x484   :  { %15766 = vst [vmem:[#allocation83_spill] sm:$0xff] %v11148_v58 }
 0x486   :  { %v1095_v12 = vpop.xlane.xlu0 %1094 }
 0x487   :  { %v8263_v41 = vpop.f32.mrb[72].mxu0  ;;  %2153 = vmax.xlane.f32.xlu0 %v11138_v36  ;;  %v1124_v13 = vsub.f32 %v10814_v6, %v1095_v12  ;;  %v11157_v36 = vadd.f32 %v7529_v9, %v2101_v40  ;;  %v7534_v12 = vld [vmem:[%s15758_s2 + $0x1d0] sm:$0xff]  ;;  %v7535_v9 = vld [vmem:[%s15758_s2 + $0x1d8] sm:$0xff] }
 0x488   :  { %v2114_v3 = vpop.f32.mrb[73].mxu0 }
 0x489   :  { %v1142_v62 = vmul.f32 1.442695, %v1124_v13  ;;  %v11150_v57 = vadd.f32 %v7532_v25, %v2114_v3  ;;  %v8264_v43 = vpop.f32.mrb[74].mxu0  ;;  %15768 = vst [vmem:[#allocation85_spill] sm:$0xff] %v11157_v36  ;;  %v11164_v25 = vadd.f32 %v8263_v41, %v7534_v12  ;;  %v7533_v12 = vld [vmem:[%s15758_s2 + $0x1c8] sm:$0xff] }
 0x48a   :  { %v2117_v39 = vpop.f32.mrb[75].mxu0 }
 0x48b   :  { %15767 = vst [vmem:[#allocation84_spill] sm:$0xff] %v11150_v57  ;;  %9256 = vpow2.f32 %v1142_v62  ;;  %2159 = vmax.xlane.f32.xlu0 %v11148_v58  ;;  %2161 = vmax.xlane.f32.xlu1 %v11150_v57 }
 0x48e   :  { %v749_v13 = vpop.xlane.xlu0 %748 }
 0x48f   :  { %v8267_v3 = vpop.f32.mrb[76].mxu0  ;;  %2155 = vmax.xlane.f32.xlu0 %v11157_v36  ;;  %v778_v46 = vsub.f32 %v10823_v28, %v749_v13  ;;  %v11173_v28 = vadd.f32 %v8264_v43, %v7535_v9 }
 0x490   :  { %v2130_v6 = vpop.f32.mrb[77].mxu0  ;;  %v751_v56 = vpop.xlane.xlu1 %750 }
 0x491   :  { %v796_v62 = vmul.f32 1.442695, %v778_v46  ;;  %v8268_v58 = vpop.f32.mrb[78].mxu0  ;;  %15770 = vst [vmem:[#allocation87_spill] sm:$0xff] %v11173_v28 }
 0x492   :  { %v2133_v40 = vpop.f32.mrb[79].mxu0  ;;  %v1091_v57 = vpop.xlane.xlu0 %1090 }
 0x493   :  { %9258 = vpow2.f32 %v796_v62  ;;  %2165 = vmax.xlane.f32.xlu0 %v11164_v25  ;;  %v1122_v2 = vsub.f32 %v10834_v47, %v1091_v57  ;;  %v11180_v62 = vadd.f32 %v7533_v12, %v2117_v39  ;;  %v7538_v47 = vld [vmem:[%s15758_s2 + $0x1f0] sm:$0xff]  ;;  %v7536_v12 = vld [vmem:[%s15758_s2 + $0x1e0] sm:$0xff] }
 0x494   :  { %v1093_v36 = vpop.xlane.xlu1 %1092 }
 0x495   :  { %v11171_v22 = vpop.eup %9256  ;;  %v1138_v41 = vmul.f32 1.442695, %v1122_v2  ;;  %v1123_v2 = vsub.f32 %v10840_v61, %v1093_v36 }
 0x496   :  { %15769 = vst [vmem:[#allocation86_spill] sm:$0xff] %v11171_v22  ;;  %1174 = vadd.xlane.f32.xlu1 %v11171_v22  ;;  %v745_v13 = vpop.xlane.xlu0 %744 }
 0x497   :  { %9260 = vpow2.f32 %v1138_v41  ;;  %2167 = vmax.xlane.f32.xlu0 %v11173_v28  ;;  %v776_v9 = vsub.f32 %v10846_v63, %v745_v13  ;;  %v11193_v28 = vadd.f32 %v8267_v3, %v7538_v47  ;;  %v1140_v36 = vmul.f32 1.442695, %v1123_v2  ;;  %v7539_v47 = vld [vmem:[%s15758_s2 + $0x1f8] sm:$0xff] }
 0x498   :  { %v747_v46 = vpop.xlane.xlu1 %746  ;;  %v779_v63 = vsub.f32 %v10828_v29, %v751_v56  ;;  %v11205_v3 = vadd.f32 %v7536_v12, %v2130_v6  ;;  %v7537_v6 = vld [vmem:[%s15758_s2 + $0x1e8] sm:$0xff]  ;;  %s9705_s2 = smov 40  }
 0x499   :  { %v777_v29 = vsub.f32 %v10854_v17, %v747_v46  ;;  %v11227_v46 = vadd.f32 %v7537_v6, %v2133_v40 }
 0x49a   :  { %v1097_v57 = vpop.xlane.xlu0 %1096  ;;  %v798_v2 = vmul.f32 1.442695, %v779_v63 }
 0x49b   :  { %2163 = vmax.xlane.f32.xlu0 %v11180_v62  ;;  %v1125_v43 = vsub.f32 %v10860_v33, %v1097_v57  ;;  %v792_v33 = vmul.f32 1.442695, %v776_v9  ;;  %v11215_v9 = vadd.f32 %v8268_v58, %v7539_v47 }
 0x49c   :  { %v11189_v22 = vpop.xlane.xlu1 %1104 }
 0x49d   :  { %v11191_v41 = vpop.eup %9258  ;;  %v1144_v39 = vmul.f32 1.442695, %v1125_v43 }
 0x49e   :  { %15771 = vst [vmem:[#allocation88_spill] sm:$0xff] %v11191_v41  ;;  %828 = vadd.xlane.f32.xlu1 %v11191_v41  ;;  %v1103_v61 = vpop.xlane.xlu0 %1102 }
 0x49f   :  { %9262 = vpow2.f32 %v1144_v39  ;;  %2173 = vmax.xlane.f32.xlu0 %v11193_v28  ;;  %v1128_v63 = vsub.f32 %v10872_v0, %v1103_v61 }
 0x4a0   :  { %v11201_v13 = vpop.xlane.xlu1 %758  ;;  %9264 = vpow2.f32 %v1140_v36  ;;  %v794_v36 = vmul.f32 1.442695, %v777_v29 }
 0x4a1   :  { %v11203_v57 = vpop.eup %9260  ;;  %9266 = vpow2.f32 %v792_v33  ;;  %v1150_v41 = vmul.f32 1.442695, %v1128_v63 }
 0x4a2   :  { %1170 = vadd.xlane.f32.xlu1 %v11203_v57  ;;  %v757_v43 = vpop.xlane.xlu0 %756  ;;  %9268 = vpow2.f32 %v798_v2 }
 0x4a3   :  { %2169 = vmax.xlane.f32.xlu0 %v11205_v3 }
 0x4a4   :  { %v11213_v56 = vpop.xlane.xlu1 %1100 }
 0x4a6   :  { %v1099_v39 = vpop.xlane.xlu0 %1098 }
 0x4a7   :  { %2175 = vmax.xlane.f32.xlu0 %v11215_v9  ;;  %v1126_v12 = vsub.f32 %v10898_v35, %v1099_v39  ;;  %v782_v35 = vsub.f32 %v10886_v5, %v757_v43 }
 0x4a8   :  { %v11223_v33 = vpop.xlane.xlu1 %754 }
 0x4a9   :  { %v11225_v17 = vpop.eup %9262  ;;  %v1146_v58 = vmul.f32 1.442695, %v1126_v12  ;;  %v804_v29 = vmul.f32 1.442695, %v782_v35 }
 0x4aa   :  { %1176 = vadd.xlane.f32.xlu1 %v11225_v17  ;;  %v753_v47 = vpop.xlane.xlu0 %752  ;;  %v11234_v0 = vpop.eup %9264 }
 0x4ab   :  { %9270 = vpow2.f32 %v1146_v58  ;;  %2171 = vmax.xlane.f32.xlu0 %v11227_v46  ;;  %v11236_v61 = vpop.eup %9266  ;;  %v780_v6 = vsub.f32 %v10910_v54, %v753_v47 }
 0x4ac   :  { %9272 = vpow2.f32 %v794_v36  ;;  %v11232_v2 = vpop.xlane.xlu1 %1112  ;;  %15772 = vst [vmem:[#allocation89_spill] sm:$0xff] %v11236_v61  ;;  %v11245_v12 = vpop.eup %9268  ;;  %v1129_v36 = vsub.f32 %v10866_v51, %v11189_v22 }
 0x4ad   :  { %9274 = vpow2.f32 %v1150_v41  ;;  %15773 = vst [vmem:[#allocation90_spill] sm:$0xff] %v11245_v12  ;;  %v800_v63 = vmul.f32 1.442695, %v780_v6 }
 0x4ae   :  { %1172 = vadd.xlane.f32.xlu1 %v11234_v0  ;;  %v11239_v40 = vpop.xlane.xlu0 %1110  ;;  %9276 = vpow2.f32 %v804_v29  ;;  %v1152_v47 = vmul.f32 1.442695, %v1129_v36  ;;  %v1127_v36 = vsub.f32 %v10892_v8, %v11213_v56 }
 0x4af   :  { %824 = vadd.xlane.f32.xlu0 %v11236_v61 }
 0x4b0   :  { %v11243_v39 = vpop.xlane.xlu1 %766 }
 0x4b2   :  { %v765_v5 = vpop.xlane.xlu0 %764 }
 0x4b3   :  { %830 = vadd.xlane.f32.xlu0 %v11245_v12  ;;  %v786_v43 = vsub.f32 %v10934_v34, %v765_v5  ;;  %v783_v34 = vsub.f32 %v10880_v32, %v11201_v13 }
 0x4b4   :  { %v1109_v58 = vpop.xlane.xlu1 %1108 }
 0x4b5   :  { %v11251_v61 = vpop.eup %9270  ;;  %v812_v41 = vmul.f32 1.442695, %v786_v43  ;;  %v1131_v6 = vsub.f32 %v10940_v30, %v1109_v58  ;;  %v806_v43 = vmul.f32 1.442695, %v783_v34  ;;  %v1148_v58 = vmul.f32 1.442695, %v1127_v36 }
 0x4b6   :  { %v11253_v35 = vpop.eup %9272  ;;  %1178 = vadd.xlane.f32.xlu1 %v11251_v61  ;;  %v1107_v54 = vpop.xlane.xlu0 %1106 }
 0x4b7   :  { %9278 = vpow2.f32 %v812_v41  ;;  %826 = vadd.xlane.f32.xlu0 %v11253_v35  ;;  %v11261_v22 = vpop.eup %9274 }
 0x4b8   :  { %9280 = vpow2.f32 %v800_v63  ;;  %v11259_v51 = vpop.xlane.xlu1 %762  ;;  %v11268_v32 = vpop.eup %9276  ;;  %v1156_v63 = vmul.f32 1.442695, %v1131_v6 }
 0x4b9   :  { %9282 = vpow2.f32 %v1152_v47 }
 0x4ba   :  { %v761_v29 = vpop.xlane.xlu0 %760 }
 0x4bb   :  { %1182 = vadd.xlane.f32.xlu0 %v11261_v22  ;;  %v784_v5 = vsub.f32 %v10959_v52, %v761_v29  ;;  %v781_v52 = vsub.f32 %v10904_v60, %v11223_v33  ;;  %v1132_v60 = vsub.f32 %v10922_v53, %v11239_v40 }
 0x4bc   :  { %v1121_v41 = vpop.xlane.xlu1 %1120 }
 0x4bd   :  { %v808_v12 = vmul.f32 1.442695, %v784_v5  ;;  %v802_v29 = vmul.f32 1.442695, %v781_v52 }
 0x4be   :  { %v1119_v13 = vpop.xlane.xlu0 %1118 }
 0x4bf   :  { %9284 = vpow2.f32 %v808_v12  ;;  %836 = vadd.xlane.f32.xlu0 %v11268_v32  ;;  %v1136_v30 = vsub.f32 %v10971_v44, %v1119_v13  ;;  %v1158_v13 = vmul.f32 1.442695, %v1132_v60 }
 0x4c0   :  { %9286 = vpow2.f32 %v806_v43  ;;  %v11274_v47 = vpop.xlane.xlu1 %774 }
 0x4c1   :  { %v11276_v34 = vpop.eup %9278  ;;  %9288 = vpow2.f32 %v1156_v63  ;;  %v1166_v12 = vmul.f32 1.442695, %v1136_v30 }
 0x4c2   :  { %v11278_v8 = vpop.eup %9280  ;;  %844 = vadd.xlane.f32.xlu1 %v11276_v34  ;;  %v773_v56 = vpop.xlane.xlu0 %772  ;;  %9290 = vpow2.f32 %v1148_v58 }
 0x4c3   :  { %832 = vadd.xlane.f32.xlu0 %v11278_v8  ;;  %v790_v44 = vsub.f32 %v10983_v4, %v773_v56  ;;  %v11287_v6 = vpop.eup %9282  ;;  %9292 = vpow2.f32 %v1166_v12  ;;  %v1130_v4 = vsub.f32 %v10947_v38, %v1107_v54 }
 0x4c4   :  { %v11285_v33 = vpop.xlane.xlu1 %1116  ;;  %9294 = vpow2.f32 %v802_v29  ;;  %v1137_v29 = vsub.f32 %v10965_v24, %v1121_v41 }
 0x4c5   :  { %v820_v43 = vmul.f32 1.442695, %v790_v44  ;;  %v1154_v38 = vmul.f32 1.442695, %v1130_v4 }
 0x4c6   :  { %v1115_v5 = vpop.xlane.xlu0 %1114  ;;  %v1168_v24 = vmul.f32 1.442695, %v1137_v29 }
 0x4c7   :  { %1184 = vadd.xlane.f32.xlu0 %v11287_v6  ;;  %v1134_v36 = vsub.f32 %v10996_v50, %v1115_v5  ;;  %9296 = vpow2.f32 %v820_v43  ;;  %v1133_v50 = vsub.f32 %v10916_v16, %v11232_v2  ;;  %v787_v16 = vsub.f32 %v10928_v31, %v11243_v39 }
 0x4c8   :  { %v11292_v63 = vpop.xlane.xlu1 %770  ;;  %9298 = vpow2.f32 %v1158_v13  ;;  %v785_v31 = vsub.f32 %v10953_v20, %v11259_v51 }
 0x4c9   :  { %v11294_v30 = vpop.eup %9284  ;;  %v1162_v58 = vmul.f32 1.442695, %v1134_v36  ;;  %v814_v41 = vmul.f32 1.442695, %v787_v16 }
 0x4ca   :  { %v11296_v53 = vpop.eup %9286  ;;  %840 = vadd.xlane.f32.xlu1 %v11294_v30  ;;  %v769_v40 = vpop.xlane.xlu0 %768 }
 0x4cb   :  { %838 = vadd.xlane.f32.xlu0 %v11296_v53  ;;  %v788_v52 = vsub.f32 %v11008_v15, %v769_v40  ;;  %v11305_v56 = vpop.eup %9288  ;;  %9300 = vpow2.f32 %v1162_v58  ;;  %v1160_v15 = vmul.f32 1.442695, %v1133_v50  ;;  %v791_v50 = vsub.f32 %v10977_v42, %v11274_v47 }
 0x4cc   :  { %v11303_v54 = vpop.xlane.xlu1 %1668  ;;  %v11307_v12 = vpop.eup %9290  ;;  %9302 = vpow2.f32 %v1154_v38  ;;  %v1135_v42 = vsub.f32 %v10989_v19, %v11285_v33  ;;  %v789_v19 = vsub.f32 %v11002_v11, %v11292_v63 }
 0x4cd   :  { %v816_v60 = vmul.f32 1.442695, %v788_v52  ;;  %v11318_v5 = vpop.eup %9292  ;;  %v810_v52 = vmul.f32 1.442695, %v785_v31  ;;  %v822_v16 = vmul.f32 1.442695, %v791_v50 }
 0x4ce   :  { %1188 = vadd.xlane.f32.xlu1 %v11305_v56  ;;  %v11310_v44 = vpop.xlane.xlu0 %1666  ;;  %v11320_v43 = vpop.eup %9294 }
 0x4cf   :  { %1180 = vadd.xlane.f32.xlu0 %v11307_v12  ;;  %9304 = vpow2.f32 %v816_v60  ;;  %v1696_v11 = vsub.f32 %v11020_v1, %v11310_v44 }
 0x4d0   :  { %v11316_v2 = vpop.xlane.xlu1 %1664  ;;  %9306 = vpow2.f32 %v1160_v15 }
 0x4d1   :  { %v11328_v13 = vpop.eup %9296  ;;  %9308 = vpow2.f32 %v1168_v24 }
 0x4d2   :  { %1198 = vadd.xlane.f32.xlu1 %v11318_v5  ;;  %v11323_v36 = vpop.xlane.xlu0 %1662  ;;  %v11330_v4 = vpop.eup %9298  ;;  %9310 = vpow2.f32 %v814_v41 }
 0x4d3   :  { %834 = vadd.xlane.f32.xlu0 %v11320_v43 }
 0x4d4   :  { %v1677_v39 = vpop.xlane.xlu1 %1676 }
 0x4d5   :  { %v11339_v20 = vpop.eup %9300  ;;  %v1701_v15 = vsub.f32 %v11038_v49, %v1677_v39  ;;  %v1164_v39 = vmul.f32 1.442695, %v1135_v42 }
 0x4d6   :  { %852 = vadd.xlane.f32.xlu1 %v11328_v13  ;;  %v1675_v40 = vpop.xlane.xlu0 %1674  ;;  %v11341_v29 = vpop.eup %9302 }
 0x4d7   :  { %1190 = vadd.xlane.f32.xlu0 %v11330_v4  ;;  %v1700_v58 = vsub.f32 %v11044_v7, %v1675_v40  ;;  %v1724_v49 = vmul.f32 1.442695, %v1701_v15 }
 0x4d8   :  { %v11337_v38 = vpop.xlane.xlu1 %1672 }
 0x4d9   :  { %v1722_v51 = vmul.f32 1.442695, %v1700_v58  ;;  %v11349_v24 = vpop.eup %9304 }
 0x4da   :  { %1194 = vadd.xlane.f32.xlu1 %v11339_v20  ;;  %v1671_v60 = vpop.xlane.xlu0 %1670  ;;  %v11351_v31 = vpop.eup %9306 }
 0x4db   :  { %9312 = vpow2.f32 %v1722_v51  ;;  %1186 = vadd.xlane.f32.xlu0 %v11341_v29  ;;  %v1698_v7 = vsub.f32 %v11056_v23, %v1671_v60  ;;  %v11360_v58 = vpop.eup %9308  ;;  %v818_v60 = vmul.f32 1.442695, %v789_v19 }
 0x4dc   :  { %9314 = vpow2.f32 %v810_v52  ;;  %v1685_v47 = vpop.xlane.xlu1 %1684  ;;  %v11362_v52 = vpop.eup %9310 }
 0x4dd   :  { %v1718_v41 = vmul.f32 1.442695, %v1698_v7 }
 0x4de   :  { %848 = vadd.xlane.f32.xlu1 %v11349_v24  ;;  %v1683_v40 = vpop.xlane.xlu0 %1682 }
 0x4df   :  { %9316 = vpow2.f32 %v1718_v41  ;;  %1192 = vadd.xlane.f32.xlu0 %v11351_v31  ;;  %v1704_v23 = vsub.f32 %v11068_v14, %v1683_v40  ;;  %v1694_v41 = vsub.f32 %v11032_v59, %v11323_v36 }
 0x4e0   :  { %9318 = vpow2.f32 %v822_v16  ;;  %v11358_v33 = vpop.xlane.xlu1 %1680  ;;  %v1705_v16 = vsub.f32 %v11062_v10, %v1685_v47  ;;  %v1697_v47 = vsub.f32 %v11014_v37, %v11303_v54 }
 0x4e1   :  { %9320 = vpow2.f32 %v1724_v49  ;;  %v1730_v51 = vmul.f32 1.442695, %v1704_v23 }
 0x4e2   :  { %1200 = vadd.xlane.f32.xlu1 %v11360_v58  ;;  %v1679_v50 = vpop.xlane.xlu0 %1678  ;;  %9322 = vpow2.f32 %v1164_v39  ;;  %v1732_v23 = vmul.f32 1.442695, %v1705_v16  ;;  %v1710_v39 = vmul.f32 1.442695, %v1694_v41 }
 0x4e3   :  { %846 = vadd.xlane.f32.xlu0 %v11362_v52  ;;  %v1702_v14 = vsub.f32 %v11080_v27, %v1679_v50  ;;  %9324 = vpow2.f32 %v1730_v51  ;;  %v1714_v27 = vmul.f32 1.442695, %v1696_v11 }
 0x4e4   :  { %v11369_v63 = vpop.xlane.xlu1 %1690  ;;  %9326 = vpow2.f32 %v818_v60 }
 0x4e5   :  { %v11371_v15 = vpop.eup %9312  ;;  %v1726_v42 = vmul.f32 1.442695, %v1702_v14  ;;  %v1695_v14 = vsub.f32 %v11026_v26, %v11316_v2  ;;  %v1703_v2 = vsub.f32 %v11074_v55, %v11358_v33  ;;  %v15776_v33 = vld [vmem:[#allocation76_spill] sm:$0xff] }
 0x4e6   :  { %v11373_v7 = vpop.eup %9314  ;;  %1754 = vadd.xlane.f32.xlu1 %v11371_v15  ;;  %v1693_v1 = vpop.xlane.xlu0 %1692 }
 0x4e7   :  { %842 = vadd.xlane.f32.xlu0 %v11373_v7  ;;  %9328 = vpow2.f32 %v1726_v42  ;;  %v1709_v10 = vsub.f32 %v11092_v18, %v1693_v1  ;;  %v1716_v18 = vmul.f32 1.442695, %v1697_v47  ;;  %v1712_v11 = vmul.f32 1.442695, %v1695_v14 }
 0x4e8   :  { %v1687_v44 = vpop.xlane.xlu1 %1686  ;;  %9330 = vpow2.f32 %v1714_v27 }
 0x4e9   :  { %v11380_v40 = vpop.eup %9316  ;;  %9332 = vpow2.f32 %v1732_v23  ;;  %v1740_v50 = vmul.f32 1.442695, %v1709_v10  ;;  %v1706_v10 = vsub.f32 %v15776_v33, %v1687_v44  ;;  %v15779_v44 = vld [vmem:[#allocation78_spill] sm:$0xff] }
 0x4ea   :  { %v11382_v49 = vpop.eup %9318  ;;  %1750 = vadd.xlane.f32.xlu1 %v11380_v40  ;;  %9334 = vpow2.f32 %v1710_v39 }
 0x4eb   :  { %854 = vadd.xlane.f32.xlu0 %v11382_v49  ;;  %v11389_v36 = vpop.eup %9320  ;;  %9336 = vpow2.f32 %v1740_v50  ;;  %v15778_v50 = vld [vmem:[#allocation77_spill] sm:$0xff] }
 0x4ec   :  { %v1689_v59 = vpop.xlane.xlu1 %1688  ;;  %v11391_v19 = vpop.eup %9322  ;;  %9338 = vpow2.f32 %v1716_v18 }
 0x4ed   :  { %v1707_v51 = vsub.f32 %v11102_v45, %v1689_v59  ;;  %v11398_v37 = vpop.eup %9324  ;;  %v1699_v45 = vsub.f32 %v11050_v48, %v11337_v38  ;;  %v1728_v48 = vmul.f32 1.442695, %v1703_v2  ;;  %v1708_v38 = vsub.f32 %v11086_v21, %v11369_v63  ;;  %v15780_v2 = vld [vmem:[#allocation79_spill] sm:$0xff] }
 0x4ee   :  { %1756 = vadd.xlane.f32.xlu1 %v11389_v36  ;;  %15774 = vst [vmem:[#allocation91_spill] sm:$0xff] %v11398_v37  ;;  %v11400_v54 = vpop.eup %9326  ;;  %v1734_v21 = vmul.f32 1.442695, %v1706_v10 }
 0x4ef   :  { %1196 = vadd.xlane.f32.xlu0 %v11391_v19  ;;  %v1736_v60 = vmul.f32 1.442695, %v1707_v51  ;;  %v1720_v26 = vmul.f32 1.442695, %v1699_v45  ;;  %v1738_v55 = vmul.f32 1.442695, %v1708_v38 }
 0x4f1   :  { %v11406_v16 = vpop.eup %9328  ;;  %9340 = vpow2.f32 %v1736_v60 }
 0x4f2   :  { %1762 = vadd.xlane.f32.xlu1 %v11398_v37  ;;  %v11408_v42 = vpop.eup %9330  ;;  %9342 = vpow2.f32 %v1712_v11  ;;  %v7581_v37 = vld [vmem:[%s15680_s26 + $0x180] sm:$0xff] }
 0x4f3   :  { %850 = vadd.xlane.f32.xlu0 %v11400_v54  ;;  %v11414_v27 = vpop.eup %9332  ;;  %9344 = vpow2.f32 %v1720_v26 }
 0x4f4   :  { %v11416_v41 = vpop.eup %9334  ;;  %9346 = vpow2.f32 %v1728_v48 }
 0x4f5   :  { %v11422_v1 = vpop.eup %9336  ;;  %9348 = vpow2.f32 %v1738_v55  ;;  %v15781_v55 = vld [vmem:[#allocation80_spill] sm:$0xff] }
 0x4f6   :  { %1758 = vadd.xlane.f32.xlu1 %v11406_v16  ;;  %15775 = vst [vmem:[#allocation92_spill] sm:$0xff] %v11422_v1  ;;  %v11424_v23 = vpop.eup %9338  ;;  %9350 = vpow2.f32 %v1734_v21 }
 0x4f7   :  { %1746 = vadd.xlane.f32.xlu0 %v11408_v42 }
 0x4fa   :  { %1764 = vadd.xlane.f32.xlu1 %v11414_v27 }
 0x4fb   :  { %1742 = vadd.xlane.f32.xlu0 %v11416_v41  ;;  %v11429_v47 = vpop.eup %9340 }
 0x4fc   :  { %15777 = vst [vmem:[#allocation76_spill] sm:$0xff] %v11429_v47  ;;  %v11431_v39 = vpop.eup %9342 }
 0x4fd   :  { %v11435_v63 = vpop.eup %9344 }
 0x4fe   :  { %1772 = vadd.xlane.f32.xlu1 %v11422_v1  ;;  %v11440_v60 = vpop.eup %9346 }
 0x4ff   :  { %1748 = vadd.xlane.f32.xlu0 %v11424_v23  ;;  %v11445_v10 = vpop.eup %9348 }
 0x500   :  { %15782 = vst [vmem:[#allocation77_spill] sm:$0xff] %v11445_v10 }
 0x502   :  { %1768 = vadd.xlane.f32.xlu1 %v11429_v47 }
 0x503   :  { %1744 = vadd.xlane.f32.xlu0 %v11431_v39 }
 0x507   :  { %v2150_v59 = vpop.xlane.xlu1 %2149  ;;  %1752 = vadd.xlane.f32.xlu0 %v11435_v63 }
 0x508   :  { %v2179_v51 = vsub.f32 %v15778_v50, %v2150_v59  ;;  %v2146_v18 = vpop.xlane.xlu0 %2145 }
 0x509   :  { %v2177_v14 = vsub.f32 %v15779_v44, %v2146_v18  ;;  %v11449_v44 = vpop.eup %9350 }
 0x50a   :  { %v2197_v11 = vmul.f32 1.442695, %v2179_v51  ;;  %v15783_v51 = vld [vmem:[#allocation81_spill] sm:$0xff]  ;;  %15784 = vst [vmem:[#allocation78_spill] sm:$0xff] %v11449_v44 }
 0x50b   :  { %v2193_v45 = vmul.f32 1.442695, %v2177_v14  ;;  %v2152_v26 = vpop.xlane.xlu1 %2151  ;;  %1760 = vadd.xlane.f32.xlu0 %v11440_v60 }
 0x50c   :  { %9352 = vpow2.f32 %v2197_v11  ;;  %v2180_v48 = vsub.f32 %v15780_v2, %v2152_v26  ;;  %v2148_v38 = vpop.xlane.xlu0 %2147  ;;  %v15785_v26 = vld [vmem:[#allocation82_spill] sm:$0xff] }
 0x50d   :  { %v2178_v33 = vsub.f32 %v15781_v55, %v2148_v38  ;;  %9354 = vpow2.f32 %v2193_v45 }
 0x50e   :  { %v2199_v21 = vmul.f32 1.442695, %v2180_v48 }
 0x50f   :  { %1770 = vadd.xlane.f32.xlu0 %v11445_v10  ;;  %v2195_v59 = vmul.f32 1.442695, %v2178_v33  ;;  %v15788_v33 = vld [vmem:[#allocation83_spill] sm:$0xff] }
 0x510   :  { %9356 = vpow2.f32 %v2199_v21  ;;  %v2158_v50 = vpop.xlane.xlu0 %2157 }
 0x511   :  { %v2183_v18 = vsub.f32 %v15783_v51, %v2158_v50  ;;  %9358 = vpow2.f32 %v2195_v59 }
 0x513   :  { %v2205_v14 = vmul.f32 1.442695, %v2183_v18  ;;  %1766 = vadd.xlane.f32.xlu0 %v11449_v44  ;;  %v15815_v44 = vld [vmem:[#allocation61_spill] sm:$0xff] }
 0x514   :  { %v2154_v11 = vpop.xlane.xlu0 %2153 }
 0x515   :  { %9360 = vpow2.f32 %v2205_v14  ;;  %v2181_v2 = vsub.f32 %v15785_v26, %v2154_v11  ;;  %v15790_v14 = vld [vmem:[#allocation85_spill] sm:$0xff] }
 0x516   :  { %v11453_v38 = vpop.eup %9352 }
 0x517   :  { %15786 = vst [vmem:[#allocation79_spill] sm:$0xff] %v11453_v38  ;;  %v2201_v45 = vmul.f32 1.442695, %v2181_v2  ;;  %2229 = vadd.xlane.f32.xlu0 %v11453_v38  ;;  %v11456_v55 = vpop.eup %9354 }
 0x518   :  { %v2160_v48 = vpop.xlane.xlu0 %2159  ;;  %15787 = vst [vmem:[#allocation80_spill] sm:$0xff] %v11456_v55  ;;  %v2162_v18 = vpop.xlane.xlu1 %2161 }
 0x519   :  { %9362 = vpow2.f32 %v2201_v45  ;;  %v2184_v21 = vsub.f32 %v15788_v33, %v2160_v48  ;;  %v15793_v45 = vld [vmem:[#allocation84_spill] sm:$0xff] }
 0x51a   :  { %v11459_v50 = vpop.eup %9356  ;;  %v2185_v48 = vsub.f32 %v15793_v45, %v2162_v18 }
 0x51b   :  { %15789 = vst [vmem:[#allocation81_spill] sm:$0xff] %v11459_v50  ;;  %v2207_v51 = vmul.f32 1.442695, %v2184_v21  ;;  %2231 = vadd.xlane.f32.xlu1 %v11459_v50  ;;  %2225 = vadd.xlane.f32.xlu0 %v11456_v55  ;;  %v11464_v26 = vpop.eup %9358 }
 0x51c   :  { %v2156_v59 = vpop.xlane.xlu0 %2155  ;;  %15791 = vst [vmem:[#allocation82_spill] sm:$0xff] %v11464_v26 }
 0x51d   :  { %v2182_v11 = vsub.f32 %v15790_v14, %v2156_v59  ;;  %9364 = vpow2.f32 %v2207_v51  ;;  %v2209_v59 = vmul.f32 1.442695, %v2185_v48  ;;  %v15795_v14 = vld [vmem:[#allocation87_spill] sm:$0xff] }
 0x51f   :  { %v11466_v2 = vpop.eup %9360  ;;  %v2203_v38 = vmul.f32 1.442695, %v2182_v11  ;;  %2227 = vadd.xlane.f32.xlu1 %v11464_v26 }
 0x520   :  { %15792 = vst [vmem:[#allocation83_spill] sm:$0xff] %v11466_v2  ;;  %2237 = vadd.xlane.f32.xlu0 %v11466_v2  ;;  %v2166_v33 = vpop.xlane.xlu0 %2165 }
 0x521   :  { %9366 = vpow2.f32 %v2203_v38  ;;  %v2187_v21 = vsub.f32 %v11164_v25, %v2166_v33 }
 0x523   :  { %v11472_v50 = vpop.eup %9362  ;;  %v2213_v55 = vmul.f32 1.442695, %v2187_v21  ;;  %v1175_v45 = vpop.xlane.xlu1 %1174 }
 0x524   :  { %15794 = vst [vmem:[#allocation85_spill] sm:$0xff] %v11472_v50  ;;  %2233 = vadd.xlane.f32.xlu0 %v11472_v50  ;;  %v2168_v51 = vpop.xlane.xlu0 %2167 }
 0x525   :  { %9368 = vpow2.f32 %v2213_v55  ;;  %v2188_v11 = vsub.f32 %v15795_v14, %v2168_v51 }
 0x526   :  { %9370 = vpow2.f32 %v2209_v59 }
 0x527   :  { %v2215_v1 = vmul.f32 1.442695, %v2188_v11  ;;  %v11476_v26 = vpop.eup %9364 }
 0x528   :  { %15796 = vst [vmem:[#allocation84_spill] sm:$0xff] %v11476_v26  ;;  %v2164_v18 = vpop.xlane.xlu0 %2163  ;;  %2239 = vadd.xlane.f32.xlu1 %v11476_v26  ;;  %v15807_v26 = vld [vmem:[#allocation19_spill] sm:$0xff] }
 0x529   :  { %9372 = vpow2.f32 %v2215_v1  ;;  %v2186_v25 = vsub.f32 %v11180_v62, %v2164_v18 }
 0x52b   :  { %v11480_v38 = vpop.eup %9366  ;;  %v2211_v48 = vmul.f32 1.442695, %v2186_v25  ;;  %v11482_v21 = vpop.xlane.xlu1 %828 }
 0x52c   :  { %15797 = vst [vmem:[#allocation87_spill] sm:$0xff] %v11480_v38  ;;  %v2174_v33 = vpop.xlane.xlu0 %2173  ;;  %2235 = vadd.xlane.f32.xlu1 %v11480_v38  ;;  %v7646_v38 = vld [vmem:[%s15680_s26 + $0x388] sm:$0xff] }
 0x52d   :  { %9374 = vpow2.f32 %v2211_v48  ;;  %v2191_v55 = vsub.f32 %v11193_v28, %v2174_v33 }
 0x52f   :  { %v11486_v51 = vpop.eup %9368  ;;  %v2221_v59 = vmul.f32 1.442695, %v2191_v55  ;;  %v1171_v18 = vpop.xlane.xlu1 %1170 }
 0x530   :  { %15798 = vst [vmem:[#allocation93_spill] sm:$0xff] %v11486_v51  ;;  %2245 = vadd.xlane.f32.xlu0 %v11486_v51  ;;  %v2170_v1 = vpop.xlane.xlu0 %2169  ;;  %v11490_v14 = vpop.eup %9370 }
 0x531   :  { %9376 = vpow2.f32 %v2221_v59  ;;  %v2189_v62 = vsub.f32 %v11205_v3, %v2170_v1  ;;  %15799 = vst [vmem:[#allocation94_spill] sm:$0xff] %v11490_v14 }
 0x533   :  { %v11492_v11 = vpop.eup %9372  ;;  %v2217_v25 = vmul.f32 1.442695, %v2189_v62 }
 0x534   :  { %15800 = vst [vmem:[#allocation95_spill] sm:$0xff] %v11492_v11  ;;  %2241 = vadd.xlane.f32.xlu0 %v11490_v14  ;;  %2247 = vadd.xlane.f32.xlu1 %v11492_v11  ;;  %v2176_v28 = vpop.xlane.xlu0 %2175 }
 0x535   :  { %9378 = vpow2.f32 %v2217_v25  ;;  %v2192_v48 = vsub.f32 %v11215_v9, %v2176_v28 }
 0x537   :  { %v11497_v33 = vpop.eup %9374  ;;  %v2223_v55 = vmul.f32 1.442695, %v2192_v48  ;;  %v1177_v59 = vpop.xlane.xlu1 %1176 }
 0x538   :  { %15801 = vst [vmem:[#allocation96_spill] sm:$0xff] %v11497_v33  ;;  %9380 = vrcp.f32 %v1177_v59  ;;  %2243 = vadd.xlane.f32.xlu1 %v11497_v33  ;;  %v2172_v3 = vpop.xlane.xlu0 %2171 }
 0x539   :  { %9382 = vpow2.f32 %v2223_v55  ;;  %v2190_v1 = vsub.f32 %v11227_v46, %v2172_v3 }
 0x53a   :  { %9384 = vrcp.f32 %v1171_v18 }
 0x53b   :  { %v11501_v62 = vpop.eup %9376  ;;  %9386 = vrcp.f32 %v1175_v45  ;;  %v2219_v51 = vmul.f32 1.442695, %v2190_v1  ;;  %v1173_v11 = vpop.xlane.xlu1 %1172 }
 0x53c   :  { %15802 = vst [vmem:[#allocation97_spill] sm:$0xff] %v11501_v62  ;;  %9388 = vrcp.f32 %v1173_v11  ;;  %2253 = vadd.xlane.f32.xlu0 %v11501_v62  ;;  %v11504_v9 = vpop.xlane.xlu0 %824  ;;  %v15806_v62 = vld [vmem:[#allocation86_spill] sm:$0xff] }
 0x53d   :  { %9390 = vpow2.f32 %v2219_v51 }
 0x53f   :  { %v11506_v25 = vpop.eup %9378 }
 0x540   :  { %15803 = vst [vmem:[#allocation98_spill] sm:$0xff] %v11506_v25  ;;  %2249 = vadd.xlane.f32.xlu0 %v11506_v25  ;;  %v11509_v28 = vpop.xlane.xlu0 %830 }
 0x542   :  { %v9381_v48 = vpop.eup %9380 }
 0x543   :  { %v11511_v46 = vpop.eup %9382  ;;  %v1221_v59 = vmul.f32 %v9381_v48, %v11225_v17  ;;  %v15808_v17 = vld [vmem:[#allocation21_spill] sm:$0xff]  ;;  %v1179_v48 = vpop.xlane.xlu1 %1178 }
 0x544   :  { %15804 = vst [vmem:[#allocation99_spill] sm:$0xff] %v11511_v46  ;;  %v9385_v18 = vpop.eup %9384  ;;  %2255 = vadd.xlane.f32.xlu1 %v11511_v46  ;;  %v11514_v45 = vpop.xlane.xlu0 %826 }
 0x545   :  { %v9387_v11 = vpop.eup %9386  ;;  %v1218_v51 = vmul.f32 %v9385_v18, %v11203_v57  ;;  %v15809_v57 = vld [vmem:[#allocation24_spill] sm:$0xff]  ;;  %v7614_v18 = vld [vmem:[%s15680_s26 + $0x288] sm:$0xff] }
 0x546   :  { %v9389_v55 = vpop.eup %9388  ;;  %v1220_v25 = vmul.f32 %v9387_v11, %v15806_v62 }
 0x547   :  { %v11517_v3 = vpop.eup %9390  ;;  %v1219_v1 = vmul.f32 %v9389_v55, %v11234_v0  ;;  %v15811_v55 = vld [vmem:[#allocation29_spill] sm:$0xff] }
 0x548   :  { %15805 = vst [vmem:[#allocation100_spill] sm:$0xff] %v11517_v3  ;;  %2251 = vadd.xlane.f32.xlu1 %v11517_v3  ;;  %v1183_v14 = vpop.xlane.xlu0 %1182  ;;  %v1235_v33 = vpack.c.bf16 %v1221_v59, %v1220_v25  ;;  %v7549_v59 = vld [vmem:[%s15680_s26 + $0x80] sm:$0xff] }
 0x549   :  { %v1234_v2 = vpack.c.bf16 %v1219_v1, %v1218_v51  ;;  %v7550_v1 = vld [vmem:[%s15680_s26 + $0x88] sm:$0xff] }
 0x54b   :  { %8125 = vmatprep.mubr.bf16.mxu1 %v1234_v2  ;;  %v7587_v2 = vld [vmem:[%s15680_s26 + $0x1b0] sm:$0xff] }
 0x54c   :  { %v11523_v46 = vpop.xlane.xlu0 %836  ;;  %8126 = vmatmul.mubr.bf16.vlgmr.msra.gmra.mrb[16].mxu1 %v1235_v33  ;;  %v15810_v33 = vld [vmem:[#allocation26_spill] sm:$0xff] }
 0x54d   :  { %8142 = vmatpush3.bf16.msra.mxu1 %v15807_v26  ;;  %v7613_v26 = vld [vmem:[%s15680_s26 + $0x280] sm:$0xff] }
 0x54e   :  { %8143 = vmatprep.subr.bf16.mxu1 %v15808_v17 }
 0x54f   :  { %v11531_v0 = vpop.xlane.xlu1 %844 }
 0x550   :  { %v11527_v50 = vpop.xlane.xlu0 %832 }
 0x551   :  { %8144 = vmatpush3.bf16.msra.mxu1 %v15808_v17 }
 0x552   :  { %8145 = vmatprep.subr.bf16.mxu1 %v15809_v57 }
 0x554   :  { %v1185_v62 = vpop.xlane.xlu0 %1184 }
 0x555   :  { %8146 = vmatpush3.bf16.msra.mxu1 %v15809_v57  ;;  %9392 = vrcp.f32 %v1185_v62  ;;  %v15812_v57 = vld [vmem:[#allocation34_spill] sm:$0xff] }
 0x556   :  { %8147 = vmatprep.subr.bf16.mxu1 %v15810_v33  ;;  %2912 = vperm.xlu0 %8624, %v7587_v2   ;;  %9394 = vrcp.f32 %v1179_v48  ;;  %v7629_v2 = vld [vmem:[%s15680_s26 + $0x300] sm:$0xff]  ;;  %v7630_v48 = vld [vmem:[%s15680_s26 + $0x308] sm:$0xff] }
 0x557   :  { %v11541_v25 = vpop.xlane.xlu1 %840  ;;  %9396 = vrcp.f32 %v1183_v14  ;;  %v15813_v14 = vld [vmem:[#allocation37_spill] sm:$0xff] }
 0x558   :  { %v11546_v11 = vpop.xlane.xlu0 %838 }
 0x559   :  { %8148 = vmatpush3.bf16.msra.mxu1 %v15810_v33  ;;  %3108 = vperm.xlu1 %8623, %v7613_v26   ;;  %v7565_v26 = vld [vmem:[%s15680_s26 + $0x100] sm:$0xff] }
 0x55a   :  { %8149 = vmatprep.subr.bf16.mxu1 %v15811_v55  ;;  %3113 = vperm.xlu0 %8624, %v7614_v18   ;;  %v7566_v18 = vld [vmem:[%s15680_s26 + $0x108] sm:$0xff] }
 0x55b   :  { %v1189_v51 = vpop.xlane.xlu1 %1188 }
 0x55c   :  { %v1181_v17 = vpop.xlane.xlu0 %1180 }
 0x55d   :  { %9398 = vrcp.f32 %v1181_v17  ;;  %8150 = vmatpush3.bf16.msra.mxu1 %v15811_v55  ;;  %2623 = vperm.xlu1 %8623, %v7549_v59  }
 0x55e   :  { %8151 = vmatprep.subr.bf16.mxu1 %v15812_v57  ;;  %2628 = vperm.xlu0 %8624, %v7550_v1   ;;  %9400 = vrcp.f32 %v1189_v51 }
 0x55f   :  { %v11561_v62 = vpop.xlane.xlu1 %1198  ;;  %v9393_v55 = vpop.eup %9392 }
 0x560   :  { %v11566_v33 = vpop.xlane.xlu0 %834  ;;  %v9395_v1 = vpop.eup %9394  ;;  %v1225_v10 = vmul.f32 %v9393_v55, %v11287_v6 }
 0x561   :  { %8152 = vmatpush3.bf16.msra.mxu1 %v15812_v57  ;;  %3221 = vperm.xlu1 %8623, %v7629_v2   ;;  %v9397_v57 = vpop.eup %9396  ;;  %v15814_v2 = vld [vmem:[#allocation40_spill] sm:$0xff] }
 0x562   :  { %8153 = vmatprep.subr.bf16.mxu1 %v15813_v14  ;;  %3226 = vperm.xlu0 %8624, %v7630_v48   ;;  %v7645_v48 = vld [vmem:[%s15680_s26 + $0x380] sm:$0xff] }
 0x563   :  { %v11576_v17 = vpop.xlane.xlu1 %852 }
 0x564   :  { %v1191_v59 = vpop.xlane.xlu0 %1190 }
 0x565   :  { %8154 = vmatpush3.bf16.msra.mxu1 %v15813_v14  ;;  %2769 = vperm.xlu1 %8623, %v7565_v26   ;;  %v1222_v14 = vmul.f32 %v9395_v1, %v11251_v61  ;;  %v7582_v61 = vld [vmem:[%s15680_s26 + $0x188] sm:$0xff]  ;;  %v7557_v1 = vld [vmem:[%s15680_s26 + $0xc0] sm:$0xff] }
 0x566   :  { %8155 = vmatprep.subr.bf16.mxu1 %v15814_v2  ;;  %2774 = vperm.xlu0 %8624, %v7566_v18   ;;  %v1224_v18 = vmul.f32 %v9397_v57, %v11261_v22  ;;  %v7621_v22 = vld [vmem:[%s15680_s26 + $0x2c0] sm:$0xff] }
 0x567   :  { %v9399_v3 = vpop.eup %9398  ;;  %v1195_v6 = vpop.xlane.xlu1 %1194 }
 0x568   :  { %v1187_v47 = vpop.xlane.xlu0 %1186  ;;  %v1223_v26 = vmul.f32 %v9399_v3, %v11307_v12  ;;  %v1237_v55 = vpack.c.bf16 %v1225_v10, %v1224_v18  ;;  %v9401_v10 = vpop.eup %9400 }
 0x569   :  { %9402 = vrcp.f32 %v1187_v47  ;;  %8156 = vmatpush3.bf16.msra.mxu1 %v15814_v2  ;;  %3334 = vperm.xlu1 %8623, %v7645_v48   ;;  %v7622_v47 = vld [vmem:[%s15680_s26 + $0x2c8] sm:$0xff] }
 0x56a   :  { %8205 = vmatprep.subr.bf16.mxu1 %v15815_v44  ;;  %3339 = vperm.xlu0 %8624, %v7646_v38   ;;  %v1236_v51 = vpack.c.bf16 %v1223_v26, %v1222_v14  ;;  %9404 = vrcp.f32 %v1191_v59  ;;  %v1227_v14 = vmul.f32 %v9401_v10, %v11305_v56  ;;  %v7574_v10 = vld [vmem:[%s15680_s26 + $0x148] sm:$0xff] }
 0x56b   :  { %v11606_v3 = vpop.xlane.xlu1 %848 }
 0x56c   :  { %8129 = vmatprep.mubr.bf16.mxu1 %v1236_v51  ;;  %v1193_v12 = vpop.xlane.xlu0 %1192  ;;  %v7638_v51 = vld [vmem:[%s15680_s26 + $0x348] sm:$0xff] }
 0x56d   :  { %9406 = vrcp.f32 %v1193_v12  ;;  %2882 = vperm.xlu1 %8623, %v7581_v37   ;;  %8130 = vmatmul.mubr.bf16.gmra.mrb[20].mxu1 %v1237_v55  ;;  %v7558_v37 = vld [vmem:[%s15680_s26 + $0xc8] sm:$0xff]  ;;  %v7637_v12 = vld [vmem:[%s15680_s26 + $0x340] sm:$0xff] }
 0x56e   :  { %2887 = vperm.xlu0 %8624, %v7582_v61   ;;  %9408 = vrcp.f32 %v11504_v9  ;;  %v7573_v9 = vld [vmem:[%s15680_s26 + $0x140] sm:$0xff] }
 0x56f   :  { %v1201_v61 = vpop.xlane.xlu1 %1200  ;;  %9410 = vrcp.f32 %v11514_v45  ;;  %v7653_v45 = vld [vmem:[%s15680_s26 + $0x3c0] sm:$0xff] }
 0x570   :  { %v11604_v38 = vpop.xlane.xlu0 %846  ;;  %9412 = vrcp.f32 %v1201_v61 }
 0x571   :  { %3148 = vperm.xlu1 %8623, %v7621_v22   ;;  %9414 = vrcp.f32 %v1195_v6 }
 0x572   :  { %3153 = vperm.xlu0 %8624, %v7622_v47   ;;  %9416 = vrcp.f32 %v11561_v62  ;;  %v7590_v62 = vld [vmem:[%s15680_s26 + $0x1c8] sm:$0xff] }
 0x573   :  { %v9403_v59 = vpop.eup %9402 }
 0x574   :  { %v11614_v57 = vpop.xlane.xlu0 %842  ;;  %v1226_v48 = vmul.f32 %v9403_v59, %v11341_v29  ;;  %v9405_v26 = vpop.eup %9404 }
 0x575   :  { %2668 = vperm.xlu1 %8623, %v7558_v37   ;;  %v1228_v56 = vmul.f32 %v9405_v26, %v11330_v4 }
 0x576   :  { %2663 = vperm.xlu0 %8624, %v7557_v1   ;;  %v1238_v18 = vpack.c.bf16 %v1227_v14, %v1226_v48  ;;  %v7589_v1 = vld [vmem:[%s15680_s26 + $0x1c0] sm:$0xff] }
 0x577   :  { %v9407_v55 = vpop.eup %9406 }
 0x578   :  { %8133 = vmatprep.mubr.bf16.mxu1 %v1238_v18  ;;  %v11625_v29 = vpop.xlane.xlu0 %854  ;;  %v1229_v22 = vmul.f32 %v9407_v55, %v11351_v31  ;;  %v7654_v31 = vld [vmem:[%s15680_s26 + $0x3c8] sm:$0xff]  ;;  %v9409_v37 = vpop.eup %9408  ;;  %v7624_v55 = vld [vmem:[%s15680_s26 + $0x2d8] sm:$0xff] }
 0x579   :  { %3266 = vperm.xlu1 %8623, %v7638_v51   ;;  %v9411_v59 = vpop.eup %9410  ;;  %v11656_v18 = vpop.xlane.xlu1 %1754 }
 0x57a   :  { %3261 = vperm.xlu0 %8624, %v7637_v12   ;;  %v1239_v47 = vpack.c.bf16 %v1229_v22, %v1228_v56  ;;  %v9413_v48 = vpop.eup %9412 }
 0x57b   :  { %v9415_v26 = vpop.eup %9414 }
 0x57c   :  { %8134 = vmatmul.mubr.bf16.gmra.mrb[24].mxu1 %v1239_v47  ;;  %v1197_v4 = vpop.xlane.xlu0 %1196  ;;  %v1230_v12 = vmul.f32 %v9415_v26, %v11339_v20 }
 0x57d   :  { %9418 = vrcp.f32 %v1197_v4  ;;  %2814 = vperm.xlu1 %8623, %v7574_v10   ;;  %v7560_v10 = vld [vmem:[%s15680_s26 + $0xd8] sm:$0xff]  ;;  %v11678_v20 = vpop.xlane.xlu1 %1750 }
 0x57e   :  { %2809 = vperm.xlu0 %8624, %v7573_v9   ;;  %9420 = vrcp.f32 %v11509_v28  ;;  %v9417_v28 = vpop.eup %9416 }
 0x57f   :  { %9422 = vrcp.f32 %v11482_v21  ;;  %v7623_v21 = vld [vmem:[%s15680_s26 + $0x2d0] sm:$0xff]  ;;  %v1232_v22 = vmul.f32 %v9417_v28, %v11318_v5 }
 0x580   :  { %v11643_v6 = vpop.xlane.xlu0 %850  ;;  %9424 = vrcp.f32 %v11566_v33  ;;  %v1233_v33 = vmul.f32 %v9413_v48, %v11360_v58  ;;  %v15816_v58 = vld [vmem:[#allocation89_spill] sm:$0xff]  ;;  %v15818_v48 = vld [vmem:[#allocation88_spill] sm:$0xff] }
 0x581   :  { %3379 = vperm.xlu1 %8623, %v7654_v31   ;;  %9426 = vrcp.f32 %v11527_v50  ;;  %v873_v50 = vmul.f32 %v9411_v59, %v11253_v35  ;;  %v872_v9 = vmul.f32 %v9409_v37, %v15816_v58  ;;  %v7559_v35 = vld [vmem:[%s15680_s26 + $0xd0] sm:$0xff]  ;;  %v15817_v37 = vld [vmem:[#allocation90_spill] sm:$0xff]  ;;  %v11695_v28 = vpop.xlane.xlu1 %1756 }
 0x582   :  { %3374 = vperm.xlu0 %8624, %v7653_v45   ;;  %9428 = vrcp.f32 %v11546_v11 }
 0x583   :  { %9430 = vrcp.f32 %v11523_v46  ;;  %v888_v4 = vpack.c.bf16 %v873_v50, %v872_v9  ;;  %v7640_v46 = vld [vmem:[%s15680_s26 + $0x358] sm:$0xff] }
 0x584   :  { %v11654_v14 = vpop.xlane.xlu0 %1746  ;;  %9432 = vrcp.f32 %v11614_v57  ;;  %v7639_v57 = vld [vmem:[%s15680_s26 + $0x350] sm:$0xff]  ;;  %v7592_v9 = vld [vmem:[%s15680_s26 + $0x1d8] sm:$0xff] }
 0x585   :  { %2927 = vperm.xlu1 %8623, %v7590_v62   ;;  %9434 = vrcp.f32 %v11541_v25 }
 0x586   :  { %2922 = vperm.xlu0 %8624, %v7589_v1   ;;  %9436 = vrcp.f32 %v11604_v38 }
 0x587   :  { %v9419_v51 = vpop.eup %9418  ;;  %9438 = vrcp.f32 %v11531_v0  ;;  %v7656_v0 = vld [vmem:[%s15680_s26 + $0x3d8] sm:$0xff] }
 0x588   :  { %v11666_v61 = vpop.xlane.xlu0 %1742  ;;  %v1231_v56 = vmul.f32 %v9419_v51, %v11391_v19  ;;  %v1241_v19 = vpack.c.bf16 %v1233_v33, %v1232_v22  ;;  %v9421_v5 = vpop.eup %9420  ;;  %9440 = vrcp.f32 %v11643_v6  ;;  %v7655_v6 = vld [vmem:[%s15680_s26 + $0x3d0] sm:$0xff] }
 0x589   :  { %3158 = vperm.xlu1 %8623, %v7623_v21   ;;  %v9423_v31 = vpop.eup %9422  ;;  %v875_v62 = vmul.f32 %v9421_v5, %v15817_v37  ;;  %v7576_v21 = vld [vmem:[%s15680_s26 + $0x158] sm:$0xff]  ;;  %9442 = vrcp.f32 %v11606_v3  ;;  %v11713_v22 = vpop.xlane.xlu1 %1762 }
 0x58a   :  { %3163 = vperm.xlu0 %8624, %v7624_v55   ;;  %v1240_v47 = vpack.c.bf16 %v1231_v56, %v1230_v12  ;;  %v9425_v45 = vpop.eup %9424  ;;  %v874_v26 = vmul.f32 %v9423_v31, %v15818_v48  ;;  %v7575_v55 = vld [vmem:[%s15680_s26 + $0x150] sm:$0xff]  ;;  %9444 = vrcp.f32 %v11625_v29 }
 0x58b   :  { %v9427_v59 = vpop.eup %9426  ;;  %v877_v25 = vmul.f32 %v9425_v45, %v11320_v43  ;;  %9446 = vrcp.f32 %v11576_v17  ;;  %v7625_v17 = vld [vmem:[%s15680_s26 + $0x2e0] sm:$0xff] }
 0x58c   :  { %8137 = vmatprep.mubr.bf16.mxu1 %v1240_v47  ;;  %v11684_v11 = vpop.xlane.xlu0 %1748  ;;  %v889_v51 = vpack.c.bf16 %v875_v62, %v874_v26  ;;  %v876_v33 = vmul.f32 %v9427_v59, %v11278_v8  ;;  %v9429_v12 = vpop.eup %9428  ;;  %v15819_v8 = vld [vmem:[#allocation63_spill] sm:$0xff]  ;;  %v15822_v59 = vld [vmem:[#allocation69_spill] sm:$0xff] }
 0x58d   :  { %2678 = vperm.xlu1 %8623, %v7560_v10   ;;  %8138 = vmatmul.mubr.bf16.gmra.mrb[28].mxu1 %v1241_v19  ;;  %v9431_v56 = vpop.eup %9430  ;;  %v879_v47 = vmul.f32 %v9429_v12, %v11296_v53  ;;  %v15820_v53 = vld [vmem:[#allocation65_spill] sm:$0xff]  ;;  %v11735_v5 = vpop.xlane.xlu1 %1758 }
 0x58e   :  { %2673 = vperm.xlu0 %8624, %v7559_v35   ;;  %8157 = vmatprep.mubr.bf16.mxu1 %v888_v4  ;;  %v890_v38 = vpack.c.bf16 %v877_v25, %v876_v33  ;;  %v9433_v50 = vpop.eup %9432 }
 0x58f   :  { %v9435_v10 = vpop.eup %9434  ;;  %v881_v58 = vmul.f32 %v9433_v50, %v11373_v7 }
 0x590   :  { %v1745_v1 = vpop.xlane.xlu0 %1744  ;;  %v880_v7 = vmul.f32 %v9435_v10, %v11294_v30  ;;  %v9437_v35 = vpop.eup %9436  ;;  %v15821_v30 = vld [vmem:[#allocation67_spill] sm:$0xff] }
 0x591   :  { %3276 = vperm.xlu1 %8623, %v7640_v46   ;;  %9448 = vrcp.f32 %v1745_v1  ;;  %v9439_v29 = vpop.eup %9438  ;;  %v883_v46 = vmul.f32 %v9437_v35, %v11362_v52  ;;  %v1765_v52 = vpop.xlane.xlu1 %1764  ;;  %v7578_v10 = vld [vmem:[%s15680_s26 + $0x168] sm:$0xff] }
 0x592   :  { %3271 = vperm.xlu0 %8624, %v7639_v57   ;;  %v892_v4 = vpack.c.bf16 %v881_v58, %v880_v7  ;;  %v9441_v31 = vpop.eup %9440  ;;  %9450 = vrcp.f32 %v11666_v61  ;;  %v882_v62 = vmul.f32 %v9439_v29, %v11276_v34  ;;  %v7561_v57 = vld [vmem:[%s15680_s26 + $0xe0] sm:$0xff]  ;;  %v7626_v34 = vld [vmem:[%s15680_s26 + $0x2e8] sm:$0xff] }
 0x593   :  { %v9443_v37 = vpop.eup %9442  ;;  %v885_v61 = vmul.f32 %v9441_v31, %v11400_v54  ;;  %9452 = vrcp.f32 %v11684_v11  ;;  %v15827_v31 = vld [vmem:[#allocation64_spill] sm:$0xff] }
 0x594   :  { %v1753_v43 = vpop.xlane.xlu0 %1752  ;;  %9454 = vrcp.f32 %v11654_v14  ;;  %v893_v1 = vpack.c.bf16 %v883_v46, %v882_v62  ;;  %v884_v54 = vmul.f32 %v9443_v37, %v11349_v24  ;;  %v9445_v11 = vpop.eup %9444  ;;  %v7641_v14 = vld [vmem:[%s15680_s26 + $0x360] sm:$0xff]  ;;  %v7562_v24 = vld [vmem:[%s15680_s26 + $0xe8] sm:$0xff] }
 0x595   :  { %2824 = vperm.xlu1 %8623, %v7576_v21   ;;  %8158 = vmatmul.mubr.bf16.vlgmr.msra.gmra.mrb[16].mxu1 %v889_v51  ;;  %9456 = vrcp.f32 %v1753_v43  ;;  %v9447_v48 = vpop.eup %9446  ;;  %v15823_v21 = vld [vmem:[#allocation71_spill] sm:$0xff]  ;;  %v887_v51 = vmul.f32 %v9445_v11, %v11382_v49  ;;  %v11771_v33 = vpop.xlane.xlu1 %1772  ;;  %v7577_v43 = vld [vmem:[%s15680_s26 + $0x160] sm:$0xff]  ;;  %v7643_v11 = vld [vmem:[%s15680_s26 + $0x370] sm:$0xff] }
 0x596   :  { %8206 = vmatpush3.bf16.msra.mxu1 %v15815_v44  ;;  %2819 = vperm.xlu0 %8624, %v7575_v55   ;;  %v878_v44 = vmul.f32 %v9431_v56, %v11268_v32  ;;  %v7591_v32 = vld [vmem:[%s15680_s26 + $0x1d0] sm:$0xff]  ;;  %v894_v26 = vpack.c.bf16 %v885_v61, %v884_v54  ;;  %9458 = vrcp.f32 %v11678_v20  ;;  %v886_v20 = vmul.f32 %v9447_v48, %v11328_v13  ;;  %v15824_v56 = vld [vmem:[#allocation73_spill] sm:$0xff]  ;;  %v7642_v13 = vld [vmem:[%s15680_s26 + $0x368] sm:$0xff] }
 0x597   :  { %8161 = vmatprep.mubr.bf16.mxu1 %v890_v38  ;;  %8207 = vmatprep.subr.bf16.mxu1 %v15819_v8  ;;  %9460 = vrcp.f32 %v11695_v28  ;;  %v7563_v61 = vld [vmem:[%s15680_s26 + $0xf0] sm:$0xff]  ;;  %v7564_v48 = vld [vmem:[%s15680_s26 + $0xf8] sm:$0xff] }
 0x598   :  { %v11720_v3 = vpop.xlane.xlu0 %1760  ;;  %v891_v19 = vpack.c.bf16 %v879_v47, %v878_v44  ;;  %9462 = vrcp.f32 %v11656_v18  ;;  %v895_v38 = vpack.c.bf16 %v887_v51, %v886_v20  ;;  %v7657_v18 = vld [vmem:[%s15680_s26 + $0x3e0] sm:$0xff]  ;;  %v15825_v47 = vld [vmem:[#allocation75_spill] sm:$0xff] }
 0x599   :  { %3389 = vperm.xlu1 %8623, %v7656_v0   ;;  %9464 = vrcp.f32 %v11720_v3  ;;  %v15832_v20 = vld [vmem:[#allocation70_spill] sm:$0xff] }
 0x59a   :  { %8208 = vmatpush3.bf16.msra.mxu1 %v15819_v8  ;;  %3384 = vperm.xlu0 %8624, %v7655_v6   ;;  %9466 = vrcp.f32 %v11735_v5 }
 0x59b   :  { %8209 = vmatprep.subr.bf16.mxu1 %v15820_v53  ;;  %v9449_v25 = vpop.eup %9448  ;;  %9468 = vrcp.f32 %v1765_v52 }
 0x59c   :  { %v11742_v45 = vpop.xlane.xlu0 %1770  ;;  %v9451_v55 = vpop.eup %9450  ;;  %v1791_v12 = vmul.f32 %v9449_v25, %v11431_v39  ;;  %9470 = vrcp.f32 %v11713_v22  ;;  %v7627_v22 = vld [vmem:[%s15680_s26 + $0x2f0] sm:$0xff] }
 0x59d   :  { %2937 = vperm.xlu1 %8623, %v7592_v9   ;;  %8162 = vmatmul.mubr.bf16.gmra.mrb[20].mxu1 %v891_v19  ;;  %v1790_v39 = vmul.f32 %v9451_v55, %v11416_v41  ;;  %v9453_v28 = vpop.eup %9452  ;;  %v1769_v41 = vpop.xlane.xlu1 %1768  ;;  %v15826_v19 = vld [vmem:[#allocation62_spill] sm:$0xff]  ;;  %v7579_v55 = vld [vmem:[%s15680_s26 + $0x170] sm:$0xff] }
 0x59e   :  { %8210 = vmatpush3.bf16.msra.mxu1 %v15820_v53  ;;  %2932 = vperm.xlu0 %8624, %v7591_v32   ;;  %v9455_v50 = vpop.eup %9454  ;;  %v1793_v6 = vmul.f32 %v9453_v28, %v11424_v23  ;;  %v7593_v23 = vld [vmem:[%s15680_s26 + $0x1e0] sm:$0xff] }
 0x59f   :  { %8165 = vmatprep.mubr.bf16.mxu1 %v892_v4  ;;  %8211 = vmatprep.subr.bf16.mxu1 %v15821_v30  ;;  %v1806_v0 = vpack.c.bf16 %v1791_v12, %v1790_v39  ;;  %v9457_v8 = vpop.eup %9456  ;;  %v1792_v44 = vmul.f32 %v9455_v50, %v11408_v42  ;;  %v7658_v42 = vld [vmem:[%s15680_s26 + $0x3e8] sm:$0xff]  ;;  %v7644_v12 = vld [vmem:[%s15680_s26 + $0x378] sm:$0xff]  ;;  %v7659_v50 = vld [vmem:[%s15680_s26 + $0x3f0] sm:$0xff] }
 0x5a0   :  { %v9459_v3 = vpop.eup %9458  ;;  %v1795_v9 = vmul.f32 %v9457_v8, %v11435_v63 }
 0x5a1   :  { %3168 = vperm.xlu1 %8623, %v7625_v17   ;;  %v1807_v32 = vpack.c.bf16 %v1793_v6, %v1792_v44  ;;  %v1794_v63 = vmul.f32 %v9459_v3, %v11380_v40  ;;  %v9461_v7 = vpop.eup %9460  ;;  %v7594_v40 = vld [vmem:[%s15680_s26 + $0x1e8] sm:$0xff]  ;;  %v7580_v6 = vld [vmem:[%s15680_s26 + $0x178] sm:$0xff]  ;;  %v15836_v3 = vld [vmem:[#allocation92_spill] sm:$0xff] }
 0x5a2   :  { %8212 = vmatpush3.bf16.msra.mxu1 %v15821_v30  ;;  %2311 = vrot.lane.b32.xlu0 %v15814_v2, %s9695_s5  ;;  %v1767_v2 = vpop.xlane.xlu0 %1766  ;;  %v9463_v35 = vpop.eup %9462  ;;  %v1797_v17 = vmul.f32 %v9461_v7, %v11389_v36  ;;  %v15839_v7 = vld [vmem:[#allocation80_spill] sm:$0xff] }
 0x5a3   :  { %8213 = vmatprep.subr.bf16.mxu1 %v15822_v59  ;;  %9472 = vrcp.f32 %v1767_v2  ;;  %v1808_v29 = vpack.c.bf16 %v1795_v9, %v1794_v63  ;;  %v9465_v5 = vpop.eup %9464  ;;  %v1796_v37 = vmul.f32 %v9463_v35, %v11371_v15  ;;  %v7628_v15 = vld [vmem:[%s15680_s26 + $0x2f8] sm:$0xff] }
 0x5a4   :  { %9474 = vrcp.f32 %v1769_v41  ;;  %v9467_v30 = vpop.eup %9466  ;;  %v1799_v62 = vmul.f32 %v9465_v5, %v11440_v60  ;;  %v15835_v41 = vld [vmem:[#allocation77_spill] sm:$0xff] }
 0x5a5   :  { %2683 = vperm.xlu1 %8623, %v7561_v57   ;;  %8166 = vmatmul.mubr.bf16.gmra.mrb[24].mxu1 %v893_v1  ;;  %9476 = vrcp.f32 %v11742_v45  ;;  %v15828_v57 = vld [vmem:[#allocation66_spill] sm:$0xff]  ;;  %v1809_v36 = vpack.c.bf16 %v1797_v17, %v1796_v37  ;;  %v1798_v60 = vmul.f32 %v9467_v30, %v11406_v16  ;;  %v9469_v52 = vpop.eup %9468  ;;  %v15829_v16 = vld [vmem:[#allocation68_spill] sm:$0xff]  ;;  %v7660_v63 = vld [vmem:[%s15680_s26 + $0x3f8] sm:$0xff] }
 0x5a6   :  { %8214 = vmatpush3.bf16.msra.mxu1 %v15822_v59  ;;  %3173 = vperm.xlu0 %8624, %v7626_v34   ;;  %v11781_v49 = vpop.xlane.xlu0 %2229  ;;  %9478 = vrcp.f32 %v11771_v33  ;;  %v9471_v45 = vpop.eup %9470  ;;  %v1801_v2 = vmul.f32 %v9469_v52, %v11414_v27  ;;  %v11923_v52 = vld [vmem:[%s15842_s7 + $0x40] sm:$0xff]  }
 0x5a7   :  { %8169 = vmatprep.mubr.bf16.mxu1 %v894_v26  ;;  %8215 = vmatprep.subr.bf16.mxu1 %v15823_v21  ;;  %v1810_v34 = vpack.c.bf16 %v1799_v62, %v1798_v60  ;;  %v7600_v62 = vld [vmem:[%s15680_s26 + $0x218] sm:$0xff] }
 0x5a8   :  { %v11806_v53 = vpop.xlane.xlu1 %2231  ;;  %7891 = vmatprep.subr.bf16.mxu0 %v11923_v52 }
 0x5a9   :  { %3281 = vperm.xlu1 %8623, %v7641_v14   ;;  %v15830_v14 = vld [vmem:[#allocation91_spill] sm:$0xff] }
 0x5aa   :  { %8216 = vmatpush3.bf16.msra.mxu1 %v15823_v21  ;;  %2688 = vperm.xlu0 %8624, %v7562_v24   ;;  %v2226_v58 = vpop.xlane.xlu0 %2225  ;;  %v1800_v21 = vmul.f32 %v9471_v45, %v15830_v14  ;;  %v15831_v24 = vld [vmem:[#allocation78_spill] sm:$0xff]  ;;  %v15843_v45 = vld [vmem:[#allocation7_spill] sm:$0xff] }
 0x5ab   :  { %8217 = vmatprep.subr.bf16.mxu1 %v15824_v56 }
 0x5ac   :  { %v2228_v46 = vpop.xlane.xlu1 %2227  ;;  %v1811_v27 = vpack.c.bf16 %v1801_v2, %v1800_v21  ;;  %v2496_v2 = vld [vmem:[%s15680_s26 + $0x20] sm:$0xff] }
 0x5ad   :  { %2829 = vperm.xlu1 %8623, %v7577_v43   ;;  %8170 = vmatmul.mubr.bf16.gmra.mrb[28].mxu1 %v895_v38  ;;  %9480 = vrcp.f32 %v2228_v46  ;;  %v9473_v54 = vpop.eup %9472  ;;  %v15833_v43 = vld [vmem:[#allocation76_spill] sm:$0xff] }
 0x5ae   :  { %8218 = vmatpush3.bf16.msra.mxu1 %v15824_v56  ;;  %3286 = vperm.xlu0 %8624, %v7642_v13   ;;  %v11817_v4 = vpop.xlane.xlu0 %2237  ;;  %9482 = vrcp.f32 %v2226_v58  ;;  %v9475_v26 = vpop.eup %9474  ;;  %v1802_v51 = vmul.f32 %v9473_v54, %v15831_v24  ;;  %v15837_v58 = vld [vmem:[#allocation82_spill] sm:$0xff]  ;;  %v2494_v46 = vld [vmem:[%s15680_s26 + $0x10] sm:$0xff] }
 0x5af   :  { %8219 = vmatprep.subr.bf16.mxu1 %v15825_v47  ;;  %8221 = vmatprep.mubr.bf16.mxu1 %v1806_v0  ;;  %v1803_v56 = vmul.f32 %v9475_v26, %v15833_v43  ;;  %v9477_v38 = vpop.eup %9476  ;;  %v11929_v54 = vld [vmem:[%s15842_s7] sm:$0xff]   ;;  %v11943_v26 = vld [vmem:[%s15842_s7 + $0x48] sm:$0xff]   ;;  %9484 = vrcp.f32 %v11806_v53  ;;  %v15947_v53 = vld [vmem:[#allocation57_spill] sm:$0xff] }
 0x5b0   :  { %v9479_v13 = vpop.eup %9478  ;;  %7892 = vmatpush3.bf16.msra.mxu0 %v11929_v54 }
 0x5b1   :  { %3394 = vperm.xlu1 %8623, %v7657_v18   ;;  %v1812_v39 = vpack.c.bf16 %v1803_v56, %v1802_v51  ;;  %v15834_v18 = vld [vmem:[#allocation72_spill] sm:$0xff]  ;;  %v1805_v44 = vmul.f32 %v9479_v13, %v15836_v3  ;;  %v7602_v51 = vld [vmem:[%s15680_s26 + $0x228] sm:$0xff]  ;;  %7893 = vmatprep.subr.bf16.mxu0 %v11943_v26  ;;  %v15850_v13 = vld [vmem:[#allocation18_spill] sm:$0xff] }
 0x5b2   :  { %8220 = vmatpush3.bf16.msra.mxu1 %v15825_v47  ;;  %2834 = vperm.xlu0 %8624, %v7578_v10   ;;  %v11837_v59 = vpop.xlane.xlu0 %2233  ;;  %v1804_v47 = vmul.f32 %v9477_v38, %v15835_v41  ;;  %v11973_v56 = vld [vmem:[%s15842_s7 + $0x50] sm:$0xff]  }
 0x5b3   :  { %8269 = vmatprep.subr.bf16.mxu1 %v15826_v19  ;;  %v12001_v3 = vld [vmem:[%s15842_s7 + $0x10] sm:$0xff]  }
 0x5b5   :  { %2942 = vperm.xlu1 %8623, %v7593_v23   ;;  %8222 = vmatmul.mubr.bf16.vlgmr.msra.gmra.mrb[16].mxu1 %v1807_v32  ;;  %v11839_v1 = vpop.xlane.xlu1 %2239  ;;  %v7595_v23 = vld [vmem:[%s15680_s26 + $0x1f0] sm:$0xff]  ;;  %v15838_v32 = vld [vmem:[#allocation74_spill] sm:$0xff] }
 0x5b6   :  { %8270 = vmatpush3.bf16.msra.mxu1 %v15826_v19  ;;  %3399 = vperm.xlu0 %8624, %v7658_v42   ;;  %v1813_v42 = vpack.c.bf16 %v1805_v44, %v1804_v47  ;;  %v12006_v44 = vld [vmem:[%s15842_s7 + $0x58] sm:$0xff]  }
 0x5b7   :  { %8225 = vmatprep.mubr.bf16.mxu1 %v1808_v29  ;;  %8271 = vmatprep.subr.bf16.mxu1 %v15827_v31  ;;  %v9481_v28 = vpop.eup %9480 }
 0x5b8   :  { %v9483_v10 = vpop.eup %9482  ;;  %v2274_v9 = vmul.f32 %v9481_v28, %v15837_v58 }
 0x5b9   :  { %3178 = vperm.xlu1 %8623, %v7627_v22   ;;  %v11858_v33 = vpop.xlane.xlu1 %2235  ;;  %v2273_v35 = vmul.f32 %v9483_v10, %v15839_v7  ;;  %v7599_v22 = vld [vmem:[%s15680_s26 + $0x210] sm:$0xff]  ;;  %v12019_v7 = vld [vmem:[%s15842_s7 + $0x18] sm:$0xff]  }
 0x5ba   :  { %8272 = vmatpush3.bf16.msra.mxu1 %v15827_v31  ;;  %2947 = vperm.xlu0 %8624, %v7594_v40   ;;  %v2473_v31 = vlaneseq  ;;  %v7596_v40 = vld [vmem:[%s15680_s26 + $0x1f8] sm:$0xff]  ;;  %15858 = vst [vmem:[#allocation61_spill] sm:$0xff] %v12019_v7  ;;  %9486 = vrcp.f32 %v11858_v33 }
 0x5bb   :  { %8273 = vmatprep.subr.bf16.mxu1 %v15828_v57  ;;  %v2289_v5 = vpack.c.bf16 %v2274_v9, %v2273_v35  ;;  %v15855_v9 = vld [vmem:[#allocation25_spill] sm:$0xff]  ;;  %v15859_v35 = vld [vmem:[#allocation23_spill] sm:$0xff]  ;;  %9488 = vrcp.f32 %v11781_v49 }
 0x5bc   :  { %v11907_v37 = vshrl.u32 %v2473_v31, 7  ;;  %9490 = vrcp.f32 %v11837_v59 }
 0x5bd   :  { %2693 = vperm.xlu1 %8623, %v7563_v61   ;;  %8226 = vmatmul.mubr.bf16.gmra.mrb[20].mxu1 %v1809_v36  ;;  %v11850_v25 = vpop.xlane.xlu0 %2245  ;;  %v7601_v61 = vld [vmem:[%s15680_s26 + $0x220] sm:$0xff]  ;;  %9492 = vrcp.f32 %v11839_v1 }
 0x5be   :  { %8274 = vmatpush3.bf16.msra.mxu1 %v15828_v57  ;;  %3183 = vperm.xlu0 %8624, %v7628_v15   ;;  %v15840_v57 = vld [vmem:[#allocation4_spill] sm:$0xff]  ;;  %vm2733_vm2 = vcmp.lt.s32.totalorder %v11907_v37, 7  ;;  %vm2475_vm3 = vcmp.lt.s32.totalorder %v11907_v37, 1 }
 0x5bf   :  { %8229 = vmatprep.mubr.bf16.mxu1 %v1810_v34  ;;  %8275 = vmatprep.subr.bf16.mxu1 %v15829_v16  ;;  %v2720_v36 = vrot.slane %v15840_v57, 1  ;;  %v15497_v34 = vrot.slane %v15843_v45, 1  ;;  %v2460_v14 = vrot.slane %v15840_v57, 7 }
 0x5c1   :  { %3291 = vperm.xlu1 %8623, %v7643_v11   ;;  %v11869_v0 = vpop.xlane.xlu1 %2247  ;;  %v11871_v8 = vpop.xlane.xlu0 %2241  ;;  %v2495_v11 = vld [vmem:[%s15680_s26 + $0x18] sm:$0xff] }
 0x5c2   :  { %8276 = vmatpush3.bf16.msra.mxu1 %v15829_v16  ;;  %2698 = vperm.xlu0 %8624, %v7564_v48   ;;  %v15844_v16 = vld [vmem:[#allocation5_spill] sm:$0xff] }
 0x5c3   :  { %8277 = vmatprep.subr.bf16.mxu1 %v15832_v20  ;;  %v2719_v48 = vrot.slane %v15844_v16, 1  ;;  %v2459_v47 = vrot.slane %v15844_v16, 7 }
 0x5c5   :  { %2839 = vperm.xlu1 %8623, %v7579_v55   ;;  %8230 = vmatmul.mubr.bf16.gmra.mrb[24].mxu1 %v1811_v27  ;;  %v11891_v29 = vpop.xlane.xlu1 %2243  ;;  %v11958_v55 = vsel %vm2733_vm2, %v2720_v36, %v15497_v34  ;;  %v11964_v27 = vld [vmem:[%s15842_s7 + $0x8] sm:$0xff]   ;;  %v11977_v38 = vsel %vm2733_vm2, %v2719_v48, %v2720_v36 }
 0x5c6   :  { %8278 = vmatpush3.bf16.msra.mxu1 %v15832_v20  ;;  %3296 = vperm.xlu0 %8624, %v7644_v12   ;;  %15847 = vst [vmem:[#allocation24_spill] sm:$0xff] %v11958_v55  ;;  %v15496_v20 = vrot.slane %v15843_v45, 7  ;;  %v15848_v12 = vld [vmem:[#allocation20_spill] sm:$0xff]  ;;  %15849 = vst [vmem:[#allocation26_spill] sm:$0xff] %v11977_v38  ;;  %9494 = vrcp.f32 %v11891_v29 }
 0x5c7   :  { %8233 = vmatprep.mubr.bf16.mxu1 %v1812_v39  ;;  %8279 = vmatprep.subr.bf16.mxu1 %v15834_v18  ;;  %v3189_v43 = vmul.f32 %v15848_v12, %v11958_v55  ;;  %v3188_v39 = vmul.f32 %v15850_v13, %v11977_v38  ;;  %v7603_v13 = vld [vmem:[%s15680_s26 + $0x230] sm:$0xff]  ;;  %9496 = vrcp.f32 %v11817_v4 }
 0x5c8   :  { %7894 = vmatpush3.bf16.msra.mxu0 %v11964_v27  ;;  %v11996_v10 = vsel %vm2475_vm3, %v2460_v14, %v15496_v20  ;;  %9498 = vrcp.f32 %v11871_v8  ;;  %v7608_v8 = vld [vmem:[%s15680_s26 + $0x258] sm:$0xff] }
 0x5c9   :  { %3404 = vperm.xlu1 %8623, %v7659_v50   ;;  %v11884_v19 = vpop.xlane.xlu0 %2253  ;;  %7895 = vmatprep.subr.bf16.mxu0 %v11973_v56  ;;  %15854 = vst [vmem:[#allocation37_spill] sm:$0xff] %v11996_v10  ;;  %v8625_v58 = vpack.i.bf16 %v3189_v43, %v3188_v39  ;;  %v15867_v39 = vld [vmem:[#allocation32_spill] sm:$0xff]  ;;  %9500 = vrcp.f32 %v11869_v0 }
 0x5ca   :  { %8280 = vmatpush3.bf16.msra.mxu1 %v15834_v18  ;;  %2844 = vperm.xlu0 %8624, %v7580_v6   ;;  %v2497_v18 = vld [vmem:[%s15680_s26 + $0x28] sm:$0xff] }
 0x5cb   :  { %8281 = vmatprep.subr.bf16.mxu1 %v15838_v32  ;;  %v15853_v6 = vld [vmem:[#allocation3_spill] sm:$0xff] }
 0x5cc   :  { %v15495_v41 = vrot.slane %v15853_v6, 1  ;;  %7896 = vmatpush3.bf16.msra.mxu0 %v12001_v3  ;;  %v15948_v33 = vrot.slane %v15853_v6, 1 }
 0x5cd   :  { %2952 = vperm.xlu1 %8623, %v7595_v23   ;;  %8234 = vmatmul.mubr.bf16.gmra.mrb[28].mxu1 %v1813_v42  ;;  %v11900_v17 = vpop.xlane.xlu0 %2249  ;;  %v3302_v23 = vmul.f32 %v15855_v9, %v11996_v10 }
 0x5ce   :  { %8282 = vmatpush3.bf16.msra.mxu1 %v15838_v32  ;;  %3409 = vperm.xlu0 %8624, %v7660_v63   ;;  %v15856_v32 = vld [vmem:[#allocation22_spill] sm:$0xff]  ;;  %v12014_v63 = vsel %vm2475_vm3, %v2459_v47, %v2460_v14  ;;  %v12046_v43 = vsel %vm2733_vm2, %v15495_v41, %v2719_v48 }
 0x5cf   :  { %8285 = vmatprep.mubr.bf16.mxu1 %v2289_v5  ;;  %v2703_v42 = vmul.f32 %v15856_v32, %v15853_v6  ;;  %15857 = vst [vmem:[#allocation40_spill] sm:$0xff] %v12014_v63  ;;  %v3301_v5 = vmul.f32 %v15859_v35, %v12014_v63  ;;  %7897 = vmatprep.subr.bf16.mxu0 %v12006_v44  ;;  %15866 = vst [vmem:[#allocation63_spill] sm:$0xff] %v12046_v43  ;;  %v12062_v48 = vld [vmem:[%s15842_s7 + $0x20] sm:$0xff]  }
 0x5d0   :  { %7898 = vmatpush3.bf16.msra.mxu0 %v12019_v7  ;;  %15871 = vst [vmem:[#allocation69_spill] sm:$0xff] %v12062_v48  ;;  %v15878_v35 = vld [vmem:[#allocation6_spill] sm:$0xff] }
 0x5d1   :  { %v11902_v30 = vpop.xlane.xlu1 %2255  ;;  %3005 = vperm.xlu1 %8623, %v7599_v22   ;;  %v2722_v12 = vrot.slane %v15878_v35, 1  ;;  %v15890_v32 = vld [vmem:[#allocation38_spill] sm:$0xff] }
 0x5d2   :  { %2957 = vperm.xlu0 %8624, %v7596_v40   ;;  %v15862_v40 = vld [vmem:[#allocation27_spill] sm:$0xff] }
 0x5d5   :  { %2520 = vperm.xlu1 %8623, %v2494_v46   ;;  %v11916_v15 = vpop.xlane.xlu1 %2251  ;;  %v11918_v60 = vpop.permute.xlu0 %2912  ;;  %v2704_v46 = vmul.f32 %v15862_v40, %v15844_v16 }
 0x5d6   :  { %15841 = vst [vmem:[#allocation86_spill] sm:$0xff] %v11918_v60  ;;  %3010 = vperm.xlu0 %8624, %v7600_v62   ;;  %v8635_v62 = vpack.i.bf16 %v3302_v23, %v3301_v5  ;;  %v15870_v5 = vld [vmem:[#allocation30_spill] sm:$0xff]  ;;  %9502 = vrcp.f32 %v11916_v15  ;;  %v7662_v15 = vld [vmem:[%s15680_s26 + $0x408] sm:$0xff] }
 0x5d7   :  { %9504 = vrcp.f32 %v11850_v25 }
 0x5d8   :  { %9506 = vrcp.f32 %v11900_v17 }
 0x5d9   :  { %3015 = vperm.xlu1 %8623, %v7601_v61   ;;  %v11947_v21 = vpop.permute.xlu1 %3108  ;;  %v11949_v24 = vpop.permute.xlu0 %3113  ;;  %v15863_v61 = vld [vmem:[#allocation31_spill] sm:$0xff]  ;;  %9508 = vrcp.f32 %v11902_v30 }
 0x5da   :  { %15845 = vst [vmem:[#allocation19_spill] sm:$0xff] %v11947_v21  ;;  %15846 = vst [vmem:[#allocation21_spill] sm:$0xff] %v11949_v24  ;;  %2525 = vperm.xlu0 %8624, %v2495_v11   ;;  %v3415_v36 = vmul.f32 %v15863_v61, %v15843_v45  ;;  %v8630_v11 = vpack.i.bf16 %v2704_v46, %v2703_v42  ;;  %v2849_v46 = vmul.f32 %v15870_v5, %v12046_v43  ;;  %v15887_v5 = vld [vmem:[#allocation36_spill] sm:$0xff] }
 0x5db   :  { %9510 = vrcp.f32 %v11884_v19 }
 0x5dd   :  { %2530 = vperm.xlu1 %8623, %v2496_v2   ;;  %v11982_v28 = vpop.permute.xlu1 %2623  ;;  %v11984_v50 = vpop.permute.xlu0 %2628  ;;  %v15864_v2 = vld [vmem:[#allocation28_spill] sm:$0xff] }
 0x5de   :  { %15851 = vst [vmem:[#allocation29_spill] sm:$0xff] %v11982_v28  ;;  %15852 = vst [vmem:[#allocation34_spill] sm:$0xff] %v11984_v50  ;;  %3020 = vperm.xlu0 %8624, %v7602_v51   ;;  %v2850_v14 = vmul.f32 %v15864_v2, %v11977_v38  ;;  %v12039_v51 = vld [vmem:[%s15842_s7 + $0x60] sm:$0xff]   ;;  %v15884_v2 = vrot.slane %v15843_v45, 1 }
 0x5df   :  { %15865 = vst [vmem:[#allocation88_spill] sm:$0xff] %v12039_v51  ;;  %7899 = vmatprep.subr.bf16.mxu0 %v12039_v51 }
 0x5e0   :  { %v8640_v20 = vpack.i.bf16 %v2850_v14, %v2849_v46  ;;  %7900 = vmatpush3.bf16.msra.mxu0 %v12062_v48  ;;  %v15898_v48 = vrot.slane %v15843_v45, 7 }
 0x5e1   :  { %8626 = vrot.lane.b32.xlu1 %v8625_v58, %s9695_s5  ;;  %v12025_v22 = vpop.permute.xlu1 %3221  ;;  %v12027_v31 = vpop.permute.xlu0 %3226  ;;  %v12070_v58 = vld [vmem:[%s15842_s7 + $0x68] sm:$0xff]  }
 0x5e2   :  { %15860 = vst [vmem:[#allocation89_spill] sm:$0xff] %v12025_v22  ;;  %15861 = vst [vmem:[#allocation90_spill] sm:$0xff] %v12027_v31  ;;  %2535 = vperm.xlu0 %8624, %v2497_v18   ;;  %v3414_v18 = vmul.f32 %v15867_v39, %v15840_v57  ;;  %7901 = vmatprep.subr.bf16.mxu0 %v12070_v58  ;;  %v12101_v39 = vld [vmem:[%s15842_s7 + $0x70] sm:$0xff]  }
 0x5e3   :  { %15873 = vst [vmem:[#allocation71_spill] sm:$0xff] %v12070_v58  ;;  %15881 = vst [vmem:[#allocation64_spill] sm:$0xff] %v12101_v39  ;;  %v2499_v58 = vld [vmem:[%s15680_s26 + $0x38] sm:$0xff] }
 0x5e4   :  { %v8645_v41 = vpack.i.bf16 %v3415_v36, %v3414_v18  ;;  %v15877_v18 = vld [vmem:[#allocation35_spill] sm:$0xff] }
 0x5e5   :  { %8636 = vrot.lane.b32.xlu1 %v8635_v62, %s9693_s4  ;;  %v12052_v23 = vpop.permute.xlu1 %2769  ;;  %v12054_v42 = vpop.permute.xlu0 %2774  ;;  %v15872_v62 = vld [vmem:[#allocation33_spill] sm:$0xff] }
 0x5e6   :  { %15868 = vst [vmem:[#allocation65_spill] sm:$0xff] %v12052_v23  ;;  %15869 = vst [vmem:[#allocation67_spill] sm:$0xff] %v12054_v42  ;;  %8631 = vrot.lane.b32.xlu0 %v8630_v11, %s9695_s5  ;;  %v2963_v34 = vmul.f32 %v15872_v62, %v12014_v63  ;;  %v15874_v11 = vrot.slane %v15853_v6, 7 }
 0x5e8   :  { %v12077_v9 = vsel %vm2475_vm3, %v15874_v11, %v2459_v47  ;;  %v12094_v47 = vld [vmem:[%s15842_s7 + $0x28] sm:$0xff]   ;;  %v12113_v11 = vsel %vm2733_vm2, %v15884_v2, %v2722_v12  ;;  %v7604_v2 = vld [vmem:[%s15680_s26 + $0x238] sm:$0xff] }
 0x5e9   :  { %8646 = vrot.lane.b32.xlu1 %v8645_v41, %s9694_s28  ;;  %v12080_v36 = vpop.permute.xlu1 %3334  ;;  %v12082_v14 = vpop.permute.xlu0 %3339  ;;  %v2962_v46 = vmul.f32 %v15877_v18, %v12077_v9  ;;  %15879 = vst [vmem:[#allocation62_spill] sm:$0xff] %v12094_v47  ;;  %v15880_v41 = vld [vmem:[#allocation9_spill] sm:$0xff]  ;;  %7902 = vmatpush3.bf16.msra.mxu0 %v12094_v47  ;;  %v2462_v18 = vrot.slane %v15878_v35, 7  ;;  %15885 = vst [vmem:[#allocation91_spill] sm:$0xff] %v12113_v11  ;;  %v3190_v40 = vmul.f32 %v15887_v5, %v12113_v11 }
 0x5ea   :  { %15875 = vst [vmem:[#allocation73_spill] sm:$0xff] %v12080_v36  ;;  %15876 = vst [vmem:[#allocation75_spill] sm:$0xff] %v12082_v14  ;;  %8641 = vrot.lane.b32.xlu0 %v8640_v20, %s9693_s4  ;;  %7903 = vmatprep.subr.bf16.mxu0 %v12101_v39  ;;  %v12147_v5 = vld [vmem:[%s15842_s7 + $0x78] sm:$0xff]   ;;  %v15894_v47 = vrot.slane %v15880_v41, 7  ;;  %v3413_v17 = vmul.f32 %v12082_v14, %v15844_v16 }
 0x5eb   :  { %v8650_v61 = vpack.i.bf16 %v2963_v34, %v2962_v46  ;;  %v12123_v46 = vld [vmem:[%s15842_s7 + $0x30] sm:$0xff]   ;;  %15893 = vst [vmem:[#allocation77_spill] sm:$0xff] %v12147_v5 }
 0x5ec   :  { %15886 = vst [vmem:[#allocation78_spill] sm:$0xff] %v12123_v46 }
 0x5ed   :  { %3025 = vperm.xlu1 %8623, %v7603_v13   ;;  %v12104_v20 = vpop.permute.xlu1 %2882  ;;  %v12106_v62 = vpop.permute.xlu0 %2887  ;;  %v2498_v13 = vld [vmem:[%s15680_s26 + $0x30] sm:$0xff]  ;;  %7904 = vmatpush3.bf16.msra.mxu0 %v12123_v46 }
 0x5ee   :  { %15882 = vst [vmem:[#allocation66_spill] sm:$0xff] %v12104_v20  ;;  %15883 = vst [vmem:[#allocation68_spill] sm:$0xff] %v12106_v62  ;;  %8651 = vrot.lane.b32.xlu0 %v8650_v61, %s9694_s28  ;;  %v15888_v61 = vrot.slane %v15880_v41, 1  ;;  %7905 = vmatprep.subr.bf16.mxu0 %v12147_v5  ;;  %v15904_v5 = vld [vmem:[#allocation41_spill] sm:$0xff] }
 0x5ef   :  { %v2705_v20 = vmul.f32 %v15904_v5, %v15840_v57  ;;  %v15910_v5 = vld [vmem:[#allocation45_spill] sm:$0xff] }
 0x5f0   :  { %v12135_v34 = vsel %vm2733_vm2, %v2722_v12, %v15888_v61  ;;  %v12153_v12 = vsel %vm2475_vm3, %v2462_v18, %v15894_v47  ;;  %v12170_v47 = vsel %vm2475_vm3, %v15898_v48, %v2462_v18  ;;  %v15905_v18 = vld [vmem:[#allocation46_spill] sm:$0xff] }
 0x5f1   :  { %15889 = vst [vmem:[#allocation70_spill] sm:$0xff] %v12135_v34  ;;  %v3191_v38 = vmul.f32 %v15890_v32, %v12135_v34  ;;  %2540 = vperm.xlu1 %8623, %v2498_v13   ;;  %v12140_v63 = vpop.permute.xlu1 %3148  ;;  %v12142_v39 = vpop.permute.xlu0 %3153  ;;  %15895 = vst [vmem:[#allocation92_spill] sm:$0xff] %v12153_v12  ;;  %v12158_v13 = vld [vmem:[%s15842_s7 + $0x38] sm:$0xff]   ;;  %v15897_v32 = vld [vmem:[#allocation42_spill] sm:$0xff]  ;;  %v3417_v7 = vmul.f32 %v15905_v18, %v15880_v41  ;;  %v2966_v59 = vmul.f32 %v11918_v60, %v12153_v12 }
 0x5f2   :  { %15891 = vst [vmem:[#allocation76_spill] sm:$0xff] %v12140_v63  ;;  %15892 = vst [vmem:[#allocation72_spill] sm:$0xff] %v12142_v39  ;;  %3030 = vperm.xlu0 %8624, %v7604_v2   ;;  %v3304_v46 = vmul.f32 %v15897_v32, %v12153_v12  ;;  %v15900_v2 = vld [vmem:[#allocation39_spill] sm:$0xff]  ;;  %7906 = vmatpush3.bf16.msra.mxu0 %v12158_v13  ;;  %v15954_v60 = vld [vmem:[#allocation16_spill] sm:$0xff] }
 0x5f3   :  { %15896 = vst [vmem:[#allocation82_spill] sm:$0xff] %v12158_v13  ;;  %v8655_v61 = vpack.i.bf16 %v3191_v38, %v3190_v40  ;;  %15899 = vst [vmem:[#allocation74_spill] sm:$0xff] %v12170_v47  ;;  %v2706_v51 = vmul.f32 %v15900_v2, %v15843_v45  ;;  %v15901_v38 = vld [vmem:[#allocation43_spill] sm:$0xff]  ;;  %v15906_v45 = vld [vmem:[#allocation44_spill] sm:$0xff] }
 0x5f4   :  { %v3303_v40 = vmul.f32 %v15901_v38, %v12170_v47  ;;  %v2852_v13 = vmul.f32 %v15906_v45, %v12113_v11  ;;  %v15907_v38 = vld [vmem:[#allocation47_spill] sm:$0xff] }
 0x5f5   :  { %8656 = vrot.lane.b32.xlu1 %v8655_v61, %s9695_s5  ;;  %v12178_v32 = vpop.permute.xlu1 %2668  ;;  %v12180_v62 = vpop.permute.xlu0 %2663  ;;  %v8660_v2 = vpack.i.bf16 %v2706_v51, %v2705_v20  ;;  %v3416_v39 = vmul.f32 %v15907_v38, %v15878_v35  ;;  %v15911_v51 = vld [vmem:[#allocation48_spill] sm:$0xff] }
 0x5f6   :  { %15902 = vst [vmem:[#allocation80_spill] sm:$0xff] %v12178_v32  ;;  %15903 = vst [vmem:[#allocation5_spill] sm:$0xff] %v12180_v62  ;;  %2545 = vperm.xlu0 %8624, %v2499_v58   ;;  %v8665_v48 = vpack.i.bf16 %v3304_v46, %v3303_v40  ;;  %v2851_v58 = vmul.f32 %v15910_v5, %v11958_v55  ;;  %v2965_v20 = vmul.f32 %v15911_v51, %v12170_v47  ;;  %v2500_v5 = vld [vmem:[%s15680_s26 + $0x40] sm:$0xff] }
 0x5f7   :  { %v8675_v46 = vpack.i.bf16 %v3417_v7, %v3416_v39  ;;  %v15923_v47 = vrot.slane %v15880_v41, 1 }
 0x5f8   :  { %v8670_v40 = vpack.i.bf16 %v2852_v13, %v2851_v58  ;;  %v2492_v58 = vld [vmem:[%s15680_s26] sm:$0xff] }
 0x5f9   :  { %8666 = vrot.lane.b32.xlu1 %v8665_v48, %s9693_s4  ;;  %v12191_v61 = vpop.permute.xlu1 %3266  ;;  %v12193_v62 = vpop.permute.xlu0 %3261  ;;  %v15914_v48 = vld [vmem:[#allocation49_spill] sm:$0xff] }
 0x5fa   :  { %15908 = vst [vmem:[#allocation6_spill] sm:$0xff] %v12191_v61  ;;  %15909 = vst [vmem:[#allocation101_spill] sm:$0xff] %v12193_v62  ;;  %8661 = vrot.lane.b32.xlu0 %v8660_v2, %s9695_s5  ;;  %v2964_v45 = vmul.f32 %v15914_v48, %v11996_v10  ;;  %v7597_v2 = vld [vmem:[%s15680_s26 + $0x200] sm:$0xff]  ;;  %v15920_v48 = vld [vmem:[#allocation11_spill] sm:$0xff] }
 0x5fb   :  { %v15928_v10 = vld [vmem:[#allocation51_spill] sm:$0xff] }
 0x5fc   :  { %v8680_v7 = vpack.i.bf16 %v2965_v20, %v2964_v45  ;;  %v15919_v45 = vld [vmem:[#allocation8_spill] sm:$0xff] }
 0x5fd   :  { %8676 = vrot.lane.b32.xlu1 %v8675_v46, %s9694_s28  ;;  %v12201_v18 = vpop.permute.xlu1 %2814  ;;  %v12203_v38 = vpop.permute.xlu0 %2809  ;;  %v7598_v46 = vld [vmem:[%s15680_s26 + $0x208] sm:$0xff]  ;;  %v2724_v20 = vrot.slane %v15919_v45, 1  ;;  %v2464_v11 = vrot.slane %v15919_v45, 7 }
 0x5fe   :  { %15912 = vst [vmem:[#allocation102_spill] sm:$0xff] %v12201_v18  ;;  %15913 = vst [vmem:[#allocation103_spill] sm:$0xff] %v12203_v38  ;;  %8671 = vrot.lane.b32.xlu0 %v8670_v40, %s9693_s4 }
 0x601   :  { %2995 = vperm.xlu1 %8623, %v7597_v2   ;;  %v12211_v39 = vpop.permute.xlu1 %3379  ;;  %v12213_v13 = vpop.permute.xlu0 %3374  ;;  %v7605_v2 = vld [vmem:[%s15680_s26 + $0x240] sm:$0xff] }
 0x602   :  { %15915 = vst [vmem:[#allocation104_spill] sm:$0xff] %v12211_v39  ;;  %15916 = vst [vmem:[#allocation105_spill] sm:$0xff] %v12213_v13  ;;  %8681 = vrot.lane.b32.xlu0 %v8680_v7, %s9694_s28  ;;  %v2493_v7 = vld [vmem:[%s15680_s26 + $0x8] sm:$0xff]  ;;  %v15933_v13 = vld [vmem:[#allocation54_spill] sm:$0xff] }
 0x605   :  { %2510 = vperm.xlu1 %8623, %v2492_v58   ;;  %v12222_v40 = vpop.permute.xlu1 %2927  ;;  %v12224_v51 = vpop.permute.xlu0 %2922  ;;  %v16008_v14 = vld [vmem:[#allocation103_spill] sm:$0xff] }
 0x606   :  { %15917 = vst [vmem:[#allocation106_spill] sm:$0xff] %v12222_v40  ;;  %15918 = vst [vmem:[#allocation107_spill] sm:$0xff] %v12224_v51  ;;  %3000 = vperm.xlu0 %8624, %v7598_v46   ;;  %v12243_v46 = vsel %vm2733_vm2, %v15923_v47, %v2724_v20 }
 0x607   :  { %15924 = vst [vmem:[#allocation110_spill] sm:$0xff] %v12243_v46 }
 0x609   :  { %3035 = vperm.xlu1 %8623, %v7605_v2   ;;  %v12234_v55 = vpop.permute.xlu1 %3158  ;;  %v12236_v58 = vpop.permute.xlu0 %3163  ;;  %v15925_v2 = vld [vmem:[#allocation50_spill] sm:$0xff] }
 0x60a   :  { %15921 = vst [vmem:[#allocation108_spill] sm:$0xff] %v12234_v55  ;;  %15922 = vst [vmem:[#allocation109_spill] sm:$0xff] %v12236_v58  ;;  %2515 = vperm.xlu0 %8624, %v2493_v7   ;;  %v3192_v57 = vmul.f32 %v15925_v2, %v12243_v46  ;;  %v7606_v58 = vld [vmem:[%s15680_s26 + $0x248] sm:$0xff]  ;;  %v15926_v55 = vrot.slane %v15920_v48, 1  ;;  %v15931_v2 = vrot.slane %v15920_v48, 7 }
 0x60c   :  { %v12258_v47 = vsel %vm2733_vm2, %v2724_v20, %v15926_v55  ;;  %v12270_v38 = vsel %vm2475_vm3, %v2464_v11, %v15931_v2  ;;  %v2501_v20 = vld [vmem:[%s15680_s26 + $0x48] sm:$0xff] }
 0x60d   :  { %15927 = vst [vmem:[#allocation111_spill] sm:$0xff] %v12258_v47  ;;  %v3193_v7 = vmul.f32 %v15928_v10, %v12258_v47  ;;  %2550 = vperm.xlu1 %8623, %v2500_v5   ;;  %v12262_v51 = vpop.permute.xlu1 %2678  ;;  %v12264_v40 = vpop.permute.xlu0 %2673  ;;  %15932 = vst [vmem:[#allocation114_spill] sm:$0xff] %v12270_v38  ;;  %v3306_v55 = vmul.f32 %v15933_v13, %v12270_v38  ;;  %v15934_v5 = vrot.slane %v15880_v41, 7  ;;  %v15937_v2 = vld [vmem:[#allocation55_spill] sm:$0xff]  ;;  %v15940_v13 = vld [vmem:[#allocation53_spill] sm:$0xff] }
 0x60e   :  { %15929 = vst [vmem:[#allocation112_spill] sm:$0xff] %v12262_v51  ;;  %15930 = vst [vmem:[#allocation113_spill] sm:$0xff] %v12264_v40  ;;  %3040 = vperm.xlu0 %8624, %v7606_v58   ;;  %v15936_v40 = vld [vmem:[#allocation52_spill] sm:$0xff]  ;;  %v2707_v38 = vmul.f32 %v15940_v13, %v15878_v35 }
 0x60f   :  { %v8685_v18 = vpack.i.bf16 %v3193_v7, %v3192_v57  ;;  %v12281_v10 = vsel %vm2475_vm3, %v15934_v5, %v2464_v11  ;;  %v2708_v51 = vmul.f32 %v15936_v40, %v15880_v41  ;;  %v15941_v11 = vld [vmem:[#allocation58_spill] sm:$0xff]  ;;  %v15942_v41 = vld [vmem:[#allocation56_spill] sm:$0xff] }
 0x610   :  { %15935 = vst [vmem:[#allocation115_spill] sm:$0xff] %v12281_v10  ;;  %v3305_v58 = vmul.f32 %v15937_v2, %v12281_v10  ;;  %v3419_v5 = vmul.f32 %v15941_v11, %v15920_v48  ;;  %v2854_v2 = vmul.f32 %v15942_v41, %v12243_v46 }
 0x611   :  { %8686 = vrot.lane.b32.xlu1 %v8685_v18, %s9695_s5  ;;  %v12288_v57 = vpop.permute.xlu1 %3276  ;;  %v12290_v7 = vpop.permute.xlu0 %3271  ;;  %v8690_v40 = vpack.i.bf16 %v2708_v51, %v2707_v38  ;;  %v15943_v18 = vld [vmem:[#allocation2_spill] sm:$0xff]  ;;  %v2853_v38 = vmul.f32 %v15947_v53, %v12135_v34  ;;  %v2701_v53 = vmul.f32 %v11982_v28, %v15954_v60 }
 0x612   :  { %15938 = vst [vmem:[#allocation116_spill] sm:$0xff] %v12288_v57  ;;  %15939 = vst [vmem:[#allocation117_spill] sm:$0xff] %v12290_v7  ;;  %2555 = vperm.xlu0 %8624, %v2501_v20   ;;  %v8695_v47 = vpack.i.bf16 %v3306_v55, %v3305_v58  ;;  %v15536_v57 = vrot.slane %v15943_v18, 1  ;;  %v15944_v7 = vld [vmem:[#allocation59_spill] sm:$0xff]  ;;  %v3187_v58 = vmul.f32 %v11949_v24, %v12046_v43 }
 0x613   :  { %v3418_v39 = vmul.f32 %v15944_v7, %v15919_v45  ;;  %v8700_v11 = vpack.i.bf16 %v2854_v2, %v2853_v38  ;;  %v15538_v7 = vrot.slane %v15943_v18, 7 }
 0x614   :  { %v12318_v51 = vsel %vm2733_vm2, %v15536_v57, %v15948_v33  ;;  %v3300_v57 = vmul.f32 %v12027_v31, %v12077_v9  ;;  %v15960_v31 = vld [vmem:[#allocation79_spill] sm:$0xff] }
 0x615   :  { %8696 = vrot.lane.b32.xlu1 %v8695_v47, %s9693_s4  ;;  %v12305_v55 = vpop.permute.xlu1 %2824  ;;  %v12307_v20 = vpop.permute.xlu0 %2819  ;;  %15949 = vst [vmem:[#allocation119_spill] sm:$0xff] %v12318_v51  ;;  %v8705_v49 = vpack.i.bf16 %v3419_v5, %v3418_v39  ;;  %v3186_v47 = vmul.f32 %v11947_v21, %v12318_v51  ;;  %v15952_v39 = vld [vmem:[#allocation60_spill] sm:$0xff]  ;;  %v15953_v5 = vrot.slane %v15853_v6, 7 }
 0x616   :  { %15945 = vst [vmem:[#allocation2_spill] sm:$0xff] %v12305_v55  ;;  %15946 = vst [vmem:[#allocation118_spill] sm:$0xff] %v12307_v20  ;;  %8691 = vrot.lane.b32.xlu0 %v8690_v40, %s9695_s5  ;;  %v2967_v40 = vmul.f32 %v15952_v39, %v12281_v10 }
 0x617   :  { %v12341_v2 = vsel %vm2475_vm3, %v15538_v7, %v15953_v5  ;;  %v8715_v38 = vpack.i.bf16 %v3187_v58, %v3186_v47  ;;  %v2702_v5 = vmul.f32 %v11984_v50, %v15943_v18  ;;  %v9485_v7 = vpop.eup %9484 }
 0x618   :  { %v8710_v39 = vpack.i.bf16 %v2967_v40, %v2966_v59  ;;  %v9487_v47 = vpop.eup %9486  ;;  %v15957_v40 = vld [vmem:[#allocation81_spill] sm:$0xff] }
 0x619   :  { %8706 = vrot.lane.b32.xlu1 %v8705_v49, %s9694_s28  ;;  %v12329_v41 = vpop.permute.xlu1 %3389  ;;  %v12331_v33 = vpop.permute.xlu0 %3384  ;;  %v3299_v49 = vmul.f32 %v12025_v22, %v12341_v2  ;;  %v2276_v28 = vmul.f32 %v9485_v7, %v15957_v40  ;;  %v8720_v50 = vpack.i.bf16 %v2702_v5, %v2701_v53  ;;  %v15959_v22 = vld [vmem:[#allocation87_spill] sm:$0xff]  ;;  %v7607_v7 = vld [vmem:[%s15680_s26 + $0x250] sm:$0xff]  ;;  %v15961_v53 = vld [vmem:[#allocation85_spill] sm:$0xff] }
 0x61a   :  { %15950 = vst [vmem:[#allocation120_spill] sm:$0xff] %v12329_v41  ;;  %15951 = vst [vmem:[#allocation121_spill] sm:$0xff] %v12331_v33  ;;  %8701 = vrot.lane.b32.xlu0 %v8700_v11, %s9693_s4  ;;  %v9489_v29 = vpop.eup %9488  ;;  %v15965_v40 = vld [vmem:[#allocation84_spill] sm:$0xff] }
 0x61b   :  { %v8725_v58 = vpack.i.bf16 %v3300_v57, %v3299_v49  ;;  %v9491_v59 = vpop.eup %9490  ;;  %v2275_v24 = vmul.f32 %v9489_v29, %v15960_v31  ;;  %v15544_v57 = vrot.slane %v15954_v60, 1 }
 0x61d   :  { %v12355_v1 = vpop.permute.xlu1 %2937  ;;  %8716 = vrot.lane.b32.xlu1 %v8715_v38, %s9695_s5  ;;  %v12358_v11 = vpop.permute.xlu0 %2932  ;;  %v2278_v38 = vmul.f32 %v9487_v47, %v15959_v22  ;;  %v2277_v22 = vmul.f32 %v9491_v59, %v15961_v53  ;;  %v2290_v31 = vpack.c.bf16 %v2276_v28, %v2275_v24  ;;  %v3412_v28 = vmul.f32 %v12080_v36, %v15853_v6  ;;  %v7661_v47 = vld [vmem:[%s15680_s26 + $0x400] sm:$0xff]  ;;  %v7668_v6 = vld [vmem:[%s15680_s26 + $0x438] sm:$0xff] }
 0x61e   :  { %15955 = vst [vmem:[#allocation16_spill] sm:$0xff] %v12355_v1  ;;  %15956 = vst [vmem:[#allocation122_spill] sm:$0xff] %v12358_v11  ;;  %8711 = vrot.lane.b32.xlu0 %v8710_v39, %s9694_s28  ;;  %v2848_v59 = vmul.f32 %v12054_v42, %v12318_v51 }
 0x61f   :  { %v2291_v49 = vpack.c.bf16 %v2278_v38, %v2277_v22 }
 0x621   :  { %v12363_v13 = vpop.permute.xlu1 %3168  ;;  %8726 = vrot.lane.b32.xlu1 %v8725_v58, %s9693_s4  ;;  %v2312_v4 = vpop.permute.xlu0 %2311 }
 0x622   :  { %15958 = vst [vmem:[#allocation81_spill] sm:$0xff] %v12363_v13  ;;  %8721 = vrot.lane.b32.xlu0 %v8720_v50, %s9695_s5  ;;  %8283 = vmatprep.subr.bf16.mxu1 %v2312_v4  ;;  %v9493_v50 = vpop.eup %9492 }
 0x623   :  { %8284 = vmatpush3.bf16.msra.mxu1 %v2312_v4  ;;  %v9495_v5 = vpop.eup %9494  ;;  %v2280_v4 = vmul.f32 %v9493_v50, %v15965_v40 }
 0x624   :  { %8506 = vmatprep.subr.bf16.mxu1 %v11923_v52  ;;  %v9497_v24 = vpop.eup %9496  ;;  %v15964_v52 = vrot.slane %v15943_v18, 1 }
 0x625   :  { %v12381_v39 = vpop.permute.xlu1 %2683  ;;  %3050 = vperm.xlu1 %8623, %v7608_v8   ;;  %v12383_v0 = vpop.permute.xlu0 %3173 }
 0x626   :  { %15962 = vst [vmem:[#allocation87_spill] sm:$0xff] %v12381_v39  ;;  %15963 = vst [vmem:[#allocation79_spill] sm:$0xff] %v12383_v0  ;;  %3045 = vperm.xlu0 %8624, %v7607_v7   ;;  %8286 = vmatmul.mubr.bf16.vlgmr.msra.gmra.mrb[16].mxu1 %v2290_v31  ;;  %v12395_v25 = vsel %vm2733_vm2, %v15544_v57, %v15964_v52  ;;  %v9499_v29 = vpop.eup %9498  ;;  %v15968_v7 = vld [vmem:[#allocation96_spill] sm:$0xff]  ;;  %v8735_v31 = vpack.i.bf16 %v3413_v17, %v3412_v28  ;;  %v15973_v28 = vld [vmem:[#allocation10_spill] sm:$0xff] }
 0x627   :  { %8289 = vmatprep.mubr.bf16.mxu1 %v2291_v49  ;;  %8514 = vmatpush3.bf16.msra.mxu1 %v11929_v54  ;;  %v2847_v58 = vmul.f32 %v12052_v23, %v12395_v25  ;;  %v2282_v53 = vmul.f32 %v9495_v5, %v15968_v7  ;;  %v15969_v54 = vld [vmem:[#allocation83_spill] sm:$0xff]  ;;  %v15970_v49 = vld [vmem:[#allocation94_spill] sm:$0xff]  ;;  %v2726_v17 = vrot.slane %v15973_v28, 1  ;;  %v15989_v23 = vld [vmem:[#allocation88_spill] sm:$0xff] }
 0x628   :  { %8507 = vmatprep.subr.bf16.mxu1 %v11943_v26  ;;  %v2279_v22 = vmul.f32 %v9497_v24, %v15969_v54  ;;  %v2281_v52 = vmul.f32 %v9499_v29, %v15970_v49  ;;  %v9501_v26 = vpop.eup %9500  ;;  %v15987_v57 = vld [vmem:[#allocation66_spill] sm:$0xff] }
 0x629   :  { %v12411_v38 = vpop.permute.xlu1 %3281  ;;  %3452 = vperm.xlu1 %8623, %v7662_v15   ;;  %v12413_v8 = vpop.permute.xlu0 %2688  ;;  %v8730_v50 = vpack.i.bf16 %v2848_v59, %v2847_v58  ;;  %v2502_v58 = vld [vmem:[%s15680_s26 + $0x50] sm:$0xff] }
 0x62a   :  { %15966 = vst [vmem:[#allocation85_spill] sm:$0xff] %v12411_v38  ;;  %15967 = vst [vmem:[#allocation84_spill] sm:$0xff] %v12413_v8  ;;  %3447 = vperm.xlu0 %8624, %v7661_v47   ;;  %v2292_v40 = vpack.c.bf16 %v2280_v4, %v2279_v22  ;;  %v2293_v24 = vpack.c.bf16 %v2282_v53, %v2281_v52  ;;  %v9503_v30 = vpop.eup %9502  ;;  %v15974_v47 = vld [vmem:[#allocation13_spill] sm:$0xff]  ;;  %v15975_v4 = vld [vmem:[#allocation95_spill] sm:$0xff]  ;;  %v2466_v53 = vrot.slane %v15973_v28, 7  ;;  %v15979_v52 = vrot.slane %v15920_v48, 1 }
 0x62b   :  { %8515 = vmatpush3.bf16.msra.mxu1 %v11964_v27  ;;  %v15545_v29 = vrot.slane %v15974_v47, 1  ;;  %v2503_v27 = vld [vmem:[%s15680_s26 + $0x58] sm:$0xff]  ;;  %v9505_v19 = vpop.eup %9504  ;;  %v2284_v7 = vmul.f32 %v9501_v26, %v15975_v4  ;;  %v15984_v4 = vld [vmem:[#allocation72_spill] sm:$0xff] }
 0x62c   :  { %8508 = vmatprep.subr.bf16.mxu1 %v11973_v56  ;;  %v15546_v56 = vrot.slane %v15954_v60, 7  ;;  %v9507_v59 = vpop.eup %9506  ;;  %v15982_v26 = vld [vmem:[#allocation93_spill] sm:$0xff] }
 0x62d   :  { %v12422_v15 = vpop.permute.xlu1 %2829  ;;  %8736 = vrot.lane.b32.xlu1 %v8735_v31, %s9694_s28  ;;  %v12425_v5 = vpop.permute.xlu0 %3286  ;;  %v15978_v31 = vld [vmem:[#allocation100_spill] sm:$0xff] }
 0x62e   :  { %15971 = vst [vmem:[#allocation96_spill] sm:$0xff] %v12422_v15  ;;  %15972 = vst [vmem:[#allocation83_spill] sm:$0xff] %v12425_v5  ;;  %8731 = vrot.lane.b32.xlu0 %v8730_v50, %s9693_s4  ;;  %8290 = vmatmul.mubr.bf16.gmra.mrb[20].mxu1 %v2292_v40  ;;  %v2286_v49 = vmul.f32 %v9503_v30, %v15978_v31  ;;  %v12450_v50 = vsel %vm2733_vm2, %v15979_v52, %v2726_v17  ;;  %v7664_v40 = vld [vmem:[%s15680_s26 + $0x418] sm:$0xff]  ;;  %v15983_v30 = vrot.slane %v15943_v18, 7  ;;  %v7663_v31 = vld [vmem:[%s15680_s26 + $0x410] sm:$0xff]  ;;  %v9509_v42 = vpop.eup %9508 }
 0x62f   :  { %8293 = vmatprep.mubr.bf16.mxu1 %v2293_v24  ;;  %8516 = vmatpush3.bf16.msra.mxu1 %v12001_v3  ;;  %15980 = vst [vmem:[#allocation100_spill] sm:$0xff] %v12450_v50  ;;  %v12456_v3 = vsel %vm2733_vm2, %v2726_v17, %v15545_v29  ;;  %v2283_v24 = vmul.f32 %v9505_v19, %v15982_v26  ;;  %v15985_v52 = vld [vmem:[#allocation98_spill] sm:$0xff]  ;;  %v15986_v26 = vld [vmem:[#allocation61_spill] sm:$0xff] }
 0x630   :  { %8509 = vmatprep.subr.bf16.mxu1 %v12006_v44  ;;  %15981 = vst [vmem:[#allocation123_spill] sm:$0xff] %v12456_v3  ;;  %v3194_v17 = vmul.f32 %v12140_v63, %v12450_v50  ;;  %v2285_v19 = vmul.f32 %v9507_v59, %v15985_v52  ;;  %v15992_v59 = vrot.slane %v15974_v47, 7 }
 0x631   :  { %v12441_v54 = vpop.permute.xlu1 %3394  ;;  %2565 = vperm.xlu1 %8623, %v2503_v27   ;;  %v12443_v22 = vpop.permute.xlu0 %2834  ;;  %v12469_v27 = vsel %vm2475_vm3, %v15546_v56, %v15983_v30  ;;  %v15988_v30 = vld [vmem:[#allocation68_spill] sm:$0xff]  ;;  %v2294_v44 = vpack.c.bf16 %v2284_v7, %v2283_v24 }
 0x632   :  { %15976 = vst [vmem:[#allocation94_spill] sm:$0xff] %v12441_v54  ;;  %15977 = vst [vmem:[#allocation95_spill] sm:$0xff] %v12443_v22  ;;  %2560 = vperm.xlu0 %8624, %v2502_v58   ;;  %v3195_v58 = vmul.f32 %v15984_v4, %v12456_v3  ;;  %v2960_v29 = vmul.f32 %v15987_v57, %v12469_v27  ;;  %v2961_v56 = vmul.f32 %v15988_v30, %v12341_v2  ;;  %v15999_v57 = vld [vmem:[#allocation71_spill] sm:$0xff] }
 0x633   :  { %8517 = vmatpush3.bf16.msra.mxu1 %v15986_v26  ;;  %v2295_v21 = vpack.c.bf16 %v2286_v49, %v2285_v19  ;;  %v12493_v52 = vsel %vm2475_vm3, %v2466_v53, %v15992_v59  ;;  %v15994_v26 = vrot.slane %v15920_v48, 7  ;;  %v15996_v19 = vld [vmem:[#allocation69_spill] sm:$0xff]  ;;  %v2710_v30 = vmul.f32 %v12178_v32, %v15920_v48 }
 0x634   :  { %8510 = vmatprep.subr.bf16.mxu1 %v15989_v23  ;;  %15993 = vst [vmem:[#allocation61_spill] sm:$0xff] %v12493_v52  ;;  %v9511_v23 = vpop.eup %9510  ;;  %v8745_v24 = vpack.i.bf16 %v3195_v58, %v3194_v17  ;;  %v8740_v59 = vpack.i.bf16 %v2961_v56, %v2960_v29 }
 0x635   :  { %v12485_v63 = vpop.permute.xlu1 %2942  ;;  %3462 = vperm.xlu1 %8623, %v7664_v40   ;;  %v12487_v4 = vpop.permute.xlu0 %3399  ;;  %v12499_v7 = vsel %vm2475_vm3, %v15994_v26, %v2466_v53  ;;  %v3308_v40 = vmul.f32 %v12191_v61, %v12493_v52  ;;  %v15997_v53 = vld [vmem:[#allocation5_spill] sm:$0xff] }
 0x636   :  { %15990 = vst [vmem:[#allocation93_spill] sm:$0xff] %v12485_v63  ;;  %15991 = vst [vmem:[#allocation98_spill] sm:$0xff] %v12487_v4  ;;  %3457 = vperm.xlu0 %8624, %v7663_v31   ;;  %8294 = vmatmul.mubr.bf16.gmra.mrb[24].mxu1 %v2294_v44  ;;  %v3307_v49 = vmul.f32 %v12193_v62, %v12499_v7  ;;  %v2709_v26 = vmul.f32 %v15997_v53, %v15919_v45  ;;  %v15998_v31 = vld [vmem:[#allocation99_spill] sm:$0xff]  ;;  %v16004_v62 = vld [vmem:[#allocation105_spill] sm:$0xff] }
 0x637   :  { %15995 = vst [vmem:[#allocation88_spill] sm:$0xff] %v12499_v7  ;;  %8297 = vmatprep.mubr.bf16.mxu1 %v2295_v21  ;;  %8518 = vmatpush3.bf16.msra.mxu1 %v15996_v19  ;;  %v2288_v44 = vmul.f32 %v9509_v42, %v15998_v31  ;;  %v16002_v21 = vld [vmem:[#allocation97_spill] sm:$0xff]  ;;  %v16003_v19 = vld [vmem:[#allocation104_spill] sm:$0xff]  ;;  %v3420_v32 = vmul.f32 %v16004_v62, %v15973_v28  ;;  %v16005_v42 = vld [vmem:[#allocation62_spill] sm:$0xff] }
 0x638   :  { %8511 = vmatprep.subr.bf16.mxu1 %v15999_v57  ;;  %v2287_v29 = vmul.f32 %v9511_v23, %v16002_v21  ;;  %v8755_v56 = vpack.i.bf16 %v3308_v40, %v3307_v49  ;;  %v3421_v61 = vmul.f32 %v16003_v19, %v15974_v47  ;;  %v8750_v57 = vpack.i.bf16 %v2710_v30, %v2709_v26  ;;  %v16006_v31 = vld [vmem:[#allocation102_spill] sm:$0xff]  ;;  %v16040_v45 = vld [vmem:[#allocation113_spill] sm:$0xff] }
 0x639   :  { %v12512_v17 = vpop.permute.xlu1 %3178  ;;  %8746 = vrot.lane.b32.xlu1 %v8745_v24, %s9695_s5  ;;  %v12515_v58 = vpop.permute.xlu0 %2947  ;;  %v2856_v53 = vmul.f32 %v16006_v31, %v12450_v50  ;;  %v16007_v24 = vld [vmem:[#allocation111_spill] sm:$0xff]  ;;  %v16012_v30 = vld [vmem:[#allocation78_spill] sm:$0xff] }
 0x63a   :  { %16000 = vst [vmem:[#allocation69_spill] sm:$0xff] %v12512_v17  ;;  %16001 = vst [vmem:[#allocation99_spill] sm:$0xff] %v12515_v58  ;;  %8741 = vrot.lane.b32.xlu0 %v8740_v59, %s9694_s28  ;;  %v2855_v36 = vmul.f32 %v16008_v14, %v16007_v24  ;;  %v2296_v51 = vpack.c.bf16 %v2288_v44, %v2287_v29  ;;  %v16009_v59 = vld [vmem:[#allocation64_spill] sm:$0xff]  ;;  %v8765_v49 = vpack.i.bf16 %v3421_v61, %v3420_v32  ;;  %v16013_v21 = vld [vmem:[#allocation106_spill] sm:$0xff] }
 0x63b   :  { %8519 = vmatpush3.bf16.msra.mxu1 %v16005_v42  ;;  %v2969_v42 = vmul.f32 %v16013_v21, %v12499_v7  ;;  %v16014_v19 = vld [vmem:[#allocation114_spill] sm:$0xff]  ;;  %v16015_v44 = vld [vmem:[#allocation107_spill] sm:$0xff]  ;;  %v16031_v24 = vld [vmem:[#allocation108_spill] sm:$0xff] }
 0x63c   :  { %8512 = vmatprep.subr.bf16.mxu1 %v16009_v59  ;;  %v8760_v26 = vpack.i.bf16 %v2856_v53, %v2855_v36  ;;  %v2968_v29 = vmul.f32 %v16015_v44, %v16014_v19  ;;  %v16016_v59 = vld [vmem:[#allocation77_spill] sm:$0xff]  ;;  %v7609_v36 = vld [vmem:[%s15680_s26 + $0x260] sm:$0xff]  ;;  %v7666_v21 = vld [vmem:[%s15680_s26 + $0x428] sm:$0xff] }
 0x63d   :  { %v12529_v23 = vpop.permute.xlu1 %2693  ;;  %8756 = vrot.lane.b32.xlu1 %v8755_v56, %s9693_s4  ;;  %v12532_v40 = vpop.permute.xlu0 %3183  ;;  %v12544_v56 = vld [vmem:[%s15842_s7 + $0x80] sm:$0xff]  }
 0x63e   :  { %16010 = vst [vmem:[#allocation71_spill] sm:$0xff] %v12529_v23  ;;  %16011 = vst [vmem:[#allocation97_spill] sm:$0xff] %v12532_v40  ;;  %8751 = vrot.lane.b32.xlu0 %v8750_v57, %s9695_s5  ;;  %8298 = vmatmul.mubr.bf16.gmra.mrb[28].mxu1 %v2296_v51  ;;  %v16020_v61 = vld [vmem:[#allocation82_spill] sm:$0xff]  ;;  %v8770_v51 = vpack.i.bf16 %v2969_v42, %v2968_v29  ;;  %v16025_v42 = vld [vmem:[#allocation12_spill] sm:$0xff] }
 0x63f   :  { %8520 = vmatpush3.bf16.msra.mxu1 %v16012_v30  ;;  %16017 = vst [vmem:[#allocation62_spill] sm:$0xff] %v12544_v56  ;;  %8301 = vmatprep.subr.bf16.mxu0 %v12544_v56  ;;  %v7610_v30 = vld [vmem:[%s15680_s26 + $0x268] sm:$0xff]  ;;  %v2728_v29 = vrot.slane %v16025_v42, 1  ;;  %v2468_v7 = vrot.slane %v16025_v42, 7  ;;  %v16037_v56 = vld [vmem:[#allocation116_spill] sm:$0xff] }
 0x640   :  { %8513 = vmatprep.subr.bf16.mxu1 %v16016_v59 }
 0x641   :  { %v12546_v62 = vpop.permute.xlu1 %3291  ;;  %8766 = vrot.lane.b32.xlu1 %v8765_v49, %s9694_s28  ;;  %v12549_v32 = vpop.permute.xlu0 %2698  ;;  %v7665_v49 = vld [vmem:[%s15680_s26 + $0x420] sm:$0xff] }
 0x642   :  { %16018 = vst [vmem:[#allocation64_spill] sm:$0xff] %v12546_v62  ;;  %16019 = vst [vmem:[#allocation78_spill] sm:$0xff] %v12549_v32  ;;  %8761 = vrot.lane.b32.xlu0 %v8760_v26, %s9693_s4 }
 0x643   :  { %8521 = vmatpush3.bf16.msra.mxu1 %v16020_v61 }
 0x645   :  { %v12557_v53 = vpop.permute.xlu1 %2839  ;;  %3055 = vperm.xlu1 %8623, %v7609_v36   ;;  %v12559_v57 = vpop.permute.xlu0 %3296  ;;  %v16026_v36 = vld [vmem:[#allocation15_spill] sm:$0xff] }
 0x646   :  { %16021 = vst [vmem:[#allocation77_spill] sm:$0xff] %v12557_v53  ;;  %16022 = vst [vmem:[#allocation82_spill] sm:$0xff] %v12559_v57  ;;  %8771 = vrot.lane.b32.xlu0 %v8770_v51, %s9694_s28  ;;  %v15561_v61 = vrot.slane %v16026_v36, 1  ;;  %v2504_v51 = vld [vmem:[%s15680_s26 + $0x60] sm:$0xff]  ;;  %v15567_v50 = vrot.slane %v16026_v36, 7 }
 0x649   :  { %v12568_v26 = vpop.permute.xlu1 %3404  ;;  %3467 = vperm.xlu1 %8623, %v7665_v49   ;;  %v12570_v59 = vpop.permute.xlu0 %2844  ;;  %v16029_v49 = vrot.slane %v15974_v47, 1 }
 0x64a   :  { %16023 = vst [vmem:[#allocation124_spill] sm:$0xff] %v12568_v26  ;;  %16024 = vst [vmem:[#allocation125_spill] sm:$0xff] %v12570_v59  ;;  %3060 = vperm.xlu0 %8624, %v7610_v30   ;;  %v12594_v30 = vsel %vm2733_vm2, %v2728_v29, %v15561_v61 }
 0x64b   :  { %v12588_v14 = vsel %vm2733_vm2, %v16029_v49, %v2728_v29  ;;  %v16032_v49 = vld [vmem:[#allocation109_spill] sm:$0xff]  ;;  %v2505_v29 = vld [vmem:[%s15680_s26 + $0x68] sm:$0xff] }
 0x64c   :  { %16030 = vst [vmem:[#allocation126_spill] sm:$0xff] %v12588_v14  ;;  %v3196_v46 = vmul.f32 %v16031_v24, %v12588_v14  ;;  %v3197_v34 = vmul.f32 %v16032_v49, %v12594_v30  ;;  %v16035_v24 = vrot.slane %v15974_v47, 7 }
 0x64d   :  { %v12580_v44 = vpop.permute.xlu1 %2952  ;;  %2570 = vperm.xlu1 %8623, %v2504_v51   ;;  %v12582_v31 = vpop.permute.xlu0 %3409  ;;  %v7667_v51 = vld [vmem:[%s15680_s26 + $0x430] sm:$0xff] }
 0x64e   :  { %16027 = vst [vmem:[#allocation12_spill] sm:$0xff] %v12580_v44  ;;  %16028 = vst [vmem:[#allocation15_spill] sm:$0xff] %v12582_v31  ;;  %3472 = vperm.xlu0 %8624, %v7666_v21   ;;  %v12616_v21 = vsel %vm2475_vm3, %v2468_v7, %v15567_v50  ;;  %v12622_v49 = vsel %vm2475_vm3, %v16035_v24, %v2468_v7  ;;  %v8775_v10 = vpack.i.bf16 %v3197_v34, %v3196_v46  ;;  %v16039_v50 = vld [vmem:[#allocation112_spill] sm:$0xff] }
 0x64f   :  { %16036 = vst [vmem:[#allocation129_spill] sm:$0xff] %v12622_v49  ;;  %v3310_v48 = vmul.f32 %v16037_v56, %v12616_v21  ;;  %v2712_v12 = vmul.f32 %v16039_v50, %v15974_v47  ;;  %v2711_v44 = vmul.f32 %v16040_v45, %v15973_v28  ;;  %v3423_v24 = vmul.f32 %v12329_v41, %v16026_v36 }
 0x650   :  { %v2857_v50 = vmul.f32 %v12307_v20, %v12456_v3 }
 0x651   :  { %v12608_v61 = vpop.permute.xlu1 %3005  ;;  %3477 = vperm.xlu1 %8623, %v7667_v51   ;;  %v12610_v19 = vpop.permute.xlu0 %2957  ;;  %v16038_v51 = vld [vmem:[#allocation117_spill] sm:$0xff]  ;;  %v8780_v56 = vpack.i.bf16 %v2712_v12, %v2711_v44  ;;  %v2970_v12 = vmul.f32 %v12358_v11, %v12493_v52 }
 0x652   :  { %16033 = vst [vmem:[#allocation127_spill] sm:$0xff] %v12608_v61  ;;  %16034 = vst [vmem:[#allocation128_spill] sm:$0xff] %v12610_v19  ;;  %2575 = vperm.xlu0 %8624, %v2505_v29   ;;  %v3309_v43 = vmul.f32 %v16038_v51, %v12622_v49  ;;  %v3422_v29 = vmul.f32 %v12331_v33, %v16025_v42  ;;  %v2858_v51 = vmul.f32 %v12305_v55, %v12588_v14  ;;  %v16047_v33 = vld [vmem:[#allocation17_spill] sm:$0xff] }
 0x653   :  { %v3075_v20 = vmul.f32 %v12608_v61, %v15844_v16  ;;  %v16050_v52 = vrot.slane %v16047_v33, 1 }
 0x654   :  { %v8785_v46 = vpack.i.bf16 %v3310_v48, %v3309_v43  ;;  %v8790_v43 = vpack.i.bf16 %v2858_v51, %v2857_v50  ;;  %v2971_v48 = vmul.f32 %v12355_v1, %v12622_v49  ;;  %v16048_v49 = vld [vmem:[#allocation4_spill] sm:$0xff] }
 0x655   :  { %v12635_v7 = vpop.permute.xlu1 %2520  ;;  %8776 = vrot.lane.b32.xlu1 %v8775_v10, %s9695_s5  ;;  %v12638_v34 = vpop.permute.xlu0 %3010 }
 0x656   :  { %16041 = vst [vmem:[#allocation130_spill] sm:$0xff] %v12635_v7  ;;  %16042 = vst [vmem:[#allocation131_spill] sm:$0xff] %v12638_v34  ;;  %3482 = vperm.xlu0 %8624, %v7668_v6   ;;  %v8795_v6 = vpack.i.bf16 %v3423_v24, %v3422_v29  ;;  %v7669_v24 = vld [vmem:[%s15680_s26 + $0x440] sm:$0xff]  ;;  %v7612_v29 = vld [vmem:[%s15680_s26 + $0x278] sm:$0xff]  ;;  %v3076_v14 = vmul.f32 %v12638_v34, %v16048_v49 }
 0x659   :  { %v12648_v45 = vpop.permute.xlu1 %3015  ;;  %8786 = vrot.lane.b32.xlu1 %v8785_v46, %s9693_s4  ;;  %v12651_v10 = vpop.permute.xlu0 %2525  ;;  %v8800_v46 = vpack.i.bf16 %v2971_v48, %v2970_v12 }
 0x65a   :  { %16043 = vst [vmem:[#allocation132_spill] sm:$0xff] %v12651_v10  ;;  %8781 = vrot.lane.b32.xlu0 %v8780_v56, %s9695_s5  ;;  %v7611_v56 = vld [vmem:[%s15680_s26 + $0x270] sm:$0xff] }
 0x65d   :  { %v12658_v44 = vpop.permute.xlu1 %2530  ;;  %8796 = vrot.lane.b32.xlu1 %v8795_v6, %s9694_s28  ;;  %v12661_v41 = vpop.permute.xlu0 %3020  ;;  %v16046_v6 = vld [vmem:[#allocation14_spill] sm:$0xff] }
 0x65e   :  { %16044 = vst [vmem:[#allocation133_spill] sm:$0xff] %v12658_v44  ;;  %8791 = vrot.lane.b32.xlu0 %v8790_v43, %s9693_s4  ;;  %v2730_v43 = vrot.slane %v16046_v6, 1  ;;  %v2470_v55 = vrot.slane %v16046_v6, 7 }
 0x660   :  { %v12699_v16 = vsel %vm2733_vm2, %v2730_v43, %v16050_v52  ;;  %v7671_v52 = vld [vmem:[%s15680_s26 + $0x450] sm:$0xff] }
 0x661   :  { %v8627_v50 = vpop.permute.xlu1 %8626  ;;  %3065 = vperm.xlu1 %8623, %v7611_v56   ;;  %v12667_v51 = vpop.permute.xlu0 %2535 }
 0x662   :  { %16045 = vst [vmem:[#allocation134_spill] sm:$0xff] %v12667_v51  ;;  %8801 = vrot.lane.b32.xlu0 %v8800_v46, %s9694_s28  ;;  %v8629_v11 = vunpack.i.h.bf16 %v8627_v50  ;;  %v8628_v48 = vunpack.i.l.bf16 %v8627_v50  ;;  %v2506_v46 = vld [vmem:[%s15680_s26 + $0x70] sm:$0xff]  ;;  %v7670_v50 = vld [vmem:[%s15680_s26 + $0x448] sm:$0xff] }
 0x664   :  { %v3977_v34 = vsel %vm96_vm0, %v3075_v20, %v8628_v48  ;;  %v3978_v61 = vsel %vm96_vm0, %v3076_v14, %v8629_v11  ;;  %v2507_v20 = vld [vmem:[%s15680_s26 + $0x78] sm:$0xff]  ;;  %v2590_v48 = vmul.f32 %v12635_v7, %v12341_v2 }
 0x665   :  { %v8637_v12 = vpop.permute.xlu1 %8636  ;;  %3487 = vperm.xlu1 %8623, %v7669_v24   ;;  %v8632_v56 = vpop.permute.xlu0 %8631  ;;  %v16049_v24 = vrot.slane %v16026_v36, 1 }
 0x666   :  { %3070 = vperm.xlu0 %8624, %v7612_v29   ;;  %v8639_v3 = vunpack.i.h.bf16 %v8637_v12  ;;  %v8638_v1 = vunpack.i.l.bf16 %v8637_v12  ;;  %v3199_v12 = vmul.f32 %v12383_v0, %v12699_v16  ;;  %v8634_v28 = vunpack.i.h.bf16 %v8632_v56 }
 0x667   :  { %v12693_v29 = vsel %vm2733_vm2, %v16049_v24, %v2730_v43  ;;  %v8633_v19 = vunpack.i.l.bf16 %v8632_v56 }
 0x668   :  { %v3993_v14 = vsel %vm3941_vm4, %v3977_v34, %v8638_v1  ;;  %v3994_v11 = vsel %vm3941_vm4, %v3978_v61, %v8639_v3 }
 0x669   :  { %v8647_v47 = vpop.permute.xlu1 %8646  ;;  %2580 = vperm.xlu1 %8623, %v2506_v46   ;;  %v8642_v24 = vpop.permute.xlu0 %8641 }
 0x66a   :  { %v8649_v53 = vunpack.i.h.bf16 %v8647_v47  ;;  %v8648_v26 = vunpack.i.l.bf16 %v8647_v47  ;;  %3492 = vperm.xlu0 %8624, %v7670_v50   ;;  %v8644_v43 = vunpack.i.h.bf16 %v8642_v24  ;;  %v8643_v49 = vunpack.i.l.bf16 %v8642_v24 }
 0x66b   :  { %v2591_v47 = vmul.f32 %v12651_v10, %v12077_v9  ;;  %v3198_v50 = vmul.f32 %v12363_v13, %v12693_v29  ;;  %v16051_v24 = vrot.slane %v16047_v33, 7 }
 0x66c   :  { %v4009_v56 = vsel %vm3958_vm5, %v3993_v14, %v8648_v26  ;;  %v4010_v46 = vsel %vm3958_vm5, %v3994_v11, %v8649_v53  ;;  %v3927_v26 = vsel %vm96_vm0, %v2590_v48, %v8633_v19 }
 0x66d   :  { %v12726_v1 = vsel %vm2475_vm3, %v2470_v55, %v16051_v24  ;;  %v12728_v3 = vpop.permute.xlu1 %3025  ;;  %3497 = vperm.xlu1 %8623, %v7671_v52   ;;  %v8652_v2 = vpop.permute.xlu0 %8651  ;;  %v4027_v61 = vpack.c.bf16 %v4010_v46, %v4009_v56  ;;  %v3928_v9 = vsel %vm96_vm0, %v2591_v47, %v8634_v28  ;;  %v8805_v14 = vpack.i.bf16 %v3199_v12, %v3198_v50  ;;  %v7672_v52 = vld [vmem:[%s15680_s26 + $0x458] sm:$0xff] }
 0x66e   :  { %v8654_v34 = vunpack.i.h.bf16 %v8652_v2  ;;  %v8653_v53 = vunpack.i.l.bf16 %v8652_v2  ;;  %2585 = vperm.xlu0 %8624, %v2507_v20   ;;  %v3312_v11 = vmul.f32 %v12425_v5, %v12726_v1  ;;  %v3944_v10 = vsel %vm3941_vm4, %v3927_v26, %v8643_v49 }
 0x66f   :  { %v3945_v24 = vsel %vm3941_vm4, %v3928_v9, %v8644_v43  ;;  %4262 = vmatprep.mubr.bf16.mxu1 %v4027_v61  ;;  %v16052_v28 = vrot.slane %v16026_v36, 7  ;;  %v2714_v12 = vmul.f32 %v12413_v8, %v16026_v36  ;;  %v2860_v2 = vmul.f32 %v12443_v22, %v12693_v29  ;;  %v16104_v22 = vld [vmem:[#allocation61_spill] sm:$0xff] }
 0x670   :  { %v3961_v20 = vsel %vm3958_vm5, %v3944_v10, %v8653_v53  ;;  %v3962_v49 = vsel %vm3958_vm5, %v3945_v24, %v8654_v34  ;;  %v3425_v10 = vmul.f32 %v12487_v4, %v16047_v33  ;;  %v3424_v61 = vmul.f32 %v12441_v54, %v16046_v6 }
 0x671   :  { %v12743_v19 = vsel %vm2475_vm3, %v16052_v28, %v2470_v55  ;;  %v4026_v48 = vpack.c.bf16 %v3962_v49, %v3961_v20  ;;  %v12751_v47 = vpop.permute.xlu1 %2540  ;;  %8806 = vrot.lane.b32.xlu1 %v8805_v14, %s9695_s5  ;;  %v12754_v56 = vpop.permute.xlu0 %3030  ;;  %v2713_v55 = vmul.f32 %v12381_v39, %v16025_v42  ;;  %v2859_v34 = vmul.f32 %v12422_v15, %v12594_v30  ;;  %v7673_v49 = vld [vmem:[%s15680_s26 + $0x460] sm:$0xff] }
 0x672   :  { %v3311_v43 = vmul.f32 %v12411_v38, %v12743_v19  ;;  %16053 = vst [vmem:[#allocation14_spill] sm:$0xff] %v12751_v47  ;;  %16054 = vst [vmem:[#allocation17_spill] sm:$0xff] %v12754_v56  ;;  %3502 = vperm.xlu0 %8624, %v7672_v52   ;;  %v8825_v53 = vpack.i.bf16 %v3425_v10, %v3424_v61  ;;  %v2972_v20 = vmul.f32 %v12485_v63, %v12616_v21 }
 0x673   :  { %4263 = vmatmul.mubr.bf16.vlgmr.msra.gmra.mrb[32].mxu1 %v4026_v48  ;;  %v8810_v50 = vpack.i.bf16 %v2714_v12, %v2713_v55  ;;  %v8820_v14 = vpack.i.bf16 %v2860_v2, %v2859_v34  ;;  %v3078_v55 = vmul.f32 %v12661_v41, %v15878_v35  ;;  %v16057_v2 = vrot.slane %v15954_v60, 1 }
 0x674   :  { %v8815_v46 = vpack.i.bf16 %v3312_v11, %v3311_v43  ;;  %v2973_v11 = vmul.f32 %v12515_v58, %v12743_v19  ;;  %v16056_v43 = vld [vmem:[#allocation7_spill] sm:$0xff]  ;;  %v16058_v61 = vrot.slane %v16047_v33, 1  ;;  %v3201_v34 = vmul.f32 %v12532_v40, %v12395_v25 }
 0x675   :  { %v8657_v9 = vpop.permute.xlu1 %8656  ;;  %v12765_v26 = vpop.permute.xlu0 %2545  ;;  %v3077_v48 = vmul.f32 %v12648_v45, %v16056_v43 }
 0x676   :  { %8816 = vrot.lane.b32.xlu1 %v8815_v46, %s9693_s4  ;;  %16055 = vst [vmem:[#allocation4_spill] sm:$0xff] %v12765_v26  ;;  %8811 = vrot.lane.b32.xlu0 %v8810_v50, %s9695_s5  ;;  %v8659_v24 = vunpack.i.h.bf16 %v8657_v9  ;;  %v8658_v52 = vunpack.i.l.bf16 %v8657_v9  ;;  %v8830_v50 = vpack.i.bf16 %v2973_v11, %v2972_v20  ;;  %v12789_v9 = vsel %vm2733_vm2, %v16058_v61, %v16057_v2  ;;  %v7675_v2 = vld [vmem:[%s15680_s26 + $0x470] sm:$0xff] }
 0x679   :  { %v8667_v28 = vpop.permute.xlu1 %8666  ;;  %v8662_v12 = vpop.permute.xlu0 %8661 }
 0x67a   :  { %8826 = vrot.lane.b32.xlu1 %v8825_v53, %s9694_s28  ;;  %8821 = vrot.lane.b32.xlu0 %v8820_v14, %s9693_s4  ;;  %v8669_v46 = vunpack.i.h.bf16 %v8667_v28  ;;  %v8668_v10 = vunpack.i.l.bf16 %v8667_v28  ;;  %v3979_v53 = vsel %vm96_vm0, %v3077_v48, %v8658_v52  ;;  %v3980_v14 = vsel %vm96_vm0, %v3078_v55, %v8659_v24  ;;  %v7674_v52 = vld [vmem:[%s15680_s26 + $0x468] sm:$0xff]  ;;  %v16059_v48 = vld [vmem:[#allocation40_spill] sm:$0xff]  ;;  %v16060_v55 = vld [vmem:[#allocation37_spill] sm:$0xff] }
 0x67b   :  { %v8664_v28 = vunpack.i.h.bf16 %v8662_v12  ;;  %v8663_v11 = vunpack.i.l.bf16 %v8662_v12  ;;  %v2592_v12 = vmul.f32 %v12658_v44, %v16059_v48  ;;  %v16074_v44 = vld [vmem:[#allocation8_spill] sm:$0xff] }
 0x67c   :  { %v3995_v24 = vsel %vm3941_vm4, %v3979_v53, %v8668_v10 }
 0x67d   :  { %v8677_v43 = vpop.permute.xlu1 %8676  ;;  %v8672_v35 = vpop.permute.xlu0 %8671  ;;  %v3929_v53 = vsel %vm96_vm0, %v2592_v12, %v8663_v11  ;;  %v16062_v11 = vrot.slane %v16047_v33, 7 }
 0x67e   :  { %3507 = vperm.xlu1 %8623, %v7673_v49   ;;  %v8679_v20 = vunpack.i.h.bf16 %v8677_v43  ;;  %v8678_v7 = vunpack.i.l.bf16 %v8677_v43  ;;  %8831 = vrot.lane.b32.xlu0 %v8830_v50, %s9694_s28  ;;  %v8674_v61 = vunpack.i.h.bf16 %v8672_v35  ;;  %v8673_v4 = vunpack.i.l.bf16 %v8672_v35 }
 0x67f   :  { %v3996_v49 = vsel %vm3941_vm4, %v3980_v14, %v8669_v46  ;;  %v2593_v50 = vmul.f32 %v12667_v51, %v16060_v55  ;;  %v3200_v35 = vmul.f32 %v12512_v17, %v12789_v9  ;;  %v3080_v51 = vmul.f32 %v12754_v56, %v16074_v44 }
 0x680   :  { %v4011_v43 = vsel %vm3958_vm5, %v3995_v24, %v8678_v7  ;;  %v4012_v54 = vsel %vm3958_vm5, %v3996_v49, %v8679_v20  ;;  %v3314_v7 = vmul.f32 %v12559_v57, %v12469_v27  ;;  %v7676_v20 = vld [vmem:[%s15680_s26 + $0x478] sm:$0xff] }
 0x681   :  { %v12812_v5 = vpop.permute.xlu1 %2995  ;;  %v8682_v38 = vpop.permute.xlu0 %8681  ;;  %v4030_v10 = vpack.c.bf16 %v4012_v54, %v4011_v43  ;;  %v3930_v46 = vsel %vm96_vm0, %v2593_v50, %v8664_v28  ;;  %v8835_v55 = vpack.i.bf16 %v3201_v34, %v3200_v35  ;;  %v16061_v28 = vrot.slane %v15954_v60, 7 }
 0x682   :  { %3517 = vperm.xlu1 %8623, %v7675_v2   ;;  %v8684_v14 = vunpack.i.h.bf16 %v8682_v38  ;;  %v8683_v48 = vunpack.i.l.bf16 %v8682_v38  ;;  %3512 = vperm.xlu0 %8624, %v7674_v52   ;;  %v3946_v2 = vsel %vm3941_vm4, %v3929_v53, %v8673_v4  ;;  %v3947_v54 = vsel %vm3941_vm4, %v3930_v46, %v8674_v61  ;;  %v16064_v53 = vld [vmem:[#allocation124_spill] sm:$0xff] }
 0x683   :  { %4270 = vmatprep.mubr.bf16.mxu1 %v4030_v10  ;;  %v12829_v38 = vsel %vm2475_vm3, %v16062_v11, %v16061_v28  ;;  %v2716_v34 = vmul.f32 %v12549_v32, %v16047_v33  ;;  %v2715_v50 = vmul.f32 %v12529_v23, %v16046_v6  ;;  %v3427_v35 = vmul.f32 %v12582_v31, %v15943_v18  ;;  %v16068_v28 = vld [vmem:[#allocation128_spill] sm:$0xff] }
 0x684   :  { %v3963_v52 = vsel %vm3958_vm5, %v3946_v2, %v8683_v48  ;;  %v3964_v24 = vsel %vm3958_vm5, %v3947_v54, %v8684_v14  ;;  %v3313_v4 = vmul.f32 %v12546_v62, %v12829_v38  ;;  %v2862_v46 = vmul.f32 %v12570_v59, %v12789_v9  ;;  %v16089_v59 = vld [vmem:[#allocation115_spill] sm:$0xff] }
 0x685   :  { %v12837_v49 = vpop.permute.xlu1 %2510  ;;  %v12840_v61 = vpop.permute.xlu0 %3000  ;;  %v4029_v12 = vpack.c.bf16 %v3964_v24, %v3963_v52  ;;  %v8840_v10 = vpack.i.bf16 %v2716_v34, %v2715_v50  ;;  %v3426_v14 = vmul.f32 %v16064_v53, %v15954_v60  ;;  %v2975_v11 = vmul.f32 %v16068_v28, %v12829_v38  ;;  %v16071_v24 = vld [vmem:[#allocation12_spill] sm:$0xff] }
 0x686   :  { %16063 = vst [vmem:[#allocation7_spill] sm:$0xff] %v12837_v49  ;;  %8836 = vrot.lane.b32.xlu1 %v8835_v55, %s9695_s5  ;;  %3522 = vperm.xlu0 %8624, %v7676_v20   ;;  %v8845_v43 = vpack.i.bf16 %v3314_v7, %v3313_v4  ;;  %v16067_v20 = vld [vmem:[#allocation77_spill] sm:$0xff]  ;;  %v2974_v4 = vmul.f32 %v16071_v24, %v12726_v1  ;;  %v16075_v24 = vld [vmem:[#allocation74_spill] sm:$0xff] }
 0x687   :  { %4271 = vmatmul.mubr.bf16.gmra.mrb[36].mxu1 %v4029_v12  ;;  %v2861_v7 = vmul.f32 %v16067_v20, %v12699_v16  ;;  %v8855_v2 = vpack.i.bf16 %v3427_v35, %v3426_v14  ;;  %v2594_v44 = vmul.f32 %v12751_v47, %v16075_v24  ;;  %v16084_v47 = vld [vmem:[#allocation11_spill] sm:$0xff]  ;;  %v16090_v20 = vld [vmem:[#allocation114_spill] sm:$0xff] }
 0x688   :  { %v8860_v12 = vpack.i.bf16 %v2975_v11, %v2974_v4 }
 0x689   :  { %v12850_v48 = vpop.permute.xlu1 %3035  ;;  %v12853_v55 = vpop.permute.xlu0 %2515  ;;  %v8850_v54 = vpack.i.bf16 %v2862_v46, %v2861_v7  ;;  %v16073_v7 = vld [vmem:[#allocation9_spill] sm:$0xff] }
 0x68a   :  { %16065 = vst [vmem:[#allocation40_spill] sm:$0xff] %v12850_v48  ;;  %8846 = vrot.lane.b32.xlu1 %v8845_v43, %s9693_s4  ;;  %16066 = vst [vmem:[#allocation37_spill] sm:$0xff] %v12853_v55  ;;  %8841 = vrot.lane.b32.xlu0 %v8840_v10, %s9695_s5 }
 0x68d   :  { %v12860_v34 = vpop.permute.xlu1 %2550  ;;  %v12863_v52 = vpop.permute.xlu0 %3040 }
 0x68e   :  { %16069 = vst [vmem:[#allocation135_spill] sm:$0xff] %v12860_v34  ;;  %8856 = vrot.lane.b32.xlu1 %v8855_v2, %s9694_s28  ;;  %16070 = vst [vmem:[#allocation136_spill] sm:$0xff] %v12863_v52  ;;  %8851 = vrot.lane.b32.xlu0 %v8850_v54, %s9693_s4  ;;  %v3079_v2 = vmul.f32 %v12728_v3, %v16073_v7 }
 0x691   :  { %v8687_v50 = vpop.permute.xlu1 %8686  ;;  %v12868_v43 = vpop.permute.xlu0 %2555 }
 0x692   :  { %16072 = vst [vmem:[#allocation137_spill] sm:$0xff] %v12868_v43  ;;  %8861 = vrot.lane.b32.xlu0 %v8860_v12, %s9694_s28  ;;  %v8689_v35 = vunpack.i.h.bf16 %v8687_v50  ;;  %v8688_v10 = vunpack.i.l.bf16 %v8687_v50 }
 0x694   :  { %v3981_v54 = vsel %vm96_vm0, %v3079_v2, %v8688_v10  ;;  %v3982_v11 = vsel %vm96_vm0, %v3080_v51, %v8689_v35 }
 0x695   :  { %v8697_v46 = vpop.permute.xlu1 %8696  ;;  %v8692_v14 = vpop.permute.xlu0 %8691 }
 0x696   :  { %v8699_v31 = vunpack.i.h.bf16 %v8697_v46  ;;  %v8698_v53 = vunpack.i.l.bf16 %v8697_v46  ;;  %v8694_v62 = vunpack.i.h.bf16 %v8692_v14  ;;  %v8693_v12 = vunpack.i.l.bf16 %v8692_v14  ;;  %v16076_v46 = vld [vmem:[#allocation92_spill] sm:$0xff] }
 0x697   :  { %v2595_v10 = vmul.f32 %v12765_v26, %v16076_v46 }
 0x698   :  { %v3997_v13 = vsel %vm3941_vm4, %v3981_v54, %v8698_v53  ;;  %v3998_v7 = vsel %vm3941_vm4, %v3982_v11, %v8699_v31 }
 0x699   :  { %v8707_v4 = vpop.permute.xlu1 %8706  ;;  %v8702_v57 = vpop.permute.xlu0 %8701 }
 0x69a   :  { %v8709_v40 = vunpack.i.h.bf16 %v8707_v4  ;;  %v8708_v50 = vunpack.i.l.bf16 %v8707_v4  ;;  %v8704_v17 = vunpack.i.h.bf16 %v8702_v57  ;;  %v8703_v0 = vunpack.i.l.bf16 %v8702_v57 }
 0x69b   :  { %v3932_v4 = vsel %vm96_vm0, %v2595_v10, %v8694_v62  ;;  %v3931_v57 = vsel %vm96_vm0, %v2594_v44, %v8693_v12 }
 0x69c   :  { %v4013_v51 = vsel %vm3958_vm5, %v3997_v13, %v8708_v50  ;;  %v4014_v35 = vsel %vm3958_vm5, %v3998_v7, %v8709_v40  ;;  %v3948_v31 = vsel %vm3941_vm4, %v3931_v57, %v8703_v0  ;;  %v3949_v24 = vsel %vm3941_vm4, %v3932_v4, %v8704_v17 }
 0x69d   :  { %v8717_v2 = vpop.permute.xlu1 %8716  ;;  %v8712_v14 = vpop.permute.xlu0 %8711  ;;  %v4033_v28 = vpack.c.bf16 %v4014_v35, %v4013_v51  ;;  %v3073_v51 = vmul.f32 %v12812_v5, %v15943_v18  ;;  %v16079_v35 = vld [vmem:[#allocation3_spill] sm:$0xff] }
 0x69e   :  { %v8714_v53 = vunpack.i.h.bf16 %v8712_v14  ;;  %v8713_v54 = vunpack.i.l.bf16 %v8712_v14  ;;  %v8718_v0 = vunpack.i.l.bf16 %v8717_v2  ;;  %v3074_v14 = vmul.f32 %v12840_v61, %v16079_v35 }
 0x69f   :  { %4278 = vmatprep.mubr.bf16.mxu1 %v4033_v28  ;;  %v8719_v28 = vunpack.i.h.bf16 %v8717_v2 }
 0x6a0   :  { %v3965_v11 = vsel %vm3958_vm5, %v3948_v31, %v8713_v54  ;;  %v3966_v13 = vsel %vm3958_vm5, %v3949_v24, %v8714_v53  ;;  %v3975_v53 = vsel %vm96_vm0, %v3073_v51, %v8718_v0 }
 0x6a1   :  { %v8727_v50 = vpop.permute.xlu1 %8726  ;;  %v8722_v40 = vpop.permute.xlu0 %8721  ;;  %v4032_v7 = vpack.c.bf16 %v3966_v13, %v3965_v11  ;;  %v3976_v54 = vsel %vm96_vm0, %v3074_v14, %v8719_v28 }
 0x6a2   :  { %v8729_v10 = vunpack.i.h.bf16 %v8727_v50  ;;  %v8728_v17 = vunpack.i.l.bf16 %v8727_v50  ;;  %v8724_v26 = vunpack.i.h.bf16 %v8722_v40  ;;  %v8723_v0 = vunpack.i.l.bf16 %v8722_v40 }
 0x6a3   :  { %4279 = vmatmul.mubr.bf16.gmra.mrb[40].mxu1 %v4032_v7 }
 0x6a4   :  { %v3991_v11 = vsel %vm3941_vm4, %v3975_v53, %v8728_v17  ;;  %v3992_v2 = vsel %vm3941_vm4, %v3976_v54, %v8729_v10  ;;  %v2588_v17 = vmul.f32 %v12837_v49, %v12829_v38  ;;  %v2589_v10 = vmul.f32 %v12853_v55, %v12469_v27 }
 0x6a5   :  { %v12891_v46 = vpop.permute.xlu1 %3050  ;;  %v12893_v62 = vpop.permute.xlu0 %3045 }
 0x6a6   :  { %16077 = vst [vmem:[#allocation9_spill] sm:$0xff] %v12891_v46  ;;  %16078 = vst [vmem:[#allocation8_spill] sm:$0xff] %v12893_v62  ;;  %v3926_v53 = vsel %vm96_vm0, %v2589_v10, %v8724_v26  ;;  %v3925_v54 = vsel %vm96_vm0, %v2588_v17, %v8723_v0 }
 0x6a9   :  { %v12895_v12 = vpop.permute.xlu1 %3452  ;;  %v12897_v44 = vpop.permute.xlu0 %3447 }
 0x6ad   :  { %v8737_v4 = vpop.permute.xlu1 %8736  ;;  %v8732_v57 = vpop.permute.xlu0 %8731 }
 0x6ae   :  { %v8739_v31 = vunpack.i.h.bf16 %v8737_v4  ;;  %v8738_v24 = vunpack.i.l.bf16 %v8737_v4  ;;  %v8734_v14 = vunpack.i.h.bf16 %v8732_v57  ;;  %v8733_v4 = vunpack.i.l.bf16 %v8732_v57 }
 0x6b0   :  { %v4007_v13 = vsel %vm3958_vm5, %v3991_v11, %v8738_v24  ;;  %v4008_v50 = vsel %vm3958_vm5, %v3992_v2, %v8739_v31  ;;  %v16082_v11 = vld [vmem:[#allocation26_spill] sm:$0xff]  ;;  %v16083_v2 = vld [vmem:[#allocation63_spill] sm:$0xff]  ;;  %v3942_v38 = vsel %vm3941_vm4, %v3925_v54, %v8733_v4  ;;  %v3943_v27 = vsel %vm3941_vm4, %v3926_v53, %v8734_v14 }
 0x6b1   :  { %v12909_v18 = vpop.permute.xlu1 %2565  ;;  %v12911_v7 = vpop.permute.xlu0 %2560  ;;  %v4024_v35 = vpack.c.bf16 %v4008_v50, %v4007_v13  ;;  %v3526_v40 = vmul.f32 %v12895_v12, %v16082_v11  ;;  %v3525_v13 = vmul.f32 %v12897_v44, %v16083_v2  ;;  %v9208_v11 = vld [vmem:[%s15842_s7 + $0x88] sm:$0xff]   ;;  %v16085_v4 = vld [vmem:[#allocation10_spill] sm:$0xff] }
 0x6b2   :  { %16080 = vst [vmem:[#allocation74_spill] sm:$0xff] %v12909_v18  ;;  %16081 = vst [vmem:[#allocation92_spill] sm:$0xff] %v12911_v7  ;;  %v3082_v14 = vmul.f32 %v12863_v52, %v16085_v4 }
 0x6b3   :  { %4254 = vmatprep.mubr.bf16.mxu0 %v4024_v35  ;;  %v4025_v2 = vpack.c.bf16 %v3526_v40, %v3525_v13 }
 0x6b5   :  { %v12913_v51 = vpop.permute.xlu1 %3462  ;;  %v12915_v28 = vpop.permute.xlu0 %3457 }
 0x6b9   :  { %v8747_v31 = vpop.permute.xlu1 %8746  ;;  %v8742_v24 = vpop.permute.xlu0 %8741 }
 0x6ba   :  { %v8744_v50 = vunpack.i.h.bf16 %v8742_v24  ;;  %v8743_v35 = vunpack.i.l.bf16 %v8742_v24  ;;  %v8749_v10 = vunpack.i.h.bf16 %v8747_v31  ;;  %v8748_v0 = vunpack.i.l.bf16 %v8747_v31  ;;  %v16087_v31 = vld [vmem:[#allocation91_spill] sm:$0xff] }
 0x6bb   :  { %v3081_v24 = vmul.f32 %v12850_v48, %v16084_v47 }
 0x6bc   :  { %v3959_v57 = vsel %vm3958_vm5, %v3942_v38, %v8743_v35  ;;  %v3960_v26 = vsel %vm3958_vm5, %v3943_v27, %v8744_v50  ;;  %v16086_v50 = vld [vmem:[#allocation62_spill] sm:$0xff]  ;;  %v3528_v35 = vmul.f32 %v12913_v51, %v16087_v31  ;;  %v16088_v38 = vld [vmem:[#allocation24_spill] sm:$0xff]  ;;  %v3984_v47 = vsel %vm96_vm0, %v3082_v14, %v8749_v10 }
 0x6bd   :  { %v4023_v17 = vpack.c.bf16 %v3960_v26, %v3959_v57  ;;  %v8757_v55 = vpop.permute.xlu1 %8756  ;;  %v8752_v49 = vpop.permute.xlu0 %8751  ;;  %v3527_v27 = vmul.f32 %v12915_v28, %v16088_v38  ;;  %v3983_v40 = vsel %vm96_vm0, %v3081_v24, %v8748_v0  ;;  %v2596_v38 = vmul.f32 %v12860_v34, %v16089_v59 }
 0x6be   :  { %v8759_v53 = vunpack.i.h.bf16 %v8757_v55  ;;  %v8758_v54 = vunpack.i.l.bf16 %v8757_v55  ;;  %v8754_v26 = vunpack.i.h.bf16 %v8752_v49  ;;  %v8753_v55 = vunpack.i.l.bf16 %v8752_v49 }
 0x6bf   :  { %4255 = vmatmul.mubr.bf16.vlgmr.msra.gmra.mrb[80].mxu0 %v4023_v17  ;;  %v2597_v0 = vmul.f32 %v12868_v43, %v16090_v20  ;;  %v4028_v49 = vpack.c.bf16 %v3528_v35, %v3527_v27 }
 0x6c0   :  { %8302 = vmatpush3.bf16.msra.mxu0 %v16086_v50  ;;  %8305 = vmatprep.mubr.msk.bf16.mxu0 %vm96_vm0, %v4025_v2  ;;  %v3999_v2 = vsel %vm3941_vm4, %v3983_v40, %v8758_v54  ;;  %v4000_v31 = vsel %vm3941_vm4, %v3984_v47, %v8759_v53  ;;  %v3933_v53 = vsel %vm96_vm0, %v2596_v38, %v8753_v55 }
 0x6c1   :  { %v8767_v13 = vpop.permute.xlu1 %8766  ;;  %v8762_v57 = vpop.permute.xlu0 %8761  ;;  %8303 = vmatprep.subr.bf16.mxu0 %v9208_v11  ;;  %v3934_v54 = vsel %vm96_vm0, %v2597_v0, %v8754_v26 }
 0x6c2   :  { %v8769_v17 = vunpack.i.h.bf16 %v8767_v13  ;;  %v8768_v4 = vunpack.i.l.bf16 %v8767_v13  ;;  %v8764_v50 = vunpack.i.h.bf16 %v8762_v57  ;;  %v8763_v58 = vunpack.i.l.bf16 %v8762_v57 }
 0x6c4   :  { %8304 = vmatpush3.bf16.msra.mxu0 %v9208_v11  ;;  %v4015_v10 = vsel %vm3958_vm5, %v3999_v2, %v8768_v4  ;;  %v4016_v24 = vsel %vm3958_vm5, %v4000_v31, %v8769_v17  ;;  %v3950_v59 = vsel %vm3941_vm4, %v3933_v53, %v8763_v58  ;;  %v3951_v20 = vsel %vm3941_vm4, %v3934_v54, %v8764_v50  ;;  %v16096_v2 = vld [vmem:[#allocation70_spill] sm:$0xff]  ;;  %v16102_v54 = vld [vmem:[#allocation100_spill] sm:$0xff] }
 0x6c5   :  { %v12954_v14 = vpop.permute.xlu1 %3055  ;;  %v8772_v13 = vpop.permute.xlu0 %8771  ;;  %v4036_v57 = vpack.c.bf16 %v4016_v24, %v4015_v10  ;;  %v16097_v58 = vld [vmem:[#allocation110_spill] sm:$0xff] }
 0x6c6   :  { %16091 = vst [vmem:[#allocation3_spill] sm:$0xff] %v12954_v14  ;;  %v8774_v40 = vunpack.i.h.bf16 %v8772_v13  ;;  %v8773_v47 = vunpack.i.l.bf16 %v8772_v13  ;;  %v16101_v13 = vld [vmem:[#allocation111_spill] sm:$0xff] }
 0x6c7   :  { %4286 = vmatprep.mubr.bf16.mxu1 %v4036_v57  ;;  %8306 = vmatmul.mubr.msk.bf16.vlgmr.msra.gmra.mrb[84].mxu0 %vm96_vm0, %v4028_v49 }
 0x6c8   :  { %v3967_v11 = vsel %vm3958_vm5, %v3950_v59, %v8773_v47  ;;  %v3968_v35 = vsel %vm3958_vm5, %v3951_v20, %v8774_v40 }
 0x6c9   :  { %v12963_v27 = vpop.permute.xlu1 %3467  ;;  %v12965_v17 = vpop.permute.xlu0 %3060  ;;  %v4035_v26 = vpack.c.bf16 %v3968_v35, %v3967_v11  ;;  %v3084_v35 = vmul.f32 %v12891_v46, %v16025_v42 }
 0x6ca   :  { %16092 = vst [vmem:[#allocation26_spill] sm:$0xff] %v12963_v27  ;;  %16093 = vst [vmem:[#allocation63_spill] sm:$0xff] %v12965_v17  ;;  %v3529_v31 = vmul.f32 %v12963_v27, %v16096_v2 }
 0x6cb   :  { %4287 = vmatmul.mubr.bf16.gmra.mrb[44].mxu1 %v4035_v26  ;;  %v16103_v26 = vld [vmem:[#allocation13_spill] sm:$0xff] }
 0x6cc   :  { %v3083_v2 = vmul.f32 %v12893_v62, %v16103_v26  ;;  %v2599_v26 = vmul.f32 %v12909_v18, %v16104_v22 }
 0x6cd   :  { %v12967_v55 = vpop.permute.xlu1 %2570  ;;  %v12969_v4 = vpop.permute.xlu0 %3472 }
 0x6ce   :  { %16094 = vst [vmem:[#allocation11_spill] sm:$0xff] %v12967_v55  ;;  %16095 = vst [vmem:[#allocation10_spill] sm:$0xff] %v12969_v4  ;;  %v3530_v50 = vmul.f32 %v12969_v4, %v16097_v58 }
 0x6d0   :  { %v4031_v38 = vpack.c.bf16 %v3530_v50, %v3529_v31 }
 0x6d1   :  { %v12975_v0 = vpop.permute.xlu1 %3477  ;;  %v12977_v10 = vpop.permute.xlu0 %2575 }
 0x6d2   :  { %16098 = vst [vmem:[#allocation62_spill] sm:$0xff] %v12975_v0  ;;  %16099 = vst [vmem:[#allocation91_spill] sm:$0xff] %v12977_v10  ;;  %8309 = vmatprep.mubr.msk.bf16.mxu0 %vm96_vm0, %v4031_v38  ;;  %v3531_v57 = vmul.f32 %v12975_v0, %v16101_v13 }
 0x6d5   :  { %v8777_v24 = vpop.permute.xlu1 %8776  ;;  %v12980_v49 = vpop.permute.xlu0 %3482 }
 0x6d6   :  { %16100 = vst [vmem:[#allocation24_spill] sm:$0xff] %v12980_v49  ;;  %v3532_v53 = vmul.f32 %v12980_v49, %v16102_v54  ;;  %v8779_v47 = vunpack.i.h.bf16 %v8777_v24  ;;  %v8778_v59 = vunpack.i.l.bf16 %v8777_v24 }
 0x6d8   :  { %v4034_v40 = vpack.c.bf16 %v3532_v53, %v3531_v57  ;;  %v3986_v50 = vsel %vm96_vm0, %v3084_v35, %v8779_v47  ;;  %v3985_v38 = vsel %vm96_vm0, %v3083_v2, %v8778_v59 }
 0x6d9   :  { %v8787_v20 = vpop.permute.xlu1 %8786  ;;  %v8782_v11 = vpop.permute.xlu0 %8781 }
 0x6da   :  { %8310 = vmatmul.mubr.msk.bf16.gmra.mrb[88].mxu0 %vm96_vm0, %v4034_v40  ;;  %v8789_v31 = vunpack.i.h.bf16 %v8787_v20  ;;  %v8788_v58 = vunpack.i.l.bf16 %v8787_v20  ;;  %v8784_v54 = vunpack.i.h.bf16 %v8782_v11  ;;  %v8783_v24 = vunpack.i.l.bf16 %v8782_v11  ;;  %v16105_v20 = vld [vmem:[#allocation88_spill] sm:$0xff] }
 0x6db   :  { %v2598_v47 = vmul.f32 %v12911_v7, %v16105_v20 }
 0x6dc   :  { %v4001_v63 = vsel %vm3941_vm4, %v3985_v38, %v8788_v58  ;;  %v4002_v42 = vsel %vm3941_vm4, %v3986_v50, %v8789_v31 }
 0x6dd   :  { %v8797_v13 = vpop.permute.xlu1 %8796  ;;  %v8792_v57 = vpop.permute.xlu0 %8791  ;;  %v3935_v58 = vsel %vm96_vm0, %v2598_v47, %v8783_v24 }
 0x6de   :  { %v8799_v53 = vunpack.i.h.bf16 %v8797_v13  ;;  %v8798_v43 = vunpack.i.l.bf16 %v8797_v13  ;;  %v8794_v34 = vunpack.i.h.bf16 %v8792_v57  ;;  %v8793_v40 = vunpack.i.l.bf16 %v8792_v57 }
 0x6df   :  { %v3936_v57 = vsel %vm96_vm0, %v2599_v26, %v8784_v54  ;;  %v16111_v26 = vld [vmem:[#allocation123_spill] sm:$0xff] }
 0x6e0   :  { %v4017_v59 = vsel %vm3958_vm5, %v4001_v63, %v8798_v43  ;;  %v4018_v35 = vsel %vm3958_vm5, %v4002_v42, %v8799_v53  ;;  %v3952_v22 = vsel %vm3941_vm4, %v3935_v58, %v8793_v40  ;;  %v3953_v50 = vsel %vm3941_vm4, %v3936_v57, %v8794_v34  ;;  %v16112_v40 = vld [vmem:[#allocation126_spill] sm:$0xff] }
 0x6e1   :  { %v13001_v2 = vpop.permute.xlu1 %3065  ;;  %v8802_v11 = vpop.permute.xlu0 %8801  ;;  %v4039_v13 = vpack.c.bf16 %v4018_v35, %v4017_v59 }
 0x6e2   :  { %16106 = vst [vmem:[#allocation115_spill] sm:$0xff] %v13001_v2  ;;  %v8804_v38 = vunpack.i.h.bf16 %v8802_v11  ;;  %v8803_v31 = vunpack.i.l.bf16 %v8802_v11 }
 0x6e3   :  { %4294 = vmatprep.mubr.bf16.mxu1 %v4039_v13 }
 0x6e4   :  { %v3969_v20 = vsel %vm3958_vm5, %v3952_v22, %v8803_v31  ;;  %v3970_v63 = vsel %vm3958_vm5, %v3953_v50, %v8804_v38 }
 0x6e5   :  { %v13009_v43 = vpop.permute.xlu1 %3487  ;;  %v13011_v53 = vpop.permute.xlu0 %3070  ;;  %v4038_v42 = vpack.c.bf16 %v3970_v63, %v3969_v20 }
 0x6e6   :  { %16107 = vst [vmem:[#allocation114_spill] sm:$0xff] %v13009_v43  ;;  %16108 = vst [vmem:[#allocation70_spill] sm:$0xff] %v13011_v53  ;;  %v3533_v47 = vmul.f32 %v13009_v43, %v16111_v26 }
 0x6e7   :  { %4295 = vmatmul.mubr.bf16.gmra.mrb[48].mxu1 %v4038_v42 }
 0x6e9   :  { %v13013_v54 = vpop.permute.xlu1 %2580  ;;  %v13015_v24 = vpop.permute.xlu0 %3492 }
 0x6ea   :  { %16109 = vst [vmem:[#allocation110_spill] sm:$0xff] %v13013_v54  ;;  %16110 = vst [vmem:[#allocation111_spill] sm:$0xff] %v13015_v24  ;;  %v3534_v34 = vmul.f32 %v13015_v24, %v16112_v40  ;;  %v3086_v40 = vmul.f32 %v12965_v17, %v16046_v6 }
 0x6ec   :  { %v4037_v59 = vpack.c.bf16 %v3534_v34, %v3533_v47  ;;  %v3085_v47 = vmul.f32 %v12954_v14, %v16026_v36 }
 0x6ed   :  { %v13021_v35 = vpop.permute.xlu1 %3497  ;;  %v13023_v11 = vpop.permute.xlu0 %2585 }
 0x6ee   :  { %16113 = vst [vmem:[#allocation100_spill] sm:$0xff] %v13021_v35  ;;  %16114 = vst [vmem:[#allocation13_spill] sm:$0xff] %v13023_v11  ;;  %8313 = vmatprep.mubr.msk.bf16.mxu0 %vm96_vm0, %v4037_v59  ;;  %v3535_v58 = vmul.f32 %v13021_v35, %v12594_v30 }
 0x6f1   :  { %v8807_v13 = vpop.permute.xlu1 %8806  ;;  %v13026_v57 = vpop.permute.xlu0 %3502 }
 0x6f2   :  { %16115 = vst [vmem:[#allocation61_spill] sm:$0xff] %v13026_v57  ;;  %v3536_v38 = vmul.f32 %v13026_v57, %v12693_v29  ;;  %v8809_v20 = vunpack.i.h.bf16 %v8807_v13  ;;  %v8808_v63 = vunpack.i.l.bf16 %v8807_v13 }
 0x6f4   :  { %v4040_v31 = vpack.c.bf16 %v3536_v38, %v3535_v58  ;;  %v3987_v29 = vsel %vm96_vm0, %v3085_v47, %v8808_v63  ;;  %v3988_v59 = vsel %vm96_vm0, %v3086_v40, %v8809_v20  ;;  %v16120_v47 = vld [vmem:[#allocation129_spill] sm:$0xff] }
 0x6f5   :  { %v8817_v22 = vpop.permute.xlu1 %8816  ;;  %v8812_v50 = vpop.permute.xlu0 %8811  ;;  %v2600_v40 = vmul.f32 %v12967_v55, %v16120_v47 }
 0x6f6   :  { %8314 = vmatmul.mubr.msk.bf16.gmra.mrb[92].mxu0 %vm96_vm0, %v4040_v31  ;;  %v8819_v42 = vunpack.i.h.bf16 %v8817_v22  ;;  %v8818_v26 = vunpack.i.l.bf16 %v8817_v22  ;;  %v8814_v31 = vunpack.i.h.bf16 %v8812_v50  ;;  %v8813_v22 = vunpack.i.l.bf16 %v8812_v50 }
 0x6f7   :  { %v2601_v50 = vmul.f32 %v12977_v10, %v12616_v21 }
 0x6f8   :  { %v4003_v36 = vsel %vm3941_vm4, %v3987_v29, %v8818_v26  ;;  %v4004_v6 = vsel %vm3941_vm4, %v3988_v59, %v8819_v42  ;;  %v3937_v29 = vsel %vm96_vm0, %v2600_v40, %v8813_v22 }
 0x6f9   :  { %v13037_v34 = vpop.f32.mrb[16].mxu1  ;;  %v8827_v30 = vpop.permute.xlu1 %8826  ;;  %v3938_v42 = vsel %vm96_vm0, %v2601_v50, %v8814_v31 }
 0x6fa   :  { %16116 = vst [vmem:[#allocation88_spill] sm:$0xff] %v13037_v34  ;;  %v8829_v58 = vunpack.i.h.bf16 %v8827_v30  ;;  %v8828_v38 = vunpack.i.l.bf16 %v8827_v30  ;;  %v8822_v13 = vpop.permute.xlu0 %8821  ;;  %v13041_v18 = vpop.f32.mrb[17].mxu1 }
 0x6fb   :  { %16117 = vst [vmem:[#allocation123_spill] sm:$0xff] %v13041_v18  ;;  %v13043_v7 = vpop.f32.mrb[18].mxu1  ;;  %v8824_v17 = vunpack.i.h.bf16 %v8822_v13  ;;  %v8823_v34 = vunpack.i.l.bf16 %v8822_v13 }
 0x6fc   :  { %16118 = vst [vmem:[#allocation126_spill] sm:$0xff] %v13043_v7  ;;  %v13047_v14 = vpop.f32.mrb[19].mxu1  ;;  %v4019_v63 = vsel %vm3958_vm5, %v4003_v36, %v8828_v38  ;;  %v4020_v20 = vsel %vm3958_vm5, %v4004_v6, %v8829_v58 }
 0x6fd   :  { %16119 = vst [vmem:[#allocation138_spill] sm:$0xff] %v13047_v14  ;;  %v13055_v30 = vpop.permute.xlu1 %3507  ;;  %v4042_v7 = vpack.c.bf16 %v4020_v20, %v4019_v63  ;;  %v3954_v38 = vsel %vm3941_vm4, %v3937_v29, %v8823_v34  ;;  %v3955_v58 = vsel %vm3941_vm4, %v3938_v42, %v8824_v17  ;;  %v16129_v29 = vld [vmem:[#allocation119_spill] sm:$0xff] }
 0x6fe   :  { %16121 = vst [vmem:[#allocation129_spill] sm:$0xff] %v13055_v30  ;;  %v8832_v26 = vpop.permute.xlu0 %8831 }
 0x6ff   :  { %v8834_v59 = vunpack.i.h.bf16 %v8832_v26  ;;  %v8833_v13 = vunpack.i.l.bf16 %v8832_v26  ;;  %4302 = vmatprep.mubr.bf16.mxu1 %v4042_v7  ;;  %v3537_v7 = vmul.f32 %v13055_v30, %v12699_v16 }
 0x701   :  { %v13061_v36 = vpop.f32.mrb[20].mxu1  ;;  %v13063_v6 = vpop.permute.xlu1 %3517  ;;  %v3971_v21 = vsel %vm3958_vm5, %v3954_v38, %v8833_v13  ;;  %v3972_v63 = vsel %vm3958_vm5, %v3955_v58, %v8834_v59 }
 0x702   :  { %16122 = vst [vmem:[#allocation139_spill] sm:$0xff] %v13061_v36  ;;  %16123 = vst [vmem:[#allocation140_spill] sm:$0xff] %v13063_v6  ;;  %v13067_v20 = vpop.permute.xlu0 %3512  ;;  %v13069_v31 = vpop.f32.mrb[21].mxu1  ;;  %v4041_v22 = vpack.c.bf16 %v3972_v63, %v3971_v21  ;;  %v3539_v42 = vmul.f32 %v13063_v6, %v12395_v25  ;;  %v3087_v25 = vmul.f32 %v13001_v2, %v16047_v33 }
 0x703   :  { %16124 = vst [vmem:[#allocation141_spill] sm:$0xff] %v13067_v20  ;;  %16125 = vst [vmem:[#allocation142_spill] sm:$0xff] %v13069_v31  ;;  %v3538_v34 = vmul.f32 %v13067_v20, %v12789_v9  ;;  %v13075_v17 = vpop.f32.mrb[22].mxu1 }
 0x704   :  { %16126 = vst [vmem:[#allocation143_spill] sm:$0xff] %v13075_v17  ;;  %4303 = vmatmul.mubr.bf16.gmra.mrb[52].mxu1 %v4041_v22  ;;  %v13077_v47 = vpop.f32.mrb[23].mxu1 }
 0x705   :  { %16127 = vst [vmem:[#allocation144_spill] sm:$0xff] %v13077_v47  ;;  %v4043_v40 = vpack.c.bf16 %v3538_v34, %v3537_v7  ;;  %v8837_v50 = vpop.permute.xlu1 %8836 }
 0x706   :  { %v13079_v26 = vpop.permute.xlu0 %3522  ;;  %v8839_v38 = vunpack.i.h.bf16 %v8837_v50  ;;  %v8838_v58 = vunpack.i.l.bf16 %v8837_v50 }
 0x707   :  { %16128 = vst [vmem:[#allocation145_spill] sm:$0xff] %v13079_v26  ;;  %v3540_v59 = vmul.f32 %v13079_v26, %v16129_v29  ;;  %8317 = vmatprep.mubr.msk.bf16.mxu0 %vm96_vm0, %v4043_v40  ;;  %v3088_v40 = vmul.f32 %v13011_v53, %v15954_v60 }
 0x708   :  { %v3989_v50 = vsel %vm96_vm0, %v3087_v25, %v8838_v58  ;;  %v2602_v58 = vmul.f32 %v13013_v54, %v12743_v19 }
 0x709   :  { %v4046_v16 = vpack.c.bf16 %v3540_v59, %v3539_v42  ;;  %v13086_v13 = vpop.f32.mrb[24].mxu1  ;;  %v8847_v9 = vpop.permute.xlu1 %8846  ;;  %v3990_v59 = vsel %vm96_vm0, %v3088_v40, %v8839_v38  ;;  %v2603_v38 = vmul.f32 %v13023_v11, %v12726_v1 }
 0x70a   :  { %16130 = vst [vmem:[#allocation119_spill] sm:$0xff] %v13086_v13  ;;  %v8842_v21 = vpop.permute.xlu0 %8841  ;;  %v13088_v63 = vpop.f32.mrb[25].mxu1  ;;  %v8849_v22 = vunpack.i.h.bf16 %v8847_v9  ;;  %v8848_v7 = vunpack.i.l.bf16 %v8847_v9 }
 0x70b   :  { %16131 = vst [vmem:[#allocation146_spill] sm:$0xff] %v13088_v63  ;;  %8318 = vmatmul.mubr.msk.bf16.gmra.mrb[96].mxu0 %vm96_vm0, %v4046_v16  ;;  %v13091_v34 = vpop.f32.mrb[26].mxu1  ;;  %v8844_v36 = vunpack.i.h.bf16 %v8842_v21  ;;  %v8843_v16 = vunpack.i.l.bf16 %v8842_v21 }
 0x70c   :  { %16132 = vst [vmem:[#allocation147_spill] sm:$0xff] %v13091_v34  ;;  %v13097_v42 = vpop.f32.mrb[27].mxu1  ;;  %v4005_v34 = vsel %vm3941_vm4, %v3989_v50, %v8848_v7  ;;  %v4006_v17 = vsel %vm3941_vm4, %v3990_v59, %v8849_v22 }
 0x70d   :  { %16133 = vst [vmem:[#allocation148_spill] sm:$0xff] %v13097_v42  ;;  %v8857_v29 = vpop.permute.xlu1 %8856  ;;  %v3940_v22 = vsel %vm96_vm0, %v2603_v38, %v8844_v36  ;;  %v3939_v7 = vsel %vm96_vm0, %v2602_v58, %v8843_v16 }
 0x70e   :  { %v8859_v13 = vunpack.i.h.bf16 %v8857_v29  ;;  %v8858_v63 = vunpack.i.l.bf16 %v8857_v29  ;;  %v8852_v9 = vpop.permute.xlu0 %8851 }
 0x70f   :  { %v8854_v33 = vunpack.i.h.bf16 %v8852_v9  ;;  %v8853_v31 = vunpack.i.l.bf16 %v8852_v9 }
 0x710   :  { %v4021_v60 = vsel %vm3958_vm5, %v4005_v34, %v8858_v63  ;;  %v4022_v42 = vsel %vm3958_vm5, %v4006_v17, %v8859_v13 }
 0x711   :  { %v13109_v25 = vpop.f32.mrb[28].mxu1  ;;  %v4045_v40 = vpack.c.bf16 %v4022_v42, %v4021_v60  ;;  %v3956_v19 = vsel %vm3941_vm4, %v3939_v7, %v8853_v31  ;;  %v3957_v1 = vsel %vm3941_vm4, %v3940_v22, %v8854_v33 }
 0x712   :  { %16134 = vst [vmem:[#allocation149_spill] sm:$0xff] %v13109_v25  ;;  %v8862_v21 = vpop.permute.xlu0 %8861  ;;  %v13111_v29 = vpop.f32.mrb[29].mxu1 }
 0x713   :  { %16135 = vst [vmem:[#allocation150_spill] sm:$0xff] %v13111_v29  ;;  %v8864_v50 = vunpack.i.h.bf16 %v8862_v21  ;;  %v8863_v63 = vunpack.i.l.bf16 %v8862_v21  ;;  %v13115_v34 = vpop.f32.mrb[30].mxu1  ;;  %4310 = vmatprep.mubr.bf16.mxu1 %v4045_v40 }
 0x714   :  { %16136 = vst [vmem:[#allocation151_spill] sm:$0xff] %v13115_v34  ;;  %v13117_v17 = vpop.f32.mrb[31].mxu1 }
 0x715   :  { %16137 = vst [vmem:[#allocation152_spill] sm:$0xff] %v13117_v17  ;;  %v3973_v13 = vsel %vm3958_vm5, %v3956_v19, %v8863_v63  ;;  %v3974_v42 = vsel %vm3958_vm5, %v3957_v1, %v8864_v50 }
 0x716   :  { %v4044_v59 = vpack.c.bf16 %v3974_v42, %v3973_v13 }
 0x718   :  { %4311 = vmatmul.mubr.bf16.gmra.mrb[56].mxu1 %v4044_v59 }
 0x746   :  { %v7913_v36 = vpop.f32.mrb[32].mxu1 }
 0x747   :  { %v7914_v9 = vpop.f32.mrb[33].mxu1 }
 0x748   :  { %v7915_v16 = vadd.f32 %v7914_v9, %v7913_v36  ;;  %v7916_v60 = vpop.f32.mrb[34].mxu1 }
 0x749   :  { %v7917_v58 = vpop.f32.mrb[35].mxu1 }
 0x74a   :  { %v7918_v38 = vadd.f32 %v7917_v58, %v7916_v60  ;;  %v13126_v60 = vld [vmem:[%s16138_s1] ss:$0 sm:$0xff] }
 0x74b   :  { %v4265_v58 = vadd.f32 %v7915_v16, %v13126_v60 }
 0x75a   :  { %v7919_v21 = vpop.f32.mrb[36].mxu1 }
 0x75b   :  { %v7920_v40 = vpop.f32.mrb[37].mxu1 }
 0x75c   :  { %v7921_v25 = vadd.f32 %v7920_v40, %v7919_v21  ;;  %v7922_v34 = vpop.f32.mrb[38].mxu1 }
 0x75d   :  { %v7923_v29 = vpop.f32.mrb[39].mxu1 }
 0x75e   :  { %v7924_v31 = vadd.f32 %v7923_v29, %v7922_v34  ;;  %v4273_v15 = vadd.f32 %v7921_v25, %v13126_v60 }
 0x776   :  { %v7925_v7 = vpop.f32.mrb[40].mxu1 }
 0x777   :  { %v7926_v33 = vpop.f32.mrb[41].mxu1 }
 0x778   :  { %v7927_v22 = vadd.f32 %v7926_v33, %v7925_v7  ;;  %v7928_v63 = vpop.f32.mrb[42].mxu1  ;;  %v4268_v7 = vadd.f32 %v7918_v38, %v13126_v60 }
 0x779   :  { %v7929_v19 = vpop.f32.mrb[43].mxu1 }
 0x77a   :  { %v7930_v50 = vadd.f32 %v7929_v19, %v7928_v63 }
 0x792   :  { %v7907_v1 = vpop.f32.mrb[80].mxu0 }
 0x793   :  { %v7908_v13 = vpop.f32.mrb[81].mxu0 }
 0x794   :  { %v7909_v42 = vadd.f32 %v7908_v13, %v7907_v1  ;;  %v7910_v59 = vpop.f32.mrb[82].mxu0 }
 0x795   :  { %v7911_v36 = vpop.f32.mrb[83].mxu0 }
 0x796   :  { %v7912_v9 = vadd.f32 %v7911_v36, %v7910_v59  ;;  %v4257_v34 = vadd.f32 %v7909_v42, %v13126_v60 }
 0x798   :  { %v4260_v19 = vadd.f32 %v7912_v9, %v13126_v60 }
 0x79a   :  { %v8307_v29 = vpop.f32.mrb[84].mxu0 }
 0x79b   :  { %v4362_v21 = vadd.f32 %v8307_v29, %v4265_v58  ;;  %v4353_v40 = vpop.f32.mrb[85].mxu0 }
 0x79c   :  { %v4354_v33 = vadd.f32 %v4353_v40, %v4257_v34  ;;  %v8308_v63 = vpop.f32.mrb[86].mxu0 }
 0x79d   :  { %v4434_v1 = vmul.f32 0.70710677, %v4362_v21  ;;  %v4365_v13 = vadd.f32 %v8308_v63, %v4268_v7  ;;  %v4356_v59 = vpop.f32.mrb[87].mxu0 }
 0x79e   :  { %v4432_v36 = vmul.f32 0.70710677, %v4354_v33  ;;  %v4357_v17 = vadd.f32 %v4356_v59, %v4260_v19  ;;  %v7931_v47 = vpop.f32.mrb[44].mxu1 }
 0x79f   :  { %v4482_v18 = vand.u32 2147483647, %v4434_v1  ;;  %v4435_v14 = vmul.f32 0.70710677, %v4365_v13  ;;  %v7932_v11 = vpop.f32.mrb[45].mxu1  ;;  %vm4450_vm6 = vcmp.ge.f32.partialorder %v4434_v1, 0.0 }
 0x7a0   :  { %v4480_v16 = vand.u32 2147483647, %v4432_v36  ;;  %v7934_v42 = vpop.f32.mrb[46].mxu1  ;;  %v4433_v40 = vmul.f32 0.70710677, %v4357_v17  ;;  %v7933_v55 = vadd.f32 %v7932_v11, %v7931_v47  ;;  %v4276_v11 = vadd.f32 %v7924_v31, %v13126_v60 }
 0x7a1   :  { %v4498_v54 = vmul.f32 0.3275911, %v4482_v18  ;;  %v4706_v58 = vsub.f32 0.0, %v4482_v18  ;;  %v4483_v10 = vand.u32 2147483647, %v4435_v14  ;;  %v7935_v9 = vpop.f32.mrb[47].mxu1 }
 0x7a2   :  { %v4496_v29 = vmul.f32 0.3275911, %v4480_v16  ;;  %v4704_v34 = vsub.f32 0.0, %v4480_v16  ;;  %v4481_v19 = vand.u32 2147483647, %v4433_v40  ;;  %v7936_v2 = vadd.f32 %v7935_v9, %v7934_v42 }
 0x7a3   :  { %v4514_v38 = vadd.f32 1.0, %v4498_v54  ;;  %v4499_v7 = vmul.f32 0.3275911, %v4483_v10  ;;  %v4707_v63 = vsub.f32 0.0, %v4483_v10  ;;  %v4722_v59 = vmul.f32 %v4706_v58, %v4482_v18 }
 0x7a4   :  { %v4512_v26 = vadd.f32 1.0, %v4496_v29  ;;  %v4720_v20 = vmul.f32 %v4704_v34, %v4480_v16  ;;  %v4497_v30 = vmul.f32 0.3275911, %v4481_v19  ;;  %v4705_v53 = vsub.f32 0.0, %v4481_v19 }
 0x7a5   :  { %9512 = vrcp.f32 %v4514_v38  ;;  %v4515_v6 = vadd.f32 1.0, %v4499_v7  ;;  %v4723_v54 = vmul.f32 %v4707_v63, %v4483_v10  ;;  %v4740_v47 = vmul.f32 1.442695, %v4722_v59 }
 0x7a6   :  { %9514 = vrcp.f32 %v4512_v26  ;;  %v4513_v32 = vadd.f32 1.0, %v4497_v30  ;;  %v4721_v29 = vmul.f32 %v4705_v53, %v4481_v19  ;;  %v4281_v38 = vadd.f32 %v7927_v22, %v13126_v60 }
 0x7a7   :  { %9516 = vrcp.f32 %v4515_v6  ;;  %vm4448_vm7 = vcmp.ge.f32.partialorder %v4432_v36, 0.0  ;;  %v4736_v18 = vmul.f32 1.442695, %v4720_v20  ;;  %v4284_v26 = vadd.f32 %v7930_v50, %v13126_v60 }
 0x7a8   :  { %9518 = vrcp.f32 %v4513_v32  ;;  %v13136_v16 = vmul.f32 0.5, %v4362_v21  ;;  %v13138_v42 = vmul.f32 0.5, %v4354_v33  ;;  %vm4451_vm8 = vcmp.ge.f32.partialorder %v4435_v14, 0.0 }
 0x7a9   :  { %vm4449_vm9 = vcmp.ge.f32.partialorder %v4433_v40, 0.0  ;;  %v15629_v10 = vmov -1.0   ;;  %v13143_v6 = vmul.f32 0.5, %v4365_v13  ;;  %v4742_v53 = vmul.f32 1.442695, %v4723_v54 }
 0x7aa   :  { %v13141_v30 = vsel %vm4450_vm6, 1.0, %v15629_v10  ;;  %v13145_v25 = vmul.f32 0.5, %v4357_v17  ;;  %9520 = vpow2.f32 %v4740_v47  ;;  %v13148_v32 = vsel %vm4448_vm7, 1.0, %v15629_v10 }
 0x7ab   :  { %v4738_v20 = vmul.f32 1.442695, %v4721_v29  ;;  %9522 = vpow2.f32 %v4736_v18  ;;  %v13153_v14 = vsel %vm4451_vm8, 1.0, %v15629_v10  ;;  %v13156_v33 = vsel %vm4449_vm9, 1.0, %v15629_v10 }
 0x7ac   :  { %v13162_v9 = vadd.f32 %v7933_v55, %v13126_v60  ;;  %9524 = vpow2.f32 %v4742_v53  ;;  %v13170_v54 = vadd.f32 %v7936_v2, %v13126_v60 }
 0x7ad   :  { %v8311_v31 = vpop.f32.mrb[88].mxu0  ;;  %9526 = vpow2.f32 %v4738_v20 }
 0x7ae   :  { %v4378_v22 = vadd.f32 %v8311_v31, %v4281_v38  ;;  %v4369_v50 = vpop.f32.mrb[89].mxu0 }
 0x7af   :  { %v13150_v21 = vpop.eup %9512  ;;  %v4370_v1 = vadd.f32 %v4369_v50, %v4273_v15  ;;  %v8312_v17 = vpop.f32.mrb[90].mxu0 }
 0x7b0   :  { %v13158_v13 = vpop.eup %9514  ;;  %v4562_v36 = vmul.f32 1.0614054, %v13150_v21  ;;  %v4438_v58 = vmul.f32 0.70710677, %v4378_v22  ;;  %v4381_v34 = vadd.f32 %v8312_v17, %v4284_v26  ;;  %v4372_v40 = vpop.f32.mrb[91].mxu0  ;;  %v13174_v38 = vmul.f32 0.5, %v4378_v22 }
 0x7b1   :  { %v4560_v7 = vmul.f32 1.0614054, %v13158_v13  ;;  %v13165_v63 = vmul.f32 0.70710677, %v4370_v1  ;;  %v13167_v19 = vadd.f32 %v4372_v40, %v4276_v11  ;;  %v13172_v47 = vpop.eup %9516  ;;  %v13176_v55 = vmul.f32 0.5, %v4370_v1 }
 0x7b2   :  { %v4578_v59 = vadd.f32 -1.4531521, %v4562_v36  ;;  %v4486_v15 = vand.u32 2147483647, %v4438_v58  ;;  %v4563_v11 = vmul.f32 1.0614054, %v13172_v47  ;;  %v13181_v20 = vpop.eup %9518 }
 0x7b3   :  { %v4576_v29 = vadd.f32 -1.4531521, %v4560_v7  ;;  %v4484_v18 = vand.u32 2147483647, %v13165_v63  ;;  %vm4454_vm10 = vcmp.ge.f32.partialorder %v4438_v58, 0.0  ;;  %vm4452_vm11 = vcmp.ge.f32.partialorder %v13165_v63, 0.0 }
 0x7b4   :  { %v4594_v26 = vmul.f32 %v13150_v21, %v4578_v59  ;;  %v4502_v53 = vmul.f32 0.3275911, %v4486_v15  ;;  %v4710_v31 = vsub.f32 0.0, %v4486_v15  ;;  %v4579_v22 = vadd.f32 -1.4531521, %v4563_v11  ;;  %v9521_v57 = vpop.eup %9520 }
 0x7b5   :  { %v4592_v2 = vmul.f32 %v13158_v13, %v4576_v29  ;;  %v4500_v50 = vmul.f32 0.3275911, %v4484_v18  ;;  %v4708_v17 = vsub.f32 0.0, %v4484_v18  ;;  %v4561_v1 = vmul.f32 1.0614054, %v13181_v20  ;;  %v9523_v29 = vpop.eup %9522 }
 0x7b6   :  { %v4610_v36 = vadd.f32 1.4214138, %v4594_v26  ;;  %v4726_v40 = vmul.f32 %v4710_v31, %v4486_v15  ;;  %v4518_v10 = vadd.f32 1.0, %v4502_v53  ;;  %v4595_v8 = vmul.f32 %v13172_v47, %v4579_v22  ;;  %v9525_v31 = vpop.eup %9524 }
 0x7b7   :  { %v4608_v7 = vadd.f32 1.4214138, %v4592_v2  ;;  %v4516_v23 = vadd.f32 1.0, %v4500_v50  ;;  %v4724_v59 = vmul.f32 %v4708_v17, %v4484_v18  ;;  %v4577_v39 = vadd.f32 -1.4531521, %v4561_v1  ;;  %v9527_v1 = vpop.eup %9526 }
 0x7b8   :  { %v4626_v35 = vmul.f32 %v13150_v21, %v4610_v36  ;;  %v4748_v24 = vmul.f32 1.442695, %v4726_v40  ;;  %9528 = vrcp.f32 %v4518_v10  ;;  %v4439_v11 = vmul.f32 0.70710677, %v4381_v34 }
 0x7b9   :  { %v4624_v43 = vmul.f32 %v13158_v13, %v4608_v7  ;;  %v4744_v26 = vmul.f32 1.442695, %v4724_v59  ;;  %v4611_v62 = vadd.f32 1.4214138, %v4595_v8  ;;  %v4593_v15 = vmul.f32 %v13181_v20, %v4577_v39 }
 0x7ba   :  { %v4642_v46 = vadd.f32 -0.28449672, %v4626_v35  ;;  %v13189_v53 = vmul.f32 0.5, %v4381_v34  ;;  %v7937_v18 = vpop.f32.mrb[48].mxu1  ;;  %v16139_v50 = vmov -1.0   ;;  %9530 = vrcp.f32 %v4516_v23 }
 0x7bb   :  { %v4640_v2 = vadd.f32 -0.28449672, %v4624_v43  ;;  %v13193_v17 = vsel %vm4454_vm10, 1.0, %v16139_v50  ;;  %v4487_v36 = vand.u32 2147483647, %v4439_v11  ;;  %v7938_v22 = vpop.f32.mrb[49].mxu1  ;;  %v4627_v35 = vmul.f32 %v13172_v47, %v4611_v62 }
 0x7bc   :  { %v4658_v10 = vmul.f32 %v13150_v21, %v4642_v46  ;;  %v4609_v8 = vadd.f32 1.4214138, %v4593_v15  ;;  %v7940_v39 = vpop.f32.mrb[50].mxu1  ;;  %9532 = vpow2.f32 %v4748_v24  ;;  %vm4455_vm12 = vcmp.ge.f32.partialorder %v4439_v11, 0.0 }
 0x7bd   :  { %v4656_v34 = vmul.f32 %v13158_v13, %v4640_v2  ;;  %v4503_v43 = vmul.f32 0.3275911, %v4487_v36  ;;  %v4711_v40 = vsub.f32 0.0, %v4487_v36  ;;  %v7941_v58 = vpop.f32.mrb[51].mxu1  ;;  %v4643_v59 = vadd.f32 -0.28449672, %v4627_v35 }
 0x7be   :  { %v4674_v7 = vadd.f32 0.2548296, %v4658_v10  ;;  %v4625_v23 = vmul.f32 %v13181_v20, %v4609_v8  ;;  %9534 = vpow2.f32 %v4744_v26  ;;  %v4437_v62 = vmul.f32 0.70710677, %v13167_v19 }
 0x7bf   :  { %v4672_v49 = vadd.f32 0.2548296, %v4656_v34  ;;  %v4519_v46 = vadd.f32 1.0, %v4503_v43  ;;  %v4659_v0 = vmul.f32 %v13172_v47, %v4643_v59  ;;  %v7939_v2 = vadd.f32 %v7938_v22, %v7937_v18 }
 0x7c0   :  { %v4690_v15 = vmul.f32 %v13150_v21, %v4674_v7  ;;  %v4641_v52 = vadd.f32 -0.28449672, %v4625_v23  ;;  %v13207_v10 = vsel %vm4452_vm11, 1.0, %v16139_v50  ;;  %v4727_v35 = vmul.f32 %v4711_v40, %v4487_v36 }
 0x7c1   :  { %v4688_v24 = vmul.f32 %v13158_v13, %v4672_v49  ;;  %9536 = vrcp.f32 %v4519_v46  ;;  %v4675_v26 = vadd.f32 0.2548296, %v4659_v0  ;;  %v13212_v21 = vsel %vm4455_vm12, 1.0, %v16139_v50 }
 0x7c2   :  { %v4770_v8 = vmul.f32 %v9521_v57, %v4690_v15  ;;  %v4657_v34 = vmul.f32 %v13181_v20, %v4641_v52  ;;  %v13214_v43 = vpop.eup %9528  ;;  %v13217_v49 = vmul.f32 0.5, %v13167_v19  ;;  %v4485_v13 = vand.u32 2147483647, %v4437_v62 }
 0x7c3   :  { %v4768_v18 = vmul.f32 %v9523_v29, %v4688_v24  ;;  %v13219_v63 = vadd.f32 %v7941_v58, %v7940_v39  ;;  %v4691_v36 = vmul.f32 %v13172_v47, %v4675_v26  ;;  %v4566_v0 = vmul.f32 1.0614054, %v13214_v43 }
 0x7c4   :  { %v4786_v22 = vsub.f32 1.0, %v4770_v8  ;;  %v4673_v57 = vadd.f32 0.2548296, %v4657_v34  ;;  %v13223_v52 = vpop.eup %9530  ;;  %v4750_v40 = vmul.f32 1.442695, %v4727_v35  ;;  %v4709_v59 = vsub.f32 0.0, %v4485_v13 }
 0x7c5   :  { %v4784_v11 = vsub.f32 1.0, %v4768_v18  ;;  %v4501_v7 = vmul.f32 0.3275911, %v4485_v13  ;;  %v4771_v23 = vmul.f32 %v9525_v31, %v4691_v36  ;;  %v4582_v46 = vadd.f32 -1.4531521, %v4566_v0 }
 0x7c6   :  { %v4802_v29 = vmul.f32 %v4786_v22, %v13141_v30  ;;  %v4689_v19 = vmul.f32 %v13181_v20, %v4673_v57  ;;  %v13227_v39 = vpop.eup %9532  ;;  %v4564_v47 = vmul.f32 1.0614054, %v13223_v52  ;;  %v4725_v24 = vmul.f32 %v4709_v59, %v4485_v13 }
 0x7c7   :  { %v4800_v58 = vmul.f32 %v4784_v11, %v13148_v32  ;;  %v4517_v15 = vadd.f32 1.0, %v4501_v7  ;;  %v4787_v8 = vsub.f32 1.0, %v4771_v23  ;;  %v4598_v35 = vmul.f32 %v13214_v43, %v4582_v46 }
 0x7c8   :  { %v4769_v26 = vmul.f32 %v9527_v1, %v4689_v19  ;;  %vm4453_vm13 = vcmp.ge.f32.partialorder %v4437_v62, 0.0  ;;  %v13232_v34 = vpop.eup %9534  ;;  %v4818_v30 = vadd.f32 1.0, %v4802_v29  ;;  %v4580_v31 = vadd.f32 -1.4531521, %v4564_v47 }
 0x7c9   :  { %9538 = vrcp.f32 %v4517_v15  ;;  %v4297_v20 = vadd.f32 %v7939_v2, %v13126_v60  ;;  %v8315_v18 = vpop.f32.mrb[92].mxu0  ;;  %v4816_v22 = vadd.f32 1.0, %v4800_v58  ;;  %v4803_v32 = vmul.f32 %v4787_v8, %v13153_v14 }
 0x7ca   :  { %v4785_v36 = vsub.f32 1.0, %v4769_v26  ;;  %v4614_v57 = vadd.f32 1.4214138, %v4598_v35  ;;  %v4385_v0 = vpop.f32.mrb[93].mxu0  ;;  %v4596_v1 = vmul.f32 %v13223_v52, %v4580_v31  ;;  %v13240_v62 = vsel %vm4453_vm13, 1.0, %v16139_v50 }
 0x7cb   :  { %v13236_v13 = vpop.eup %9536  ;;  %v4746_v11 = vmul.f32 1.442695, %v4725_v24  ;;  %v4394_v7 = vadd.f32 %v8315_v18, %v4297_v20  ;;  %v8316_v59 = vpop.f32.mrb[94].mxu0  ;;  %v4819_v29 = vadd.f32 1.0, %v4803_v32  ;;  %9540 = vpow2.f32 %v4750_v40 }
 0x7cc   :  { %v4801_v2 = vmul.f32 %v4785_v36, %v13156_v33  ;;  %v4630_v23 = vmul.f32 %v13214_v43, %v4614_v57  ;;  %v4567_v14 = vmul.f32 1.0614054, %v13236_v13  ;;  %v4388_v19 = vpop.f32.mrb[95].mxu0  ;;  %v4612_v46 = vadd.f32 1.4214138, %v4596_v1 }
 0x7cd   :  { %v4442_v58 = vmul.f32 0.70710677, %v4394_v7  ;;  %v4386_v47 = vadd.f32 %v4385_v0, %v13162_v9  ;;  %v13247_v15 = vmul.f32 %v4818_v30, %v13136_v16  ;;  %v13250_v24 = vmul.f32 %v4816_v22, %v13138_v42 }
 0x7ce   :  { %v4646_v8 = vadd.f32 -0.28449672, %v4630_v23  ;;  %v4583_v26 = vadd.f32 -1.4531521, %v4567_v14  ;;  %v4628_v33 = vmul.f32 %v13223_v52, %v4612_v46  ;;  %9542 = vpow2.f32 %v4746_v11 }
 0x7cf   :  { %v13253_v35 = vmul.f32 0.5, %v4394_v7  ;;  %v4490_v31 = vand.u32 2147483647, %v4442_v58  ;;  %v13256_v20 = vmul.f32 %v4819_v29, %v13143_v6  ;;  %v4817_v40 = vadd.f32 1.0, %v4801_v2 }
 0x7d0   :  { %v4662_v9 = vmul.f32 %v13214_v43, %v4646_v8  ;;  %v4599_v16 = vmul.f32 %v13236_v13, %v4583_v26  ;;  %v4644_v30 = vadd.f32 -0.28449672, %v4628_v33  ;;  %v4300_v22 = vadd.f32 %v13219_v63, %v13126_v60 }
 0x7d1   :  { %v4506_v18 = vmul.f32 0.3275911, %v4490_v31  ;;  %v4714_v42 = vsub.f32 0.0, %v4490_v31  ;;  %v4440_v57 = vmul.f32 0.70710677, %v4386_v47  ;;  %v13263_v0 = vadd.f32 %v4388_v19, %v13170_v54 }
 0x7d2   :  { %v4678_v32 = vadd.f32 0.2548296, %v4662_v9  ;;  %v4615_v36 = vadd.f32 1.4214138, %v4599_v16  ;;  %v4660_v6 = vmul.f32 %v13223_v52, %v4644_v30  ;;  %vm4458_vm14 = vcmp.ge.f32.partialorder %v4442_v58, 0.0 }
 0x7d3   :  { %v13265_v1 = vpop.eup %9538  ;;  %v4522_v11 = vadd.f32 1.0, %v4506_v18  ;;  %v4397_v7 = vadd.f32 %v8316_v59, %v4300_v22  ;;  %v13271_v63 = vmul.f32 0.5, %v4386_v47  ;;  %v13274_v14 = vmul.f32 %v4817_v40, %v13145_v25 }
 0x7d4   :  { %v4694_v29 = vmul.f32 %v13214_v43, %v4678_v32  ;;  %v4631_v2 = vmul.f32 %v13236_v13, %v4615_v36  ;;  %v4565_v23 = vmul.f32 1.0614054, %v13265_v1  ;;  %v4676_v54 = vadd.f32 0.2548296, %v4660_v6 }
 0x7d5   :  { %9544 = vrcp.f32 %v4522_v11  ;;  %v4730_v19 = vmul.f32 %v4714_v42, %v4490_v31  ;;  %v4488_v33 = vand.u32 2147483647, %v4440_v57  ;;  %v9541_v59 = vpop.eup %9540  ;;  %v13280_v9 = vsel %vm4458_vm14, 1.0, %v16139_v50 }
 0x7d6   :  { %v4774_v46 = vmul.f32 %v13227_v39, %v4694_v29  ;;  %v4647_v8 = vadd.f32 -0.28449672, %v4631_v2  ;;  %v4581_v26 = vadd.f32 -1.4531521, %v4565_v23  ;;  %v4692_v43 = vmul.f32 %v13223_v52, %v4676_v54 }
 0x7d7   :  { %vm4456_vm15 = vcmp.ge.f32.partialorder %v4440_v57, 0.0  ;;  %v4443_v47 = vmul.f32 0.70710677, %v4397_v7  ;;  %v13282_v16 = vpop.f32.mrb[52].mxu1  ;;  %v4504_v39 = vmul.f32 0.3275911, %v4488_v33 }
 0x7d8   :  { %v4790_v25 = vsub.f32 1.0, %v4774_v46  ;;  %v4663_v40 = vmul.f32 %v13236_v13, %v4647_v8  ;;  %v4597_v31 = vmul.f32 %v13265_v1, %v4581_v26  ;;  %v13286_v30 = vpop.f32.mrb[53].mxu1  ;;  %v9543_v18 = vpop.eup %9542  ;;  %v4772_v42 = vmul.f32 %v13232_v34, %v4692_v43 }
 0x7d9   :  { %v4756_v52 = vmul.f32 1.442695, %v4730_v19  ;;  %v4712_v22 = vsub.f32 0.0, %v4488_v33  ;;  %v4491_v58 = vand.u32 2147483647, %v4443_v47  ;;  %v13289_v32 = vpop.f32.mrb[54].mxu1 }
 0x7da   :  { %v4806_v36 = vmul.f32 %v4790_v25, %v13193_v17  ;;  %v4679_v6 = vadd.f32 0.2548296, %v4663_v40  ;;  %v4613_v11 = vadd.f32 1.4214138, %v4597_v31  ;;  %v4520_v29 = vadd.f32 1.0, %v4504_v39  ;;  %v13292_v2 = vpop.f32.mrb[55].mxu1 }
 0x7db   :  { %v4788_v23 = vsub.f32 1.0, %v4772_v42  ;;  %v13296_v54 = vsel %vm4456_vm15, 1.0, %v16139_v50  ;;  %v4728_v46 = vmul.f32 %v4712_v22, %v4488_v33  ;;  %v4507_v8 = vmul.f32 0.3275911, %v4491_v58 }
 0x7dc   :  { %v4695_v34 = vmul.f32 %v13236_v13, %v4679_v6  ;;  %v4629_v19 = vmul.f32 %v13265_v1, %v4613_v11  ;;  %9546 = vrcp.f32 %v4520_v29  ;;  %vm4459_vm5 = vcmp.ge.f32.partialorder %v4443_v47, 0.0 }
 0x7dd   :  { %v4822_v26 = vadd.f32 1.0, %v4806_v36  ;;  %v4804_v17 = vmul.f32 %v4788_v23, %v13207_v10  ;;  %v4523_v43 = vadd.f32 1.0, %v4507_v8  ;;  %v4715_v25 = vsub.f32 0.0, %v4491_v58 }
 0x7de   :  { %v4775_v40 = vmul.f32 %v9541_v59, %v4695_v34  ;;  %v4645_v31 = vadd.f32 -0.28449672, %v4629_v19  ;;  %9548 = vpow2.f32 %v4756_v52  ;;  %v4752_v39 = vmul.f32 1.442695, %v4728_v46  ;;  %v13301_v57 = vpop.f32.mrb[96].mxu0 }
 0x7df   :  { %v13303_v42 = vpop.eup %9544  ;;  %v4820_v33 = vadd.f32 1.0, %v4804_v17  ;;  %v13305_v22 = vmul.f32 0.5, %v4397_v7  ;;  %v4731_v13 = vmul.f32 %v4715_v25, %v4491_v58  ;;  %v4441_v6 = vmul.f32 0.70710677, %v13263_v0  ;;  %v13308_v11 = vpop.f32.mrb[97].mxu0 }
 0x7e0   :  { %v4661_v10 = vmul.f32 %v13265_v1, %v4645_v31  ;;  %v4570_v36 = vmul.f32 1.0614054, %v13303_v42  ;;  %v13314_v59 = vsel %vm4459_vm5, 1.0, %v16139_v50  ;;  %9550 = vrcp.f32 %v4523_v43  ;;  %v13316_v52 = vpop.f32.mrb[98].mxu0  ;;  %v16140_v31 = vld [vmem:[#allocation22_spill] sm:$0xff] }
 0x7e1   :  { %v13319_v29 = vmul.f32 %v4822_v26, %v13174_v38  ;;  %v4791_v7 = vsub.f32 1.0, %v4775_v40  ;;  %v13322_v58 = vmul.f32 0.5, %v13263_v0  ;;  %v4489_v23 = vand.u32 2147483647, %v4441_v6  ;;  %v13324_v46 = vpop.f32.mrb[99].mxu0 }
 0x7e2   :  { %v13327_v8 = vmul.f32 %v4820_v33, %v13176_v55  ;;  %v4677_v34 = vadd.f32 0.2548296, %v4661_v10  ;;  %v4586_v47 = vadd.f32 -1.4531521, %v4570_v36  ;;  %9552 = vpow2.f32 %v4752_v39  ;;  %v16141_v33 = vld [vmem:[#allocation27_spill] sm:$0xff] }
 0x7e3   :  { %v13329_v19 = vmul.f32 1.442695, %v4731_v13  ;;  %vm4457_vm6 = vcmp.ge.f32.partialorder %v4441_v6, 0.0  ;;  %v4505_v17 = vmul.f32 0.3275911, %v4489_v23  ;;  %v4713_v43 = vsub.f32 0.0, %v4489_v23 }
 0x7e4   :  { %v4693_v38 = vmul.f32 %v13265_v1, %v4677_v34  ;;  %v4602_v26 = vmul.f32 %v13303_v42, %v4586_v47  ;;  %v4976_v0 = vmul.f32 %v13250_v24, %v12812_v5  ;;  %v4977_v25 = vmul.f32 %v13274_v14, %v12840_v61 }
 0x7e5   :  { %v4807_v55 = vmul.f32 %v4791_v7, %v13212_v21  ;;  %v4521_v40 = vadd.f32 1.0, %v4505_v17  ;;  %v4898_v39 = vmul.f32 %v13274_v14, %v16140_v31  ;;  %v4899_v13 = vmul.f32 %v13247_v15, %v16141_v33 }
 0x7e6   :  { %v13342_v6 = vpop.eup %9546  ;;  %v4773_v1 = vmul.f32 %v9543_v18, %v4693_v38  ;;  %v4618_v10 = vadd.f32 1.4214138, %v4602_v26  ;;  %v13345_v36 = vsel %vm4457_vm6, 1.0, %v16139_v50  ;;  %v8865_v5 = vpack.i.bf16 %v4977_v25, %v4976_v0  ;;  %v16142_v18 = vld [vmem:[#allocation73_spill] sm:$0xff]  ;;  %v16143_v0 = vld [vmem:[#allocation75_spill] sm:$0xff] }
 0x7e7   :  { %v4568_v34 = vmul.f32 1.0614054, %v13342_v6  ;;  %9554 = vrcp.f32 %v4521_v40  ;;  %v4729_v61 = vmul.f32 %v4713_v43, %v4489_v23  ;;  %v8870_v21 = vpack.i.bf16 %v4899_v13, %v4898_v39  ;;  %v16144_v43 = vld [vmem:[#allocation127_spill] sm:$0xff] }
 0x7e8   :  { %v9549_v7 = vpop.eup %9548  ;;  %v4789_v47 = vsub.f32 1.0, %v4773_v1  ;;  %v4634_v17 = vmul.f32 %v13303_v42, %v4618_v10  ;;  %8866 = vrot.lane.b32.xlu1 %v8865_v5, %s9695_s5  ;;  %v7945_v31 = vadd.f32 %v13286_v30, %v13282_v16  ;;  %v5024_v38 = vmul.f32 %v13274_v14, %v16142_v18  ;;  %v16145_v16 = vld [vmem:[#allocation131_spill] sm:$0xff] }
 0x7e9   :  { %v4823_v26 = vadd.f32 1.0, %v4807_v55  ;;  %v4584_v33 = vadd.f32 -1.4531521, %v4568_v34  ;;  %8871 = vrot.lane.b32.xlu0 %v8870_v21, %s9703_s25  ;;  %v5025_v23 = vmul.f32 %v13247_v15, %v16143_v0  ;;  %v4978_v25 = vmul.f32 %v13247_v15, %v16144_v43 }
 0x7ea   :  { %v13359_v40 = vpop.eup %9550  ;;  %v4805_v39 = vmul.f32 %v4789_v47, %v13240_v62  ;;  %v4650_v13 = vadd.f32 -0.28449672, %v4634_v17  ;;  %v4979_v30 = vmul.f32 %v13256_v20, %v16145_v16  ;;  %v13366_v55 = vadd.f32 %v13292_v2, %v13289_v32 }
 0x7eb   :  { %v4600_v1 = vmul.f32 %v13342_v6, %v4584_v33  ;;  %v4571_v10 = vmul.f32 1.0614054, %v13359_v40  ;;  %v4754_v5 = vmul.f32 1.442695, %v4729_v61  ;;  %v8875_v34 = vpack.i.bf16 %v5025_v23, %v5024_v38  ;;  %v13370_v21 = vpop.f32.mrb[56].mxu1 }
 0x7ec   :  { %v13372_v18 = vpop.eup %9552  ;;  %v4666_v62 = vmul.f32 %v13303_v42, %v4650_v13  ;;  %v8880_v47 = vpack.i.bf16 %v4979_v30, %v4978_v25  ;;  %v15643_v17 = vrot.slane %v13250_v24, 1  ;;  %v4913_v0 = vrot.slane %v13274_v14, 1  ;;  %v13377_v43 = vpop.f32.mrb[57].mxu1 }
 0x7ed   :  { %v4616_v32 = vadd.f32 1.4214138, %v4600_v1  ;;  %v4587_v2 = vadd.f32 -1.4531521, %v4571_v10  ;;  %8876 = vrot.lane.b32.xlu1 %v8875_v34, %s9704_s9  ;;  %v4914_v61 = vrot.slane %v13247_v15, 1  ;;  %v15650_v38 = vrot.slane %v13256_v20, 1 }
 0x7ee   :  { %v4821_v33 = vadd.f32 1.0, %v4805_v39  ;;  %v4682_v23 = vadd.f32 0.2548296, %v4666_v62  ;;  %8881 = vrot.lane.b32.xlu0 %v8880_v47, %s9695_s5  ;;  %v13387_v25 = vsel %vm2733_vm2, %v15643_v17, %v4913_v0  ;;  %v4305_v13 = vadd.f32 %v7945_v31, %v13126_v60  ;;  %v13390_v16 = vpop.f32.mrb[58].mxu1  ;;  %v16147_v10 = vld [vmem:[#allocation19_spill] sm:$0xff]  ;;  %v16148_v17 = vld [vmem:[#allocation21_spill] sm:$0xff] }
 0x7ef   :  { %16146 = vst [vmem:[#allocation22_spill] sm:$0xff] %v13387_v25  ;;  %v4632_v30 = vmul.f32 %v13342_v6, %v4616_v32  ;;  %v4603_v1 = vmul.f32 %v13359_v40, %v4587_v2  ;;  %v13396_v39 = vsel %vm2733_vm2, %v4913_v0, %v4914_v61  ;;  %v4992_v34 = vmul.f32 %v13387_v25, %v16147_v10  ;;  %v13400_v62 = vpop.f32.mrb[59].mxu1  ;;  %v16149_v2 = vld [vmem:[#allocation30_spill] sm:$0xff]  ;;  %v16150_v25 = vld [vmem:[#allocation28_spill] sm:$0xff] }
 0x7f0   :  { %v4698_v47 = vmul.f32 %v13303_v42, %v4682_v23  ;;  %v4993_v31 = vmul.f32 %v13396_v39, %v16148_v17  ;;  %v13409_v32 = vsel %vm2733_vm2, %v4914_v61, %v15650_v38  ;;  %v4946_v0 = vmul.f32 %v13396_v39, %v16149_v2 }
 0x7f1   :  { %v13413_v48 = vpop.eup %9554  ;;  %v4648_v4 = vadd.f32 -0.28449672, %v4632_v30  ;;  %v4619_v10 = vadd.f32 1.4214138, %v4603_v1  ;;  %v4947_v27 = vmul.f32 %v13409_v32, %v16150_v25  ;;  %v4402_v42 = vadd.f32 %v13308_v11, %v4305_v13 }
 0x7f2   :  { %v4778_v23 = vmul.f32 %v9549_v7, %v4698_v47  ;;  %9556 = vpow2.f32 %v13329_v19  ;;  %v4569_v17 = vmul.f32 1.0614054, %v13413_v48  ;;  %v8885_v56 = vpack.i.bf16 %v4993_v31, %v4992_v34 }
 0x7f3   :  { %v13421_v61 = vmul.f32 %v4823_v26, %v13189_v53  ;;  %v4664_v2 = vmul.f32 %v13342_v6, %v4648_v4  ;;  %v4635_v38 = vmul.f32 %v13359_v40, %v4619_v10  ;;  %v8895_v30 = vpack.i.bf16 %v4947_v27, %v4946_v0  ;;  %v16151_v10 = vld [vmem:[#allocation90_spill] sm:$0xff] }
 0x7f4   :  { %v4585_v1 = vadd.f32 -1.4531521, %v4569_v17  ;;  %9558 = vpow2.f32 %v4754_v5  ;;  %8886 = vrot.lane.b32.xlu1 %v8885_v56, %s9705_s2  ;;  %v4444_v11 = vmul.f32 0.70710677, %v4402_v42  ;;  %v4849_v7 = vrot.slane %v13274_v14, 7 }
 0x7f5   :  { %v13428_v19 = vmul.f32 %v4821_v33, %v13217_v49  ;;  %v4680_v25 = vadd.f32 0.2548296, %v4664_v2  ;;  %v4651_v13 = vadd.f32 -0.28449672, %v4635_v38  ;;  %8896 = vrot.lane.b32.xlu0 %v8895_v30, %s9706_s3  ;;  %v4850_v4 = vrot.slane %v13247_v15, 7 }
 0x7f6   :  { %v4794_v53 = vsub.f32 1.0, %v4778_v23  ;;  %v4601_v27 = vmul.f32 %v13413_v48, %v4585_v1  ;;  %v4492_v26 = vand.u32 2147483647, %v4444_v11  ;;  %v4848_v5 = vrot.slane %v13250_v24, 7 }
 0x7f7   :  { %v4696_v56 = vmul.f32 %v13342_v6, %v4680_v25  ;;  %v4667_v14 = vmul.f32 %v13359_v40, %v4651_v13  ;;  %v13438_v49 = vsel %vm2475_vm3, %v4849_v7, %v4850_v4  ;;  %v4851_v38 = vrot.slane %v13256_v20, 7 }
 0x7f8   :  { %v4617_v33 = vadd.f32 1.4214138, %v4601_v27  ;;  %v13441_v34 = vmul.f32 0.5, %v4402_v42  ;;  %v4508_v15 = vmul.f32 0.3275911, %v4492_v26  ;;  %v4716_v47 = vsub.f32 0.0, %v4492_v26 }
 0x7f9   :  { %v4776_v31 = vmul.f32 %v13372_v18, %v4696_v56  ;;  %v4683_v0 = vadd.f32 0.2548296, %v4667_v14  ;;  %v13448_v6 = vsel %vm2475_vm3, %v4848_v5, %v4849_v7  ;;  %v5009_v23 = vmul.f32 %v13438_v49, %v16151_v10  ;;  %v16152_v18 = vld [vmem:[#allocation89_spill] sm:$0xff] }
 0x7fa   :  { %v4810_v17 = vmul.f32 %v4794_v53, %v13280_v9  ;;  %v4633_v2 = vmul.f32 %v13413_v48, %v4617_v33  ;;  %v4524_v42 = vadd.f32 1.0, %v4508_v15  ;;  %v4732_v30 = vmul.f32 %v4716_v47, %v4492_v26  ;;  %v16153_v9 = vld [vmem:[#allocation35_spill] sm:$0xff]  ;;  %v16154_v33 = vld [vmem:[#allocation33_spill] sm:$0xff] }
 0x7fb   :  { %v4792_v1 = vsub.f32 1.0, %v4776_v31  ;;  %v4699_v25 = vmul.f32 %v13359_v40, %v4683_v0  ;;  %v5008_v13 = vmul.f32 %v13448_v6, %v16152_v18  ;;  %v13461_v7 = vsel %vm2475_vm3, %v4850_v4, %v4851_v38 }
 0x7fc   :  { %v9557_v27 = vpop.eup %9556  ;;  %v4649_v56 = vadd.f32 -0.28449672, %v4633_v2  ;;  %vm4460_vm7 = vcmp.ge.f32.partialorder %v4444_v11, 0.0  ;;  %9560 = vrcp.f32 %v4524_v42  ;;  %v4962_v53 = vmul.f32 %v13438_v49, %v16153_v9 }
 0x7fd   :  { %v4808_v26 = vmul.f32 %v4792_v1, %v13296_v54  ;;  %v4779_v14 = vmul.f32 %v9557_v27, %v4699_v25  ;;  %v8890_v40 = vpack.i.bf16 %v5009_v23, %v5008_v13  ;;  %v4963_v15 = vmul.f32 %v13461_v7, %v16154_v33  ;;  %v16155_v25 = vld [vmem:[#allocation32_spill] sm:$0xff]  ;;  %v16156_v13 = vld [vmem:[#allocation31_spill] sm:$0xff] }
 0x7fe   :  { %v9559_v47 = vpop.eup %9558  ;;  %v4826_v31 = vadd.f32 1.0, %v4810_v17  ;;  %v4665_v0 = vmul.f32 %v13413_v48, %v4649_v56  ;;  %v4308_v4 = vadd.f32 %v13366_v55, %v13126_v60  ;;  %v5040_v10 = vmul.f32 %v13396_v39, %v12897_v44 }
 0x7ff   :  { %v4795_v2 = vsub.f32 1.0, %v4779_v14  ;;  %v4760_v42 = vmul.f32 1.442695, %v4732_v30  ;;  %8891 = vrot.lane.b32.xlu1 %v8890_v40, %s9707_s29  ;;  %v8900_v54 = vpack.i.bf16 %v4963_v15, %v4962_v53  ;;  %v5041_v23 = vmul.f32 %v13409_v32, %v12895_v12  ;;  %v16157_v53 = vld [vmem:[#allocation41_spill] sm:$0xff]  ;;  %v16158_v14 = vld [vmem:[#allocation39_spill] sm:$0xff] }
 0x800   :  { %v4681_v1 = vadd.f32 0.2548296, %v4665_v0  ;;  %v4405_v17 = vadd.f32 %v13324_v46, %v4308_v4  ;;  %v5026_v18 = vmul.f32 %v13256_v20, %v16155_v25  ;;  %v5027_v55 = vmul.f32 %v13327_v8, %v16156_v13 }
 0x801   :  { %v4824_v27 = vadd.f32 1.0, %v4808_v26  ;;  %v4811_v44 = vmul.f32 %v4795_v2, %v13314_v59  ;;  %v13484_v39 = vsel %vm4460_vm7, 1.0, %v16139_v50  ;;  %8901 = vrot.lane.b32.xlu0 %v8900_v54, %s9708_s8  ;;  %v8905_v12 = vpack.i.bf16 %v5041_v23, %v5040_v10 }
 0x802   :  { %v13488_v30 = vmul.f32 %v4826_v31, %v13253_v35  ;;  %v4697_v46 = vmul.f32 %v13413_v48, %v4681_v1  ;;  %v4445_v56 = vmul.f32 0.70710677, %v4405_v17  ;;  %v8910_v9 = vpack.i.bf16 %v5027_v55, %v5026_v18 }
 0x803   :  { %8906 = vrot.lane.b32.xlu1 %v8905_v12, %s9693_s4  ;;  %v4980_v59 = vmul.f32 %v13327_v8, %v12648_v45  ;;  %v4981_v11 = vmul.f32 %v13428_v19, %v12661_v41  ;;  %v4900_v26 = vmul.f32 %v13256_v20, %v16157_v53  ;;  %v4901_v40 = vmul.f32 %v13327_v8, %v16158_v14 }
 0x804   :  { %v4777_v35 = vmul.f32 %v9559_v47, %v4697_v46  ;;  %9562 = vpow2.f32 %v4760_v42  ;;  %v4493_v33 = vand.u32 2147483647, %v4445_v56  ;;  %v7951_v48 = vadd.f32 %v13377_v43, %v13370_v21 }
 0x805   :  { %v13503_v15 = vmul.f32 %v4824_v27, %v13271_v63  ;;  %v4827_v31 = vadd.f32 1.0, %v4811_v44  ;;  %8911 = vrot.lane.b32.xlu0 %v8910_v9, %s9704_s9  ;;  %v8920_v45 = vpack.i.bf16 %v4981_v11, %v4980_v59  ;;  %v8915_v41 = vpack.i.bf16 %v4901_v40, %v4900_v26  ;;  %v16160_v11 = vld [vmem:[#allocation18_spill] sm:$0xff] }
 0x806   :  { %v13506_v0 = vpop.eup %9560  ;;  %v4793_v4 = vsub.f32 1.0, %v4777_v35  ;;  %v4509_v10 = vmul.f32 0.3275911, %v4493_v33  ;;  %v4717_v2 = vsub.f32 0.0, %v4493_v33  ;;  %v4313_v47 = vadd.f32 %v7951_v48, %v13126_v60  ;;  %v16162_v48 = vld [vmem:[#allocation45_spill] sm:$0xff] }
 0x807   :  { %v4572_v42 = vmul.f32 1.0614054, %v13506_v0  ;;  %vm4461_vm8 = vcmp.ge.f32.partialorder %v4445_v56, 0.0  ;;  %8921 = vrot.lane.b32.xlu1 %v8920_v45, %s9695_s5  ;;  %v4916_v63 = vrot.slane %v13327_v8, 1  ;;  %v4917_v21 = vrot.slane %v13428_v19, 1 }
 0x808   :  { %v4809_v43 = vmul.f32 %v4793_v4, %v13345_v36  ;;  %v4525_v54 = vadd.f32 1.0, %v4509_v10  ;;  %v4733_v23 = vmul.f32 %v4717_v2, %v4493_v33  ;;  %v4410_v1 = vadd.f32 %v13301_v57, %v4313_v47 }
 0x809   :  { %v4588_v25 = vadd.f32 -1.4531521, %v4572_v42  ;;  %8916 = vrot.lane.b32.xlu0 %v8915_v41, %s9703_s25  ;;  %v13520_v18 = vsel %vm2733_vm2, %v4916_v63, %v4917_v21  ;;  %v16159_v13 = vrot.slane %v13256_v20, 1  ;;  %v7954_v36 = vadd.f32 %v13400_v62, %v13390_v16  ;;  %v16165_v20 = vld [vmem:[#allocation25_spill] sm:$0xff] }
 0x80a   :  { %v13529_v27 = vmul.f32 %v4827_v31, %v13305_v22  ;;  %v13531_v57 = vmul.f32 0.5, %v4405_v17  ;;  %v13534_v44 = vsel %vm4461_vm8, 1.0, %v16139_v50  ;;  %9564 = vrcp.f32 %v4525_v54  ;;  %v16161_v22 = vld [vmem:[#allocation20_spill] sm:$0xff] }
 0x80b   :  { %v4939_v55 = vsel %vm2733_vm2, %v16159_v13, %v4916_v63  ;;  %v4604_v12 = vmul.f32 %v13506_v0, %v4588_v25  ;;  %v4446_v46 = vmul.f32 0.70710677, %v4410_v1  ;;  %v5043_v9 = vmul.f32 %v13520_v18, %v12913_v51  ;;  %v16164_v25 = vld [vmem:[#allocation23_spill] sm:$0xff] }
 0x80c   :  { %v5042_v56 = vmul.f32 %v4939_v55, %v12915_v28  ;;  %v4825_v59 = vadd.f32 1.0, %v4809_v43  ;;  %v4994_v16 = vmul.f32 %v13409_v32, %v16160_v11  ;;  %v4995_v62 = vmul.f32 %v4939_v55, %v16161_v22  ;;  %v16163_v32 = vld [vmem:[#allocation44_spill] sm:$0xff]  ;;  %v16166_v11 = vld [vmem:[#allocation49_spill] sm:$0xff] }
 0x80d   :  { %v4316_v17 = vadd.f32 %v7954_v36, %v13126_v60  ;;  %v4620_v53 = vadd.f32 1.4214138, %v4604_v12  ;;  %v4762_v26 = vmul.f32 1.442695, %v4733_v23  ;;  %v4494_v14 = vand.u32 2147483647, %v4446_v46 }
 0x80e   :  { %v8935_v40 = vpack.i.bf16 %v5043_v9, %v5042_v56  ;;  %v9563_v35 = vpop.eup %9562  ;;  %vm4462_vm9 = vcmp.ge.f32.partialorder %v4446_v46, 0.0  ;;  %v8925_v33 = vpack.i.bf16 %v4995_v62, %v4994_v16  ;;  %v4948_v31 = vmul.f32 %v4939_v55, %v16162_v48 }
 0x80f   :  { %v4413_v28 = vadd.f32 %v13316_v52, %v4316_v17  ;;  %v4636_v51 = vmul.f32 %v13506_v0, %v4620_v53  ;;  %v4510_v45 = vmul.f32 0.3275911, %v4494_v14  ;;  %v4718_v41 = vsub.f32 0.0, %v4494_v14  ;;  %v16167_v53 = vld [vmem:[#allocation48_spill] sm:$0xff] }
 0x810   :  { %8936 = vrot.lane.b32.xlu1 %v8935_v40, %s9693_s4  ;;  %v4949_v60 = vmul.f32 %v13520_v18, %v16163_v32  ;;  %v13551_v4 = vmul.f32 %v4825_v59, %v13322_v58  ;;  %v13553_v10 = vmul.f32 0.5, %v4410_v1  ;;  %8926 = vrot.lane.b32.xlu0 %v8925_v33, %s9705_s2  ;;  %v4852_v52 = vrot.slane %v13327_v8, 7  ;;  %v16168_v33 = vld [vmem:[#allocation53_spill] sm:$0xff] }
 0x811   :  { %v13556_v2 = vmul.f32 0.70710677, %v4413_v28  ;;  %v4652_v47 = vadd.f32 -0.28449672, %v4636_v51  ;;  %9566 = vpow2.f32 %v4762_v26  ;;  %v4526_v42 = vadd.f32 1.0, %v4510_v45 }
 0x812   :  { %v8940_v63 = vpack.i.bf16 %v4949_v60, %v4948_v31  ;;  %v13561_v43 = vsel %vm4462_vm9, 1.0, %v16139_v50  ;;  %v13568_v58 = vsel %vm2475_vm3, %v4851_v38, %v4852_v52  ;;  %v4853_v23 = vrot.slane %v13428_v19, 7  ;;  %v16169_v31 = vld [vmem:[#allocation52_spill] sm:$0xff] }
 0x813   :  { %v4495_v54 = vand.u32 2147483647, %v13556_v2  ;;  %v4668_v8 = vmul.f32 %v13506_v0, %v4652_v47  ;;  %9568 = vrcp.f32 %v4526_v42  ;;  %v4734_v1 = vmul.f32 %v4718_v41, %v4494_v14  ;;  %v16170_v41 = vld [vmem:[#allocation47_spill] sm:$0xff] }
 0x814   :  { %8941 = vrot.lane.b32.xlu1 %v8940_v63, %s9706_s3  ;;  %v5010_v13 = vmul.f32 %v13461_v7, %v16164_v25  ;;  %v13575_v55 = vpop.eup %9564  ;;  %v5011_v46 = vmul.f32 %v13568_v58, %v16165_v20  ;;  %v13581_v38 = vsel %vm2475_vm3, %v4852_v52, %v4853_v23  ;;  %v13584_v59 = vmul.f32 0.5, %v4413_v28  ;;  %v16173_v20 = vld [vmem:[#allocation36_spill] sm:$0xff] }
 0x815   :  { %v4511_v36 = vmul.f32 0.3275911, %v4495_v54  ;;  %v4719_v12 = vsub.f32 0.0, %v4495_v54  ;;  %v4684_v56 = vadd.f32 0.2548296, %v4668_v8  ;;  %v4964_v16 = vmul.f32 %v13568_v58, %v16166_v11  ;;  %v16172_v8 = vld [vmem:[#allocation17_spill] sm:$0xff] }
 0x816   :  { %v4573_v9 = vmul.f32 1.0614054, %v13575_v55  ;;  %v8930_v17 = vpack.i.bf16 %v5011_v46, %v5010_v13  ;;  %v4965_v26 = vmul.f32 %v13581_v38, %v16167_v53  ;;  %v4902_v48 = vmul.f32 %v13428_v19, %v16168_v33 }
 0x817   :  { %v4527_v22 = vadd.f32 1.0, %v4511_v36  ;;  %v4735_v62 = vmul.f32 %v4719_v12, %v4495_v54  ;;  %v4700_v14 = vmul.f32 %v13506_v0, %v4684_v56  ;;  %v4903_v51 = vmul.f32 %v13319_v29, %v16169_v31  ;;  %v16171_v0 = vld [vmem:[#allocation46_spill] sm:$0xff] }
 0x818   :  { %v4589_v40 = vadd.f32 -1.4531521, %v4573_v9  ;;  %v4764_v28 = vmul.f32 1.442695, %v4734_v1  ;;  %8931 = vrot.lane.b32.xlu0 %v8930_v17, %s9707_s29  ;;  %v8945_v45 = vpack.i.bf16 %v4965_v26, %v4964_v16  ;;  %v5028_v32 = vmul.f32 %v13428_v19, %v16170_v41 }
 0x819   :  { %9570 = vrcp.f32 %v4527_v22  ;;  %v4780_v60 = vmul.f32 %v9563_v35, %v4700_v14  ;;  %v8950_v47 = vpack.i.bf16 %v4903_v51, %v4902_v48  ;;  %v5029_v42 = vmul.f32 %v13319_v29, %v16171_v0  ;;  %v16177_v48 = vld [vmem:[#allocation56_spill] sm:$0xff]  ;;  %v16180_v0 = vld [vmem:[#allocation26_spill] sm:$0xff] }
 0x81a   :  { %v4605_v52 = vmul.f32 %v13575_v55, %v4589_v40  ;;  %v4766_v63 = vmul.f32 1.442695, %v4735_v62  ;;  %8946 = vrot.lane.b32.xlu1 %v8945_v45, %s9708_s8  ;;  %v4982_v54 = vmul.f32 %v13319_v29, %v12728_v3  ;;  %v4983_v1 = vmul.f32 %v13421_v61, %v16172_v8  ;;  %v16174_v62 = vld [vmem:[#allocation38_spill] sm:$0xff] }
 0x81b   :  { %v4918_v25 = vrot.slane %v13319_v29, 1  ;;  %v9567_v13 = vpop.eup %9566  ;;  %v4796_v36 = vsub.f32 1.0, %v4780_v60  ;;  %v8955_v12 = vpack.i.bf16 %v5029_v42, %v5028_v32  ;;  %v4996_v46 = vmul.f32 %v13520_v18, %v16173_v20  ;;  %v16175_v18 = vld [vmem:[#allocation57_spill] sm:$0xff]  ;;  %v16178_v45 = vld [vmem:[#allocation42_spill] sm:$0xff] }
 0x81c   :  { %v4621_v35 = vadd.f32 1.4214138, %v4605_v52  ;;  %8951 = vrot.lane.b32.xlu0 %v8950_v47, %s9703_s25  ;;  %v8960_v56 = vpack.i.bf16 %v4983_v1, %v4982_v54  ;;  %v4919_v9 = vrot.slane %v13421_v61, 1  ;;  %v4854_v11 = vrot.slane %v13319_v29, 7  ;;  %v16176_v29 = vld [vmem:[#allocation43_spill] sm:$0xff]  ;;  %v16179_v52 = vld [vmem:[#allocation86_spill] sm:$0xff] }
 0x81d   :  { %v4937_v3 = vsel %vm2733_vm2, %v4917_v21, %v4918_v25  ;;  %v13616_v16 = vpop.eup %9568  ;;  %9572 = vpow2.f32 %v4764_v28  ;;  %v5012_v14 = vmul.f32 %v13581_v38, %v16176_v29  ;;  %v4812_v51 = vmul.f32 %v4796_v36, %v13484_v39  ;;  %v16181_v1 = vld [vmem:[#allocation10_spill] sm:$0xff] }
 0x81e   :  { %v4637_v22 = vmul.f32 %v13575_v55, %v4621_v35  ;;  %v4997_v17 = vmul.f32 %v4937_v3, %v16174_v62  ;;  %v4950_v53 = vmul.f32 %v4937_v3, %v16175_v18  ;;  %v4574_v26 = vmul.f32 1.0614054, %v13616_v16  ;;  %8956 = vrot.lane.b32.xlu1 %v8955_v12, %s9704_s9  ;;  %v16182_v12 = vld [vmem:[#allocation60_spill] sm:$0xff]  ;;  %v16184_v62 = vld [vmem:[#allocation58_spill] sm:$0xff] }
 0x81f   :  { %v4936_v19 = vsel %vm2733_vm2, %v4918_v25, %v4919_v9  ;;  %v13627_v21 = vsel %vm2475_vm3, %v4853_v23, %v4854_v11  ;;  %9574 = vpow2.f32 %v4766_v63  ;;  %v4855_v32 = vrot.slane %v13421_v61, 7 }
 0x820   :  { %v4653_v40 = vadd.f32 -0.28449672, %v4637_v22  ;;  %v8965_v33 = vpack.i.bf16 %v4997_v17, %v4996_v46  ;;  %v4951_v31 = vmul.f32 %v4936_v19, %v16177_v48  ;;  %v4590_v28 = vadd.f32 -1.4531521, %v4574_v26  ;;  %8961 = vrot.lane.b32.xlu0 %v8960_v56, %s9695_s5  ;;  %v16183_v46 = vld [vmem:[#allocation59_spill] sm:$0xff] }
 0x821   :  { %v5013_v41 = vmul.f32 %v13627_v21, %v16178_v45  ;;  %v4966_v47 = vmul.f32 %v13627_v21, %v16179_v52  ;;  %v5044_v42 = vmul.f32 %v4937_v3, %v16180_v0  ;;  %v13647_v8 = vsel %vm2475_vm3, %v4854_v11, %v4855_v32  ;;  %v16185_v11 = vld [vmem:[#allocation40_spill] sm:$0xff] }
 0x822   :  { %v4669_v23 = vmul.f32 %v13575_v55, %v4653_v40  ;;  %v8975_v60 = vpack.i.bf16 %v4951_v31, %v4950_v53  ;;  %v4606_v39 = vmul.f32 %v13616_v16, %v4590_v28  ;;  %8966 = vrot.lane.b32.xlu1 %v8965_v33, %s9705_s2  ;;  %v5045_v25 = vmul.f32 %v4936_v19, %v16181_v1  ;;  %v16187_v31 = vld [vmem:[#allocation5_spill] sm:$0xff]  ;;  %v16188_v45 = vld [vmem:[#allocation80_spill] sm:$0xff] }
 0x823   :  { %v13641_v63 = vpop.eup %9570  ;;  %v8970_v54 = vpack.i.bf16 %v5013_v41, %v5012_v14  ;;  %v4967_v20 = vmul.f32 %v13647_v8, %v16182_v12  ;;  %v5030_v56 = vmul.f32 %v13421_v61, %v16183_v46  ;;  %v5031_v17 = vmul.f32 %v13503_v15, %v16184_v62  ;;  %v16186_v14 = vld [vmem:[#allocation136_spill] sm:$0xff]  ;;  %v16190_v46 = vld [vmem:[#allocation51_spill] sm:$0xff]  ;;  %v16191_v62 = vld [vmem:[#allocation62_spill] sm:$0xff] }
 0x824   :  { %v4685_v36 = vadd.f32 0.2548296, %v4669_v23  ;;  %v4575_v35 = vmul.f32 1.0614054, %v13641_v63  ;;  %v4622_v3 = vadd.f32 1.4214138, %v4606_v39  ;;  %8976 = vrot.lane.b32.xlu0 %v8975_v60, %s9706_s3  ;;  %v8985_v22 = vpack.i.bf16 %v5045_v25, %v5044_v42 }
 0x825   :  { %v4984_v18 = vmul.f32 %v13503_v15, %v16185_v11  ;;  %v8980_v29 = vpack.i.bf16 %v4967_v20, %v4966_v47  ;;  %v4985_v40 = vmul.f32 %v13551_v4, %v16186_v14  ;;  %v8990_v48 = vpack.i.bf16 %v5031_v17, %v5030_v56  ;;  %v16192_v11 = vld [vmem:[#allocation24_spill] sm:$0xff] }
 0x826   :  { %v4701_v53 = vmul.f32 %v13575_v55, %v4685_v36  ;;  %v4591_v26 = vadd.f32 -1.4531521, %v4575_v35  ;;  %v4638_v33 = vmul.f32 %v13616_v16, %v4622_v3  ;;  %8971 = vrot.lane.b32.xlu1 %v8970_v54, %s9707_s29  ;;  %v4904_v28 = vmul.f32 %v13421_v61, %v16187_v31  ;;  %v16189_v36 = vld [vmem:[#allocation50_spill] sm:$0xff]  ;;  %v16195_v31 = vld [vmem:[#allocation55_spill] sm:$0xff] }
 0x827   :  { %v4905_v41 = vmul.f32 %v13503_v15, %v16188_v45  ;;  %v9573_v23 = vpop.eup %9572  ;;  %v9000_v52 = vpack.i.bf16 %v4985_v40, %v4984_v18  ;;  %v4920_v47 = vrot.slane %v13503_v15, 1  ;;  %v4828_v0 = vadd.f32 1.0, %v4812_v51  ;;  %v16193_v18 = vld [vmem:[#allocation103_spill] sm:$0xff] }
 0x828   :  { %v4781_v60 = vmul.f32 %v9567_v13, %v4701_v53  ;;  %v4607_v55 = vmul.f32 %v13641_v63, %v4591_v26  ;;  %v4654_v42 = vadd.f32 -0.28449672, %v4638_v33  ;;  %8981 = vrot.lane.b32.xlu0 %v8980_v29, %s9708_s8  ;;  %v4921_v54 = vrot.slane %v13551_v4, 1  ;;  %v16194_v26 = vld [vmem:[#allocation102_spill] sm:$0xff] }
 0x829   :  { %v8995_v39 = vpack.i.bf16 %v4905_v41, %v4904_v28  ;;  %v9575_v1 = vpop.eup %9574  ;;  %v4935_v61 = vsel %vm2733_vm2, %v4919_v9, %v4920_v47  ;;  %v4998_v35 = vmul.f32 %v4936_v19, %v16189_v36  ;;  %v4856_v13 = vrot.slane %v13503_v15, 7  ;;  %v16196_v41 = vld [vmem:[#allocation54_spill] sm:$0xff]  ;;  %v16199_v36 = vld [vmem:[#allocation112_spill] sm:$0xff] }
 0x82a   :  { %v4623_v25 = vadd.f32 1.4214138, %v4607_v55  ;;  %v4797_v12 = vsub.f32 1.0, %v4781_v60  ;;  %v4670_v20 = vmul.f32 %v13616_v16, %v4654_v42  ;;  %8986 = vrot.lane.b32.xlu1 %v8985_v22, %s9693_s4  ;;  %v4934_v51 = vsel %vm2733_vm2, %v4920_v47, %v4921_v54  ;;  %v16197_v47 = vld [vmem:[#allocation107_spill] sm:$0xff]  ;;  %v16198_v42 = vld [vmem:[#allocation113_spill] sm:$0xff] }
 0x82b   :  { %v4999_v56 = vmul.f32 %v4935_v61, %v16190_v46  ;;  %v5046_v17 = vmul.f32 %v4935_v61, %v16191_v62  ;;  %v5047_v9 = vmul.f32 %v4934_v51, %v16192_v11  ;;  %v4952_v19 = vmul.f32 %v4935_v61, %v16193_v18  ;;  %v16201_v46 = vld [vmem:[#allocation105_spill] sm:$0xff] }
 0x82c   :  { %v4639_v3 = vmul.f32 %v13641_v63, %v4623_v25  ;;  %v4686_v53 = vadd.f32 0.2548296, %v4670_v20  ;;  %8991 = vrot.lane.b32.xlu0 %v8990_v48, %s9704_s9  ;;  %v4953_v29 = vmul.f32 %v4934_v51, %v16194_v26  ;;  %v13690_v22 = vsel %vm2475_vm3, %v4855_v32, %v4856_v13  ;;  %v16204_v11 = vld [vmem:[#allocation9_spill] sm:$0xff] }
 0x82d   :  { %v9005_v15 = vpack.i.bf16 %v4999_v56, %v4998_v35  ;;  %v13693_v14 = vmul.f32 %v4828_v0, %v13441_v34  ;;  %vm4463_vm10 = vcmp.ge.f32.partialorder %v13556_v2, 0.0  ;;  %v9015_v33 = vpack.i.bf16 %v5047_v9, %v5046_v17  ;;  %v16203_v17 = vld [vmem:[#allocation8_spill] sm:$0xff] }
 0x82e   :  { %v4655_v40 = vadd.f32 -0.28449672, %v4639_v3  ;;  %v5014_v28 = vmul.f32 %v13647_v8, %v16195_v31  ;;  %v4702_v45 = vmul.f32 %v13616_v16, %v4686_v53  ;;  %9001 = vrot.lane.b32.xlu1 %v9000_v52, %s9695_s5  ;;  %v9020_v48 = vpack.i.bf16 %v4953_v29, %v4952_v19  ;;  %v16202_v3 = vld [vmem:[#allocation104_spill] sm:$0xff] }
 0x82f   :  { %v5015_v60 = vmul.f32 %v13690_v22, %v16196_v41  ;;  %v4857_v32 = vrot.slane %v13551_v4, 7  ;;  %v4813_v34 = vmul.f32 %v4797_v12, %v13534_v44  ;;  %v4968_v0 = vmul.f32 %v13690_v22, %v16197_v47  ;;  %v16200_v12 = vld [vmem:[#allocation106_spill] sm:$0xff] }
 0x830   :  { %v4671_v55 = vmul.f32 %v13641_v63, %v4655_v40  ;;  %v4906_v25 = vmul.f32 %v13551_v4, %v16198_v42  ;;  %v4782_v61 = vmul.f32 %v9573_v23, %v4702_v45  ;;  %8996 = vrot.lane.b32.xlu0 %v8995_v39, %s9703_s25  ;;  %v4907_v35 = vmul.f32 %v13488_v30, %v16199_v36  ;;  %v16205_v40 = vld [vmem:[#allocation76_spill] sm:$0xff] }
 0x831   :  { %v9010_v16 = vpack.i.bf16 %v5015_v60, %v5014_v28  ;;  %v13712_v52 = vsel %vm2475_vm3, %v4856_v13, %v4857_v32  ;;  %v5032_v56 = vmul.f32 %v13551_v4, %v16201_v46  ;;  %v5033_v23 = vmul.f32 %v13488_v30, %v16202_v3  ;;  %v16206_v60 = vld [vmem:[#allocation72_spill] sm:$0xff]  ;;  %v16212_v46 = vld [vmem:[#allocation114_spill] sm:$0xff] }
 0x832   :  { %v4687_v44 = vadd.f32 0.2548296, %v4671_v55  ;;  %v4969_v20 = vmul.f32 %v13712_v52, %v16200_v12  ;;  %v4798_v62 = vsub.f32 1.0, %v4782_v61  ;;  %9016 = vrot.lane.b32.xlu1 %v9015_v33, %s9693_s4  ;;  %v9030_v39 = vpack.i.bf16 %v4907_v35, %v4906_v25  ;;  %v16210_v61 = vld [vmem:[#allocation6_spill] sm:$0xff]  ;;  %v16213_v3 = vld [vmem:[#allocation16_spill] sm:$0xff] }
 0x833   :  { %v4986_v13 = vmul.f32 %v13488_v30, %v16203_v17  ;;  %v4987_v9 = vmul.f32 %v13529_v27, %v16204_v11  ;;  %v9035_v53 = vpack.i.bf16 %v5033_v23, %v5032_v56  ;;  %v4922_v26 = vrot.slane %v13488_v30, 1  ;;  %v16211_v35 = vld [vmem:[#allocation122_spill] sm:$0xff] }
 0x834   :  { %v4703_v18 = vmul.f32 %v13641_v63, %v4687_v44  ;;  %v9025_v19 = vpack.i.bf16 %v4969_v20, %v4968_v0  ;;  %v4829_v4 = vadd.f32 1.0, %v4813_v34  ;;  %9006 = vrot.lane.b32.xlu0 %v9005_v15, %s9705_s2  ;;  %v5000_v31 = vmul.f32 %v4934_v51, %v16205_v40  ;;  %v16207_v34 = vld [vmem:[#allocation118_spill] sm:$0xff]  ;;  %v16208_v51 = vld [vmem:[#allocation101_spill] sm:$0xff] }
 0x835   :  { %v9040_v29 = vpack.i.bf16 %v4987_v9, %v4986_v13  ;;  %v4923_v33 = vrot.slane %v13529_v27, 1  ;;  %v4814_v28 = vmul.f32 %v4798_v62, %v13561_v43  ;;  %v4933_v41 = vsel %vm2733_vm2, %v4921_v54, %v4922_v26  ;;  %v16214_v62 = vld [vmem:[#allocation111_spill] sm:$0xff]  ;;  %v16215_v9 = vld [vmem:[#allocation121_spill] sm:$0xff] }
 0x836   :  { %v4783_v45 = vmul.f32 %v9575_v1, %v4703_v18  ;;  %v4858_v63 = vrot.slane %v13488_v30, 7  ;;  %9021 = vrot.lane.b32.xlu1 %v9020_v48, %s9706_s3  ;;  %v5001_v55 = vmul.f32 %v4933_v41, %v16206_v60  ;;  %v4954_v47 = vmul.f32 %v4933_v41, %v16207_v34  ;;  %v16209_v1 = vld [vmem:[#allocation2_spill] sm:$0xff]  ;;  %v16241_v34 = vld [vmem:[#allocation99_spill] sm:$0xff] }
 0x837   :  { %v4932_v15 = vsel %vm2733_vm2, %v4922_v26, %v4923_v33  ;;  %v13743_v0 = vmul.f32 %v13712_v52, %v16208_v51  ;;  %v4859_v30 = vrot.slane %v13529_v27, 7  ;;  %v4479_v48 = vsel %vm4463_vm10, 1.0, %v16139_v50  ;;  %v16216_v26 = vld [vmem:[#allocation120_spill] sm:$0xff]  ;;  %v16248_v50 = vld [vmem:[#allocation69_spill] sm:$0xff] }
 0x838   :  { %v4799_v43 = vsub.f32 1.0, %v4783_v45  ;;  %v4955_v42 = vmul.f32 %v4932_v15, %v16209_v1  ;;  %v13748_v54 = vsel %vm2475_vm3, %v4857_v32, %v4858_v63  ;;  %9011 = vrot.lane.b32.xlu0 %v9010_v16, %s9707_s29  ;;  %v9045_v25 = vpack.i.bf16 %v5001_v55, %v5000_v31  ;;  %v16219_v55 = vld [vmem:[#allocation34_spill] sm:$0xff]  ;;  %v16222_v1 = vld [vmem:[#allocation109_spill] sm:$0xff] }
 0x839   :  { %v13757_v36 = vmul.f32 %v13748_v54, %v16210_v61  ;;  %v13761_v44 = vmul.f32 %v13748_v54, %v16211_v35  ;;  %v13765_v20 = vsel %vm2475_vm3, %v4858_v63, %v4859_v30  ;;  %v13768_v2 = vmul.f32 %v4933_v41, %v16212_v46 }
 0x83a   :  { %v4815_v12 = vmul.f32 %v4799_v43, %v4479_v48  ;;  %v9055_v32 = vpack.i.bf16 %v4955_v42, %v4954_v47  ;;  %v4830_v56 = vadd.f32 1.0, %v4814_v28  ;;  %9026 = vrot.lane.b32.xlu1 %v9025_v19, %s9708_s8  ;;  %v13775_v23 = vmul.f32 %v13765_v20, %v16213_v3  ;;  %v16217_v28 = vld [vmem:[#allocation87_spill] sm:$0xff]  ;;  %v16220_v47 = vld [vmem:[#allocation29_spill] sm:$0xff]  ;;  %v16221_v43 = vld [vmem:[#allocation108_spill] sm:$0xff] }
 0x83b   :  { %v9050_v16 = vpack.i.bf16 %v13757_v36, %v13743_v0  ;;  %v13778_v17 = vmul.f32 %v4932_v15, %v16214_v62  ;;  %v13781_v13 = vmul.f32 %v4829_v4, %v13531_v57  ;;  %v13785_v18 = vmul.f32 %v13529_v27, %v16215_v9  ;;  %v16218_v4 = vld [vmem:[#allocation84_spill] sm:$0xff]  ;;  %v9209_v3 = vld [vmem:[%s15341_s10] sm:$0xff]  }
 0x83c   :  { %v4831_v11 = vadd.f32 1.0, %v4815_v12  ;;  %v13789_v19 = vmul.f32 %v13693_v14, %v16216_v26  ;;  %9031 = vrot.lane.b32.xlu0 %v9030_v39, %s9703_s25  ;;  %v9060_v40 = vpack.i.bf16 %v13775_v23, %v13761_v44  ;;  %v13798_v57 = vmul.f32 %v13529_v27, %v16217_v28  ;;  %v16226_v44 = vld [vmem:[#allocation22_spill] sm:$0xff]  ;;  %v16227_v12 = vld [vmem:[#allocation117_spill] sm:$0xff]  ;;  %v16229_v9 = vld [vmem:[#allocation100_spill] sm:$0xff]  ;;  %8321 = vmatprep.subr.bf16.mxu0 %v9209_v3 }
 0x83d   :  { %v9065_v31 = vpack.i.bf16 %v13778_v17, %v13768_v2  ;;  %v13802_v45 = vmul.f32 %v13693_v14, %v16218_v4  ;;  %v4924_v63 = vrot.slane %v13693_v14, 1  ;;  %v13811_v60 = vmul.f32 %v4830_v56, %v13553_v10  ;;  %v16228_v56 = vld [vmem:[#allocation116_spill] sm:$0xff]  ;;  %v16230_v4 = vld [vmem:[#allocation61_spill] sm:$0xff]  ;;  %8322 = vmatpush3.bf16.msra.mxu0 %v9209_v3 }
 0x83e   :  { %v13805_v41 = vmul.f32 %v4831_v11, %v13584_v59  ;;  %9036 = vrot.lane.b32.xlu1 %v9035_v53, %s9704_s9  ;;  %v13816_v27 = vmul.f32 %v13250_v24, %v16219_v55  ;;  %v4860_v59 = vrot.slane %v13693_v14, 7  ;;  %v13829_v53 = vmul.f32 %v4932_v15, %v16221_v43  ;;  %v16225_v15 = vld [vmem:[#allocation67_spill] sm:$0xff]  ;;  %v16239_v28 = vld [vmem:[#allocation77_spill] sm:$0xff] }
 0x83f   :  { %v4931_v10 = vsel %vm2733_vm2, %v4923_v33, %v4924_v63  ;;  %v4925_v36 = vrot.slane %v13781_v13, 1  ;;  %v16224_v35 = vrot.slane %v13250_v24, 1  ;;  %v13853_v46 = vmul.f32 %v13765_v20, %v16227_v12  ;;  %v16235_v12 = vld [vmem:[#allocation95_spill] sm:$0xff]  ;;  %v16249_v2 = vld [vmem:[#allocation97_spill] sm:$0xff] }
 0x840   :  { %v13823_v51 = vmul.f32 %v13805_v41, %v16220_v47  ;;  %v4927_v0 = vrot.slane %v13805_v41, 1  ;;  %9041 = vrot.lane.b32.xlu0 %v9040_v29, %s9695_s5  ;;  %v13833_v42 = vmul.f32 %v4931_v10, %v16222_v1  ;;  %v4863_v48 = vrot.slane %v13805_v41, 7  ;;  %v16231_v47 = vld [vmem:[#allocation71_spill] sm:$0xff] }
 0x841   :  { %v13838_v61 = vsel %vm2475_vm3, %v4859_v30, %v4860_v59  ;;  %v13849_v29 = vmul.f32 %v16226_v44, %v16225_v15  ;;  %v4930_v11 = vsel %vm2733_vm2, %v4924_v63, %v4925_v36  ;;  %v13870_v26 = vmul.f32 %v4931_v10, %v16229_v9  ;;  %v16233_v63 = vld [vmem:[#allocation65_spill] sm:$0xff] }
 0x842   :  { %16223 = vst [vmem:[#allocation27_spill] sm:$0xff] %v13838_v61  ;;  %v13845_v33 = vsel %vm2733_vm2, %v4927_v0, %v16224_v35  ;;  %v13857_v30 = vmul.f32 %v13838_v61, %v16228_v56  ;;  %9046 = vrot.lane.b32.xlu1 %v9045_v25, %s9705_s2  ;;  %v9090_v23 = vpack.i.bf16 %v13816_v27, %v13823_v51  ;;  %v16232_v27 = vld [vmem:[#allocation78_spill] sm:$0xff]  ;;  %v16234_v35 = vld [vmem:[#allocation96_spill] sm:$0xff]  ;;  %vm5601_vm11 = vcmask 195584  }
 0x843   :  { %v13875_v55 = vmul.f32 %v4930_v11, %v16230_v4  ;;  %v13879_v25 = vmul.f32 %v13781_v13, %v16231_v47  ;;  %v13883_v51 = vmul.f32 %v13811_v60, %v16232_v27  ;;  %v13888_v43 = vmul.f32 %v13845_v33, %v16233_v63  ;;  %v16236_v27 = vld [vmem:[#allocation93_spill] sm:$0xff] }
 0x844   :  { %9056 = vrot.lane.b32.xlu0 %v9055_v32, %s9706_s3  ;;  %v13894_v1 = vsel %vm2475_vm3, %v4863_v48, %v4848_v5  ;;  %v13897_v15 = vmul.f32 %v4931_v10, %v16234_v35  ;;  %v13900_v56 = vmul.f32 %v4930_v11, %v16235_v12  ;;  %v4926_v4 = vrot.slane %v13811_v60, 1  ;;  %v9210_v5 = vld [vmem:[%s15341_s10 + $0x8] sm:$0xff]  }
 0x845   :  { %v4861_v47 = vrot.slane %v13781_v13, 7  ;;  %v13916_v63 = vmul.f32 %v13838_v61, %v16236_v27  ;;  %v4862_v35 = vrot.slane %v13811_v60, 7  ;;  %v16237_v12 = vld [vmem:[#allocation3_spill] sm:$0xff]  ;;  %8323 = vmatprep.subr.bf16.mxu0 %v9210_v5  ;;  %v13979_v17 = vmul.f32 %v13845_v33, %v16249_v2 }
 0x846   :  { %9051 = vrot.lane.b32.xlu1 %v9050_v16, %s9707_s29  ;;  %v13921_v32 = vmul.f32 %v13693_v14, %v16237_v12  ;;  %v4928_v3 = vsel %vm2733_vm2, %v4926_v4, %v4927_v0  ;;  %v4929_v9 = vsel %vm2733_vm2, %v4925_v36, %v4926_v4  ;;  %v16238_v10 = vld [vmem:[#allocation63_spill] sm:$0xff]  ;;  %v16240_v12 = vld [vmem:[#allocation125_spill] sm:$0xff]  ;;  %v16242_v4 = vld [vmem:[#allocation128_spill] sm:$0xff]  ;;  %8324 = vmatpush3.bf16.msra.mxu0 %v9210_v5  ;;  %vm5777_vm2 = vcmask 1043456  }
 0x847   :  { %v13929_v16 = vsel %vm2475_vm3, %v4860_v59, %v4861_v47  ;;  %v13933_v27 = vmul.f32 %v13781_v13, %v16238_v10  ;;  %v4958_v14 = vmul.f32 %v4929_v9, %v16239_v28  ;;  %v4959_v62 = vmul.f32 %v4928_v3, %v16240_v12  ;;  %v16243_v28 = vld [vmem:[#allocation115_spill] sm:$0xff] }
 0x848   :  { %9061 = vrot.lane.b32.xlu0 %v9060_v40, %s9708_s8  ;;  %v4973_v0 = vmul.f32 %v13929_v16, %v16241_v34  ;;  %v13942_v36 = vsel %vm2475_vm3, %v4862_v35, %v4863_v48  ;;  %v13946_v59 = vsel %vm2475_vm3, %v4861_v47, %v4862_v35  ;;  %v13954_v12 = vmul.f32 %v13811_v60, %v16243_v28  ;;  %v9211_v34 = vld [vmem:[%s15341_s10 + $0x10] sm:$0xff]   ;;  %v16245_v35 = vld [vmem:[#allocation70_spill] sm:$0xff]  ;;  %v16247_v28 = vld [vmem:[#allocation79_spill] sm:$0xff] }
 0x849   :  { %v4975_v10 = vmul.f32 %v13942_v36, %v16242_v4  ;;  %v9135_v40 = vpack.i.bf16 %v13933_v27, %v13921_v32  ;;  %v9125_v37 = vpack.i.bf16 %v4959_v62, %v4958_v14  ;;  %v16244_v47 = vld [vmem:[#allocation12_spill] sm:$0xff]  ;;  %v4991_v27 = vmul.f32 %v13805_v41, %v16245_v35  ;;  %v16246_v4 = vld [vmem:[#allocation81_spill] sm:$0xff]  ;;  %8325 = vmatprep.subr.bf16.mxu0 %v9211_v34  ;;  %v16252_v35 = vld [vmem:[#allocation83_spill] sm:$0xff] }
 0x84a   :  { %9066 = vrot.lane.b32.xlu1 %v9065_v31, %s9693_s4  ;;  %v9120_v48 = vpack.i.bf16 %v4973_v0, %v13916_v63  ;;  %v4974_v32 = vmul.f32 %v13946_v59, %v16244_v47  ;;  %v13969_v5 = vmul.f32 %v4930_v11, %v16246_v4  ;;  %v13972_v39 = vmul.f32 %v4929_v9, %v16247_v28  ;;  %v16251_v0 = vld [vmem:[#allocation85_spill] sm:$0xff] }
 0x84b   :  { %v13975_v61 = vmul.f32 %v4928_v3, %v16248_v50  ;;  %v16250_v31 = vpack.i.bf16 %v13789_v19, %v13785_v18  ;;  %v9095_v62 = vpack.i.bf16 %v13849_v29, %v13888_v43  ;;  %v9140_v63 = vpack.i.bf16 %v4991_v27, %v13954_v12  ;;  %8326 = vmatpush3.bf16.msra.mxu0 %v9211_v34  ;;  %v9212_v18 = vld [vmem:[%s15341_s10 + $0x18] sm:$0xff]   ;;  %v16253_v19 = vld [vmem:[#allocation64_spill] sm:$0xff]  ;;  %v16256_v12 = vld [vmem:[#allocation98_spill] sm:$0xff] }
 0x84c   :  { %v9130_v11 = vpack.i.bf16 %v4975_v10, %v4974_v32  ;;  %v9145_v50 = vpack.i.bf16 %v13972_v39, %v13969_v5  ;;  %v5020_v47 = vmul.f32 %v13929_v16, %v16251_v0  ;;  %v5021_v4 = vmul.f32 %v13946_v59, %v16252_v35  ;;  %v16254_v39 = vld [vmem:[#allocation82_spill] sm:$0xff]  ;;  %8327 = vmatprep.subr.bf16.mxu0 %v9212_v18  ;;  %v16260_v0 = vld [vmem:[#allocation141_spill] sm:$0xff] }
 0x84d   :  { %9071 = vrot.lane.b32.xlu0 %v16250_v31, %s9704_s9  ;;  %v9150_v14 = vpack.i.bf16 %v13979_v17, %v13975_v61  ;;  %v5022_v29 = vmul.f32 %v13942_v36, %v16253_v19  ;;  %v5023_v43 = vmul.f32 %v13894_v1, %v16254_v39  ;;  %v16255_v61 = vld [vmem:[#allocation94_spill] sm:$0xff]  ;;  %v5037_v32 = vmul.f32 %v13811_v60, %v16256_v12  ;;  %v16259_v17 = vld [vmem:[#allocation129_spill] sm:$0xff] }
 0x84e   :  { %9091 = vrot.lane.b32.xlu1 %v9090_v23, %s9703_s25  ;;  %v5036_v10 = vmul.f32 %v13781_v13, %v16255_v61  ;;  %v16257_v27 = vld [vmem:[#allocation66_spill] sm:$0xff]  ;;  %v9155_v5 = vpack.i.bf16 %v5021_v4, %v5020_v47  ;;  %v16258_v23 = vpack.i.bf16 %v13802_v45, %v13798_v57  ;;  %v5052_v31 = vmul.f32 %v4929_v9, %v16259_v17  ;;  %v16261_v13 = vld [vmem:[#allocation68_spill] sm:$0xff]  ;;  %v16270_v61 = vld [vmem:[#allocation15_spill] sm:$0xff] }
 0x84f   :  { %v4960_v34 = vmul.f32 %v13894_v1, %v16257_v27  ;;  %v9160_v28 = vpack.i.bf16 %v5023_v43, %v5022_v29  ;;  %v5053_v35 = vmul.f32 %v4928_v3, %v16260_v0  ;;  %8328 = vmatpush3.bf16.msra.mxu0 %v9212_v18  ;;  %v4961_v60 = vmul.f32 %v13448_v6, %v16261_v13  ;;  %v9213_v47 = vld [vmem:[%s15341_s10 + $0x20] ss:$0 sps:$4 sm:$0xff]  }
 0x850   :  { %v9165_v2 = vpack.i.bf16 %v5037_v32, %v5036_v10  ;;  %v16262_v57 = vpack.i.bf16 %v13833_v42, %v13829_v53  ;;  %8602 = vmatprep.subr.msk.bf16.mxu0 %vm5777_vm2, %v9213_v47  ;;  %v5779_v9 = vsel %vm5777_vm2, %v9213_v47, 0  ;;  %v16263_v3 = vpack.i.bf16 %v13857_v30, %v13853_v46  ;;  %v16271_v32 = vld [vmem:[#allocation140_spill] sm:$0xff]  ;;  %v16273_v47 = vld [vmem:[#allocation134_spill] sm:$0xff] }
 0x851   :  { %9076 = vrot.lane.b32.xlu0 %v16258_v23, %s9703_s25  ;;  %v9175_v19 = vpack.i.bf16 %v5053_v35, %v5052_v31  ;;  %v9100_v45 = vpack.i.bf16 %v4961_v60, %v4960_v34  ;;  %v16265_v42 = vpack.i.bf16 %v13883_v51, %v13879_v25  ;;  %v16266_v4 = vpack.i.bf16 %v13900_v56, %v13897_v15  ;;  %v16267_v25 = vld [vmem:[#allocation130_spill] sm:$0xff]  ;;  %v16268_v15 = vld [vmem:[#allocation132_spill] sm:$0xff]  ;;  %v16272_v34 = vld [vmem:[#allocation145_spill] sm:$0xff] }
 0x852   :  { %9096 = vrot.lane.b32.xlu1 %v9095_v62, %s9706_s3  ;;  %v16264_v62 = vpack.i.bf16 %v13875_v55, %v13870_v26  ;;  %v4882_v51 = vmul.f32 %v13448_v6, %v16267_v25  ;;  %v4883_v56 = vmul.f32 %v13438_v49, %v16268_v15  ;;  %vm5584_vm3 = vcmask 130048   ;;  %v16269_v49 = vld [vmem:[#allocation124_spill] sm:$0xff] }
 0x853   :  { %8330 = vmatpush3.bf16.msra.mxu0 %v5779_v9  ;;  %v5039_v10 = vmul.f32 %v13250_v24, %v16270_v61  ;;  %v5054_v27 = vmul.f32 %v13845_v33, %v16271_v32  ;;  %vm5634_vm12 = vcmask 326656   ;;  %vm5651_vm13 = vcmask 392192  }
 0x854   :  { %vm5668_vm14 = vcmask 457728   ;;  %vm5752_vm15 = vcmask 588800   ;;  %vm6141_vm5 = vcmask 15360   ;;  %vm6190_vm6 = vcmask 1041408  }
 0x855   :  { %9081 = vrot.lane.b32.xlu0 %v16262_v57, %s9705_s2  ;;  %v4885_v57 = vmul.f32 %v13568_v58, %v16273_v47 }
 0x856   :  { %9101 = vrot.lane.b32.xlu1 %v9100_v45, %s9708_s8 }
 0x859   :  { %9086 = vrot.lane.b32.xlu0 %v16263_v3, %s9707_s29 }
 0x85a   :  { %9106 = vrot.lane.b32.xlu1 %v16264_v62, %s9693_s4  ;;  %v14045_v18 = vpop.permute.xlu1 %8866 }
 0x85b   :  { %v8872_v53 = vpop.permute.xlu0 %8871 }
 0x85c   :  { %v8874_v30 = vunpack.i.h.bf16 %v8872_v53  ;;  %v8873_v26 = vunpack.i.l.bf16 %v8872_v53 }
 0x85d   :  { %9111 = vrot.lane.b32.xlu0 %v16265_v42, %s9703_s25 }
 0x85e   :  { %9116 = vrot.lane.b32.xlu1 %v16266_v4, %s9706_s3  ;;  %v5571_v39 = vsel %vm598_vm1, %v4883_v56, %v8874_v30  ;;  %v16274_v4 = vld [vmem:[#allocation133_spill] sm:$0xff] }
 0x85f   :  { %v14050_v55 = vpop.permute.xlu1 %8876 }
 0x860   :  { %v8882_v46 = vpop.permute.xlu0 %8881 }
 0x861   :  { %9126 = vrot.lane.b32.xlu0 %v9125_v37, %s9706_s3  ;;  %v8883_v17 = vunpack.i.l.bf16 %v8882_v46 }
 0x862   :  { %9121 = vrot.lane.b32.xlu1 %v9120_v48, %s9708_s8 }
 0x865   :  { %9131 = vrot.lane.b32.xlu0 %v9130_v11, %s9708_s8  ;;  %v5570_v11 = vsel %vm598_vm1, %v4882_v51, %v8873_v26 }
 0x866   :  { %9136 = vrot.lane.b32.xlu1 %v9135_v40, %s9695_s5  ;;  %v14063_v6 = vpop.permute.xlu1 %8886 }
 0x867   :  { %v8897_v29 = vpop.permute.xlu0 %8896 }
 0x868   :  { %v8899_v37 = vunpack.i.h.bf16 %v8897_v29  ;;  %v8898_v48 = vunpack.i.l.bf16 %v8897_v29 }
 0x869   :  { %9141 = vrot.lane.b32.xlu0 %v9140_v63, %s9695_s5  ;;  %v5038_v63 = vmul.f32 %v13805_v41, %v16269_v49  ;;  %v5055_v41 = vmul.f32 %v16226_v44, %v16272_v34 }
 0x86a   :  { %9146 = vrot.lane.b32.xlu1 %v9145_v50, %s9705_s2  ;;  %v5587_v40 = vsel %vm5584_vm3, %v5570_v11, %v8898_v48  ;;  %v5588_v43 = vsel %vm5584_vm3, %v5571_v39, %v8899_v37  ;;  %v16275_v39 = vld [vmem:[#allocation14_spill] sm:$0xff] }
 0x86b   :  { %v9170_v50 = vpack.i.bf16 %v5039_v10, %v5038_v63 }
 0x86d   :  { %9151 = vrot.lane.b32.xlu0 %v9150_v14, %s9705_s2 }
 0x86e   :  { %9156 = vrot.lane.b32.xlu1 %v9155_v5, %s9707_s29 }
 0x871   :  { %9161 = vrot.lane.b32.xlu0 %v9160_v28, %s9707_s29  ;;  %v14072_v12 = vpop.permute.xlu1 %8891  ;;  %v8884_v28 = vunpack.i.h.bf16 %v8882_v46  ;;  %v4884_v46 = vmul.f32 %v13461_v7, %v16274_v4  ;;  %v4886_v7 = vmul.f32 %v13581_v38, %v16275_v39 }
 0x872   :  { %9166 = vrot.lane.b32.xlu1 %v9165_v2, %s9704_s9  ;;  %v9180_v2 = vpack.i.bf16 %v5055_v41, %v5054_v27 }
 0x873   :  { %v8902_v14 = vpop.permute.xlu0 %8901 }
 0x874   :  { %v8904_v5 = vunpack.i.h.bf16 %v8902_v14  ;;  %v8903_v23 = vunpack.i.l.bf16 %v8902_v14 }
 0x875   :  { %9171 = vrot.lane.b32.xlu0 %v9170_v50, %s9704_s9  ;;  %v14080_v24 = vpop.permute.xlu1 %8906 }
 0x876   :  { %9176 = vrot.lane.b32.xlu1 %v9175_v19, %s9693_s4  ;;  %v5605_v31 = vsel %vm5601_vm11, %v5588_v43, %v8904_v5  ;;  %v5604_v33 = vsel %vm5601_vm11, %v5587_v40, %v8903_v23  ;;  %v16276_v40 = vld [vmem:[#allocation4_spill] sm:$0xff] }
 0x877   :  { %v8912_v0 = vpop.permute.xlu0 %8911  ;;  %v5620_v35 = vsel %vm96_vm0, %v5604_v33, %v8883_v17  ;;  %v5621_v13 = vsel %vm96_vm0, %v5605_v31, %v8884_v28  ;;  %v4887_v43 = vmul.f32 %v13627_v21, %v16276_v40 }
 0x878   :  { %v8914_v49 = vunpack.i.h.bf16 %v8912_v0  ;;  %v8913_v63 = vunpack.i.l.bf16 %v8912_v0 }
 0x879   :  { %9181 = vrot.lane.b32.xlu0 %v9180_v2, %s9693_s4  ;;  %v8922_v44 = vpop.permute.xlu1 %8921 }
 0x87a   :  { %v8924_v41 = vunpack.i.h.bf16 %v8922_v44  ;;  %v8923_v5 = vunpack.i.l.bf16 %v8922_v44 }
 0x87b   :  { %v8917_v60 = vpop.permute.xlu0 %8916 }
 0x87c   :  { %v8919_v45 = vunpack.i.h.bf16 %v8917_v60  ;;  %v8918_v62 = vunpack.i.l.bf16 %v8917_v60 }
 0x87e   :  { %v5573_v19 = vsel %vm598_vm1, %v4885_v57, %v8919_v45  ;;  %v5572_v58 = vsel %vm598_vm1, %v4884_v46, %v8918_v62 }
 0x882   :  { %v8937_v9 = vpop.permute.xlu1 %8936  ;;  %v8927_v3 = vpop.permute.xlu0 %8926 }
 0x883   :  { %v8929_v53 = vunpack.i.h.bf16 %v8927_v3  ;;  %v8928_v42 = vunpack.i.l.bf16 %v8927_v3  ;;  %v8939_v61 = vunpack.i.h.bf16 %v8937_v9  ;;  %v8938_v10 = vunpack.i.l.bf16 %v8937_v9 }
 0x885   :  { %v5637_v30 = vsel %vm5634_vm12, %v5620_v35, %v8928_v42  ;;  %v5638_v26 = vsel %vm5634_vm12, %v5621_v13, %v8929_v53 }
 0x886   :  { %v8942_v25 = vpop.permute.xlu1 %8941 }
 0x887   :  { %v8944_v51 = vunpack.i.h.bf16 %v8942_v25  ;;  %v8943_v15 = vunpack.i.l.bf16 %v8942_v25 }
 0x889   :  { %v5589_v56 = vsel %vm5584_vm3, %v5572_v58, %v8943_v15  ;;  %v5590_v29 = vsel %vm5584_vm3, %v5573_v19, %v8944_v51 }
 0x88a   :  { %v8932_v37 = vpop.permute.xlu0 %8931 }
 0x88b   :  { %v8934_v48 = vunpack.i.h.bf16 %v8932_v37  ;;  %v8933_v11 = vunpack.i.l.bf16 %v8932_v37 }
 0x88c   :  { %v8947_v50 = vpop.permute.xlu1 %8946 }
 0x88d   :  { %v5654_v32 = vsel %vm5651_vm13, %v5637_v30, %v8933_v11  ;;  %v5655_v27 = vsel %vm5651_vm13, %v5638_v26, %v8934_v48  ;;  %v8949_v14 = vunpack.i.h.bf16 %v8947_v50  ;;  %v8948_v34 = vunpack.i.l.bf16 %v8947_v50 }
 0x88e   :  { %v5671_v23 = vsel %vm5668_vm14, %v5654_v32, %v8913_v63  ;;  %v5672_v38 = vsel %vm5668_vm14, %v5655_v27, %v8914_v49  ;;  %v8952_v28 = vpop.permute.xlu0 %8951 }
 0x88f   :  { %v14107_v21 = vsel %vm3941_vm4, %v5671_v23, %v8938_v10  ;;  %v14110_v17 = vsel %vm3941_vm4, %v5672_v38, %v8939_v61  ;;  %v5606_v2 = vsel %vm5601_vm11, %v5589_v56, %v8948_v34  ;;  %v5607_v31 = vsel %vm5601_vm11, %v5590_v29, %v8949_v14 }
 0x890   :  { %v5702_v33 = vpack.c.bf16 %v14110_v17, %v14107_v21  ;;  %v8954_v0 = vunpack.i.h.bf16 %v8952_v28  ;;  %v8953_v35 = vunpack.i.l.bf16 %v8952_v28  ;;  %v8957_v13 = vpop.permute.xlu1 %8956  ;;  %v5622_v44 = vsel %vm96_vm0, %v5606_v2, %v8923_v5 }
 0x891   :  { %v5623_v60 = vsel %vm96_vm0, %v5607_v31, %v8924_v41  ;;  %v8959_v46 = vunpack.i.h.bf16 %v8957_v13  ;;  %v8958_v30 = vunpack.i.l.bf16 %v8957_v13 }
 0x892   :  { %v5575_v47 = vsel %vm598_vm1, %v4887_v43, %v8954_v0  ;;  %v5574_v57 = vsel %vm598_vm1, %v4886_v7, %v8953_v35  ;;  %v8962_v45 = vpop.permute.xlu0 %8961 }
 0x893   :  { %v8964_v51 = vunpack.i.h.bf16 %v8962_v45  ;;  %v8963_v15 = vunpack.i.l.bf16 %v8962_v45 }
 0x894   :  { %v8967_v19 = vpop.permute.xlu1 %8966 }
 0x895   :  { %v8969_v9 = vunpack.i.h.bf16 %v8967_v19  ;;  %v8968_v3 = vunpack.i.l.bf16 %v8967_v19 }
 0x896   :  { %v8977_v62 = vpop.permute.xlu0 %8976 }
 0x897   :  { %v8979_v53 = vunpack.i.h.bf16 %v8977_v62  ;;  %v8978_v42 = vunpack.i.l.bf16 %v8977_v62  ;;  %v5639_v58 = vsel %vm5634_vm12, %v5622_v44, %v8968_v3  ;;  %v5640_v56 = vsel %vm5634_vm12, %v5623_v60, %v8969_v9 }
 0x898   :  { %v8972_v4 = vpop.permute.xlu1 %8971 }
 0x899   :  { %v8974_v26 = vunpack.i.h.bf16 %v8972_v4  ;;  %v8973_v25 = vunpack.i.l.bf16 %v8972_v4  ;;  %v5591_v7 = vsel %vm5584_vm3, %v5574_v57, %v8978_v42  ;;  %v5592_v40 = vsel %vm5584_vm3, %v5575_v47, %v8979_v53 }
 0x89a   :  { %v8982_v29 = vpop.permute.xlu0 %8981 }
 0x89b   :  { %v5656_v37 = vsel %vm5651_vm13, %v5639_v58, %v8973_v25  ;;  %v5657_v48 = vsel %vm5651_vm13, %v5640_v56, %v8974_v26  ;;  %v8984_v11 = vunpack.i.h.bf16 %v8982_v29  ;;  %v8983_v39 = vunpack.i.l.bf16 %v8982_v29  ;;  %v16277_v29 = vld [vmem:[#allocation135_spill] sm:$0xff] }
 0x89c   :  { %v8987_v43 = vpop.permute.xlu1 %8986  ;;  %v5673_v49 = vsel %vm5668_vm14, %v5656_v37, %v8958_v30  ;;  %v5674_v63 = vsel %vm5668_vm14, %v5657_v48, %v8959_v46  ;;  %v4888_v37 = vmul.f32 %v13647_v8, %v16277_v29 }
 0x89d   :  { %v5608_v61 = vsel %vm5601_vm11, %v5591_v7, %v8983_v39  ;;  %v5609_v10 = vsel %vm5601_vm11, %v5592_v40, %v8984_v11  ;;  %v8989_v50 = vunpack.i.h.bf16 %v8987_v43  ;;  %v8988_v32 = vunpack.i.l.bf16 %v8987_v43  ;;  %v16278_v39 = vld [vmem:[#allocation137_spill] sm:$0xff] }
 0x89e   :  { %v8992_v27 = vpop.permute.xlu0 %8991  ;;  %v5624_v14 = vsel %vm96_vm0, %v5608_v61, %v8963_v15  ;;  %v5625_v34 = vsel %vm96_vm0, %v5609_v10, %v8964_v51  ;;  %v4889_v7 = vmul.f32 %v13690_v22, %v16278_v39 }
 0x89f   :  { %v14133_v41 = vsel %vm3941_vm4, %v5673_v49, %v8988_v32  ;;  %v14136_v5 = vsel %vm3941_vm4, %v5674_v63, %v8989_v50  ;;  %v8994_v57 = vunpack.i.h.bf16 %v8992_v27  ;;  %v8993_v45 = vunpack.i.l.bf16 %v8992_v27 }
 0x8a0   :  { %v5703_v23 = vpack.c.bf16 %v14136_v5, %v14133_v41  ;;  %v9002_v38 = vpop.permute.xlu1 %9001  ;;  %v16287_v5 = vld [vmem:[#allocation13_spill] sm:$0xff] }
 0x8a2   :  { %v8997_v28 = vpop.permute.xlu0 %8996 }
 0x8a3   :  { %v8999_v25 = vunpack.i.h.bf16 %v8997_v28  ;;  %v8998_v51 = vunpack.i.l.bf16 %v8997_v28 }
 0x8a4   :  { %v9017_v2 = vpop.permute.xlu1 %9016 }
 0x8a5   :  { %v9019_v42 = vunpack.i.h.bf16 %v9017_v2  ;;  %v9018_v4 = vunpack.i.l.bf16 %v9017_v2  ;;  %v5577_v61 = vsel %vm598_vm1, %v4889_v7, %v8999_v25  ;;  %v5576_v10 = vsel %vm598_vm1, %v4888_v37, %v8998_v51  ;;  %v16279_v7 = vld [vmem:[#allocation92_spill] sm:$0xff] }
 0x8a6   :  { %v9007_v31 = vpop.permute.xlu0 %9006  ;;  %v9004_v2 = vunpack.i.h.bf16 %v9002_v38 }
 0x8a7   :  { %v9009_v0 = vunpack.i.h.bf16 %v9007_v31  ;;  %v9008_v35 = vunpack.i.l.bf16 %v9007_v31  ;;  %v9003_v31 = vunpack.i.l.bf16 %v9002_v38 }
 0x8a8   :  { %v9022_v13 = vpop.permute.xlu1 %9021 }
 0x8a9   :  { %v5641_v19 = vsel %vm5634_vm12, %v5624_v14, %v9008_v35  ;;  %v5642_v9 = vsel %vm5634_vm12, %v5625_v34, %v9009_v0  ;;  %v9024_v48 = vunpack.i.h.bf16 %v9022_v13  ;;  %v9023_v11 = vunpack.i.l.bf16 %v9022_v13 }
 0x8aa   :  { %v9012_v44 = vpop.permute.xlu0 %9011 }
 0x8ab   :  { %v9014_v60 = vunpack.i.h.bf16 %v9012_v44  ;;  %v9013_v47 = vunpack.i.l.bf16 %v9012_v44  ;;  %v5593_v32 = vsel %vm5584_vm3, %v5576_v10, %v9023_v11  ;;  %v5594_v8 = vsel %vm5584_vm3, %v5577_v61, %v9024_v48 }
 0x8ac   :  { %v9027_v3 = vpop.permute.xlu1 %9026 }
 0x8ad   :  { %v5658_v62 = vsel %vm5651_vm13, %v5641_v19, %v9013_v47  ;;  %v5659_v53 = vsel %vm5651_vm13, %v5642_v9, %v9014_v60  ;;  %v9029_v40 = vunpack.i.h.bf16 %v9027_v3  ;;  %v9028_v43 = vunpack.i.l.bf16 %v9027_v3 }
 0x8ae   :  { %v5675_v46 = vsel %vm5668_vm14, %v5658_v62, %v8993_v45  ;;  %v5676_v30 = vsel %vm5668_vm14, %v5659_v53, %v8994_v57  ;;  %v14146_v26 = vpop.permute.xlu0 %9031 }
 0x8af   :  { %v14149_v58 = vsel %vm3941_vm4, %v5675_v46, %v9018_v4  ;;  %v14152_v56 = vsel %vm3941_vm4, %v5676_v30, %v9019_v42  ;;  %v5610_v27 = vsel %vm5601_vm11, %v5593_v32, %v9028_v43  ;;  %v5611_v22 = vsel %vm5601_vm11, %v5594_v8, %v9029_v40  ;;  %v16280_v43 = vld [vmem:[#allocation74_spill] sm:$0xff]  ;;  %v16282_v8 = vld [vmem:[#allocation37_spill] sm:$0xff] }
 0x8b0   :  { %v9037_v15 = vpop.permute.xlu1 %9036  ;;  %v5704_v63 = vpack.c.bf16 %v14152_v56, %v14149_v58  ;;  %v5626_v35 = vsel %vm96_vm0, %v5610_v27, %v9003_v31  ;;  %v5627_v13 = vsel %vm96_vm0, %v5611_v22, %v9004_v2  ;;  %v9034_v25 = vunpack.i.h.bf16 %v14146_v26 }
 0x8b1   :  { %v9039_v3 = vunpack.i.h.bf16 %v9037_v15  ;;  %v9038_v62 = vunpack.i.l.bf16 %v9037_v15  ;;  %v9033_v51 = vunpack.i.l.bf16 %v14146_v26  ;;  %v4890_v40 = vmul.f32 %v13712_v52, %v16279_v7 }
 0x8b2   :  { %v14158_v49 = vpop.permute.xlu0 %9041  ;;  %v4891_v61 = vmul.f32 %v13748_v54, %v16280_v43  ;;  %v4881_v27 = vmul.f32 %v13894_v1, %v16282_v8  ;;  %v8879_v54 = vunpack.i.h.bf16 %v14050_v55  ;;  %v8878_v2 = vunpack.i.l.bf16 %v14050_v55 }
 0x8b3   :  { %v5578_v52 = vsel %vm598_vm1, %v4890_v40, %v9033_v51  ;;  %v8889_v55 = vunpack.i.h.bf16 %v14063_v6 }
 0x8b4   :  { %v9047_v50 = vpop.permute.xlu1 %9046 }
 0x8b5   :  { %v9049_v14 = vunpack.i.h.bf16 %v9047_v50  ;;  %v9048_v34 = vunpack.i.l.bf16 %v9047_v50  ;;  %v16281_v50 = vld [vmem:[#allocation7_spill] sm:$0xff] }
 0x8b6   :  { %v9057_v28 = vpop.permute.xlu0 %9056  ;;  %v4880_v32 = vmul.f32 %v13942_v36, %v16281_v50 }
 0x8b7   :  { %v5643_v47 = vsel %vm5634_vm12, %v5626_v35, %v9048_v34  ;;  %v5644_v57 = vsel %vm5634_vm12, %v5627_v13, %v9049_v14  ;;  %v9059_v15 = vunpack.i.h.bf16 %v9057_v28  ;;  %v9058_v48 = vunpack.i.l.bf16 %v9057_v28 }
 0x8b8   :  { %v9052_v0 = vpop.permute.xlu1 %9051  ;;  %v8869_v14 = vunpack.i.h.bf16 %v14045_v18  ;;  %v8868_v34 = vunpack.i.l.bf16 %v14045_v18  ;;  %v5579_v28 = vsel %vm598_vm1, %v4891_v61, %v9034_v25  ;;  %v9044_v18 = vunpack.i.h.bf16 %v14158_v49 }
 0x8b9   :  { %v9054_v44 = vunpack.i.h.bf16 %v9052_v0  ;;  %v9053_v60 = vunpack.i.l.bf16 %v9052_v0  ;;  %v5595_v31 = vsel %vm5584_vm3, %v5578_v52, %v9058_v48  ;;  %v5596_v36 = vsel %vm5584_vm3, %v5579_v28, %v9059_v15 }
 0x8ba   :  { %v9062_v45 = vpop.permute.xlu0 %9061 }
 0x8bb   :  { %v5660_v19 = vsel %vm5651_vm13, %v5643_v47, %v9053_v60  ;;  %v5661_v9 = vsel %vm5651_vm13, %v5644_v57, %v9054_v44  ;;  %v9064_v10 = vunpack.i.h.bf16 %v9062_v45  ;;  %v9063_v26 = vunpack.i.l.bf16 %v9062_v45 }
 0x8bc   :  { %v9067_v53 = vpop.permute.xlu1 %9066  ;;  %v5677_v4 = vsel %vm5668_vm14, %v5660_v19, %v9038_v62  ;;  %v5678_v46 = vsel %vm5668_vm14, %v5661_v9, %v9039_v3  ;;  %v9043_v60 = vunpack.i.l.bf16 %v14158_v49  ;;  %v8888_v19 = vunpack.i.l.bf16 %v14063_v6 }
 0x8bd   :  { %v9069_v38 = vunpack.i.h.bf16 %v9067_v53  ;;  %v9068_v42 = vunpack.i.l.bf16 %v9067_v53  ;;  %v5612_v1 = vsel %vm5601_vm11, %v5595_v31, %v9063_v26  ;;  %v5613_v35 = vsel %vm5601_vm11, %v5596_v36, %v9064_v10 }
 0x8be   :  { %v8894_v9 = vunpack.i.h.bf16 %v14072_v12  ;;  %v8893_v3 = vunpack.i.l.bf16 %v14072_v12 }
 0x8bf   :  { %v14176_v30 = vpop.permute.xlu0 %9071  ;;  %v14181_v29 = vsel %vm3941_vm4, %v5677_v4, %v9068_v42  ;;  %v14184_v37 = vsel %vm3941_vm4, %v5678_v46, %v9069_v38  ;;  %v5628_v38 = vsel %vm96_vm0, %v5612_v1, %v9043_v60  ;;  %v5629_v42 = vsel %vm96_vm0, %v5613_v35, %v9044_v18 }
 0x8c0   :  { %v5705_v11 = vpack.c.bf16 %v14184_v37, %v14181_v29  ;;  %v9092_v39 = vpop.permute.xlu1 %9091  ;;  %v9074_v15 = vunpack.i.h.bf16 %v14176_v30  ;;  %v9073_v6 = vunpack.i.l.bf16 %v14176_v30 }
 0x8c1   :  { %v9094_v13 = vunpack.i.h.bf16 %v9092_v39  ;;  %v9093_v44 = vunpack.i.l.bf16 %v9092_v39 }
 0x8c3   :  { %v14196_v22 = vpop.permute.xlu0 %9076  ;;  %v5569_v49 = vsel %vm598_vm1, %v4881_v27, %v9094_v13  ;;  %v5568_v46 = vsel %vm598_vm1, %v4880_v32, %v9093_v44 }
 0x8c4   :  { %v9097_v0 = vpop.permute.xlu1 %9096 }
 0x8c5   :  { %v9099_v47 = vunpack.i.h.bf16 %v9097_v0  ;;  %v9098_v57 = vunpack.i.l.bf16 %v9097_v0 }
 0x8c7   :  { %v9082_v45 = vpop.permute.xlu0 %9081  ;;  %v5585_v48 = vsel %vm5584_vm3, %v5568_v46, %v9098_v57  ;;  %v5586_v12 = vsel %vm5584_vm3, %v5569_v49, %v9099_v47  ;;  %v16284_v46 = vld [vmem:[#allocation91_spill] sm:$0xff] }
 0x8c8   :  { %v9084_v62 = vunpack.i.h.bf16 %v9082_v45  ;;  %v9083_v53 = vunpack.i.l.bf16 %v9082_v45  ;;  %v9102_v4 = vpop.permute.xlu1 %9101 }
 0x8c9   :  { %v9104_v25 = vunpack.i.h.bf16 %v9102_v4  ;;  %v9103_v51 = vunpack.i.l.bf16 %v9102_v4  ;;  %v16283_v4 = vld [vmem:[#allocation11_spill] sm:$0xff] }
 0x8ca   :  { %v5645_v10 = vsel %vm5634_vm12, %v5628_v38, %v9083_v53  ;;  %v5646_v26 = vsel %vm5634_vm12, %v5629_v42, %v9084_v62  ;;  %v9079_v38 = vunpack.i.h.bf16 %v14196_v22  ;;  %v9078_v42 = vunpack.i.l.bf16 %v14196_v22 }
 0x8cb   :  { %v9087_v39 = vpop.permute.xlu0 %9086  ;;  %v5602_v7 = vsel %vm5601_vm11, %v5585_v48, %v9103_v51  ;;  %v5603_v40 = vsel %vm5601_vm11, %v5586_v12, %v9104_v25  ;;  %v4892_v49 = vmul.f32 %v13765_v20, %v16283_v4  ;;  %v16285_v25 = vld [vmem:[#allocation27_spill] sm:$0xff] }
 0x8cc   :  { %v9089_v43 = vunpack.i.h.bf16 %v9087_v39  ;;  %v9088_v61 = vunpack.i.l.bf16 %v9087_v39  ;;  %v5618_v50 = vsel %vm96_vm0, %v5602_v7, %v8868_v34  ;;  %v5619_v32 = vsel %vm96_vm0, %v5603_v40, %v8869_v14  ;;  %v9107_v30 = vpop.permute.xlu1 %9106 }
 0x8cd   :  { %v5635_v8 = vsel %vm5634_vm12, %v5618_v50, %v8888_v19  ;;  %v5636_v27 = vsel %vm5634_vm12, %v5619_v32, %v8889_v55  ;;  %v9109_v31 = vunpack.i.h.bf16 %v9107_v30  ;;  %v9108_v36 = vunpack.i.l.bf16 %v9107_v30 }
 0x8ce   :  { %v5662_v28 = vsel %vm5651_vm13, %v5645_v10, %v9088_v61  ;;  %v5663_v52 = vsel %vm5651_vm13, %v5646_v26, %v9089_v43  ;;  %v8909_v34 = vunpack.i.h.bf16 %v14080_v24  ;;  %v8908_v14 = vunpack.i.l.bf16 %v14080_v24 }
 0x8cf   :  { %v5679_v0 = vsel %vm5668_vm14, %v5662_v28, %v9073_v6  ;;  %v5680_v1 = vsel %vm5668_vm14, %v5663_v52, %v9074_v15  ;;  %v9112_v35 = vpop.permute.xlu0 %9111  ;;  %v5652_v13 = vsel %vm5651_vm13, %v5635_v8, %v8893_v3  ;;  %v5653_v44 = vsel %vm5651_vm13, %v5636_v27, %v8894_v9  ;;  %v16286_v15 = vld [vmem:[#allocation110_spill] sm:$0xff] }
 0x8d0   :  { %v14239_v18 = vsel %vm3941_vm4, %v5679_v0, %v9108_v36  ;;  %v14242_v60 = vsel %vm3941_vm4, %v5680_v1, %v9109_v31  ;;  %v9117_v47 = vpop.permute.xlu1 %9116  ;;  %v5669_v57 = vsel %vm5668_vm14, %v5652_v13, %v8878_v2  ;;  %v5670_v45 = vsel %vm5668_vm14, %v5653_v44, %v8879_v54 }
 0x8d1   :  { %v5706_v55 = vpack.c.bf16 %v14242_v60, %v14239_v18  ;;  %v5685_v24 = vsel %vm3941_vm4, %v5669_v57, %v8908_v14  ;;  %v5686_v3 = vsel %vm3941_vm4, %v5670_v45, %v8909_v34  ;;  %v4893_v21 = vmul.f32 %v16285_v25, %v16284_v46 }
 0x8d2   :  { %v5701_v9 = vpack.c.bf16 %v5686_v3, %v5685_v24  ;;  %v9114_v17 = vunpack.i.h.bf16 %v9112_v35  ;;  %v4894_v41 = vmul.f32 %v13929_v16, %v16286_v15  ;;  %v9119_v6 = vunpack.i.h.bf16 %v9117_v47 }
 0x8d3   :  { %v9127_v19 = vpop.permute.xlu0 %9126  ;;  %v9118_v48 = vunpack.i.l.bf16 %v9117_v47  ;;  %v5581_v40 = vsel %vm598_vm1, %v4893_v21, %v9079_v38  ;;  %v5580_v43 = vsel %vm598_vm1, %v4892_v49, %v9078_v42 }
 0x8d4   :  { %v9122_v62 = vpop.permute.xlu1 %9121  ;;  %8331 = vmatprep.mubr.msk.bf16.mxu0 %vm5752_vm15, %v5701_v9  ;;  %v9129_v12 = vunpack.i.h.bf16 %v9127_v19  ;;  %v9128_v39 = vunpack.i.l.bf16 %v9127_v19  ;;  %v5598_v56 = vsel %vm5584_vm3, %v5581_v40, %v9119_v6  ;;  %v5949_v40 = vld [vmem:[%s15342_s12] sm:$0xff] }
 0x8d5   :  { %8332 = vmatmul.mubr.msk.bf16.vlgmr.msra.gmra.mrb[100].mxu0 %vm5752_vm15, %v5702_v33  ;;  %v9113_v33 = vunpack.i.l.bf16 %v9112_v35  ;;  %v9124_v22 = vunpack.i.h.bf16 %v9122_v62  ;;  %v9123_v7 = vunpack.i.l.bf16 %v9122_v62  ;;  %v5597_v58 = vsel %vm5584_vm3, %v5580_v43, %v9118_v48  ;;  %v5950_v43 = vld [vmem:[%s15342_s12 + $0x8] sm:$0xff] }
 0x8d6   :  { %8335 = vmatprep.mubr.msk.bf16.mxu0 %vm5752_vm15, %v5703_v23  ;;  %v4895_v23 = vmul.f32 %v13946_v59, %v16287_v5 }
 0x8d7   :  { %v9132_v2 = vpop.permute.xlu0 %9131  ;;  %v5582_v59 = vsel %vm598_vm1, %v4894_v41, %v9113_v33  ;;  %v5614_v29 = vsel %vm5601_vm11, %v5597_v58, %v9123_v7  ;;  %v5615_v37 = vsel %vm5601_vm11, %v5598_v56, %v9124_v22  ;;  %v9709_v7 = vmov 0.0|0.0   ;;  %v7704_v58 = vld [vmem:[%s15343_s11] ss:$0 sm:$0xff] }
 0x8d8   :  { %v9137_v54 = vpop.permute.xlu1 %9136  ;;  %v5583_v16 = vsel %vm598_vm1, %v4895_v23, %v9114_v17  ;;  %v9134_v61 = vunpack.i.h.bf16 %v9132_v2  ;;  %v9133_v10 = vunpack.i.l.bf16 %v9132_v2  ;;  %v5599_v32 = vsel %vm5584_vm3, %v5582_v59, %v9128_v39  ;;  %8476 = vmatprep.subr.bf16.mxu1 %v9709_v7  ;;  %8500 = vmatprep.subr.bf16.mxu0 %v9709_v7 }
 0x8d9   :  { %v9138_v50 = vunpack.i.l.bf16 %v9137_v54  ;;  %v5600_v30 = vsel %vm5584_vm3, %v5583_v16, %v9129_v12  ;;  %vm9710_vm1 = vmmov 0   ;;  %v5951_v16 = vld [vmem:[%s15342_s12 + $0x10] sm:$0xff]  ;;  %v8501_v59 = vpack.c.bf16 %v5950_v43, %v5949_v40  ;;  %v6126_v43 = vld [vmem:[%s15347_s17 + $0x8] sm:$0xff] }
 0x8da   :  { %v5616_v31 = vsel %vm5601_vm11, %v5599_v32, %v9133_v10  ;;  %v5617_v36 = vsel %vm5601_vm11, %v5600_v30, %v9134_v61  ;;  %v5952_v61 = vld [vmem:[%s15342_s12 + $0x18] sm:$0xff] }
 0x8db   :  { %v9142_v53 = vpop.permute.xlu0 %9141  ;;  %v5630_v34 = vsel %vm96_vm0, %v5614_v29, %v9138_v50  ;;  %8502 = vmatpush3.bf16.msra.mxu0 %v8501_v59  ;;  %v8504_v10 = vpack.c.bf16 %v5952_v61, %v5951_v16  ;;  %v6127_v16 = vld [vmem:[%s15347_s17 + $0x10] sm:$0xff]  ;;  %v6128_v59 = vld [vmem:[%s15347_s17 + $0x18] sm:$0xff]  ;;  %v6129_v61 = vld [vmem:[%s15347_s17 + $0x20] sm:$0xff] }
 0x8dc   :  { %v9147_v51 = vpop.permute.xlu1 %9146  ;;  %v9144_v8 = vunpack.i.h.bf16 %v9142_v53  ;;  %v9143_v27 = vunpack.i.l.bf16 %v9142_v53  ;;  %8503 = vmatprep.subr.bf16.mxu0 %v9709_v7 }
 0x8dd   :  { %8336 = vmatmul.mubr.msk.bf16.gmra.mrb[104].mxu0 %vm5752_vm15, %v5704_v63  ;;  %v9139_v63 = vunpack.i.h.bf16 %v9137_v54  ;;  %v9149_v28 = vunpack.i.h.bf16 %v9147_v51  ;;  %v9148_v52 = vunpack.i.l.bf16 %v9147_v51 }
 0x8de   :  { %8339 = vmatprep.mubr.msk.bf16.mxu0 %vm5752_vm15, %v5705_v11  ;;  %v5632_v3 = vsel %vm96_vm0, %v5616_v31, %v9143_v27  ;;  %v5633_v9 = vsel %vm96_vm0, %v5617_v36, %v9144_v8 }
 0x8df   :  { %v9152_v20 = vpop.permute.xlu0 %9151  ;;  %v5631_v14 = vsel %vm96_vm0, %v5615_v37, %v9139_v63  ;;  %v5647_v62 = vsel %vm5634_vm12, %v5630_v34, %v9148_v52  ;;  %8505 = vmatpush3.bf16.msra.mxu0 %v8504_v10  ;;  %v6130_v10 = vld [vmem:[%s15347_s17 + $0x28] sm:$0xff] }
 0x8e0   :  { %v9157_v26 = vpop.permute.xlu1 %9156  ;;  %v9154_v0 = vunpack.i.h.bf16 %v9152_v20  ;;  %v9153_v1 = vunpack.i.l.bf16 %v9152_v20  ;;  %v5648_v2 = vsel %vm5634_vm12, %v5631_v14, %v9149_v28  ;;  %v9711_v20 = vmov 0.0  }
 0x8e1   :  { %v9159_v13 = vunpack.i.h.bf16 %v9157_v26  ;;  %v9158_v44 = vunpack.i.l.bf16 %v9157_v26  ;;  %8379 = vmatprep.mubr.msk.f32.mxu1 %vm9710_vm1, %v9711_v20  ;;  %8393 = vmatprep.subr.mxu0 %v9711_v20 }
 0x8e2   :  { %v5649_v54 = vsel %vm5634_vm12, %v5632_v3, %v9153_v1  ;;  %v5650_v53 = vsel %vm5634_vm12, %v5633_v9, %v9154_v0 }
 0x8e3   :  { %v9162_v11 = vpop.permute.xlu0 %9161  ;;  %v5664_v18 = vsel %vm5651_vm13, %v5647_v62, %v9158_v44  ;;  %v5665_v60 = vsel %vm5651_vm13, %v5648_v2, %v9159_v13 }
 0x8e4   :  { %v9167_v35 = vpop.permute.xlu1 %9166  ;;  %v9164_v47 = vunpack.i.h.bf16 %v9162_v11  ;;  %v9163_v57 = vunpack.i.l.bf16 %v9162_v11 }
 0x8e5   :  { %v9169_v45 = vunpack.i.h.bf16 %v9167_v35  ;;  %v9168_v19 = vunpack.i.l.bf16 %v9167_v35  ;;  %8340 = vmatmul.mubr.msk.bf16.gmra.mrb[108].mxu0 %vm5752_vm15, %v5706_v55 }
 0x8e6   :  { %v5666_v46 = vsel %vm5651_vm13, %v5649_v54, %v9163_v57  ;;  %v5667_v25 = vsel %vm5651_vm13, %v5650_v53, %v9164_v47 }
 0x8e7   :  { %v9172_v24 = vpop.permute.xlu0 %9171  ;;  %v5681_v21 = vsel %vm5668_vm14, %v5664_v18, %v9168_v19  ;;  %v5682_v17 = vsel %vm5668_vm14, %v5665_v60, %v9169_v45 }
 0x8e8   :  { %v9174_v38 = vunpack.i.h.bf16 %v9172_v24  ;;  %v9173_v42 = vunpack.i.l.bf16 %v9172_v24  ;;  %v9177_v4 = vpop.permute.xlu1 %9176 }
 0x8e9   :  { %v9179_v55 = vunpack.i.h.bf16 %v9177_v4  ;;  %v9178_v49 = vunpack.i.l.bf16 %v9177_v4 }
 0x8ea   :  { %v5683_v23 = vsel %vm5668_vm14, %v5666_v46, %v9173_v42  ;;  %v5684_v6 = vsel %vm5668_vm14, %v5667_v25, %v9174_v38  ;;  %v5878_v46 = vld [vmem:[%s15344_s16] sm:$0x3] }
 0x8eb   :  { %v9182_v33 = vpop.permute.xlu0 %9181  ;;  %v5697_v51 = vsel %vm3941_vm4, %v5681_v21, %v9178_v49  ;;  %v5698_v15 = vsel %vm3941_vm4, %v5682_v17, %v9179_v55  ;;  %v6034_v17 = vld [vmem:[%s15345_s14] sm:$0xf] }
 0x8ec   :  { %v9184_v41 = vunpack.i.h.bf16 %v9182_v33  ;;  %v9183_v5 = vunpack.i.l.bf16 %v9182_v33  ;;  %v5707_v48 = vpack.c.bf16 %v5698_v15, %v5697_v51  ;;  %v7718_v33 = vld [vmem:[%s15346_s13] ss:$0 sm:$0xff] }
 0x8ee   :  { %v5699_v12 = vsel %vm3941_vm4, %v5683_v23, %v9183_v5  ;;  %v5700_v39 = vsel %vm3941_vm4, %v5684_v6, %v9184_v41  ;;  %8343 = vmatprep.mubr.msk.bf16.mxu0 %vm5752_vm15, %v5707_v48  ;;  %vm6042_vm4 = vcmask 31744   ;;  %v6125_v23 = vld [vmem:[%s15347_s17] sm:$0xff] }
 0x8ef   :  { %v5708_v22 = vpack.c.bf16 %v5700_v39, %v5699_v12  ;;  %v7720_v6 = vld [vmem:[%s15348_s15] ss:$0 sm:$0xff] }
 0x8f1   :  { %8344 = vmatmul.mubr.msk.bf16.gmra.mrb[112].mxu0 %vm5752_vm15, %v5708_v22 }
 0x8f2   :  { %8390 = vmatprep.mubr.msk.f32.mxu0 %vm9710_vm1, %v9711_v20 }
 0x9a8   :  { %v8333_v26 = vpop.f32.mrb[100].mxu0 }
 0x9a9   :  { %v5815_v56 = vpop.f32.mrb[101].mxu0  ;;  %v14346_v11 = vadd.f32 %v8333_v26, %v7704_v58  ;;  %v6131_v26 = vld [vmem:[%s15347_s17 + $0x30] sm:$0xff] }
 0x9aa   :  { %v8334_v63 = vpop.f32.mrb[102].mxu0  ;;  %v14338_v32 = vadd.f32 %v7704_v58, %v5815_v56  ;;  %v6133_v56 = vld [vmem:[%s15347_s17 + $0x40] sm:$0xff] }
 0x9ab   :  { %v5818_v50 = vpop.f32.mrb[103].mxu0  ;;  %v14342_v29 = vadd.f32 %v8334_v63, %v7704_v58  ;;  %v6134_v63 = vld [vmem:[%s15347_s17 + $0x48] sm:$0xff] }
 0x9ac   :  { %v14340_v30 = vadd.f32 %v7704_v58, %v5818_v50  ;;  %v6135_v50 = vld [vmem:[%s15347_s17 + $0x50] sm:$0xff] }
 0x9ad   :  { %v8480_v28 = vpack.c.bf16 %v14342_v29, %v14346_v11 }
 0x9ae   :  { %v8477_v37 = vpack.c.bf16 %v14340_v30, %v14338_v32 }
 0x9b0   :  { %v8337_v8 = vpop.f32.mrb[104].mxu0  ;;  %8478 = vmatpush3.bf16.msra.mxu1 %v8477_v37  ;;  %v6136_v37 = vld [vmem:[%s15347_s17 + $0x58] sm:$0xff] }
 0x9b1   :  { %v5831_v27 = vpop.f32.mrb[105].mxu0  ;;  %8479 = vmatprep.subr.bf16.mxu1 %v9709_v7  ;;  %v14360_v34 = vadd.f32 %v8337_v8, %v7704_v58  ;;  %v6137_v8 = vld [vmem:[%s15347_s17 + $0x60] sm:$0xff] }
 0x9b2   :  { %v8338_v52 = vpop.f32.mrb[106].mxu0  ;;  %v14351_v36 = vadd.f32 %v7704_v58, %v5831_v27  ;;  %v6138_v27 = vld [vmem:[%s15347_s17 + $0x68] sm:$0xff] }
 0x9b3   :  { %v5834_v31 = vpop.f32.mrb[107].mxu0  ;;  %v14356_v1 = vadd.f32 %v8338_v52, %v7704_v58  ;;  %v6140_v52 = vld [vmem:[%s15347_s17 + $0x78] sm:$0xff] }
 0x9b4   :  { %v14353_v0 = vadd.f32 %v7704_v58, %v5834_v31  ;;  %8481 = vmatpush3.bf16.msra.mxu1 %v8480_v28  ;;  %v6139_v28 = vld [vmem:[%s15347_s17 + $0x70] sm:$0xff]  ;;  %v14476_v31 = vld [vmem:[%s15349_s6] ss:$0 sm:$0xff] }
 0x9b5   :  { %8482 = vmatprep.subr.bf16.mxu1 %v9709_v7  ;;  %v8486_v44 = vpack.c.bf16 %v14356_v1, %v14360_v34 }
 0x9b6   :  { %v8483_v35 = vpack.c.bf16 %v14353_v0, %v14351_v36 }
 0x9b8   :  { %v8341_v14 = vpop.f32.mrb[108].mxu0  ;;  %8484 = vmatpush3.bf16.msra.mxu1 %v8483_v35  ;;  %v16288_v35 = vld [vmem:[#allocation138_spill] sm:$0xff] }
 0x9b9   :  { %v5847_v13 = vpop.f32.mrb[109].mxu0  ;;  %8485 = vmatprep.subr.bf16.mxu1 %v9709_v7  ;;  %v14374_v9 = vadd.f32 %v8341_v14, %v7704_v58  ;;  %v2442_v14 = vadd.f32 %v14476_v31, %v16288_v35 }
 0x9ba   :  { %v8342_v47 = vpop.f32.mrb[110].mxu0  ;;  %v14365_v45 = vadd.f32 %v7704_v58, %v5847_v13  ;;  %v16289_v13 = vld [vmem:[#allocation123_spill] sm:$0xff] }
 0x9bb   :  { %v5850_v57 = vpop.f32.mrb[111].mxu0  ;;  %v14370_v24 = vadd.f32 %v8342_v47, %v7704_v58 }
 0x9bc   :  { %v14367_v19 = vadd.f32 %v7704_v58, %v5850_v57  ;;  %8487 = vmatpush3.bf16.msra.mxu1 %v8486_v44  ;;  %v2441_v44 = vadd.f32 %v14476_v31, %v16289_v13 }
 0x9bd   :  { %8488 = vmatprep.subr.bf16.mxu1 %v9709_v7  ;;  %v8492_v62 = vpack.c.bf16 %v14370_v24, %v14374_v9 }
 0x9be   :  { %v8489_v3 = vpack.c.bf16 %v14367_v19, %v14365_v45 }
 0x9c0   :  { %8490 = vmatpush3.bf16.msra.mxu1 %v8489_v3 }
 0x9c1   :  { %8491 = vmatprep.subr.bf16.mxu1 %v9709_v7 }
 0x9c4   :  { %v8345_v2 = vpop.f32.mrb[112].mxu0  ;;  %8493 = vmatpush3.bf16.msra.mxu1 %v8492_v62 }
 0x9c5   :  { %v5863_v54 = vpop.f32.mrb[113].mxu0  ;;  %8494 = vmatprep.subr.bf16.mxu1 %v9709_v7  ;;  %v14388_v55 = vadd.f32 %v8345_v2, %v7704_v58  ;;  %v16290_v2 = vld [vmem:[#allocation126_spill] sm:$0xff] }
 0x9c6   :  { %v8346_v53 = vpop.f32.mrb[114].mxu0  ;;  %v14380_v42 = vadd.f32 %v7704_v58, %v5863_v54  ;;  %v2444_v54 = vadd.f32 %v16290_v2, %v14476_v31 }
 0x9c7   :  { %v5866_v38 = vpop.f32.mrb[115].mxu0  ;;  %v14384_v18 = vadd.f32 %v8346_v53, %v7704_v58  ;;  %v9676_v53 = vld [vmem:[%s15678_s27 + $0x8] sm:$0xff] }
 0x9c8   :  { %v14382_v4 = vadd.f32 %v7704_v58, %v5866_v38  ;;  %v6132_v58 = vld [vmem:[%s15347_s17 + $0x38] sm:$0xff]  ;;  %v6356_v38 = vadd.f32 %v9676_v53, %v2442_v14 }
 0x9c9   :  { %v8498_v49 = vpack.c.bf16 %v14384_v18, %v14388_v55 }
 0x9ca   :  { %v8495_v60 = vpack.c.bf16 %v14382_v4, %v14380_v42 }
 0x9cc   :  { %8496 = vmatpush3.bf16.msra.mxu1 %v8495_v60 }
 0x9cd   :  { %8497 = vmatprep.subr.bf16.mxu1 %v9709_v7 }
 0x9d0   :  { %8499 = vmatpush3.bf16.msra.mxu1 %v8498_v49  ;;  %v16291_v49 = vld [vmem:[#allocation88_spill] sm:$0xff] }
 0x9d3   :  { %8380 = vmatmul.mubr.f32.vlgmr.msra.gmra.mrb[60].mxu1 %v5878_v46  ;;  %v2443_v46 = vadd.f32 %v16291_v49, %v14476_v31 }
 0x9d4   :  { %8400 = vmatprep.mubr.msk.f32.mxu1 %vm6141_vm5, %v6125_v23 }
 0xaa6   :  { %v5945_v25 = vpop.f32.mrb[60].mxu1 }
 0xaa7   :  { %8391 = vmatmul.mubr.msk.f32.vlgmr.msra.gmra.mrb[116].mxu0 %vm96_vm0, %v5945_v25  ;;  %v8381_v21 = vpop.f32.mrb[61].mxu1  ;;  %v9677_v25 = vld [vmem:[%s15678_s27] sm:$0xff] }
 0xaa8   :  { %8395 = vmatprep.mubr.msk.f32.mxu0 %vm9710_vm1, %v9711_v20  ;;  %8394 = vmatpush3.msk.msra.mxu0 %vm5777_vm2, %v6034_v17 }
 0xb7a   :  { %v6029_v51 = vpop.f32.mrb[116].mxu0 }
 0xb7b   :  { %v6030_v15 = vadd.f32 %v7718_v33, %v6029_v51  ;;  %v8392_v41 = vpop.f32.mrb[117].mxu0 }
 0xb7d   :  { %v6033_v5 = vmax.f32 %v6030_v15, 0.0 }
 0xb7f   :  { %8396 = vmatmul.mubr.msk.f32.vlgmr.msra.gmra.mrb[118].mxu0 %vm6042_vm4, %v6033_v5  ;;  %v9678_v5 = vld [vmem:[%s15678_s27 + $0x18] sm:$0xff] }
 0xb80   :  { %v6358_v23 = vadd.f32 %v9678_v5, %v2444_v54  ;;  %v16302_v54 = vld [vmem:[#allocation148_spill] sm:$0xff] }
 0xb81   :  { %v2450_v53 = vadd.f32 %v14476_v31, %v16302_v54 }
 0xc52   :  { %v6115_v48 = vpop.f32.mrb[118].mxu0 }
 0xc53   :  { %v6116_v12 = vadd.f32 %v7720_v6, %v6115_v48  ;;  %v8397_v39 = vpop.f32.mrb[119].mxu0  ;;  %v16294_v6 = vld [vmem:[#allocation144_spill] sm:$0xff] }
 0xc54   :  { %v2446_v48 = vadd.f32 %v14476_v31, %v16294_v6 }
 0xc55   :  { %v7723_v22 = vmul.f32 -1.442695, %v6116_v12 }
 0xc57   :  { %9576 = vpow2.f32 %v7723_v22 }
 0xc61   :  { %v9577_v7 = vpop.eup %9576 }
 0xc62   :  { %v6122_v20 = vadd.f32 1.0, %v9577_v7  ;;  %v16295_v7 = vld [vmem:[#allocation142_spill] sm:$0xff] }
 0xc64   :  { %9578 = vrcp.f32 %v6122_v20 }
 0xc6e   :  { %v9579_v40 = vpop.eup %9578 }
 0xc6f   :  { %8398 = vmatprep.subr.msk.mxu1 %vm6190_vm6, %v9579_v40 }
 0xc70   :  { %8399 = vmatpush3.msk.msra.mxu1 %vm6190_vm6, %v9579_v40 }
 0xc71   :  { %8401 = vmatmul.mubr.msk.f32.vlgmr.msra.gmra.mrb[62].mxu1 %vm6141_vm5, %v6126_v43 }
 0xc72   :  { %8403 = vmatprep.mubr.msk.f32.mxu1 %vm6141_vm5, %v6127_v16 }
 0xc75   :  { %8404 = vmatmul.mubr.msk.f32.gmra.mrb[64].mxu1 %vm6141_vm5, %v6128_v59 }
 0xc76   :  { %8406 = vmatprep.mubr.msk.f32.mxu1 %vm6141_vm5, %v6129_v61 }
 0xc79   :  { %8407 = vmatmul.mubr.msk.f32.gmra.mrb[66].mxu1 %vm6141_vm5, %v6130_v10 }
 0xc7a   :  { %8409 = vmatprep.mubr.msk.f32.mxu1 %vm6141_vm5, %v6131_v26 }
 0xc7d   :  { %8410 = vmatmul.mubr.msk.f32.gmra.mrb[68].mxu1 %vm6141_vm5, %v6132_v58  ;;  %v16298_v58 = vld [vmem:[#allocation143_spill] sm:$0xff] }
 0xc7e   :  { %8412 = vmatprep.mubr.msk.f32.mxu1 %vm6141_vm5, %v6133_v56  ;;  %v2448_v56 = vadd.f32 %v16298_v58, %v14476_v31 }
 0xc81   :  { %8413 = vmatmul.mubr.msk.f32.gmra.mrb[70].mxu1 %vm6141_vm5, %v6134_v63  ;;  %v9680_v63 = vld [vmem:[%s15678_s27 + $0x28] sm:$0xff] }
 0xc82   :  { %8415 = vmatprep.mubr.msk.f32.mxu1 %vm6141_vm5, %v6135_v50  ;;  %v6360_v50 = vadd.f32 %v9680_v63, %v2446_v48  ;;  %v9684_v48 = vld [vmem:[%s15678_s27 + $0x48] sm:$0xff] }
 0xc85   :  { %8416 = vmatmul.mubr.msk.f32.gmra.mrb[72].mxu1 %vm6141_vm5, %v6136_v37 }
 0xc86   :  { %8418 = vmatprep.mubr.msk.f32.mxu1 %vm6141_vm5, %v6137_v8 }
 0xc89   :  { %8419 = vmatmul.mubr.msk.f32.gmra.mrb[74].mxu1 %vm6141_vm5, %v6138_v27 }
 0xc8a   :  { %8421 = vmatprep.mubr.msk.f32.mxu1 %vm6141_vm5, %v6139_v28  ;;  %v9681_v28 = vld [vmem:[%s15678_s27 + $0x20] sm:$0xff] }
 0xc8d   :  { %8422 = vmatmul.mubr.msk.f32.gmra.mrb[76].mxu1 %vm6141_vm5, %v6140_v52 }
 0xd44   :  { %v8402_v47 = vpop.f32.mrb[62].mxu1 }
 0xd45   :  { %v6340_v57 = vmul.f32 %v8402_v47, %v14340_v30  ;;  %v6260_v3 = vpop.f32.mrb[63].mxu1  ;;  %v6355_v30 = vadd.f32 %v9677_v25, %v2441_v44 }
 0xd46   :  { %v6339_v62 = vmul.f32 %v6260_v3, %v14338_v32 }
 0xd47   :  { %v6372_v60 = vmul.f32 0.01, %v6340_v57 }
 0xd48   :  { %v6371_v21 = vmul.f32 0.01, %v6339_v62  ;;  %v8405_v17 = vpop.f32.mrb[64].mxu1  ;;  %v9682_v62 = vld [vmem:[%s15678_s27 + $0x38] sm:$0xff] }
 0xd49   :  { %v14494_v32 = vadd.f32 %v6372_v60, %v6356_v38  ;;  %v6342_v33 = vmul.f32 %v8405_v17, %v14342_v29  ;;  %v6270_v51 = vpop.f32.mrb[65].mxu1  ;;  %v9679_v29 = vld [vmem:[%s15678_s27 + $0x10] sm:$0xff]  ;;  %v6362_v2 = vadd.f32 %v9682_v62, %v2448_v56  ;;  %v9686_v56 = vld [vmem:[%s15678_s27 + $0x58] sm:$0xff] }
 0xd4a   :  { %v14497_v15 = vadd.f32 %v6371_v21, %v6355_v30  ;;  %v6341_v41 = vmul.f32 %v6270_v51, %v14346_v11  ;;  %v6357_v22 = vadd.f32 %v9679_v29, %v2443_v46  ;;  %v2445_v11 = vadd.f32 %v14476_v31, %v16295_v7  ;;  %v16303_v46 = vld [vmem:[#allocation146_spill] sm:$0xff] }
 0xd4b   :  { %16292 = vst [vmem:[#allocation73_spill] sm:$0xff] %v14494_v32  ;;  %v6374_v12 = vmul.f32 0.01, %v6342_v33  ;;  %v6408_v39 = vsel %vm96_vm0, %v14494_v32, 0.0  ;;  %v9685_v7 = vld [vmem:[%s15678_s27 + $0x40] sm:$0xff] }
 0xd4c   :  { %16293 = vst [vmem:[#allocation75_spill] sm:$0xff] %v14497_v15  ;;  %v6373_v20 = vmul.f32 0.01, %v6341_v41  ;;  %6409 = vadd.xlane.f32.xlu0 %v6408_v39  ;;  %v8408_v40 = vpop.f32.mrb[66].mxu1  ;;  %v6405_v43 = vsel %vm96_vm0, %v14497_v15, 0.0 }
 0xd4d   :  { %v14514_v16 = vadd.f32 %v6374_v12, %v6358_v23  ;;  %v6344_v59 = vmul.f32 %v8408_v40, %v14353_v0  ;;  %6406 = vadd.xlane.f32.xlu1 %v6405_v43  ;;  %v6280_v61 = vpop.f32.mrb[67].mxu1  ;;  %v16299_v0 = vld [vmem:[#allocation139_spill] sm:$0xff]  ;;  %v6364_v12 = vadd.f32 %v9684_v48, %v2450_v53 }
 0xd4e   :  { %v14517_v10 = vadd.f32 %v6373_v20, %v6357_v22  ;;  %v6343_v26 = vmul.f32 %v6280_v61, %v14351_v36  ;;  %v2447_v27 = vadd.f32 %v16299_v0, %v14476_v31  ;;  %v6359_v36 = vadd.f32 %v9681_v28, %v2445_v11  ;;  %v16306_v23 = vld [vmem:[#allocation147_spill] sm:$0xff]  ;;  %v16311_v28 = vld [vmem:[#allocation150_spill] sm:$0xff] }
 0xd4f   :  { %16296 = vst [vmem:[#allocation127_spill] sm:$0xff] %v14514_v16  ;;  %v6376_v37 = vmul.f32 0.01, %v6344_v59  ;;  %v6414_v8 = vsel %vm96_vm0, %v14514_v16, 0.0  ;;  %v2452_v6 = vadd.f32 %v16306_v23, %v14476_v31  ;;  %v9688_v53 = vld [vmem:[%s15678_s27 + $0x68] sm:$0xff]  ;;  %v9690_v23 = vld [vmem:[%s15678_s27 + $0x78] sm:$0xff] }
 0xd50   :  { %16297 = vst [vmem:[#allocation131_spill] sm:$0xff] %v14517_v10  ;;  %v6375_v52 = vmul.f32 0.01, %v6343_v26  ;;  %v8411_v35 = vpop.f32.mrb[68].mxu1  ;;  %v6411_v14 = vsel %vm96_vm0, %v14517_v10, 0.0 }
 0xd51   :  { %v14534_v13 = vadd.f32 %v6376_v37, %v6360_v50  ;;  %v6346_v44 = vmul.f32 %v8411_v35, %v14356_v1  ;;  %6415 = vadd.xlane.f32.xlu1 %v6414_v8  ;;  %6412 = vadd.xlane.f32.xlu0 %v6411_v14  ;;  %v6290_v47 = vpop.f32.mrb[69].mxu1  ;;  %v9683_v1 = vld [vmem:[%s15678_s27 + $0x30] sm:$0xff]  ;;  %v6366_v63 = vadd.f32 %v9686_v56, %v2452_v6 }
 0xd52   :  { %v14537_v57 = vadd.f32 %v6375_v52, %v6359_v36  ;;  %v6345_v3 = vmul.f32 %v6290_v47, %v14360_v34  ;;  %v6361_v49 = vadd.f32 %v9683_v1, %v2447_v27  ;;  %v2449_v34 = vadd.f32 %v14476_v31, %v16303_v46  ;;  %v16310_v50 = vld [vmem:[#allocation152_spill] sm:$0xff]  ;;  %v9689_v46 = vld [vmem:[%s15678_s27 + $0x60] sm:$0xff] }
 0xd53   :  { %16300 = vst [vmem:[#allocation19_spill] sm:$0xff] %v14534_v13  ;;  %v6378_v38 = vmul.f32 0.01, %v6346_v44  ;;  %v6420_v60 = vsel %vm96_vm0, %v14534_v13, 0.0  ;;  %v2454_v37 = vadd.f32 %v14476_v31, %v16310_v50 }
 0xd54   :  { %16301 = vst [vmem:[#allocation21_spill] sm:$0xff] %v14537_v57  ;;  %v6377_v25 = vmul.f32 0.01, %v6345_v3  ;;  %v8414_v30 = vpop.f32.mrb[70].mxu1  ;;  %v6417_v21 = vsel %vm96_vm0, %v14537_v57, 0.0 }
 0xd55   :  { %v14554_v17 = vadd.f32 %v6378_v38, %v6362_v2  ;;  %v6348_v33 = vmul.f32 %v8414_v30, %v14367_v19  ;;  %6421 = vadd.xlane.f32.xlu1 %v6420_v60  ;;  %6418 = vadd.xlane.f32.xlu0 %v6417_v21  ;;  %v6300_v51 = vpop.f32.mrb[71].mxu1  ;;  %v16307_v19 = vld [vmem:[#allocation119_spill] sm:$0xff]  ;;  %v6368_v38 = vadd.f32 %v9688_v53, %v2454_v37 }
 0xd56   :  { %v14557_v41 = vadd.f32 %v6377_v25, %v6361_v49  ;;  %v6347_v5 = vmul.f32 %v6300_v51, %v14365_v45  ;;  %v2451_v22 = vadd.f32 %v16307_v19, %v14476_v31  ;;  %v6363_v45 = vadd.f32 %v9685_v7, %v2449_v34  ;;  %v16314_v2 = vld [vmem:[#allocation151_spill] sm:$0xff] }
 0xd57   :  { %16304 = vst [vmem:[#allocation30_spill] sm:$0xff] %v14554_v17  ;;  %v6380_v39 = vmul.f32 0.01, %v6348_v33  ;;  %v6426_v29 = vsel %vm96_vm0, %v14554_v17, 0.0  ;;  %v2456_v54 = vadd.f32 %v16314_v2, %v14476_v31 }
 0xd58   :  { %16305 = vst [vmem:[#allocation28_spill] sm:$0xff] %v14557_v41  ;;  %v6379_v11 = vmul.f32 0.01, %v6347_v5  ;;  %v8417_v20 = vpop.f32.mrb[72].mxu1  ;;  %v6423_v40 = vsel %vm96_vm0, %v14557_v41, 0.0 }
 0xd59   :  { %v14574_v43 = vadd.f32 %v6380_v39, %v6364_v12  ;;  %v6350_v59 = vmul.f32 %v8417_v20, %v14370_v24  ;;  %6427 = vadd.xlane.f32.xlu1 %v6426_v29  ;;  %6424 = vadd.xlane.f32.xlu0 %v6423_v40  ;;  %v6310_v61 = vpop.f32.mrb[73].mxu1  ;;  %v9687_v24 = vld [vmem:[%s15678_s27 + $0x50] sm:$0xff]  ;;  %v6370_v6 = vadd.f32 %v9690_v23, %v2456_v54 }
 0xd5a   :  { %v14577_v26 = vadd.f32 %v6379_v11, %v6363_v45  ;;  %v6349_v58 = vmul.f32 %v6310_v61, %v14374_v9  ;;  %v6365_v27 = vadd.f32 %v9687_v24, %v2451_v22  ;;  %v2453_v9 = vadd.f32 %v14476_v31, %v16311_v28 }
 0xd5b   :  { %16308 = vst [vmem:[#allocation90_spill] sm:$0xff] %v14574_v43  ;;  %v6382_v8 = vmul.f32 0.01, %v6350_v59  ;;  %v6432_v0 = vsel %vm96_vm0, %v14574_v43, 0.0 }
 0xd5c   :  { %16309 = vst [vmem:[#allocation89_spill] sm:$0xff] %v14577_v26  ;;  %v6381_v36 = vmul.f32 0.01, %v6349_v58  ;;  %v8420_v52 = vpop.f32.mrb[74].mxu1  ;;  %v6429_v35 = vsel %vm96_vm0, %v14577_v26, 0.0 }
 0xd5d   :  { %v14594_v14 = vadd.f32 %v6382_v8, %v6366_v63  ;;  %v6352_v44 = vmul.f32 %v8420_v52, %v14382_v4  ;;  %6433 = vadd.xlane.f32.xlu1 %v6432_v0  ;;  %6430 = vadd.xlane.f32.xlu0 %v6429_v35  ;;  %v6320_v47 = vpop.f32.mrb[75].mxu1  ;;  %v16315_v4 = vld [vmem:[#allocation149_spill] sm:$0xff] }
 0xd5e   :  { %v14597_v3 = vadd.f32 %v6381_v36, %v6365_v27  ;;  %v6351_v62 = vmul.f32 %v6320_v47, %v14380_v42  ;;  %v2455_v49 = vadd.f32 %v16315_v4, %v14476_v31  ;;  %v6367_v42 = vadd.f32 %v9689_v46, %v2453_v9 }
 0xd5f   :  { %16312 = vst [vmem:[#allocation35_spill] sm:$0xff] %v14594_v14  ;;  %v6384_v60 = vmul.f32 0.01, %v6352_v44  ;;  %v6438_v1 = vsel %vm96_vm0, %v14594_v14, 0.0 }
 0xd60   :  { %16313 = vst [vmem:[#allocation33_spill] sm:$0xff] %v14597_v3  ;;  %v6383_v34 = vmul.f32 0.01, %v6351_v62  ;;  %v8423_v25 = vpop.f32.mrb[76].mxu1  ;;  %v6435_v30 = vsel %vm96_vm0, %v14597_v3, 0.0 }
 0xd61   :  { %v14614_v21 = vadd.f32 %v6384_v60, %v6368_v38  ;;  %v6354_v33 = vmul.f32 %v8423_v25, %v14384_v18  ;;  %6439 = vadd.xlane.f32.xlu1 %v6438_v1  ;;  %6436 = vadd.xlane.f32.xlu0 %v6435_v30  ;;  %v6330_v51 = vpop.f32.mrb[77].mxu1  ;;  %v9691_v18 = vld [vmem:[%s15678_s27 + $0x70] sm:$0xff] }
 0xd62   :  { %v14617_v5 = vadd.f32 %v6383_v34, %v6367_v42  ;;  %v6353_v31 = vmul.f32 %v6330_v51, %v14388_v55  ;;  %v6369_v39 = vadd.f32 %v9691_v18, %v2455_v49 }
 0xd63   :  { %16316 = vst [vmem:[#allocation32_spill] sm:$0xff] %v14614_v21  ;;  %v6386_v48 = vmul.f32 0.01, %v6354_v33  ;;  %v6444_v12 = vsel %vm96_vm0, %v14614_v21, 0.0 }
 0xd64   :  { %16317 = vst [vmem:[#allocation31_spill] sm:$0xff] %v14617_v5  ;;  %v6385_v29 = vmul.f32 0.01, %v6353_v31  ;;  %v6441_v19 = vsel %vm96_vm0, %v14617_v5, 0.0 }
 0xd65   :  { %v14630_v22 = vadd.f32 %v6386_v48, %v6370_v6  ;;  %6445 = vadd.xlane.f32.xlu1 %v6444_v12  ;;  %6442 = vadd.xlane.f32.xlu0 %v6441_v19 }
 0xd66   :  { %v14632_v55 = vadd.f32 %v6385_v29, %v6369_v39 }
 0xd67   :  { %16318 = vst [vmem:[#allocation41_spill] sm:$0xff] %v14630_v22  ;;  %v6450_v7 = vsel %vm96_vm0, %v14630_v22, 0.0 }
 0xd68   :  { %16319 = vst [vmem:[#allocation39_spill] sm:$0xff] %v14632_v55  ;;  %v6447_v45 = vsel %vm96_vm0, %v14632_v55, 0.0 }
 0xd69   :  { %6451 = vadd.xlane.f32.xlu1 %v6450_v7  ;;  %6448 = vadd.xlane.f32.xlu0 %v6447_v45 }
 0xdd9   :  { %v6410_v11 = vpop.xlane.xlu0 %6409 }
 0xdda   :  { %v6454_v20 = vmul.f32 0.03125, %v6410_v11  ;;  %v6407_v40 = vpop.xlane.xlu1 %6406 }
 0xddb   :  { %v6453_v59 = vmul.f32 0.03125, %v6407_v40 }
 0xddc   :  { %v14639_v61 = vsub.f32 %v14494_v32, %v6454_v20 }
 0xddd   :  { %v14642_v58 = vsub.f32 %v14497_v15, %v6453_v59 }
 0xdde   :  { %v6416_v56 = vpop.xlane.xlu1 %6415  ;;  %v6413_v63 = vpop.xlane.xlu0 %6412  ;;  %v6486_v50 = vmul.f32 %v14639_v61, %v14639_v61 }
 0xddf   :  { %v6456_v37 = vmul.f32 0.03125, %v6416_v56  ;;  %v6455_v8 = vmul.f32 0.03125, %v6413_v63  ;;  %v6485_v0 = vmul.f32 %v14642_v58, %v14642_v58 }
 0xde0   :  { %v6504_v24 = vsel %vm96_vm0, %v6486_v50, 0.0 }
 0xde1   :  { %v14650_v27 = vsub.f32 %v14514_v16, %v6456_v37  ;;  %v14653_v28 = vsub.f32 %v14517_v10, %v6455_v8  ;;  %6505 = vadd.xlane.f32.xlu1 %v6504_v24  ;;  %v6501_v9 = vsel %vm96_vm0, %v6485_v0, 0.0 }
 0xde2   :  { %v6422_v36 = vpop.xlane.xlu1 %6421  ;;  %v6419_v52 = vpop.xlane.xlu0 %6418  ;;  %6502 = vadd.xlane.f32.xlu0 %v6501_v9 }
 0xde3   :  { %v6458_v35 = vmul.f32 0.03125, %v6422_v36  ;;  %v6457_v44 = vmul.f32 0.03125, %v6419_v52  ;;  %v6488_v47 = vmul.f32 %v14650_v27, %v14650_v27  ;;  %v6487_v62 = vmul.f32 %v14653_v28, %v14653_v28 }
 0xde5   :  { %v14661_v2 = vsub.f32 %v14534_v13, %v6458_v35  ;;  %v14664_v54 = vsub.f32 %v14537_v57, %v6457_v44  ;;  %v6510_v53 = vsel %vm96_vm0, %v6488_v47, 0.0  ;;  %v6507_v38 = vsel %vm96_vm0, %v6487_v62, 0.0 }
 0xde6   :  { %v6428_v60 = vpop.xlane.xlu1 %6427  ;;  %v6425_v1 = vpop.xlane.xlu0 %6424  ;;  %6511 = vadd.xlane.f32.xlu1 %v6510_v53  ;;  %6508 = vadd.xlane.f32.xlu0 %v6507_v38 }
 0xde7   :  { %v6460_v4 = vmul.f32 0.03125, %v6428_v60  ;;  %v6459_v49 = vmul.f32 0.03125, %v6425_v1  ;;  %v6490_v46 = vmul.f32 %v14661_v2, %v14661_v2  ;;  %v6489_v42 = vmul.f32 %v14664_v54, %v14664_v54 }
 0xde9   :  { %v14673_v34 = vsub.f32 %v14554_v17, %v6460_v4  ;;  %v14676_v25 = vsub.f32 %v14557_v41, %v6459_v49  ;;  %v6516_v30 = vsel %vm96_vm0, %v6490_v46, 0.0  ;;  %v6513_v33 = vsel %vm96_vm0, %v6489_v42, 0.0 }
 0xdea   :  { %v6434_v51 = vpop.xlane.xlu1 %6433  ;;  %v6431_v31 = vpop.xlane.xlu0 %6430  ;;  %6517 = vadd.xlane.f32.xlu1 %v6516_v30  ;;  %6514 = vadd.xlane.f32.xlu0 %v6513_v33 }
 0xdeb   :  { %v6462_v23 = vmul.f32 0.03125, %v6434_v51  ;;  %v6461_v6 = vmul.f32 0.03125, %v6431_v31  ;;  %v6492_v48 = vmul.f32 %v14673_v34, %v14673_v34  ;;  %v6491_v12 = vmul.f32 %v14676_v25, %v14676_v25 }
 0xded   :  { %v14685_v18 = vsub.f32 %v14574_v43, %v6462_v23  ;;  %v14688_v39 = vsub.f32 %v14577_v26, %v6461_v6  ;;  %v6522_v29 = vsel %vm96_vm0, %v6492_v48, 0.0  ;;  %v6519_v19 = vsel %vm96_vm0, %v6491_v12, 0.0  ;;  %v9214_v48 = vld [vmem:[%s15350_s20] sm:$0xff]   ;;  %v9215_v12 = vld [vmem:[%s15350_s20 + $0x8] sm:$0xff]  }
 0xdee   :  { %v6440_v7 = vpop.xlane.xlu1 %6439  ;;  %v6437_v45 = vpop.xlane.xlu0 %6436  ;;  %6523 = vadd.xlane.f32.xlu1 %v6522_v29  ;;  %6520 = vadd.xlane.f32.xlu0 %v6519_v19 }
 0xdef   :  { %v6464_v11 = vmul.f32 0.03125, %v6440_v7  ;;  %v6463_v20 = vmul.f32 0.03125, %v6437_v45  ;;  %v6494_v40 = vmul.f32 %v14685_v18, %v14685_v18  ;;  %v6493_v59 = vmul.f32 %v14688_v39, %v14688_v39  ;;  %8424 = vmatprep.subr.bf16.mxu0 %v9214_v48 }
 0xdf0   :  { %8425 = vmatpush3.bf16.msra.mxu0 %v9214_v48 }
 0xdf1   :  { %v14697_v56 = vsub.f32 %v14594_v14, %v6464_v11  ;;  %v14700_v63 = vsub.f32 %v14597_v3, %v6463_v20  ;;  %v6528_v50 = vsel %vm96_vm0, %v6494_v40, 0.0  ;;  %v6525_v37 = vsel %vm96_vm0, %v6493_v59, 0.0  ;;  %8426 = vmatprep.subr.bf16.mxu0 %v9215_v12 }
 0xdf2   :  { %v6446_v8 = vpop.xlane.xlu1 %6445  ;;  %v6443_v0 = vpop.xlane.xlu0 %6442  ;;  %6529 = vadd.xlane.f32.xlu1 %v6528_v50  ;;  %6526 = vadd.xlane.f32.xlu0 %v6525_v37 }
 0xdf3   :  { %v6466_v24 = vmul.f32 0.03125, %v6446_v8  ;;  %v6465_v9 = vmul.f32 0.03125, %v6443_v0  ;;  %v6496_v36 = vmul.f32 %v14697_v56, %v14697_v56  ;;  %v6495_v52 = vmul.f32 %v14700_v63, %v14700_v63 }
 0xdf4   :  { %8427 = vmatpush3.bf16.msra.mxu0 %v9215_v12  ;;  %v14750_v12 = vld [vmem:[%s15352_s19] ss:$0 sm:$0xff] }
 0xdf5   :  { %v14709_v35 = vsub.f32 %v14614_v21, %v6466_v24  ;;  %v14712_v44 = vsub.f32 %v14617_v5, %v6465_v9  ;;  %v6534_v47 = vsel %vm96_vm0, %v6496_v36, 0.0  ;;  %v6531_v62 = vsel %vm96_vm0, %v6495_v52, 0.0 }
 0xdf6   :  { %6535 = vadd.xlane.f32.xlu1 %v6534_v47  ;;  %v6452_v53 = vpop.xlane.xlu1 %6451  ;;  %6532 = vadd.xlane.f32.xlu0 %v6531_v62  ;;  %v6449_v38 = vpop.xlane.xlu0 %6448  ;;  %v16320_v5 = vmov -1.0  }
 0xdf7   :  { %v6468_v60 = vmul.f32 0.03125, %v6452_v53  ;;  %v6467_v1 = vmul.f32 0.03125, %v6449_v38  ;;  %v6498_v4 = vmul.f32 %v14709_v35, %v14709_v35  ;;  %v6497_v49 = vmul.f32 %v14712_v44, %v14712_v44 }
 0xdf9   :  { %v14721_v46 = vsub.f32 %v14630_v22, %v6468_v60  ;;  %v14724_v42 = vsub.f32 %v14632_v55, %v6467_v1  ;;  %v6540_v30 = vsel %vm96_vm0, %v6498_v4, 0.0  ;;  %v6537_v33 = vsel %vm96_vm0, %v6497_v49, 0.0  ;;  %v14743_v49 = vld [vmem:[%s15351_s18] ss:$0 sm:$0xff] }
 0xdfa   :  { %6541 = vadd.xlane.f32.xlu1 %v6540_v30  ;;  %6538 = vadd.xlane.f32.xlu0 %v6537_v33 }
 0xdfb   :  { %v6500_v51 = vmul.f32 %v14721_v46, %v14721_v46  ;;  %v6499_v31 = vmul.f32 %v14724_v42, %v14724_v42 }
 0xdfd   :  { %v6546_v23 = vsel %vm96_vm0, %v6500_v51, 0.0  ;;  %v6543_v6 = vsel %vm96_vm0, %v6499_v31, 0.0 }
 0xdfe   :  { %6547 = vadd.xlane.f32.xlu1 %v6546_v23  ;;  %6544 = vadd.xlane.f32.xlu0 %v6543_v6 }
 0xe6e   :  { %v6506_v29 = vpop.xlane.xlu1 %6505 }
 0xe6f   :  { %v6550_v19 = vmul.f32 0.03125, %v6506_v29  ;;  %v6503_v7 = vpop.xlane.xlu0 %6502 }
 0xe70   :  { %v6549_v45 = vmul.f32 0.03125, %v6503_v7 }
 0xe71   :  { %v6566_v11 = vadd.f32 1e-05, %v6550_v19 }
 0xe72   :  { %v6565_v20 = vadd.f32 1e-05, %v6549_v45 }
 0xe73   :  { %9580 = vrsqrt.f32 %v6566_v11  ;;  %v6512_v40 = vpop.xlane.xlu1 %6511  ;;  %v6509_v59 = vpop.xlane.xlu0 %6508 }
 0xe74   :  { %9582 = vrsqrt.f32 %v6565_v20  ;;  %v6552_v50 = vmul.f32 0.03125, %v6512_v40  ;;  %v6551_v37 = vmul.f32 0.03125, %v6509_v59 }
 0xe76   :  { %v6568_v8 = vadd.f32 1e-05, %v6552_v50  ;;  %v6567_v0 = vadd.f32 1e-05, %v6551_v37 }
 0xe77   :  { %v6518_v24 = vpop.xlane.xlu1 %6517  ;;  %v6515_v9 = vpop.xlane.xlu0 %6514 }
 0xe78   :  { %9584 = vrsqrt.f32 %v6568_v8  ;;  %v6554_v36 = vmul.f32 0.03125, %v6518_v24  ;;  %v6553_v52 = vmul.f32 0.03125, %v6515_v9 }
 0xe79   :  { %9586 = vrsqrt.f32 %v6567_v0 }
 0xe7a   :  { %v6570_v47 = vadd.f32 1e-05, %v6554_v36  ;;  %v6569_v62 = vadd.f32 1e-05, %v6553_v52 }
 0xe7b   :  { %v6524_v53 = vpop.xlane.xlu1 %6523  ;;  %v6521_v38 = vpop.xlane.xlu0 %6520 }
 0xe7c   :  { %9588 = vrsqrt.f32 %v6570_v47  ;;  %v6556_v60 = vmul.f32 0.03125, %v6524_v53  ;;  %v6555_v1 = vmul.f32 0.03125, %v6521_v38 }
 0xe7d   :  { %v9581_v4 = vpop.eup %9580  ;;  %9590 = vrsqrt.f32 %v6569_v62 }
 0xe7e   :  { %v9583_v30 = vpop.eup %9582  ;;  %v6598_v33 = vmul.f32 %v9581_v4, %v14639_v61  ;;  %v6572_v51 = vadd.f32 1e-05, %v6556_v60  ;;  %v6571_v31 = vadd.f32 1e-05, %v6555_v1 }
 0xe7f   :  { %v6597_v23 = vmul.f32 %v9583_v30, %v14642_v58  ;;  %v6530_v6 = vpop.xlane.xlu1 %6529  ;;  %v6527_v48 = vpop.xlane.xlu0 %6526 }
 0xe80   :  { %9592 = vrsqrt.f32 %v6572_v51  ;;  %v6558_v29 = vmul.f32 0.03125, %v6530_v6  ;;  %v6557_v19 = vmul.f32 0.03125, %v6527_v48  ;;  %v6620_v7 = vmul.f32 %v14743_v49, %v6598_v33 }
 0xe81   :  { %9594 = vrsqrt.f32 %v6571_v31  ;;  %v6619_v45 = vmul.f32 %v14743_v49, %v6597_v23 }
 0xe82   :  { %v9585_v61 = vpop.eup %9584  ;;  %v6574_v11 = vadd.f32 1e-05, %v6558_v29  ;;  %v6573_v20 = vadd.f32 1e-05, %v6557_v19  ;;  %v6642_v58 = vadd.f32 %v14750_v12, %v6620_v7 }
 0xe83   :  { %v9587_v40 = vpop.eup %9586  ;;  %v6600_v59 = vmul.f32 %v9585_v61, %v14650_v27  ;;  %v6536_v50 = vpop.xlane.xlu1 %6535  ;;  %v6641_v8 = vadd.f32 %v14750_v12, %v6619_v45 }
 0xe84   :  { %v6533_v37 = vpop.xlane.xlu0 %6532  ;;  %v6599_v0 = vmul.f32 %v9587_v40, %v14653_v28  ;;  %9596 = vrsqrt.f32 %v6574_v11  ;;  %v6560_v24 = vmul.f32 0.03125, %v6536_v50 }
 0xe85   :  { %v6559_v9 = vmul.f32 0.03125, %v6533_v37  ;;  %v6622_v36 = vmul.f32 %v14743_v49, %v6600_v59  ;;  %9598 = vrsqrt.f32 %v6573_v20  ;;  %v6657_v52 = vpack.c.bf16 %v6642_v58, %v6641_v8 }
 0xe86   :  { %v9589_v47 = vpop.eup %9588  ;;  %v6621_v62 = vmul.f32 %v14743_v49, %v6599_v0  ;;  %v6576_v53 = vadd.f32 1e-05, %v6560_v24 }
 0xe87   :  { %v6575_v38 = vadd.f32 1e-05, %v6559_v9  ;;  %v9591_v60 = vpop.eup %9590  ;;  %v6602_v27 = vmul.f32 %v9589_v47, %v14661_v2  ;;  %v6542_v1 = vpop.xlane.xlu1 %6541  ;;  %8428 = vmatprep.mubr.msk.bf16.mxu0 %vm96_vm0, %v6657_v52  ;;  %v6644_v28 = vadd.f32 %v14750_v12, %v6622_v36 }
 0xe88   :  { %v6539_v4 = vpop.xlane.xlu0 %6538  ;;  %v6601_v30 = vmul.f32 %v9591_v60, %v14664_v54  ;;  %9600 = vrsqrt.f32 %v6576_v53  ;;  %v6562_v33 = vmul.f32 0.03125, %v6542_v1  ;;  %v6643_v31 = vadd.f32 %v14750_v12, %v6621_v62 }
 0xe89   :  { %v6561_v51 = vmul.f32 0.03125, %v6539_v4  ;;  %9602 = vrsqrt.f32 %v6575_v38  ;;  %v6624_v23 = vmul.f32 %v14743_v49, %v6602_v27 }
 0xe8a   :  { %v9593_v6 = vpop.eup %9592  ;;  %v6578_v48 = vadd.f32 1e-05, %v6562_v33  ;;  %v6623_v2 = vmul.f32 %v14743_v49, %v6601_v30  ;;  %v6658_v61 = vpack.c.bf16 %v6644_v28, %v6643_v31 }
 0xe8b   :  { %v6577_v29 = vadd.f32 1e-05, %v6561_v51  ;;  %v9595_v19 = vpop.eup %9594  ;;  %v6604_v7 = vmul.f32 %v9593_v6, %v14673_v34  ;;  %v6548_v45 = vpop.xlane.xlu1 %6547  ;;  %v6646_v54 = vadd.f32 %v14750_v12, %v6624_v23 }
 0xe8c   :  { %v6545_v11 = vpop.xlane.xlu0 %6544  ;;  %v6603_v20 = vmul.f32 %v9595_v19, %v14676_v25  ;;  %9604 = vrsqrt.f32 %v6578_v48  ;;  %v6564_v58 = vmul.f32 0.03125, %v6548_v45  ;;  %8429 = vmatmul.mubr.msk.bf16.vlgmr.msra.gmra.mrb[120].mxu0 %vm96_vm0, %v6658_v61  ;;  %v6645_v59 = vadd.f32 %v14750_v12, %v6623_v2 }
 0xe8d   :  { %v6563_v40 = vmul.f32 0.03125, %v6545_v11  ;;  %9606 = vrsqrt.f32 %v6577_v29  ;;  %v6626_v50 = vmul.f32 %v14743_v49, %v6604_v7 }
 0xe8e   :  { %v9597_v37 = vpop.eup %9596  ;;  %v6580_v8 = vadd.f32 1e-05, %v6564_v58  ;;  %v6625_v0 = vmul.f32 %v14743_v49, %v6603_v20  ;;  %v6659_v36 = vpack.c.bf16 %v6646_v54, %v6645_v59  ;;  %v9217_v59 = vld [vmem:[%s15353_s22 + $0x8] sm:$0xff]  }
 0xe8f   :  { %v6579_v34 = vadd.f32 1e-05, %v6563_v40  ;;  %v9599_v24 = vpop.eup %9598  ;;  %v6606_v9 = vmul.f32 %v9597_v37, %v14685_v18  ;;  %v6648_v25 = vadd.f32 %v14750_v12, %v6626_v50  ;;  %v14821_v50 = vld [vmem:[%s15354_s21] ss:$0 sm:$0xff] }
 0xe90   :  { %v6605_v52 = vmul.f32 %v9599_v24, %v14688_v39  ;;  %9608 = vrsqrt.f32 %v6580_v8  ;;  %v6647_v47 = vadd.f32 %v14750_v12, %v6625_v0  ;;  %8432 = vmatprep.mubr.msk.bf16.mxu0 %vm96_vm0, %v6659_v36  ;;  %v9220_v37 = vld [vmem:[%s15353_s22 + $0x20] sm:$0xff]   ;;  %v9221_v36 = vld [vmem:[%s15353_s22 + $0x28] sm:$0xff]  }
 0xe91   :  { %9610 = vrsqrt.f32 %v6579_v34  ;;  %v6628_v62 = vmul.f32 %v14743_v49, %v6606_v9 }
 0xe92   :  { %v9601_v53 = vpop.eup %9600  ;;  %v6660_v38 = vpack.c.bf16 %v6648_v25, %v6647_v47  ;;  %v6627_v60 = vmul.f32 %v14743_v49, %v6605_v52 }
 0xe93   :  { %v9603_v27 = vpop.eup %9602  ;;  %v6608_v18 = vmul.f32 %v9601_v53, %v14697_v56  ;;  %v6650_v1 = vadd.f32 %v14750_v12, %v6628_v62  ;;  %v9222_v53 = vld [vmem:[%s15353_s22 + $0x30] sm:$0xff]  }
 0xe94   :  { %v6607_v4 = vmul.f32 %v9603_v27, %v14700_v63  ;;  %v6649_v39 = vadd.f32 %v14750_v12, %v6627_v60  ;;  %8433 = vmatmul.mubr.msk.bf16.gmra.mrb[124].mxu0 %vm96_vm0, %v6660_v38 }
 0xe95   :  { %v6630_v28 = vmul.f32 %v14743_v49, %v6608_v18 }
 0xe96   :  { %v9605_v30 = vpop.eup %9604  ;;  %v6661_v33 = vpack.c.bf16 %v6650_v1, %v6649_v39  ;;  %v6629_v51 = vmul.f32 %v14743_v49, %v6607_v4  ;;  %v9223_v1 = vld [vmem:[%s15353_s22 + $0x38] sm:$0xff]  }
 0xe97   :  { %v9607_v31 = vpop.eup %9606  ;;  %v6610_v23 = vmul.f32 %v9605_v30, %v14709_v35  ;;  %v6652_v6 = vadd.f32 %v14750_v12, %v6630_v28 }
 0xe98   :  { %v6609_v56 = vmul.f32 %v9607_v31, %v14712_v44  ;;  %8436 = vmatprep.mubr.msk.bf16.mxu0 %vm96_vm0, %v6661_v33  ;;  %v6651_v63 = vadd.f32 %v14750_v12, %v6629_v51 }
 0xe99   :  { %v6632_v48 = vmul.f32 %v14743_v49, %v6610_v23 }
 0xe9a   :  { %v9609_v29 = vpop.eup %9608  ;;  %v6662_v2 = vpack.c.bf16 %v6652_v6, %v6651_v63  ;;  %v6631_v19 = vmul.f32 %v14743_v49, %v6609_v56 }
 0xe9b   :  { %v9611_v7 = vpop.eup %9610  ;;  %v6612_v45 = vmul.f32 %v9609_v29, %v14721_v46  ;;  %v6654_v61 = vadd.f32 %v14750_v12, %v6632_v48 }
 0xe9c   :  { %v6611_v35 = vmul.f32 %v9611_v7, %v14724_v42  ;;  %v6653_v11 = vadd.f32 %v14750_v12, %v6631_v19  ;;  %8437 = vmatmul.mubr.msk.bf16.gmra.mrb[128].mxu0 %vm96_vm0, %v6662_v2  ;;  %v9216_v42 = vld [vmem:[%s15353_s22] sm:$0xff]  }
 0xe9d   :  { %v6634_v44 = vmul.f32 %v14743_v49, %v6612_v45  ;;  %8444 = vmatprep.subr.bf16.mxu1 %v9216_v42 }
 0xe9e   :  { %v6663_v54 = vpack.c.bf16 %v6654_v61, %v6653_v11  ;;  %v6633_v20 = vmul.f32 %v14743_v49, %v6611_v35  ;;  %8445 = vmatpush3.bf16.msra.mxu1 %v9216_v42  ;;  %v9218_v49 = vld [vmem:[%s15353_s22 + $0x10] sm:$0xff]  }
 0xe9f   :  { %v6656_v58 = vadd.f32 %v14750_v12, %v6634_v44  ;;  %8446 = vmatprep.subr.bf16.mxu1 %v9217_v59 }
 0xea0   :  { %8440 = vmatprep.mubr.msk.bf16.mxu0 %vm96_vm0, %v6663_v54  ;;  %v6655_v40 = vadd.f32 %v14750_v12, %v6633_v20  ;;  %v9219_v12 = vld [vmem:[%s15353_s22 + $0x18] sm:$0xff]  }
 0xea2   :  { %v6664_v46 = vpack.c.bf16 %v6656_v58, %v6655_v40  ;;  %8447 = vmatpush3.bf16.msra.mxu1 %v9217_v59 }
 0xea3   :  { %8448 = vmatprep.subr.bf16.mxu1 %v9218_v49 }
 0xea4   :  { %8441 = vmatmul.mubr.msk.bf16.gmra.mrb[132].mxu0 %vm96_vm0, %v6664_v46 }
 0xea6   :  { %8449 = vmatpush3.bf16.msra.mxu1 %v9218_v49 }
 0xea7   :  { %8450 = vmatprep.subr.bf16.mxu1 %v9219_v12 }
 0xeaa   :  { %8451 = vmatpush3.bf16.msra.mxu1 %v9219_v12 }
 0xeab   :  { %8452 = vmatprep.subr.bf16.mxu1 %v9220_v37 }
 0xeae   :  { %8453 = vmatpush3.bf16.msra.mxu1 %v9220_v37 }
 0xeaf   :  { %8454 = vmatprep.subr.bf16.mxu1 %v9221_v36 }
 0xeb2   :  { %8455 = vmatpush3.bf16.msra.mxu1 %v9221_v36 }
 0xeb3   :  { %8456 = vmatprep.subr.bf16.mxu1 %v9222_v53 }
 0xeb6   :  { %8457 = vmatpush3.bf16.msra.mxu1 %v9222_v53 }
 0xeb7   :  { %8458 = vmatprep.subr.bf16.mxu1 %v9223_v1 }
 0xeba   :  { %8459 = vmatpush3.bf16.msra.mxu1 %v9223_v1 }
 0xf5f   :  { %v8430_v8 = vpop.f32.mrb[120].mxu0 }
 0xf60   :  { %v14827_v34 = vadd.f32 %v8430_v8, %v14821_v50  ;;  %v6746_v0 = vpop.f32.mrb[121].mxu0 }
 0xf61   :  { %v14830_v24 = vadd.f32 %v14821_v50, %v6746_v0  ;;  %v8431_v9 = vpop.f32.mrb[122].mxu0 }
 0xf62   :  { %v14836_v25 = vmul.f32 0.70710677, %v14827_v34  ;;  %v14839_v52 = vadd.f32 %v8431_v9, %v14821_v50  ;;  %v6749_v47 = vpop.f32.mrb[123].mxu0 }
 0xf63   :  { %v14842_v62 = vmul.f32 0.70710677, %v14830_v24  ;;  %v14852_v27 = vadd.f32 %v14821_v50, %v6749_v47 }
 0xf64   :  { %v6875_v38 = vand.u32 2147483647, %v14836_v25  ;;  %v14849_v60 = vmul.f32 0.70710677, %v14839_v52  ;;  %vm6843_vm7 = vcmp.ge.f32.partialorder %v14836_v25, 0.0 }
 0xf65   :  { %v6873_v18 = vand.u32 2147483647, %v14842_v62  ;;  %v14860_v33 = vmul.f32 0.70710677, %v14852_v27  ;;  %vm6841_vm9 = vcmp.ge.f32.partialorder %v14842_v62, 0.0 }
 0xf66   :  { %v6891_v4 = vmul.f32 0.3275911, %v6875_v38  ;;  %v6876_v28 = vand.u32 2147483647, %v14849_v60  ;;  %v7099_v35 = vsub.f32 0.0, %v6875_v38  ;;  %vm6844_vm8 = vcmp.ge.f32.partialorder %v14849_v60, 0.0 }
 0xf67   :  { %v6889_v39 = vmul.f32 0.3275911, %v6873_v18  ;;  %v8434_v51 = vpop.f32.mrb[124].mxu0  ;;  %v14863_v56 = vand.u32 2147483647, %v14860_v33  ;;  %v7097_v12 = vsub.f32 0.0, %v6873_v18 }
 0xf68   :  { %v6907_v30 = vadd.f32 1.0, %v6891_v4  ;;  %v6892_v23 = vmul.f32 0.3275911, %v6876_v28  ;;  %v6762_v6 = vpop.f32.mrb[125].mxu0  ;;  %v14867_v19 = vadd.f32 %v8434_v51, %v14821_v50  ;;  %v7115_v49 = vmul.f32 %v7099_v35, %v6875_v38 }
 0xf69   :  { %v6905_v31 = vadd.f32 1.0, %v6889_v39  ;;  %v8435_v63 = vpop.f32.mrb[126].mxu0  ;;  %v6890_v2 = vmul.f32 0.3275911, %v14863_v56  ;;  %v14870_v7 = vadd.f32 %v14821_v50, %v6762_v6  ;;  %v7100_v0 = vsub.f32 0.0, %v6876_v28 }
 0xf6a   :  { %9612 = vrcp.f32 %v6907_v30  ;;  %v6908_v48 = vadd.f32 1.0, %v6892_v23  ;;  %v6765_v29 = vpop.f32.mrb[127].mxu0  ;;  %v14873_v61 = vadd.f32 %v8435_v63, %v14821_v50  ;;  %v14876_v11 = vmul.f32 0.70710677, %v14867_v19 }
 0xf6b   :  { %9614 = vrcp.f32 %v6905_v31  ;;  %v6906_v45 = vadd.f32 1.0, %v6890_v2  ;;  %v14881_v54 = vmul.f32 0.70710677, %v14870_v7  ;;  %v14911_v30 = vadd.f32 %v14821_v50, %v6765_v29 }
 0xf6c   :  { %9616 = vrcp.f32 %v6908_v48  ;;  %v14886_v58 = vand.u32 2147483647, %v14876_v11  ;;  %v14889_v40 = vmul.f32 0.70710677, %v14873_v61  ;;  %v7133_v31 = vmul.f32 1.442695, %v7115_v49 }
 0xf6d   :  { %9618 = vrcp.f32 %v6906_v45  ;;  %v14894_v42 = vand.u32 2147483647, %v14881_v54  ;;  %v7113_v23 = vmul.f32 %v7097_v12, %v6873_v18  ;;  %v7116_v2 = vmul.f32 %v7100_v0, %v6876_v28 }
 0xf6e   :  { %v6895_v37 = vmul.f32 0.3275911, %v14886_v58  ;;  %v14903_v36 = vand.u32 2147483647, %v14889_v40  ;;  %v7098_v22 = vsub.f32 0.0, %v14863_v56  ;;  %vm6842_vm10 = vcmp.ge.f32.partialorder %v14860_v33, 0.0 }
 0xf6f   :  { %v14878_v44 = vpop.f32.mrb[128].mxu0  ;;  %v6893_v9 = vmul.f32 0.3275911, %v14894_v42  ;;  %vm6847_vm2 = vcmp.ge.f32.partialorder %v14876_v11, 0.0  ;;  %vm6845_vm3 = vcmp.ge.f32.partialorder %v14881_v54, 0.0  ;;  %vm6848_vm11 = vcmp.ge.f32.partialorder %v14889_v40, 0.0 }
 0xf70   :  { %v14883_v20 = vpop.f32.mrb[129].mxu0  ;;  %v6911_v1 = vadd.f32 1.0, %v6895_v37  ;;  %v6896_v38 = vmul.f32 0.3275911, %v14903_v36  ;;  %v14920_v37 = vmul.f32 0.5, %v14827_v34 }
 0xf71   :  { %v14891_v46 = vpop.f32.mrb[130].mxu0  ;;  %v6909_v39 = vadd.f32 1.0, %v6893_v9  ;;  %v14924_v9 = vmul.f32 0.5, %v14830_v24  ;;  %v14935_v34 = vmul.f32 0.70710677, %v14911_v30 }
 0xf72   :  { %v14896_v59 = vpop.f32.mrb[131].mxu0  ;;  %9620 = vrcp.f32 %v6911_v1  ;;  %v6912_v45 = vadd.f32 1.0, %v6896_v38  ;;  %v7135_v38 = vmul.f32 1.442695, %v7116_v2 }
 0xf73   :  { %9622 = vrcp.f32 %v6909_v39  ;;  %v14941_v39 = vmul.f32 0.5, %v14839_v52  ;;  %v14955_v52 = vmul.f32 0.5, %v14852_v27  ;;  %vm6846_vm12 = vcmp.ge.f32.partialorder %v14935_v34, 0.0 }
 0xf74   :  { %v14899_v8 = vpop.eup %9612  ;;  %9624 = vrcp.f32 %v6912_v45 }
 0xf75   :  { %v14905_v47 = vpop.eup %9614  ;;  %v6955_v53 = vmul.f32 1.0614054, %v14899_v8  ;;  %9626 = vpow2.f32 %v7133_v31  ;;  %v14952_v31 = vsel %vm6844_vm8, 1.0, %v16320_v5 }
 0xf76   :  { %v6953_v4 = vmul.f32 1.0614054, %v14905_v47  ;;  %v14915_v63 = vpop.eup %9616  ;;  %9628 = vpow2.f32 %v7135_v38 }
 0xf77   :  { %v6971_v51 = vadd.f32 -1.4531521, %v6955_v53  ;;  %v14913_v6 = vpop.f32.mrb[132].mxu0  ;;  %v6956_v18 = vmul.f32 1.0614054, %v14915_v63  ;;  %v14929_v12 = vpop.eup %9618 }
 0xf78   :  { %v6969_v48 = vadd.f32 -1.4531521, %v6953_v4  ;;  %v14917_v35 = vpop.f32.mrb[133].mxu0  ;;  %v6954_v1 = vmul.f32 1.0614054, %v14929_v12 }
 0xf79   :  { %v6987_v29 = vmul.f32 %v14899_v8, %v6971_v51  ;;  %v14927_v49 = vpop.f32.mrb[134].mxu0  ;;  %v6972_v24 = vadd.f32 -1.4531521, %v6956_v18  ;;  %v7129_v4 = vmul.f32 1.442695, %v7113_v23 }
 0xf7a   :  { %v6985_v28 = vmul.f32 %v14905_v47, %v6969_v48  ;;  %v14937_v0 = vpop.f32.mrb[135].mxu0  ;;  %v6970_v21 = vadd.f32 -1.4531521, %v6954_v1  ;;  %v14958_v23 = vand.u32 2147483647, %v14935_v34 }
 0xf7b   :  { %v7003_v53 = vadd.f32 1.4214138, %v6987_v29  ;;  %v6988_v48 = vmul.f32 %v14915_v63, %v6972_v24  ;;  %v6859_v29 = vsel %vm6843_vm7, 1.0, %v16320_v5  ;;  %v14964_v24 = vadd.f32 %v14878_v44, %v14821_v50 }
 0xf7c   :  { %v7001_v45 = vadd.f32 1.4214138, %v6985_v28  ;;  %v6894_v25 = vmul.f32 0.3275911, %v14958_v23  ;;  %v14966_v60 = vpop.eup %9620  ;;  %9630 = vpow2.f32 %v7129_v4 }
 0xf7d   :  { %v7019_v51 = vmul.f32 %v14899_v8, %v7003_v53  ;;  %v7004_v18 = vadd.f32 1.4214138, %v6988_v48  ;;  %v6986_v53 = vmul.f32 %v14929_v12, %v6970_v21  ;;  %v14971_v28 = vpop.eup %9622  ;;  %v6959_v38 = vmul.f32 1.0614054, %v14966_v60 }
 0xf7e   :  { %v7103_v21 = vsub.f32 0.0, %v14886_v58  ;;  %v7101_v48 = vsub.f32 0.0, %v14894_v42  ;;  %v6910_v55 = vadd.f32 1.0, %v6894_v25  ;;  %v7017_v43 = vmul.f32 %v14905_v47, %v7001_v45 }
 0xf7f   :  { %v7035_v2 = vadd.f32 -0.28449672, %v7019_v51  ;;  %v7020_v1 = vmul.f32 %v14915_v63, %v7004_v18  ;;  %v7114_v51 = vmul.f32 %v7098_v22, %v14863_v56  ;;  %v7002_v4 = vadd.f32 1.4214138, %v6986_v53  ;;  %v14981_v56 = vpop.eup %9624 }
 0xf80   :  { %v6975_v26 = vadd.f32 -1.4531521, %v6959_v38  ;;  %9632 = vrcp.f32 %v6910_v55  ;;  %v14979_v22 = vmul.f32 0.70710677, %v14964_v24  ;;  %v7117_v53 = vmul.f32 %v7101_v48, %v14894_v42 }
 0xf81   :  { %v7051_v27 = vmul.f32 %v14899_v8, %v7035_v2  ;;  %v7036_v14 = vadd.f32 -0.28449672, %v7020_v1  ;;  %v6957_v2 = vmul.f32 1.0614054, %v14971_v28  ;;  %v7131_v13 = vmul.f32 1.442695, %v7114_v51 }
 0xf82   :  { %v6991_v45 = vmul.f32 %v14966_v60, %v6975_v26  ;;  %v7119_v1 = vmul.f32 %v7103_v21, %v14886_v58  ;;  %v6960_v55 = vmul.f32 1.0614054, %v14981_v56  ;;  %v7033_v17 = vadd.f32 -0.28449672, %v7017_v43 }
 0xf83   :  { %v7067_v44 = vadd.f32 0.2548296, %v7051_v27  ;;  %v7052_v3 = vmul.f32 %v14915_v63, %v7036_v14  ;;  %v6973_v25 = vadd.f32 -1.4531521, %v6957_v2  ;;  %v9627_v27 = vpop.eup %9626  ;;  %v14992_v51 = vand.u32 2147483647, %v14979_v22 }
 0xf84   :  { %v6976_v14 = vadd.f32 -1.4531521, %v6960_v55  ;;  %v7104_v42 = vsub.f32 0.0, %v14903_v36  ;;  %v9629_v21 = vpop.eup %9628  ;;  %v7102_v48 = vsub.f32 0.0, %v14958_v23  ;;  %9634 = vpow2.f32 %v7131_v13 }
 0xf85   :  { %v7083_v18 = vmul.f32 %v14899_v8, %v7067_v44  ;;  %v7068_v57 = vadd.f32 0.2548296, %v7052_v3  ;;  %v6989_v41 = vmul.f32 %v14971_v28, %v6973_v25  ;;  %v7018_v8 = vmul.f32 %v14929_v12, %v7002_v4 }
 0xf86   :  { %v7007_v44 = vadd.f32 1.4214138, %v6991_v45  ;;  %v6992_v3 = vmul.f32 %v14981_v56, %v6976_v14  ;;  %v6899_v4 = vmul.f32 0.3275911, %v14992_v51  ;;  %v7120_v14 = vmul.f32 %v7104_v42, %v14903_v36 }
 0xf87   :  { %v7163_v38 = vmul.f32 %v9627_v27, %v7083_v18  ;;  %v7084_v26 = vmul.f32 %v14915_v63, %v7068_v57  ;;  %v7005_v58 = vadd.f32 1.4214138, %v6989_v41  ;;  %v9631_v18 = vpop.eup %9630  ;;  %v7049_v27 = vmul.f32 %v14905_v47, %v7033_v17 }
 0xf88   :  { %v7023_v43 = vmul.f32 %v14966_v60, %v7007_v44  ;;  %v7034_v41 = vadd.f32 -0.28449672, %v7018_v8  ;;  %v7008_v63 = vadd.f32 1.4214138, %v6992_v3  ;;  %v6915_v55 = vadd.f32 1.0, %v6899_v4 }
 0xf89   :  { %v7179_v2 = vsub.f32 1.0, %v7163_v38  ;;  %v7164_v45 = vmul.f32 %v9629_v21, %v7084_v26  ;;  %v7021_v57 = vmul.f32 %v14971_v28, %v7005_v58  ;;  %v7141_v44 = vmul.f32 1.442695, %v7119_v1 }
 0xf8a   :  { %v7039_v32 = vadd.f32 -0.28449672, %v7023_v43  ;;  %v15004_v16 = vpop.eup %9632  ;;  %v7137_v15 = vmul.f32 1.442695, %v7117_v53  ;;  %v7024_v10 = vmul.f32 %v14981_v56, %v7008_v63  ;;  %9636 = vrcp.f32 %v6915_v55 }
 0xf8b   :  { %v7195_v25 = vmul.f32 %v7179_v2, %v6859_v29  ;;  %v7180_v38 = vsub.f32 1.0, %v7164_v45  ;;  %v7118_v29 = vmul.f32 %v7102_v48, %v14958_v23  ;;  %v7065_v2 = vadd.f32 0.2548296, %v7049_v27 }
 0xf8c   :  { %v7037_v13 = vadd.f32 -0.28449672, %v7021_v57  ;;  %v7050_v26 = vmul.f32 %v14929_v12, %v7034_v41  ;;  %v7040_v58 = vadd.f32 -0.28449672, %v7024_v10  ;;  %v6958_v1 = vmul.f32 1.0614054, %v15004_v16 }
 0xf8d   :  { %v7211_v17 = vadd.f32 1.0, %v7195_v25  ;;  %v7196_v8 = vmul.f32 %v7180_v38, %v14952_v31  ;;  %v15013_v36 = vadd.f32 %v14821_v50, %v14883_v20  ;;  %v7055_v42 = vmul.f32 %v14966_v60, %v7039_v32 }
 0xf8e   :  { %9638 = vpow2.f32 %v7141_v44  ;;  %v7143_v23 = vmul.f32 1.442695, %v7120_v14  ;;  %v6974_v21 = vadd.f32 -1.4531521, %v6958_v1  ;;  %v7139_v31 = vmul.f32 1.442695, %v7118_v29 }
 0xf8f   :  { %v7212_v53 = vadd.f32 1.0, %v7196_v8  ;;  %9640 = vpow2.f32 %v7137_v15  ;;  %v15018_v43 = vmul.f32 %v7211_v17, %v14920_v37  ;;  %v7081_v10 = vmul.f32 %v14905_v47, %v7065_v2 }
 0xf90   :  { %v7053_v20 = vmul.f32 %v14971_v28, %v7037_v13  ;;  %v7066_v48 = vadd.f32 0.2548296, %v7050_v26  ;;  %v7056_v32 = vmul.f32 %v14981_v56, %v7040_v58  ;;  %v6990_v4 = vmul.f32 %v15004_v16, %v6974_v21 }
 0xf91   :  { %v15022_v3 = vmul.f32 %v7212_v53, %v14941_v39  ;;  %v15028_v25 = vmul.f32 0.70710677, %v15013_v36  ;;  %v6857_v15 = vsel %vm6841_vm9, 1.0, %v16320_v5  ;;  %v7071_v37 = vadd.f32 0.2548296, %v7055_v42  ;;  %v9635_v39 = vpop.eup %9634 }
 0xf92   :  { %9642 = vpow2.f32 %v7143_v23  ;;  %v6858_v27 = vsel %vm6842_vm10, 1.0, %v16320_v5  ;;  %v15039_v45 = vmul.f32 0.5, %v14867_v19  ;;  %v7006_v57 = vadd.f32 1.4214138, %v6990_v4 }
 0xf93   :  { %v7242_v47 = vpack.c.bf16 %v15022_v3, %v15018_v43  ;;  %v7161_v41 = vmul.f32 %v9631_v18, %v7081_v10  ;;  %v7069_v63 = vadd.f32 0.2548296, %v7053_v20  ;;  %9644 = vpow2.f32 %v7139_v31 }
 0xf94   :  { %v15043_v62 = vand.u32 2147483647, %v15028_v25  ;;  %v15045_v55 = vpop.eup %9636  ;;  %v7082_v38 = vmul.f32 %v14929_v12, %v7066_v48  ;;  %v7072_v44 = vadd.f32 0.2548296, %v7056_v32  ;;  %v7022_v33 = vmul.f32 %v15004_v16, %v7006_v57 }
 0xf95   :  { %v15051_v19 = vadd.f32 %v14891_v46, %v14821_v50  ;;  %v7087_v11 = vmul.f32 %v14966_v60, %v7071_v37  ;;  %v15055_v18 = vmul.f32 0.5, %v14870_v7  ;;  %v6963_v14 = vmul.f32 1.0614054, %v15045_v55 }
 0xf96   :  { %v6897_v29 = vmul.f32 0.3275911, %v15043_v62  ;;  %v6863_v17 = vsel %vm6847_vm2, 1.0, %v16320_v5  ;;  %v15062_v12 = vmul.f32 0.5, %v14873_v61  ;;  %v7038_v2 = vadd.f32 -0.28449672, %v7022_v33 }
 0xf97   :  { %v7177_v46 = vsub.f32 1.0, %v7161_v41  ;;  %v7085_v13 = vmul.f32 %v14971_v28, %v7069_v63  ;;  %v6979_v60 = vadd.f32 -1.4531521, %v6963_v14  ;;  %v7162_v58 = vmul.f32 %v9635_v39, %v7082_v38 }
 0xf98   :  { %v9639_v8 = vpop.eup %9638  ;;  %v6913_v26 = vadd.f32 1.0, %v6897_v29  ;;  %v7088_v1 = vmul.f32 %v14981_v56, %v7072_v44  ;;  %v7054_v53 = vmul.f32 %v15004_v16, %v7038_v2  ;;  %v15068_v42 = vmul.f32 0.70710677, %v15051_v19 }
 0xf99   :  { %v9641_v7 = vpop.eup %9640  ;;  %v7167_v54 = vmul.f32 %v9639_v8, %v7087_v11  ;;  %v6861_v61 = vsel %vm6845_vm3, 1.0, %v16320_v5  ;;  %v6995_v23 = vmul.f32 %v15045_v55, %v6979_v60  ;;  %v7107_v21 = vsub.f32 0.0, %v14992_v51 }
 0xf9a   :  { %9646 = vrcp.f32 %v6913_v26  ;;  %v7070_v28 = vadd.f32 0.2548296, %v7054_v53  ;;  %v15075_v31 = vand.u32 2147483647, %v15068_v42  ;;  %v7193_v10 = vmul.f32 %v7177_v46, %v6857_v15 }
 0xf9b   :  { %v7165_v20 = vmul.f32 %v9641_v7, %v7085_v13  ;;  %v7011_v48 = vadd.f32 1.4214138, %v6995_v23  ;;  %v15079_v32 = vadd.f32 %v14821_v50, %v14896_v59  ;;  %v7178_v4 = vsub.f32 1.0, %v7162_v58 }
 0xf9c   :  { %v9643_v56 = vpop.eup %9642  ;;  %v7086_v39 = vmul.f32 %v15004_v16, %v7070_v28  ;;  %v6900_v40 = vmul.f32 0.3275911, %v15075_v31  ;;  %v7183_v41 = vsub.f32 1.0, %v7167_v54  ;;  %v6864_v63 = vsel %vm6848_vm11, 1.0, %v16320_v5 }
 0xf9d   :  { %v7168_v37 = vmul.f32 %v9643_v56, %v7088_v1  ;;  %v9645_v57 = vpop.eup %9644  ;;  %v15085_v38 = vmul.f32 0.70710677, %v15079_v32  ;;  %v15089_v15 = vadd.f32 %v14913_v6, %v14821_v50  ;;  %v7123_v44 = vmul.f32 %v7107_v21, %v14992_v51 }
 0xf9e   :  { %v7166_v59 = vmul.f32 %v9645_v57, %v7086_v39  ;;  %v6916_v33 = vadd.f32 1.0, %v6900_v40  ;;  %v7181_v16 = vsub.f32 1.0, %v7165_v20  ;;  %v7027_v11 = vmul.f32 %v15045_v55, %v7011_v48 }
 0xf9f   :  { %v15095_v14 = vand.u32 2147483647, %v15085_v38  ;;  %v15099_v29 = vadd.f32 %v14821_v50, %v14917_v35  ;;  %v7209_v2 = vadd.f32 1.0, %v7193_v10  ;;  %v7194_v8 = vmul.f32 %v7178_v4, %v6858_v27 }
 0xfa0   :  { %v7184_v6 = vsub.f32 1.0, %v7168_v37  ;;  %9648 = vrcp.f32 %v6916_v33  ;;  %v7199_v46 = vmul.f32 %v7183_v41, %v6863_v17  ;;  %v7182_v13 = vsub.f32 1.0, %v7166_v59 }
 0xfa1   :  { %v6898_v60 = vmul.f32 0.3275911, %v15095_v14  ;;  %v15103_v51 = vmul.f32 0.70710677, %v15089_v15  ;;  %v6814_v26 = vmul.f32 0.5, %v14911_v30  ;;  %v6862_v7 = vsel %vm6846_vm12, 1.0, %v16320_v5 }
 0xfa2   :  { %v7149_v58 = vmul.f32 1.442695, %v7123_v44  ;;  %v7105_v35 = vsub.f32 0.0, %v15043_v62  ;;  %v7197_v27 = vmul.f32 %v7181_v16, %v6861_v61  ;;  %v7043_v53 = vadd.f32 -0.28449672, %v7027_v11 }
 0xfa3   :  { %v6914_v17 = vadd.f32 1.0, %v6898_v60  ;;  %v15113_v54 = vmul.f32 0.70710677, %v15099_v29  ;;  %v7225_v23 = vmul.f32 %v7209_v2, %v14924_v9  ;;  %v7200_v28 = vmul.f32 %v7184_v6, %v6864_v63 }
 0xfa4   :  { %v15110_v1 = vpop.eup %9646  ;;  %v15118_v21 = vand.u32 2147483647, %v15103_v51  ;;  %v7210_v34 = vadd.f32 1.0, %v7194_v8  ;;  %v7215_v56 = vadd.f32 1.0, %v7199_v46  ;;  %v7198_v10 = vmul.f32 %v7182_v13, %v6862_v7 }
 0xfa5   :  { %v6961_v30 = vmul.f32 1.0614054, %v15110_v1  ;;  %9650 = vrcp.f32 %v6914_v17  ;;  %v7121_v61 = vmul.f32 %v7105_v35, %v15043_v62  ;;  %v7108_v48 = vsub.f32 0.0, %v15075_v31 }
 0xfa6   :  { %v6903_v4 = vmul.f32 0.3275911, %v15118_v21  ;;  %v7213_v37 = vadd.f32 1.0, %v7197_v27  ;;  %v7059_v9 = vmul.f32 %v15045_v55, %v7043_v53  ;;  %9652 = vpow2.f32 %v7149_v58 }
 0xfa7   :  { %v6977_v20 = vadd.f32 -1.4531521, %v6961_v30  ;;  %v15125_v39 = vand.u32 2147483647, %v15113_v54  ;;  %v7216_v40 = vadd.f32 1.0, %v7200_v28  ;;  %v15130_v63 = vadd.f32 %v14927_v49, %v14821_v50 }
 0xfa8   :  { %v6919_v41 = vadd.f32 1.0, %v6903_v4  ;;  %v7226_v62 = vmul.f32 %v7210_v34, %v14955_v52  ;;  %v15134_v59 = vmul.f32 %v7215_v56, %v15039_v45  ;;  %v7214_v44 = vadd.f32 1.0, %v7198_v10 }
 0xfa9   :  { %v6993_v57 = vmul.f32 %v15110_v1, %v6977_v20  ;;  %vm6851_vm13 = vcmp.ge.f32.partialorder %v14979_v22, 0.0  ;;  %v6901_v33 = vmul.f32 0.3275911, %v15125_v39  ;;  %vm6849_vm14 = vcmp.ge.f32.partialorder %v15028_v25, 0.0 }
 0xfaa   :  { %v15138_v16 = vpop.eup %9648  ;;  %v7145_v2 = vmul.f32 1.442695, %v7121_v61  ;;  %v7124_v8 = vmul.f32 %v7108_v48, %v15075_v31  ;;  %9654 = vrcp.f32 %v6919_v41  ;;  %v7075_v49 = vadd.f32 0.2548296, %v7059_v9 }
 0xfab   :  { %v7009_v11 = vadd.f32 1.4214138, %v6993_v57  ;;  %v6964_v52 = vmul.f32 1.0614054, %v15138_v16  ;;  %v7106_v45 = vsub.f32 0.0, %v15095_v14  ;;  %v6917_v6 = vadd.f32 1.0, %v6901_v33 }
 0xfac   :  { %v7229_v46 = vmul.f32 %v7213_v37, %v15055_v18  ;;  %v15146_v13 = vmul.f32 %v7216_v40, %v15062_v12  ;;  %v15150_v7 = vmul.f32 0.70710677, %v15130_v63  ;;  %v7230_v58 = vmul.f32 %v7214_v44, %v6814_v26 }
 0xfad   :  { %v7025_v60 = vmul.f32 %v15110_v1, %v7009_v11  ;;  %v6980_v35 = vadd.f32 -1.4531521, %v6964_v52  ;;  %9656 = vrcp.f32 %v6917_v6  ;;  %v15154_v31 = vadd.f32 %v14821_v50, %v14937_v0 }
 0xfae   :  { %v7151_v53 = vmul.f32 1.442695, %v7124_v8  ;;  %v15157_v17 = vand.u32 2147483647, %v15150_v7  ;;  %v7241_v18 = vpack.c.bf16 %v7226_v62, %v7225_v23  ;;  %v7091_v28 = vmul.f32 %v15045_v55, %v7075_v49 }
 0xfaf   :  { %v7041_v27 = vadd.f32 -0.28449672, %v7025_v60  ;;  %v15159_v12 = vpop.eup %9650  ;;  %9658 = vpow2.f32 %v7145_v2  ;;  %v6996_v30 = vmul.f32 %v15138_v16, %v6980_v35  ;;  %v7122_v26 = vmul.f32 %v7106_v45, %v15095_v14 }
 0xfb0   :  { %v6962_v50 = vmul.f32 1.0614054, %v15159_v12  ;;  %v7111_v0 = vsub.f32 0.0, %v15118_v21  ;;  %v6904_v56 = vmul.f32 0.3275911, %v15157_v17  ;;  %8460 = vmatprep.mubr.bf16.mxu1 %v7241_v18  ;;  %v9653_v10 = vpop.eup %9652  ;;  %v7243_v55 = vpack.c.bf16 %v7230_v58, %v7229_v46 }
 0xfb1   :  { %v7057_v34 = vmul.f32 %v15110_v1, %v7041_v27  ;;  %v7012_v23 = vadd.f32 1.4214138, %v6996_v30  ;;  %v15169_v20 = vmul.f32 0.70710677, %v15154_v31  ;;  %8461 = vmatmul.mubr.bf16.vlgmr.msra.gmra.mrb[80].mxu1 %v7242_v47  ;;  %v7244_v14 = vpack.c.bf16 %v15146_v13, %v15134_v59 }
 0xfb2   :  { %9660 = vpow2.f32 %v7151_v53  ;;  %v6978_v48 = vadd.f32 -1.4531521, %v6962_v50  ;;  %v6920_v4 = vadd.f32 1.0, %v6904_v56  ;;  %v7171_v37 = vmul.f32 %v9653_v10, %v7091_v28  ;;  %8464 = vmatprep.mubr.bf16.mxu1 %v7243_v55 }
 0xfb3   :  { %v7073_v61 = vadd.f32 0.2548296, %v7057_v34  ;;  %v7028_v9 = vmul.f32 %v15138_v16, %v7012_v23  ;;  %v7147_v40 = vmul.f32 1.442695, %v7122_v26  ;;  %v15178_v57 = vand.u32 2147483647, %v15169_v20 }
 0xfb4   :  { %v15180_v41 = vpop.eup %9654  ;;  %v15183_v43 = vmul.f32 0.5, %v14964_v24  ;;  %v6867_v3 = vsel %vm6851_vm13, 1.0, %v16320_v5  ;;  %v6994_v47 = vmul.f32 %v15159_v12, %v6978_v48  ;;  %9662 = vrcp.f32 %v6920_v4 }
 0xfb5   :  { %v6865_v62 = vsel %vm6849_vm14, 1.0, %v16320_v5  ;;  %v7044_v59 = vadd.f32 -0.28449672, %v7028_v9  ;;  %v6967_v44 = vmul.f32 1.0614054, %v15180_v41  ;;  %v7127_v33 = vmul.f32 %v7111_v0, %v15118_v21 }
 0xfb6   :  { %v7089_v11 = vmul.f32 %v15110_v1, %v7073_v61  ;;  %vm6852_vm15 = vcmp.ge.f32.partialorder %v15068_v42, 0.0  ;;  %v7010_v24 = vadd.f32 1.4214138, %v6994_v47  ;;  %v6902_v22 = vmul.f32 0.3275911, %v15178_v57 }
 0xfb7   :  { %v15197_v2 = vpop.eup %9656  ;;  %v7187_v8 = vsub.f32 1.0, %v7171_v37  ;;  %v7060_v49 = vmul.f32 %v15138_v16, %v7044_v59  ;;  %9664 = vpow2.f32 %v7147_v40  ;;  %v6983_v25 = vadd.f32 -1.4531521, %v6967_v44 }
 0xfb8   :  { %v7026_v52 = vmul.f32 %v15159_v12, %v7010_v24  ;;  %v6965_v45 = vmul.f32 1.0614054, %v15197_v2  ;;  %v7109_v21 = vsub.f32 0.0, %v15125_v39  ;;  %v6918_v6 = vadd.f32 1.0, %v6902_v22 }
 0xfb9   :  { %v9659_v1 = vpop.eup %9658  ;;  %v7076_v46 = vadd.f32 0.2548296, %v7060_v49  ;;  %v6999_v13 = vmul.f32 %v15180_v41, %v6983_v25  ;;  %v7157_v60 = vmul.f32 1.442695, %v7127_v33  ;;  %v7112_v58 = vsub.f32 0.0, %v15157_v17  ;;  %8465 = vmatmul.mubr.bf16.gmra.mrb[84].mxu1 %v7244_v14 }
 0xfba   :  { %v7169_v35 = vmul.f32 %v9659_v1, %v7089_v11  ;;  %v7042_v27 = vadd.f32 -0.28449672, %v7026_v52  ;;  %v6981_v53 = vadd.f32 -1.4531521, %v6965_v45  ;;  %9666 = vrcp.f32 %v6918_v6 }
 0xfbb   :  { %v7203_v18 = vmul.f32 %v7187_v8, %v6867_v3  ;;  %v6820_v28 = vmul.f32 0.5, %v15051_v19  ;;  %v7092_v30 = vmul.f32 %v15138_v16, %v7076_v46  ;;  %v7015_v26 = vadd.f32 1.4214138, %v6999_v13 }
 0xfbc   :  { %v9661_v34 = vpop.eup %9660  ;;  %v6868_v50 = vsel %vm6852_vm15, 1.0, %v16320_v5  ;;  %v7058_v0 = vmul.f32 %v15159_v12, %v7042_v27  ;;  %v6997_v56 = vmul.f32 %v15197_v2, %v6981_v53  ;;  %v7125_v10 = vmul.f32 %v7109_v21, %v15125_v39 }
 0xfbd   :  { %v7172_v23 = vmul.f32 %v9661_v34, %v7092_v30  ;;  %vm6850_vm1 = vcmp.ge.f32.partialorder %v15085_v38, 0.0  ;;  %v7031_v55 = vmul.f32 %v15180_v41, %v7015_v26  ;;  %9668 = vpow2.f32 %v7157_v60 }
 0xfbe   :  { %v15215_v19 = vpop.eup %9662  ;;  %v7185_v16 = vsub.f32 1.0, %v7169_v35  ;;  %v7074_v14 = vadd.f32 0.2548296, %v7058_v0  ;;  %v7013_v61 = vadd.f32 1.4214138, %v6997_v56  ;;  %v7128_v42 = vmul.f32 %v7112_v58, %v15157_v17 }
 0xfbf   :  { %v7219_v48 = vadd.f32 1.0, %v7203_v18  ;;  %v7188_v4 = vsub.f32 1.0, %v7172_v23  ;;  %v7047_v37 = vadd.f32 -0.28449672, %v7031_v55  ;;  %v6968_v9 = vmul.f32 1.0614054, %v15215_v19 }
 0xfc0   :  { %v7090_v39 = vmul.f32 %v15159_v12, %v7074_v14  ;;  %v7029_v40 = vmul.f32 %v15197_v2, %v7013_v61  ;;  %v7153_v3 = vmul.f32 1.442695, %v7125_v10  ;;  %v7110_v47 = vsub.f32 0.0, %v15178_v57 }
 0xfc1   :  { %v9665_v59 = vpop.eup %9664  ;;  %v7204_v44 = vmul.f32 %v7188_v4, %v6868_v50  ;;  %v6866_v33 = vsel %vm6850_vm1, 1.0, %v16320_v5  ;;  %v7063_v17 = vmul.f32 %v15180_v41, %v7047_v37  ;;  %v6984_v11 = vadd.f32 -1.4531521, %v6968_v9 }
 0xfc2   :  { %v7201_v24 = vmul.f32 %v7185_v16, %v6865_v62  ;;  %v7170_v22 = vmul.f32 %v9665_v59, %v7090_v39  ;;  %v7045_v8 = vadd.f32 -0.28449672, %v7029_v40  ;;  %v7159_v49 = vmul.f32 1.442695, %v7128_v42 }
 0xfc3   :  { %v7235_v12 = vmul.f32 %v7219_v48, %v15183_v43  ;;  %v7220_v25 = vadd.f32 1.0, %v7204_v44  ;;  %v7079_v52 = vadd.f32 0.2548296, %v7063_v17  ;;  %v7000_v45 = vmul.f32 %v15215_v19, %v6984_v11 }
 0xfc4   :  { %v9667_v21 = vpop.eup %9666  ;;  %v7186_v6 = vsub.f32 1.0, %v7170_v22  ;;  %v7061_v1 = vmul.f32 %v15197_v2, %v7045_v8  ;;  %9670 = vpow2.f32 %v7153_v3  ;;  %v7126_v38 = vmul.f32 %v7110_v47, %v15178_v57 }
 0xfc5   :  { %v7236_v46 = vmul.f32 %v7220_v25, %v6820_v28  ;;  %v7095_v13 = vmul.f32 %v15180_v41, %v7079_v52  ;;  %v7016_v62 = vadd.f32 1.4214138, %v7000_v45  ;;  %v6966_v60 = vmul.f32 1.0614054, %v9667_v21 }
 0xfc6   :  { %v7217_v58 = vadd.f32 1.0, %v7201_v24  ;;  %v7202_v35 = vmul.f32 %v7186_v6, %v6866_v33  ;;  %9672 = vpow2.f32 %v7159_v49  ;;  %v7077_v27 = vadd.f32 0.2548296, %v7061_v1 }
 0xfc7   :  { %v9669_v43 = vpop.eup %9668  ;;  %v7032_v53 = vmul.f32 %v15215_v19, %v7016_v62  ;;  %v6982_v18 = vadd.f32 -1.4531521, %v6966_v60  ;;  %v7246_v30 = vpack.c.bf16 %v7236_v46, %v7235_v12  ;;  %v6817_v26 = vmul.f32 0.5, %v15013_v36 }
 0xfc8   :  { %v6818_v34 = vmul.f32 0.5, %v15079_v32  ;;  %v7218_v50 = vadd.f32 1.0, %v7202_v35  ;;  %v7155_v57 = vmul.f32 1.442695, %v7126_v38  ;;  %v7175_v28 = vmul.f32 %v9669_v43, %v7095_v13 }
 0xfc9   :  { %v7048_v0 = vadd.f32 -0.28449672, %v7032_v53  ;;  %v6998_v41 = vmul.f32 %v9667_v21, %v6982_v18  ;;  %v7233_v56 = vmul.f32 %v7217_v58, %v6817_v26  ;;  %v7093_v23 = vmul.f32 %v15197_v2, %v7077_v27  ;;  %v16321_v27 = vld [vmem:[#allocation131_spill] sm:$0xff] }
 0xfca   :  { %v7234_v10 = vmul.f32 %v7218_v50, %v6818_v34  ;;  %9674 = vpow2.f32 %v7155_v57  ;;  %vm6855_vm4 = vcmp.ge.f32.partialorder %v15103_v51, 0.0  ;;  %v7191_v61 = vsub.f32 1.0, %v7175_v28  ;;  %v16323_v34 = vld [vmem:[#allocation127_spill] sm:$0xff]  ;;  %v16324_v57 = vld [vmem:[#allocation73_spill] sm:$0xff] }
 0xfcb   :  { %v7064_v55 = vmul.f32 %v15215_v19, %v7048_v0  ;;  %v7014_v16 = vadd.f32 1.4214138, %v6998_v41  ;;  %v6871_v2 = vsel %vm6855_vm4, 1.0, %v16320_v5  ;;  %vm6856_vm5 = vcmp.ge.f32.partialorder %v15150_v7, 0.0 }
 0xfcc   :  { %v7245_v14 = vpack.c.bf16 %v7234_v10, %v7233_v56  ;;  %v7207_v39 = vmul.f32 %v7191_v61, %v6871_v2  ;;  %vm6853_vm6 = vcmp.ge.f32.partialorder %v15113_v54, 0.0  ;;  %v6872_v44 = vsel %vm6856_vm5, 1.0, %v16320_v5 }
 0xfcd   :  { %v7080_v36 = vadd.f32 0.2548296, %v7064_v55  ;;  %v7030_v42 = vmul.f32 %v9667_v21, %v7014_v16  ;;  %v6823_v24 = vmul.f32 0.5, %v15089_v15  ;;  %v6869_v22 = vsel %vm6853_vm6, 1.0, %v16320_v5  ;;  %v16325_v55 = vld [vmem:[#allocation28_spill] sm:$0xff] }
 0xfce   :  { %v9671_v32 = vpop.eup %9670  ;;  %8468 = vmatprep.mubr.bf16.mxu1 %v7245_v14  ;;  %v7223_v33 = vadd.f32 1.0, %v7207_v39  ;;  %v6824_v8 = vmul.f32 0.5, %v15130_v63  ;;  %vm6854_vm7 = vcmp.ge.f32.partialorder %v15169_v20, 0.0  ;;  %v6821_v38 = vmul.f32 0.5, %v15099_v29  ;;  %v7754_v20 = vld [vmem:[%s15355_s23] ss:$0 sm:$0xff] }
 0xfcf   :  { %v7173_v48 = vmul.f32 %v9671_v32, %v7093_v23  ;;  %v7096_v4 = vmul.f32 %v15215_v19, %v7080_v36  ;;  %v7046_v37 = vadd.f32 -0.28449672, %v7030_v42  ;;  %8469 = vmatmul.mubr.bf16.gmra.mrb[88].mxu1 %v7246_v30  ;;  %v6870_v45 = vsel %vm6854_vm7, 1.0, %v16320_v5  ;;  %v16326_v36 = vld [vmem:[#allocation21_spill] sm:$0xff] }
 0xfd0   :  { %v9673_v9 = vpop.eup %9672  ;;  %v7239_v12 = vmul.f32 %v7223_v33, %v6823_v24  ;;  %v6822_v15 = vmul.f32 0.5, %v15154_v31  ;;  %v16322_v31 = vld [vmem:[#allocation75_spill] sm:$0xff] }
 0xfd1   :  { %v7176_v40 = vmul.f32 %v9673_v9, %v7096_v4  ;;  %v7062_v3 = vmul.f32 %v9667_v21, %v7046_v37  ;;  %v7189_v51 = vsub.f32 1.0, %v7173_v48  ;;  %v16327_v48 = vld [vmem:[#allocation30_spill] sm:$0xff]  ;;  %v16328_v37 = vld [vmem:[#allocation19_spill] sm:$0xff] }
 0xfd2   :  { %v16331_v24 = vld [vmem:[#allocation35_spill] sm:$0xff] }
 0xfd3   :  { %v7192_v47 = vsub.f32 1.0, %v7176_v40  ;;  %v7078_v59 = vadd.f32 0.2548296, %v7062_v3  ;;  %v7205_v7 = vmul.f32 %v7189_v51, %v6869_v22 }
 0xfd4   :  { %v9675_v11 = vpop.eup %9674 }
 0xfd5   :  { %v7208_v17 = vmul.f32 %v7192_v47, %v6872_v44  ;;  %v7094_v19 = vmul.f32 %v9667_v21, %v7078_v59  ;;  %v7221_v6 = vadd.f32 1.0, %v7205_v7  ;;  %v16329_v47 = vld [vmem:[#allocation33_spill] sm:$0xff] }
 0xfd7   :  { %v7224_v49 = vadd.f32 1.0, %v7208_v17  ;;  %v7174_v54 = vmul.f32 %v9675_v11, %v7094_v19  ;;  %v7237_v13 = vmul.f32 %v7221_v6, %v6821_v38  ;;  %v16330_v17 = vld [vmem:[#allocation89_spill] sm:$0xff]  ;;  %v16334_v38 = vld [vmem:[#allocation31_spill] sm:$0xff] }
 0xfd9   :  { %v7240_v25 = vmul.f32 %v7224_v49, %v6824_v8  ;;  %v7190_v52 = vsub.f32 1.0, %v7174_v54  ;;  %v16332_v8 = vld [vmem:[#allocation90_spill] sm:$0xff] }
 0xfdb   :  { %v7206_v1 = vmul.f32 %v7190_v52, %v6870_v45  ;;  %v7248_v21 = vpack.c.bf16 %v7240_v25, %v7239_v12  ;;  %v16333_v45 = vld [vmem:[#allocation39_spill] sm:$0xff] }
 0xfdd   :  { %v7222_v46 = vadd.f32 1.0, %v7206_v1 }
 0xfdf   :  { %v7238_v63 = vmul.f32 %v7222_v46, %v6822_v15 }
 0xfe1   :  { %v7247_v62 = vpack.c.bf16 %v7238_v63, %v7237_v13  ;;  %v16335_v13 = vld [vmem:[#allocation41_spill] sm:$0xff] }
 0xfe3   :  { %8472 = vmatprep.mubr.bf16.mxu1 %v7247_v62  ;;  %v16336_v62 = vld [vmem:[#allocation32_spill] sm:$0xff] }
 0xfe4   :  { %8473 = vmatmul.mubr.bf16.gmra.mrb[92].mxu1 %v7248_v21 }
0x1084   :  { %v8462_v60 = vpop.f32.mrb[80].mxu1 }
0x1085   :  { %v7363_v58 = vadd.f32 %v8462_v60, %v7754_v20  ;;  %v7354_v5 = vpop.f32.mrb[81].mxu1 }
0x1086   :  { %v7355_v35 = vadd.f32 %v7754_v20, %v7354_v5  ;;  %v8463_v43 = vpop.f32.mrb[82].mxu1 }
0x1087   :  { %v7419_v53 = vadd.f32 %v7363_v58, %v16321_v27  ;;  %v7366_v29 = vadd.f32 %v8463_v43, %v7754_v20  ;;  %v7357_v18 = vpop.f32.mrb[83].mxu1 }
0x1088   :  { %v7417_v30 = vadd.f32 %v7355_v35, %v16322_v31  ;;  %v7358_v26 = vadd.f32 %v7754_v20, %v7357_v18 }
0x1089   :  { %7435 = vst.msk [vmem:[%s15356_s24 + $0x10] sm:$0xff] %vm96_vm0, %v7419_v53  ;;  %v7420_v50 = vadd.f32 %v7366_v29, %v16323_v34 }
0x108a   :  { %7433 = vst.msk [vmem:[%s15356_s24] sm:$0xff] %vm96_vm0, %v7417_v30  ;;  %v7418_v28 = vadd.f32 %v7358_v26, %v16324_v57 }
0x108b   :  { %7436 = vst.msk [vmem:[%s15356_s24 + $0x18] sm:$0xff] %vm96_vm0, %v7420_v50 }
0x108c   :  { %7434 = vst.msk [vmem:[%s15356_s24 + $0x8] sm:$0xff] %vm96_vm0, %v7418_v28  ;;  %v8466_v0 = vpop.f32.mrb[84].mxu1 }
0x108d   :  { %v7379_v41 = vadd.f32 %v8466_v0, %v7754_v20  ;;  %v7370_v56 = vpop.f32.mrb[85].mxu1 }
0x108e   :  { %v7371_v10 = vadd.f32 %v7754_v20, %v7370_v56  ;;  %v8467_v23 = vpop.f32.mrb[86].mxu1 }
0x108f   :  { %v7423_v16 = vadd.f32 %v7379_v41, %v16325_v55  ;;  %v7382_v14 = vadd.f32 %v8467_v23, %v7754_v20  ;;  %v7373_v61 = vpop.f32.mrb[87].mxu1 }
0x1090   :  { %v7421_v42 = vadd.f32 %v7371_v10, %v16326_v36  ;;  %v7374_v32 = vadd.f32 %v7754_v20, %v7373_v61 }
0x1091   :  { %7439 = vst.msk [vmem:[%s15356_s24 + $0x30] sm:$0xff] %vm96_vm0, %v7423_v16  ;;  %v7424_v4 = vadd.f32 %v7382_v14, %v16327_v48 }
0x1092   :  { %7437 = vst.msk [vmem:[%s15356_s24 + $0x20] sm:$0xff] %vm96_vm0, %v7421_v42  ;;  %v7422_v9 = vadd.f32 %v7374_v32, %v16328_v37 }
0x1093   :  { %7440 = vst.msk [vmem:[%s15356_s24 + $0x38] sm:$0xff] %vm96_vm0, %v7424_v4 }
0x1094   :  { %7438 = vst.msk [vmem:[%s15356_s24 + $0x28] sm:$0xff] %vm96_vm0, %v7422_v9 }
0x10a2   :  { %v8470_v2 = vpop.f32.mrb[88].mxu1 }
0x10a3   :  { %v7395_v39 = vadd.f32 %v8470_v2, %v7754_v20  ;;  %v7386_v40 = vpop.f32.mrb[89].mxu1 }
0x10a4   :  { %v7387_v3 = vadd.f32 %v7754_v20, %v7386_v40  ;;  %v8471_v51 = vpop.f32.mrb[90].mxu1 }
0x10a5   :  { %v7427_v59 = vadd.f32 %v7395_v39, %v16329_v47  ;;  %v7398_v44 = vadd.f32 %v8471_v51, %v7754_v20  ;;  %v7389_v33 = vpop.f32.mrb[91].mxu1 }
0x10a6   :  { %v7425_v19 = vadd.f32 %v7387_v3, %v16330_v17  ;;  %v7390_v11 = vadd.f32 %v7754_v20, %v7389_v33 }
0x10a7   :  { %7443 = vst.msk [vmem:[%s15356_s24 + $0x50] sm:$0xff] %vm96_vm0, %v7427_v59  ;;  %v7428_v22 = vadd.f32 %v7398_v44, %v16331_v24 }
0x10a8   :  { %7441 = vst.msk [vmem:[%s15356_s24 + $0x40] sm:$0xff] %vm96_vm0, %v7425_v19  ;;  %v7426_v7 = vadd.f32 %v7390_v11, %v16332_v8 }
0x10a9   :  { %7444 = vst.msk [vmem:[%s15356_s24 + $0x58] sm:$0xff] %vm96_vm0, %v7428_v22 }
0x10aa   :  { %7442 = vst.msk [vmem:[%s15356_s24 + $0x48] sm:$0xff] %vm96_vm0, %v7426_v7 }
0x10b7   :  { %v8474_v49 = vpop.f32.mrb[92].mxu1 }
0x10b8   :  { %v7411_v54 = vadd.f32 %v8474_v49, %v7754_v20  ;;  %v7402_v12 = vpop.f32.mrb[93].mxu1 }
0x10b9   :  { %v7403_v25 = vadd.f32 %v7754_v20, %v7402_v12  ;;  %v8475_v52 = vpop.f32.mrb[94].mxu1 }
0x10ba   :  { %v7431_v6 = vadd.f32 %v7411_v54, %v16333_v45  ;;  %v7414_v1 = vadd.f32 %v8475_v52, %v7754_v20  ;;  %v7405_v21 = vpop.f32.mrb[95].mxu1 }
0x10bb   :  { %v7429_v15 = vadd.f32 %v7403_v25, %v16334_v38  ;;  %v7406_v46 = vadd.f32 %v7754_v20, %v7405_v21 }
0x10bc   :  { %7447 = vst.msk [vmem:[%s15356_s24 + $0x70] sm:$0xff] %vm96_vm0, %v7431_v6  ;;  %v7432_v63 = vadd.f32 %v7414_v1, %v16335_v13 }
0x10bd   :  { %7445 = vst.msk [vmem:[%s15356_s24 + $0x60] sm:$0xff] %vm96_vm0, %v7429_v15  ;;  %v7430_v60 = vadd.f32 %v7406_v46, %v16336_v62 }
0x10be   :  { %7448 = vst.msk [vmem:[%s15356_s24 + $0x78] sm:$0xff] %vm96_vm0, %v7432_v63 }
0x10bf   :  { %7446 = vst.msk [vmem:[%s15356_s24 + $0x68] sm:$0xff] %vm96_vm0, %v7430_v60 }

</bundles_post_ra>
